<compile_context>
chip_gen: v6e
topology: v6e:2x2x1
jax: 0.10.0
libtpu: 0.0.40
codegen_flags: <defaults>
</compile_context>

<pallas_src>
import math

import jax
import jax.numpy as jnp
from jax import lax
from jax.experimental import pallas as pl
from jax.experimental.pallas import tpu as pltpu


_TM_MAX = 256                 # row tile (activations)
_TN_MAX = 512                 # output-feature tile
_TK_MAX = 1024                # contraction tile
_VMEM_LIMIT = 32 * 1024 * 1024


def _round_up(v, m):
    return ((v + m - 1) // m) * m


def _gelu_exact(x):
    # PyTorch nn.GELU() default = exact erf-based GELU.
    return 0.5 * x * (1.0 + lax.erf(x / jnp.sqrt(2.0).astype(x.dtype)))


def _full_spec(arr):
    """BlockSpec covering the whole array, constant across the grid."""
    nd = arr.ndim
    return pl.BlockSpec(arr.shape, lambda b, _nd=nd: (0,) * _nd)


# ------------------------------------------------------------------ kernels --

def fused_matmul(x, w, b, *, activation=None, out_dtype=jnp.float32):
    """o = act(x @ w + b), tiled over (M, N, K) with an f32 VMEM accumulator.

    x:[M,K] (f32/bf16)   w:[K,N] bf16   b:[1,N] f32.  MXU operands in bf16.
    """
    M, K = x.shape
    Kw, N = w.shape
    assert K == Kw

    if M <= _TM_MAX:
        tm, Mp = M, M
    else:
        tm, Mp = _TM_MAX, _round_up(M, _TM_MAX)
    if N <= _TN_MAX:
        tn, Np = N, N
    else:
        tn, Np = _TN_MAX, _round_up(N, _TN_MAX)
    if K <= _TK_MAX:
        tk, Kp = K, K
    else:
        tk, Kp = _TK_MAX, _round_up(K, _TK_MAX)

    if (Mp, Kp) != (M, K):
        x = jnp.pad(x, ((0, Mp - M), (0, Kp - K)))
    if (Kp, Np) != (K, N):
        w = jnp.pad(w, ((0, Kp - K), (0, Np - N)))
    if Np != N:
        b = jnp.pad(b, ((0, 0), (0, Np - N)))

    grid = (Mp // tm, Np // tn, Kp // tk)

    def kernel(x_ref, w_ref, b_ref, o_ref, acc_ref):
        @pl.when(pl.program_id(2) == 0)
        def _():
            acc_ref[...] = jnp.zeros_like(acc_ref)

        acc_ref[...] += jnp.dot(x_ref[...].astype(jnp.bfloat16),
                                w_ref[...].astype(jnp.bfloat16),
                                preferred_element_type=jnp.float32)

        @pl.when(pl.program_id(2) == pl.num_programs(2) - 1)
        def _():
            out = acc_ref[...] + b_ref[...]
            if activation == "gelu":
                out = _gelu_exact(out)
            o_ref[...] = out.astype(o_ref.dtype)

    out = pl.pallas_call(
        kernel,
        out_shape=jax.ShapeDtypeStruct((Mp, Np), out_dtype),
        grid=grid,
        in_specs=[pl.BlockSpec((tm, tk), lambda i, j, k: (i, k)),
                  pl.BlockSpec((tk, tn), lambda i, j, k: (k, j)),
                  pl.BlockSpec((1, tn), lambda i, j, k: (0, j))],
        out_specs=pl.BlockSpec((tm, tn), lambda i, j, k: (i, j)),
        scratch_shapes=[pltpu.VMEM((tm, tn), jnp.float32)],
        compiler_params=pltpu.CompilerParams(
            dimension_semantics=("parallel", "parallel", "arbitrary"),
            vmem_limit_bytes=_VMEM_LIMIT),
    )(x, w, b)
    if (Mp, Np) != (M, N):
        out = out[:M, :N]
    return out


def embed_layernorm(seq, pos, gamma, beta, eps=1e-5):
    """(seq + pos_embedding) followed by LayerNorm over the feature dim.

    seq:[B,S,D] f32   pos:[1,S,D] f32   gamma/beta:[1,D] f32.  Grid over B.
    """
    B, S, D = seq.shape

    def kernel(x_ref, p_ref, g_ref, b_ref, o_ref):
        xv = x_ref[0].astype(jnp.float32) + p_ref[0]
        mu = jnp.mean(xv, axis=-1, keepdims=True)
        var = jnp.mean(jnp.square(xv - mu), axis=-1, keepdims=True)
        o_ref[0] = ((xv - mu) * lax.rsqrt(var + eps) * g_ref[...]
                    + b_ref[...]).astype(o_ref.dtype)

    return pl.pallas_call(
        kernel,
        out_shape=jax.ShapeDtypeStruct((B, S, D), jnp.float32),
        grid=(B,),
        in_specs=[pl.BlockSpec((1, S, D), lambda b: (b, 0, 0)),
                  pl.BlockSpec((1, S, D), lambda b: (0, 0, 0)),
                  pl.BlockSpec((1, D), lambda b: (0, 0)),
                  pl.BlockSpec((1, D), lambda b: (0, 0))],
        out_specs=pl.BlockSpec((1, S, D), lambda b: (b, 0, 0)),
        compiler_params=pltpu.CompilerParams(dimension_semantics=("parallel",)),
    )(seq, pos, gamma, beta)


def transformer_layer(x, lyr, num_heads, scale):
    """One full encoder layer (pre-LN attention + pre-LN MLP) per pallas_call.

    x:[B,S,D] f32 residual stream.  Grid over B; all weights VMEM-resident
    with constant index maps.  Dropouts are identity (eval mode).
    """
    B, S, D = x.shape
    hd = D // num_heads

    wqkv = jnp.concatenate([lyr["wq"], lyr["wk"], lyr["wv"]], axis=1).astype(jnp.bfloat16)
    bqkv = jnp.concatenate([lyr["bq"], lyr["bk"], lyr["bv"]], axis=1)
    wo = lyr["wo"].astype(jnp.bfloat16)
    w1 = lyr["w_mlp1"].astype(jnp.bfloat16)
    w2 = lyr["w_mlp2"].astype(jnp.bfloat16)

    def kernel(x_ref, n1g_ref, n1b_ref, wqkv_ref, bqkv_ref, wo_ref, bo_ref,
               n2g_ref, n2b_ref, w1_ref, b1_ref, w2_ref, b2_ref, o_ref):
        xv = x_ref[0].astype(jnp.float32)                         # [S, D] residual

        # ---- norm1 + fused QKV projection ----
        mu = jnp.mean(xv, axis=-1, keepdims=True)
        var = jnp.mean(jnp.square(xv - mu), axis=-1, keepdims=True)
        h = (xv - mu) * lax.rsqrt(var + 1e-5) * n1g_ref[...] + n1b_ref[...]
        qkv = jnp.dot(h.astype(jnp.bfloat16), wqkv_ref[...],
                      preferred_element_type=jnp.float32) + bqkv_ref[...]
        qkv = qkv.astype(jnp.bfloat16)                            # [S, 3D]

        # ---- multi-head attention (heads unrolled; H is small) ----
        # TODO(synk): top_k / top_p score filtering not implemented (module defaults are None).
        outs = []
        for hh in range(num_heads):
            q = qkv[:, hh * hd:(hh + 1) * hd]
            k = qkv[:, D + hh * hd:D + (hh + 1) * hd]
            v = qkv[:, 2 * D + hh * hd:2 * D + (hh + 1) * hd]
            s = jnp.dot(q, k.T, preferred_element_type=jnp.float32) * scale
            m = jnp.max(s, axis=-1, keepdims=True)
            p = jnp.exp(s - m)
            p = p * pl.reciprocal(jnp.sum(p, axis=-1, keepdims=True), approx=True)
            outs.append(jnp.dot(p.astype(jnp.bfloat16), v,
                                preferred_element_type=jnp.float32))
        attn = jnp.concatenate(outs, axis=-1).astype(jnp.bfloat16)  # [S, D]

        # ---- out_proj + residual add ----
        xv = xv + jnp.dot(attn, wo_ref[...],
                          preferred_element_type=jnp.float32) + bo_ref[...]

        # ---- norm2 + MLP (Linear/GELU, Linear) + residual add ----
        mu = jnp.mean(xv, axis=-1, keepdims=True)
        var = jnp.mean(jnp.square(xv - mu), axis=-1, keepdims=True)
        h = (xv - mu) * lax.rsqrt(var + 1e-5) * n2g_ref[...] + n2b_ref[...]
        h = _gelu_exact(jnp.dot(h.astype(jnp.bfloat16), w1_ref[...],
                                preferred_element_type=jnp.float32) + b1_ref[...])
        xv = xv + jnp.dot(h.astype(jnp.bfloat16), w2_ref[...],
                          preferred_element_type=jnp.float32) + b2_ref[...]

        o_ref[0] = xv.astype(o_ref.dtype)

    operands = [x, lyr["n1_g"], lyr["n1_b"], wqkv, bqkv, wo, lyr["bo"],
                lyr["n2_g"], lyr["n2_b"], w1, lyr["b_mlp1"], w2, lyr["b_mlp2"]]
    in_specs = [pl.BlockSpec((1, S, D), lambda b: (b, 0, 0))]
    in_specs += [_full_spec(op) for op in operands[1:]]

    return pl.pallas_call(
        kernel,
        out_shape=jax.ShapeDtypeStruct((B, S, D), jnp.float32),
        grid=(B,),
        in_specs=in_specs,
        out_specs=pl.BlockSpec((1, S, D), lambda b: (b, 0, 0)),
        compiler_params=pltpu.CompilerParams(
            dimension_semantics=("parallel",),
            vmem_limit_bytes=_VMEM_LIMIT),
    )(*operands)


def conv1_3x3_gelu(x_nchw, w, b):
    """First conv (Cin=1): 3x3, pad=1 + folded BN + GELU as a 9-tap VPU
    multiply-accumulate (avoids a 9-deep MXU contraction).  Output is NHWC."""
    B, _, Hh, Ww = x_nchw.shape
    Cout = w.shape[0]
    xp = jnp.pad(x_nchw[:, 0], ((0, 0), (1, 1), (1, 1)))                # [B,H+2,W+2]
    cols = jnp.stack([xp[:, kh:kh + Hh, kw:kw + Ww]
                      for kh in range(3) for kw in range(3)], axis=-1)  # [B,H,W,9]
    cols = cols.reshape(B * Hh * Ww, 9)
    wtaps = w.reshape(Cout, 9).T                                        # [9,Cout], (kh,kw) order
    bias = b.reshape(1, Cout)

    M = B * Hh * Ww
    if M <= _TM_MAX:
        tm, Mp = M, M
    else:
        tm, Mp = _TM_MAX, _round_up(M, _TM_MAX)
    if Mp != M:
        cols = jnp.pad(cols, ((0, Mp - M), (0, 0)))

    def kernel(c_ref, w_ref, b_ref, o_ref):
        cv = c_ref[...].astype(jnp.float32)                  # (tm, 9)
        acc = jnp.zeros((tm, Cout), jnp.float32)
        for t in range(9):                                   # unrolled taps (VPU)
            acc = acc + cv[:, t:t + 1] * w_ref[t:t + 1, :]
        o_ref[...] = _gelu_exact(acc + b_ref[...]).astype(o_ref.dtype)

    out = pl.pallas_call(
        kernel,
        out_shape=jax.ShapeDtypeStruct((Mp, Cout), jnp.bfloat16),
        grid=(Mp // tm,),
        in_specs=[pl.BlockSpec((tm, 9), lambda i: (i, 0)),
                  pl.BlockSpec((9, Cout), lambda i: (0, 0)),
                  pl.BlockSpec((1, Cout), lambda i: (0, 0))],
        out_specs=pl.BlockSpec((tm, Cout), lambda i: (i, 0)),
        compiler_params=pltpu.CompilerParams(dimension_semantics=("parallel",)),
    )(cols, wtaps, bias)
    return out[:M].reshape(B, Hh, Ww, Cout)                  # NHWC, bf16


def classifier_head(cls_x, gamma, beta, w1, b1, w2, b2, w3, b3, temperature):
    """LayerNorm + Linear/GELU x2 + Linear + temperature scale, one launch."""
    B, D = cls_x.shape
    n_cls = w3.shape[1]

    def kernel(x_ref, g_ref, be_ref, w1_ref, b1_ref, w2_ref, b2_ref,
               w3_ref, b3_ref, t_ref, o_ref):
        xv = x_ref[...].astype(jnp.float32)
        mu = jnp.mean(xv, axis=-1, keepdims=True)
        var = jnp.mean(jnp.square(xv - mu), axis=-1, keepdims=True)
        h = (xv - mu) * lax.rsqrt(var + 1e-5) * g_ref[...] + be_ref[...]
        h = _gelu_exact(jnp.dot(h.astype(jnp.bfloat16), w1_ref[...],
                                preferred_element_type=jnp.float32) + b1_ref[...])
        h = _gelu_exact(jnp.dot(h.astype(jnp.bfloat16), w2_ref[...],
                                preferred_element_type=jnp.float32) + b2_ref[...])
        logits = jnp.dot(h.astype(jnp.bfloat16), w3_ref[...],
                         preferred_element_type=jnp.float32) + b3_ref[...]
        o_ref[...] = logits / t_ref[...]

    def vspec(shape):
        return pl.BlockSpec(shape, lambda i, _s=shape: tuple(0 for _ in _s))

    return pl.pallas_call(
        kernel,
        out_shape=jax.ShapeDtypeStruct((B, n_cls), jnp.float32),
        grid=(1,),
        in_specs=[vspec(cls_x.shape), vspec(gamma.shape), vspec(beta.shape),
                  vspec(w1.shape), vspec(b1.shape),
                  vspec(w2.shape), vspec(b2.shape),
                  vspec(w3.shape), vspec(b3.shape),
                  vspec((1, 1))],
        out_specs=vspec((B, n_cls)),
        compiler_params=pltpu.CompilerParams(dimension_semantics=("arbitrary",)),
    )(cls_x, gamma, beta, w1, b1, w2, b2, w3, b3, temperature)


# ---------------------------------------------------------------- conv glue --

def _fold_bn(conv_w, conv_b, gamma, beta, mean, var, eps=1e-5):
    """Fold eval-mode BatchNorm into the preceding conv (NCHW weight layout)."""
    scale = gamma / jnp.sqrt(var + eps)
    w = conv_w * scale[:, None, None, None]
    b = (conv_b - mean) * scale + beta
    return w, b


def _im2col_3x3_nhwc(x):
    """x: [B,H,W,C] -> [B*H*W, 9*C] patches, feature order (kh, kw, c)."""
    B, Hh, Ww, C = x.shape
    xp = jnp.pad(x, ((0, 0), (1, 1), (1, 1), (0, 0)))
    cols = jnp.concatenate(
        [xp[:, kh:kh + Hh, kw:kw + Ww, :] for kh in range(3) for kw in range(3)],
        axis=-1)
    return cols.reshape(B * Hh * Ww, 9 * C)


# ----------------------------------------------------------------- params ----

def init_params(key, cfg):
    D = cfg["embed_dim"]
    mlp_dim = int(D * cfg["mlp_ratio"])
    p = cfg["patch_size"]
    num_patches = (cfg["img_size"] // p) ** 2
    keys = iter(jax.random.split(key, 256))

    def tn(shape, std=0.02):
        return jax.random.truncated_normal(next(keys), -2.0, 2.0, shape, jnp.float32) * std

    zeros = lambda *s: jnp.zeros(s, jnp.float32)
    ones = lambda *s: jnp.ones(s, jnp.float32)

    params = dict(
        conv1_w=tn((64, 1, 3, 3)), conv1_b=zeros(64),
        bn1=(ones(64), zeros(64), zeros(64), ones(64)),          # gamma, beta, mean, var
        conv2_w=tn((128, 64, 3, 3)), conv2_b=zeros(128),
        bn2=(ones(128), zeros(128), zeros(128), ones(128)),
        conv3_w=tn((D, 128, p, p)), conv3_b=zeros(D),
        pos_embedding=jax.random.normal(next(keys), (1, num_patches + 1, D), jnp.float32) * 0.02,
        cls_token=jax.random.normal(next(keys), (1, 1, D), jnp.float32) * 0.02,
        input_norm_g=ones(1, D), input_norm_b=zeros(1, D),
        cls_norm_g=ones(1, D), cls_norm_b=zeros(1, D),
        w_c1=tn((D, D // 2)), b_c1=zeros(1, D // 2),
        w_c2=tn((D // 2, D // 4)), b_c2=zeros(1, D // 4),
        w_c3=tn((D // 4, cfg["num_classes"])), b_c3=zeros(1, cfg["num_classes"]),
        logits_temperature=jnp.float32(cfg["temperature"]),
        layers=[],
    )
    for _ in range(cfg["depth"]):
        params["layers"].append(dict(
            n1_g=ones(1, D), n1_b=zeros(1, D),
            wq=tn((D, D)), bq=zeros(1, D),
            wk=tn((D, D)), bk=zeros(1, D),
            wv=tn((D, D)), bv=zeros(1, D),
            wo=tn((D, D)), bo=zeros(1, D),
            n2_g=ones(1, D), n2_b=zeros(1, D),
            w_mlp1=tn((D, mlp_dim)), b_mlp1=zeros(1, mlp_dim),
            w_mlp2=tn((mlp_dim, D)), b_mlp2=zeros(1, D),
        ))
    return params


# ---------------------------------------------------------------- forward ----

def forward(params, x, cfg):
    B = x.shape[0]
    D = cfg["embed_dim"]
    H = cfg["num_heads"]
    hd = D // H
    p = cfg["patch_size"]
    Himg, Wimg = x.shape[2], x.shape[3]

    # --- patch embedding (eval: Dropout2d identity, BN folded, NHWC layout) ---
    w1, b1 = _fold_bn(params["conv1_w"], params["conv1_b"], *params["bn1"])
    h1 = conv1_3x3_gelu(x, w1, b1)                              # [B,H,W,64] bf16

    w2, b2 = _fold_bn(params["conv2_w"], params["conv2_b"], *params["bn2"])
    cols2 = _im2col_3x3_nhwc(h1)                                # [B*H*W, 576] bf16
    w2mat = jnp.transpose(w2, (2, 3, 1, 0)).reshape(9 * 64, 128).astype(jnp.bfloat16)
    h2 = fused_matmul(cols2, w2mat, b2.reshape(1, 128), activation="gelu",
                      out_dtype=jnp.bfloat16).reshape(B, Himg, Wimg, 128)

    gh, gw = Himg // p, Wimg // p
    patches = (h2.reshape(B, gh, p, gw, p, 128)
                 .transpose(0, 1, 3, 2, 4, 5)
                 .reshape(B * gh * gw, p * p * 128))
    w3mat = (jnp.transpose(params["conv3_w"], (2, 3, 1, 0))
               .reshape(p * p * 128, D).astype(jnp.bfloat16))
    tokens = fused_matmul(patches, w3mat, params["conv3_b"].reshape(1, D))
    tokens = tokens.reshape(B, gh * gw, D)                      # [B, num_patches, D]

    # --- cls token + positional embedding + input LayerNorm (fused) ---
    cls = jnp.broadcast_to(params["cls_token"], (B, 1, D))
    seq = jnp.concatenate([cls, tokens], axis=1)                # [B, S, D] f32
    xt = embed_layernorm(seq, params["pos_embedding"],
                         params["input_norm_g"], params["input_norm_b"])

    if cfg["nkat_strength"] > 0:
        mean_act = jnp.mean(xt, axis=-1, keepdims=True)
        xt = xt * (1.0 + cfg["nkat_strength"] * 0.01 * jnp.tanh(mean_act))

    scale = (1.0 / math.sqrt(hd)) / cfg["temperature"]

    # --- transformer encoder: one fused pallas_call per layer ---
    for i, lyr in enumerate(params["layers"]):
        xt = transformer_layer(xt, lyr, H, scale)               # [B,S,D] f32

        if cfg["nkat_strength"] > 0:
            cur = cfg["nkat_strength"] * cfg["nkat_decay"] ** i
            if cur > 1e-4:
                mean_act = jnp.mean(xt, axis=-1, keepdims=True)
                xt = xt * (1.0 + cur * 0.01 * jnp.tanh(mean_act))

    # --- classifier head on the CLS token (single fused pallas_call) ---
    cls_out = xt[:, 0]                                          # [B, D]
    logits = classifier_head(
        cls_out, params["cls_norm_g"], params["cls_norm_b"],
        params["w_c1"].astype(jnp.bfloat16), params["b_c1"],
        params["w_c2"].astype(jnp.bfloat16), params["b_c2"],
        params["w_c3"].astype(jnp.bfloat16), params["b_c3"],
        params["logits_temperature"].reshape(1, 1))
    return logits


# ------------------------------------------------------------------- main ----

if __name__ == "__main__":
    cfg = dict(img_size=16, patch_size=4, num_classes=10, embed_dim=64,
               depth=2, num_heads=4, mlp_ratio=2.0, temperature=1.0,
               nkat_strength=0.0, nkat_decay=1.0)

    key = jax.random.PRNGKey(0)
    pkey, xkey = jax.random.split(key)
    params = init_params(pkey, cfg)
    x = jax.random.normal(xkey, (2, 1, cfg["img_size"], cfg["img_size"]), jnp.float32)

    fwd = jax.jit(lambda p_, x_: forward(p_, x_, cfg))
    logits = fwd(params, x)
    jax.block_until_ready(logits)
    assert logits.shape == (2, cfg["num_classes"]), logits.shape
    assert bool(jnp.all(jnp.isfinite(logits)))
    print("KERNEL_OK")
</pallas_src>

<mosaic_0001>
module attributes {stable_mosaic.version = 11 : i64} {
  func.func @kernel(%arg0: i32, %arg1: memref<256x9xf32, #tpu.memory_space<vmem>>, %arg2: memref<9x64xf32, #tpu.memory_space<vmem>>, %arg3: memref<1x64xf32, #tpu.memory_space<vmem>>, %arg4: memref<256x64xbf16, #tpu.memory_space<vmem>>) attributes {dimension_semantics = [#tpu.dimension_semantics<parallel>], iteration_bounds = array<i64: 2>, scalar_prefetch = 0 : i64, scratch_operands = 0 : i64, tpu.core_type = #tpu.core_type<tc>, window_params = [{transform_indices = @transform_0, window_bounds = array<i64: 256, 9>}, {pipeline_mode = #tpu.pipeline_mode<synchronous>, transform_indices = @transform_1, window_bounds = array<i64: 9, 64>}, {pipeline_mode = #tpu.pipeline_mode<synchronous>, transform_indices = @transform_2, window_bounds = array<i64: 1, 64>}, {transform_indices = @transform_3, window_bounds = array<i64: 256, 64>}]} {
    %c0 = arith.constant 0 : index
    %c0_0 = arith.constant 0 : index
    %0 = vector.load %arg1[%c0, %c0_0] : memref<256x9xf32, #tpu.memory_space<vmem>>, vector<256x9xf32>
    %cst = arith.constant 0.000000e+00 : f32
    %1 = vector.broadcast %cst : f32 to vector<256x64xf32>
    %2 = vector.extract_strided_slice %0 {offsets = [0, 0], sizes = [256, 1], strides = [1, 1]} : vector<256x9xf32> to vector<256x1xf32>
    %c0_1 = arith.constant 0 : index
    %c0_2 = arith.constant 0 : index
    %3 = vector.load %arg2[%c0_1, %c0_2] : memref<9x64xf32, #tpu.memory_space<vmem>>, vector<1x64xf32>
    %4 = vector.broadcast %2 : vector<256x1xf32> to vector<256x64xf32>
    %5 = vector.broadcast %3 : vector<1x64xf32> to vector<256x64xf32>
    %6 = arith.mulf %4, %5 : vector<256x64xf32>
    %7 = arith.addf %1, %6 : vector<256x64xf32>
    %8 = vector.extract_strided_slice %0 {offsets = [0, 1], sizes = [256, 1], strides = [1, 1]} : vector<256x9xf32> to vector<256x1xf32>
    %c1 = arith.constant 1 : index
    %c0_3 = arith.constant 0 : index
    %9 = vector.load %arg2[%c1, %c0_3] : memref<9x64xf32, #tpu.memory_space<vmem>>, vector<1x64xf32>
    %10 = vector.broadcast %8 : vector<256x1xf32> to vector<256x64xf32>
    %11 = vector.broadcast %9 : vector<1x64xf32> to vector<256x64xf32>
    %12 = arith.mulf %10, %11 : vector<256x64xf32>
    %13 = arith.addf %7, %12 : vector<256x64xf32>
    %14 = vector.extract_strided_slice %0 {offsets = [0, 2], sizes = [256, 1], strides = [1, 1]} : vector<256x9xf32> to vector<256x1xf32>
    %c2 = arith.constant 2 : index
    %c0_4 = arith.constant 0 : index
    %15 = vector.load %arg2[%c2, %c0_4] : memref<9x64xf32, #tpu.memory_space<vmem>>, vector<1x64xf32>
    %16 = vector.broadcast %14 : vector<256x1xf32> to vector<256x64xf32>
    %17 = vector.broadcast %15 : vector<1x64xf32> to vector<256x64xf32>
    %18 = arith.mulf %16, %17 : vector<256x64xf32>
    %19 = arith.addf %13, %18 : vector<256x64xf32>
    %20 = vector.extract_strided_slice %0 {offsets = [0, 3], sizes = [256, 1], strides = [1, 1]} : vector<256x9xf32> to vector<256x1xf32>
    %c3 = arith.constant 3 : index
    %c0_5 = arith.constant 0 : index
    %21 = vector.load %arg2[%c3, %c0_5] : memref<9x64xf32, #tpu.memory_space<vmem>>, vector<1x64xf32>
    %22 = vector.broadcast %20 : vector<256x1xf32> to vector<256x64xf32>
    %23 = vector.broadcast %21 : vector<1x64xf32> to vector<256x64xf32>
    %24 = arith.mulf %22, %23 : vector<256x64xf32>
    %25 = arith.addf %19, %24 : vector<256x64xf32>
    %26 = vector.extract_strided_slice %0 {offsets = [0, 4], sizes = [256, 1], strides = [1, 1]} : vector<256x9xf32> to vector<256x1xf32>
    %c4 = arith.constant 4 : index
    %c0_6 = arith.constant 0 : index
    %27 = vector.load %arg2[%c4, %c0_6] : memref<9x64xf32, #tpu.memory_space<vmem>>, vector<1x64xf32>
    %28 = vector.broadcast %26 : vector<256x1xf32> to vector<256x64xf32>
    %29 = vector.broadcast %27 : vector<1x64xf32> to vector<256x64xf32>
    %30 = arith.mulf %28, %29 : vector<256x64xf32>
    %31 = arith.addf %25, %30 : vector<256x64xf32>
    %32 = vector.extract_strided_slice %0 {offsets = [0, 5], sizes = [256, 1], strides = [1, 1]} : vector<256x9xf32> to vector<256x1xf32>
    %c5 = arith.constant 5 : index
    %c0_7 = arith.constant 0 : index
    %33 = vector.load %arg2[%c5, %c0_7] : memref<9x64xf32, #tpu.memory_space<vmem>>, vector<1x64xf32>
    %34 = vector.broadcast %32 : vector<256x1xf32> to vector<256x64xf32>
    %35 = vector.broadcast %33 : vector<1x64xf32> to vector<256x64xf32>
    %36 = arith.mulf %34, %35 : vector<256x64xf32>
    %37 = arith.addf %31, %36 : vector<256x64xf32>
    %38 = vector.extract_strided_slice %0 {offsets = [0, 6], sizes = [256, 1], strides = [1, 1]} : vector<256x9xf32> to vector<256x1xf32>
    %c6 = arith.constant 6 : index
    %c0_8 = arith.constant 0 : index
    %39 = vector.load %arg2[%c6, %c0_8] : memref<9x64xf32, #tpu.memory_space<vmem>>, vector<1x64xf32>
    %40 = vector.broadcast %38 : vector<256x1xf32> to vector<256x64xf32>
    %41 = vector.broadcast %39 : vector<1x64xf32> to vector<256x64xf32>
    %42 = arith.mulf %40, %41 : vector<256x64xf32>
    %43 = arith.addf %37, %42 : vector<256x64xf32>
    %44 = vector.extract_strided_slice %0 {offsets = [0, 7], sizes = [256, 1], strides = [1, 1]} : vector<256x9xf32> to vector<256x1xf32>
    %c7 = arith.constant 7 : index
    %c0_9 = arith.constant 0 : index
    %45 = vector.load %arg2[%c7, %c0_9] : memref<9x64xf32, #tpu.memory_space<vmem>>, vector<1x64xf32>
    %46 = vector.broadcast %44 : vector<256x1xf32> to vector<256x64xf32>
    %47 = vector.broadcast %45 : vector<1x64xf32> to vector<256x64xf32>
    %48 = arith.mulf %46, %47 : vector<256x64xf32>
    %49 = arith.addf %43, %48 : vector<256x64xf32>
    %50 = vector.extract_strided_slice %0 {offsets = [0, 8], sizes = [256, 1], strides = [1, 1]} : vector<256x9xf32> to vector<256x1xf32>
    %c8 = arith.constant 8 : index
    %c0_10 = arith.constant 0 : index
    %51 = vector.load %arg2[%c8, %c0_10] : memref<9x64xf32, #tpu.memory_space<vmem>>, vector<1x64xf32>
    %52 = vector.broadcast %50 : vector<256x1xf32> to vector<256x64xf32>
    %53 = vector.broadcast %51 : vector<1x64xf32> to vector<256x64xf32>
    %54 = arith.mulf %52, %53 : vector<256x64xf32>
    %55 = arith.addf %49, %54 : vector<256x64xf32>
    %c0_11 = arith.constant 0 : index
    %c0_12 = arith.constant 0 : index
    %56 = vector.load %arg3[%c0_11, %c0_12] : memref<1x64xf32, #tpu.memory_space<vmem>>, vector<1x64xf32>
    %57 = vector.broadcast %56 : vector<1x64xf32> to vector<256x64xf32>
    %58 = arith.addf %55, %57 : vector<256x64xf32>
    %cst_13 = arith.constant 5.000000e-01 : f32
    %59 = vector.broadcast %cst_13 : f32 to vector<256x64xf32>
    %60 = arith.mulf %59, %58 : vector<256x64xf32>
    %cst_14 = arith.constant 2.000000e+00 : f32
    %61 = math.sqrt %cst_14 : f32
    %62 = vector.broadcast %61 : f32 to vector<256x64xf32>
    %63 = arith.divf %58, %62 : vector<256x64xf32>
    %64 = math.erf %63 : vector<256x64xf32>
    %cst_15 = arith.constant 1.000000e+00 : f32
    %65 = vector.broadcast %cst_15 : f32 to vector<256x64xf32>
    %66 = arith.addf %65, %64 : vector<256x64xf32>
    %67 = arith.mulf %60, %66 : vector<256x64xf32>
    %68 = arith.truncf %67 : vector<256x64xf32> to vector<256x64xbf16>
    %c0_16 = arith.constant 0 : index
    %c0_17 = arith.constant 0 : index
    %69 = vector.load %arg4[%c0_16, %c0_17] : memref<256x64xbf16, #tpu.memory_space<vmem>>, vector<256x64xbf16>
    tpu.vector_store %arg4[%c0_16, %c0_17], %68 {strides = array<i32>} : memref<256x64xbf16, #tpu.memory_space<vmem>>, vector<256x64xbf16>,
    return
  }
  func.func @transform_0(%arg0: i32) -> (i32, i32) {
    %c0_i32 = arith.constant 0 : i32
    %c0_i32_0 = arith.constant 0 : i32
    return %arg0, %c0_i32 : i32, i32
  }
  func.func @transform_1(%arg0: i32) -> (i32, i32) {
    %c0_i32 = arith.constant 0 : i32
    %c0_i32_0 = arith.constant 0 : i32
    %c0_i32_1 = arith.constant 0 : i32
    return %c0_i32, %c0_i32_0 : i32, i32
  }
  func.func @transform_2(%arg0: i32) -> (i32, i32) {
    %c0_i32 = arith.constant 0 : i32
    %c0_i32_0 = arith.constant 0 : i32
    %c0_i32_1 = arith.constant 0 : i32
    return %c0_i32, %c0_i32_0 : i32, i32
  }
  func.func @transform_3(%arg0: i32) -> (i32, i32) {
    %c0_i32 = arith.constant 0 : i32
    %c0_i32_0 = arith.constant 0 : i32
    return %arg0, %c0_i32 : i32, i32
  }
}

module attributes {stable_mosaic.version = 11 : i64} {
  func.func @kernel(%arg0: i32, %arg1: i32, %arg2: i32, %arg3: memref<256x576xbf16, #tpu.memory_space<vmem>>, %arg4: memref<576x128xbf16, #tpu.memory_space<vmem>>, %arg5: memref<1x128xf32, #tpu.memory_space<vmem>>, %arg6: memref<256x128xbf16, #tpu.memory_space<vmem>>, %arg7: memref<256x128xf32, #tpu.memory_space<vmem>>) attributes {dimension_semantics = [#tpu.dimension_semantics<parallel>, #tpu.dimension_semantics<parallel>, #tpu.dimension_semantics<arbitrary>], iteration_bounds = array<i64: 2, 1, 1>, scalar_prefetch = 0 : i64, scratch_operands = 1 : i64, tpu.core_type = #tpu.core_type<tc>, window_params = [{transform_indices = @transform_0, window_bounds = array<i64: 256, 576>}, {transform_indices = @transform_1, window_bounds = array<i64: 576, 128>}, {transform_indices = @transform_2, window_bounds = array<i64: 1, 128>}, {transform_indices = @transform_3, window_bounds = array<i64: 256, 128>}]} {
    %c0_i32 = arith.constant 0 : i32
    %0 = arith.cmpi eq, %arg2, %c0_i32 : i32
    %1 = arith.extui %0 : i1 to i32
    %c0_i32_0 = arith.constant 0 : i32
    %2 = arith.cmpi ne, %1, %c0_i32_0 : i32
    scf.if %2 {
      %cst_10 = arith.constant 0.000000e+00 : f32
      %12 = vector.broadcast %cst_10 : f32 to vector<256x128xf32>
      %c0_11 = arith.constant 0 : index
      %c0_12 = arith.constant 0 : index
      %13 = vector.load %arg7[%c0_11, %c0_12] : memref<256x128xf32, #tpu.memory_space<vmem>>, vector<256x128xf32>
      tpu.vector_store %arg7[%c0_11, %c0_12], %12 {strides = array<i32>} : memref<256x128xf32, #tpu.memory_space<vmem>>, vector<256x128xf32>,
    } else {
    }
    %c0 = arith.constant 0 : index
    %c0_1 = arith.constant 0 : index
    %3 = vector.load %arg7[%c0, %c0_1] : memref<256x128xf32, #tpu.memory_space<vmem>>, vector<256x128xf32>
    %c0_2 = arith.constant 0 : index
    %c0_3 = arith.constant 0 : index
    %4 = vector.load %arg3[%c0_2, %c0_3] : memref<256x576xbf16, #tpu.memory_space<vmem>>, vector<256x576xbf16>
    %c0_4 = arith.constant 0 : index
    %c0_5 = arith.constant 0 : index
    %5 = vector.load %arg4[%c0_4, %c0_5] : memref<576x128xbf16, #tpu.memory_space<vmem>>, vector<576x128xbf16>
    %cst = arith.constant dense<0.000000e+00> : vector<256x128xf32>
    %6 = tpu.matmul %4, %5, %cst {dimension_numbers = #tpu.dot_dimension_numbers<[1], [0], [0], [1], [0, 0, 1, 1], [], []>} : vector<256x576xbf16>, vector<576x128xbf16>, vector<256x128xf32> -> vector<256x128xf32>
    %7 = arith.addf %3, %6 : vector<256x128xf32>
    %c0_6 = arith.constant 0 : index
    %c0_7 = arith.constant 0 : index
    %8 = vector.load %arg7[%c0_6, %c0_7] : memref<256x128xf32, #tpu.memory_space<vmem>>, vector<256x128xf32>
    tpu.vector_store %arg7[%c0_6, %c0_7], %7 {strides = array<i32>} : memref<256x128xf32, #tpu.memory_space<vmem>>, vector<256x128xf32>,
    %c0_i32_8 = arith.constant 0 : i32
    %9 = arith.cmpi eq, %arg2, %c0_i32_8 : i32
    %10 = arith.extui %9 : i1 to i32
    %c0_i32_9 = arith.constant 0 : i32
    %11 = arith.cmpi ne, %10, %c0_i32_9 : i32
    scf.if %11 {
      %c0_10 = arith.constant 0 : index
      %c0_11 = arith.constant 0 : index
      %12 = vector.load %arg7[%c0_10, %c0_11] : memref<256x128xf32, #tpu.memory_space<vmem>>, vector<256x128xf32>
      %c0_12 = arith.constant 0 : index
      %c0_13 = arith.constant 0 : index
      %13 = vector.load %arg5[%c0_12, %c0_13] : memref<1x128xf32, #tpu.memory_space<vmem>>, vector<1x128xf32>
      %14 = vector.broadcast %13 : vector<1x128xf32> to vector<256x128xf32>
      %15 = arith.addf %12, %14 : vector<256x128xf32>
      %cst_14 = arith.constant 5.000000e-01 : f32
      %16 = vector.broadcast %cst_14 : f32 to vector<256x128xf32>
      %17 = arith.mulf %16, %15 : vector<256x128xf32>
      %cst_15 = arith.constant 2.000000e+00 : f32
      %18 = math.sqrt %cst_15 : f32
      %19 = vector.broadcast %18 : f32 to vector<256x128xf32>
      %20 = arith.divf %15, %19 : vector<256x128xf32>
      %21 = math.erf %20 : vector<256x128xf32>
      %cst_16 = arith.constant 1.000000e+00 : f32
      %22 = vector.broadcast %cst_16 : f32 to vector<256x128xf32>
      %23 = arith.addf %22, %21 : vector<256x128xf32>
      %24 = arith.mulf %17, %23 : vector<256x128xf32>
      %25 = arith.truncf %24 : vector<256x128xf32> to vector<256x128xbf16>
      %c0_17 = arith.constant 0 : index
      %c0_18 = arith.constant 0 : index
      %26 = vector.load %arg6[%c0_17, %c0_18] : memref<256x128xbf16, #tpu.memory_space<vmem>>, vector<256x128xbf16>
      tpu.vector_store %arg6[%c0_17, %c0_18], %25 {strides = array<i32>} : memref<256x128xbf16, #tpu.memory_space<vmem>>, vector<256x128xbf16>,
    } else {
    }
    return
  }
  func.func @transform_0(%arg0: i32, %arg1: i32, %arg2: i32) -> (i32, i32) {
    %c0_i32 = arith.constant 0 : i32
    return %arg0, %arg2 : i32, i32
  }
  func.func @transform_1(%arg0: i32, %arg1: i32, %arg2: i32) -> (i32, i32) {
    %c0_i32 = arith.constant 0 : i32
    return %arg2, %arg1 : i32, i32
  }
  func.func @transform_2(%arg0: i32, %arg1: i32, %arg2: i32) -> (i32, i32) {
    %c0_i32 = arith.constant 0 : i32
    %c0_i32_0 = arith.constant 0 : i32
    return %c0_i32, %arg1 : i32, i32
  }
  func.func @transform_3(%arg0: i32, %arg1: i32, %arg2: i32) -> (i32, i32) {
    %c0_i32 = arith.constant 0 : i32
    return %arg0, %arg1 : i32, i32
  }
}

module attributes {stable_mosaic.version = 11 : i64} {
  func.func @kernel(%arg0: i32, %arg1: i32, %arg2: i32, %arg3: memref<32x1024xbf16, #tpu.memory_space<vmem>>, %arg4: memref<1024x64xbf16, #tpu.memory_space<vmem>>, %arg5: memref<1x64xf32, #tpu.memory_space<vmem>>, %arg6: memref<32x64xf32, #tpu.memory_space<vmem>>, %arg7: memref<32x64xf32, #tpu.memory_space<vmem>>) attributes {dimension_semantics = [#tpu.dimension_semantics<parallel>, #tpu.dimension_semantics<parallel>, #tpu.dimension_semantics<arbitrary>], iteration_bounds = array<i64: 1, 1, 2>, scalar_prefetch = 0 : i64, scratch_operands = 1 : i64, tpu.core_type = #tpu.core_type<tc>, window_params = [{transform_indices = @transform_0, window_bounds = array<i64: 32, 1024>}, {transform_indices = @transform_1, window_bounds = array<i64: 1024, 64>}, {transform_indices = @transform_2, window_bounds = array<i64: 1, 64>}, {transform_indices = @transform_3, window_bounds = array<i64: 32, 64>}]} {
    %c0_i32 = arith.constant 0 : i32
    %0 = arith.cmpi eq, %arg2, %c0_i32 : i32
    %1 = arith.extui %0 : i1 to i32
    %c0_i32_0 = arith.constant 0 : i32
    %2 = arith.cmpi ne, %1, %c0_i32_0 : i32
    scf.if %2 {
      %cst_9 = arith.constant 0.000000e+00 : f32
      %12 = vector.broadcast %cst_9 : f32 to vector<32x64xf32>
      %c0_10 = arith.constant 0 : index
      %c0_11 = arith.constant 0 : index
      %13 = vector.load %arg7[%c0_10, %c0_11] : memref<32x64xf32, #tpu.memory_space<vmem>>, vector<32x64xf32>
      tpu.vector_store %arg7[%c0_10, %c0_11], %12 {strides = array<i32>} : memref<32x64xf32, #tpu.memory_space<vmem>>, vector<32x64xf32>,
    } else {
    }
    %c0 = arith.constant 0 : index
    %c0_1 = arith.constant 0 : index
    %3 = vector.load %arg7[%c0, %c0_1] : memref<32x64xf32, #tpu.memory_space<vmem>>, vector<32x64xf32>
    %c0_2 = arith.constant 0 : index
    %c0_3 = arith.constant 0 : index
    %4 = vector.load %arg3[%c0_2, %c0_3] : memref<32x1024xbf16, #tpu.memory_space<vmem>>, vector<32x1024xbf16>
    %c0_4 = arith.constant 0 : index
    %c0_5 = arith.constant 0 : index
    %5 = vector.load %arg4[%c0_4, %c0_5] : memref<1024x64xbf16, #tpu.memory_space<vmem>>, vector<1024x64xbf16>
    %cst = arith.constant dense<0.000000e+00> : vector<32x64xf32>
    %6 = tpu.matmul %4, %5, %cst {dimension_numbers = #tpu.dot_dimension_numbers<[1], [0], [0], [1], [0, 0, 1, 1], [], []>} : vector<32x1024xbf16>, vector<1024x64xbf16>, vector<32x64xf32> -> vector<32x64xf32>
    %7 = arith.addf %3, %6 : vector<32x64xf32>
    %c0_6 = arith.constant 0 : index
    %c0_7 = arith.constant 0 : index
    %8 = vector.load %arg7[%c0_6, %c0_7] : memref<32x64xf32, #tpu.memory_space<vmem>>, vector<32x64xf32>
    tpu.vector_store %arg7[%c0_6, %c0_7], %7 {strides = array<i32>} : memref<32x64xf32, #tpu.memory_space<vmem>>, vector<32x64xf32>,
    %c1_i32 = arith.constant 1 : i32
    %9 = arith.cmpi eq, %arg2, %c1_i32 : i32
    %10 = arith.extui %9 : i1 to i32
    %c0_i32_8 = arith.constant 0 : i32
    %11 = arith.cmpi ne, %10, %c0_i32_8 : i32
    scf.if %11 {
      %c0_9 = arith.constant 0 : index
      %c0_10 = arith.constant 0 : index
      %12 = vector.load %arg7[%c0_9, %c0_10] : memref<32x64xf32, #tpu.memory_space<vmem>>, vector<32x64xf32>
      %c0_11 = arith.constant 0 : index
      %c0_12 = arith.constant 0 : index
      %13 = vector.load %arg5[%c0_11, %c0_12] : memref<1x64xf32, #tpu.memory_space<vmem>>, vector<1x64xf32>
      %14 = vector.broadcast %13 : vector<1x64xf32> to vector<32x64xf32>
      %15 = arith.addf %12, %14 : vector<32x64xf32>
      %c0_13 = arith.constant 0 : index
      %c0_14 = arith.constant 0 : index
      %16 = vector.load %arg6[%c0_13, %c0_14] : memref<32x64xf32, #tpu.memory_space<vmem>>, vector<32x64xf32>
      tpu.vector_store %arg6[%c0_13, %c0_14], %15 {strides = array<i32>} : memref<32x64xf32, #tpu.memory_space<vmem>>, vector<32x64xf32>,
    } else {
    }
    return
  }
  func.func @transform_0(%arg0: i32, %arg1: i32, %arg2: i32) -> (i32, i32) {
    %c0_i32 = arith.constant 0 : i32
    return %arg0, %arg2 : i32, i32
  }
  func.func @transform_1(%arg0: i32, %arg1: i32, %arg2: i32) -> (i32, i32) {
    %c0_i32 = arith.constant 0 : i32
    return %arg2, %arg1 : i32, i32
  }
  func.func @transform_2(%arg0: i32, %arg1: i32, %arg2: i32) -> (i32, i32) {
    %c0_i32 = arith.constant 0 : i32
    %c0_i32_0 = arith.constant 0 : i32
    return %c0_i32, %arg1 : i32, i32
  }
  func.func @transform_3(%arg0: i32, %arg1: i32, %arg2: i32) -> (i32, i32) {
    %c0_i32 = arith.constant 0 : i32
    return %arg0, %arg1 : i32, i32
  }
}

module attributes {stable_mosaic.version = 11 : i64} {
  func.func @kernel(%arg0: i32, %arg1: memref<1x17x64xf32, #tpu.memory_space<vmem>>, %arg2: memref<1x17x64xf32, #tpu.memory_space<vmem>>, %arg3: memref<1x64xf32, #tpu.memory_space<vmem>>, %arg4: memref<1x64xf32, #tpu.memory_space<vmem>>, %arg5: memref<1x17x64xf32, #tpu.memory_space<vmem>>) attributes {dimension_semantics = [#tpu.dimension_semantics<parallel>], iteration_bounds = array<i64: 2>, scalar_prefetch = 0 : i64, scratch_operands = 0 : i64, tpu.core_type = #tpu.core_type<tc>, window_params = [{transform_indices = @transform_0, window_bounds = array<i64: 1, 17, 64>}, {pipeline_mode = #tpu.pipeline_mode<synchronous>, transform_indices = @transform_1, window_bounds = array<i64: 1, 17, 64>}, {pipeline_mode = #tpu.pipeline_mode<synchronous>, transform_indices = @transform_2, window_bounds = array<i64: 1, 64>}, {pipeline_mode = #tpu.pipeline_mode<synchronous>, transform_indices = @transform_3, window_bounds = array<i64: 1, 64>}, {transform_indices = @transform_4, window_bounds = array<i64: 1, 17, 64>}]} {
    %c0 = arith.constant 0 : index
    %c0_0 = arith.constant 0 : index
    %c0_1 = arith.constant 0 : index
    %0 = vector.load %arg1[%c0, %c0_0, %c0_1] : memref<1x17x64xf32, #tpu.memory_space<vmem>>, vector<1x17x64xf32>
    %1 = vector.shape_cast %0 : vector<1x17x64xf32> to vector<17x64xf32>
    %c0_2 = arith.constant 0 : index
    %c0_3 = arith.constant 0 : index
    %c0_4 = arith.constant 0 : index
    %2 = vector.load %arg2[%c0_2, %c0_3, %c0_4] : memref<1x17x64xf32, #tpu.memory_space<vmem>>, vector<1x17x64xf32>
    %3 = vector.shape_cast %2 : vector<1x17x64xf32> to vector<17x64xf32>
    %4 = arith.addf %1, %3 : vector<17x64xf32>
    %cst = arith.constant dense<0.000000e+00> : vector<17xf32>
    %5 = vector.multi_reduction <add>, %4, %cst [1] : vector<17x64xf32> to vector<17xf32>
    %6 = vector.shape_cast %5 : vector<17xf32> to vector<17x1xf32>
    %cst_5 = arith.constant 6.400000e+01 : f32
    %7 = vector.broadcast %cst_5 : f32 to vector<17x1xf32>
    %8 = arith.divf %6, %7 : vector<17x1xf32>
    %9 = vector.broadcast %8 : vector<17x1xf32> to vector<17x64xf32>
    %10 = arith.subf %4, %9 : vector<17x64xf32>
    %11 = arith.mulf %10, %10 : vector<17x64xf32>
    %cst_6 = arith.constant dense<0.000000e+00> : vector<17xf32>
    %12 = vector.multi_reduction <add>, %11, %cst_6 [1] : vector<17x64xf32> to vector<17xf32>
    %13 = vector.shape_cast %12 : vector<17xf32> to vector<17x1xf32>
    %cst_7 = arith.constant 6.400000e+01 : f32
    %14 = vector.broadcast %cst_7 : f32 to vector<17x1xf32>
    %15 = arith.divf %13, %14 : vector<17x1xf32>
    %16 = vector.broadcast %8 : vector<17x1xf32> to vector<17x64xf32>
    %17 = arith.subf %4, %16 : vector<17x64xf32>
    %cst_8 = arith.constant 9.99999974E-6 : f32
    %18 = vector.broadcast %cst_8 : f32 to vector<17x1xf32>
    %19 = arith.addf %15, %18 : vector<17x1xf32>
    %20 = math.rsqrt %19 : vector<17x1xf32>
    %21 = vector.broadcast %20 : vector<17x1xf32> to vector<17x64xf32>
    %22 = arith.mulf %17, %21 : vector<17x64xf32>
    %c0_9 = arith.constant 0 : index
    %c0_10 = arith.constant 0 : index
    %23 = vector.load %arg3[%c0_9, %c0_10] : memref<1x64xf32, #tpu.memory_space<vmem>>, vector<1x64xf32>
    %24 = vector.broadcast %23 : vector<1x64xf32> to vector<17x64xf32>
    %25 = arith.mulf %22, %24 : vector<17x64xf32>
    %c0_11 = arith.constant 0 : index
    %c0_12 = arith.constant 0 : index
    %26 = vector.load %arg4[%c0_11, %c0_12] : memref<1x64xf32, #tpu.memory_space<vmem>>, vector<1x64xf32>
    %27 = vector.broadcast %26 : vector<1x64xf32> to vector<17x64xf32>
    %28 = arith.addf %25, %27 : vector<17x64xf32>
    %c0_13 = arith.constant 0 : index
    %c0_14 = arith.constant 0 : index
    %c0_15 = arith.constant 0 : index
    %29 = vector.load %arg5[%c0_13, %c0_14, %c0_15] : memref<1x17x64xf32, #tpu.memory_space<vmem>>, vector<1x17x64xf32>
    %30 = vector.shape_cast %29 : vector<1x17x64xf32> to vector<17x64xf32>
    %31 = vector.shape_cast %28 : vector<17x64xf32> to vector<1x17x64xf32>
    tpu.vector_store %arg5[%c0_13, %c0_14, %c0_15], %31 {strides = array<i32>} : memref<1x17x64xf32, #tpu.memory_space<vmem>>, vector<1x17x64xf32>,
    return
  }
  func.func @transform_0(%arg0: i32) -> (i32, i32, i32) {
    %c0_i32 = arith.constant 0 : i32
    %c0_i32_0 = arith.constant 0 : i32
    %c0_i32_1 = arith.constant 0 : i32
    return %arg0, %c0_i32, %c0_i32_0 : i32, i32, i32
  }
  func.func @transform_1(%arg0: i32) -> (i32, i32, i32) {
    %c0_i32 = arith.constant 0 : i32
    %c0_i32_0 = arith.constant 0 : i32
    %c0_i32_1 = arith.constant 0 : i32
    %c0_i32_2 = arith.constant 0 : i32
    return %c0_i32, %c0_i32_0, %c0_i32_1 : i32, i32, i32
  }
  func.func @transform_2(%arg0: i32) -> (i32, i32) {
    %c0_i32 = arith.constant 0 : i32
    %c0_i32_0 = arith.constant 0 : i32
    %c0_i32_1 = arith.constant 0 : i32
    return %c0_i32, %c0_i32_0 : i32, i32
  }
  func.func @transform_3(%arg0: i32) -> (i32, i32) {
    %c0_i32 = arith.constant 0 : i32
    %c0_i32_0 = arith.constant 0 : i32
    %c0_i32_1 = arith.constant 0 : i32
    return %c0_i32, %c0_i32_0 : i32, i32
  }
  func.func @transform_4(%arg0: i32) -> (i32, i32, i32) {
    %c0_i32 = arith.constant 0 : i32
    %c0_i32_0 = arith.constant 0 : i32
    %c0_i32_1 = arith.constant 0 : i32
    return %arg0, %c0_i32, %c0_i32_0 : i32, i32, i32
  }
}

module attributes {stable_mosaic.version = 11 : i64} {
  func.func @kernel(%arg0: i32, %arg1: memref<1x17x64xf32, #tpu.memory_space<vmem>>, %arg2: memref<1x64xf32, #tpu.memory_space<vmem>>, %arg3: memref<1x64xf32, #tpu.memory_space<vmem>>, %arg4: memref<64x192xbf16, #tpu.memory_space<vmem>>, %arg5: memref<1x192xf32, #tpu.memory_space<vmem>>, %arg6: memref<64x64xbf16, #tpu.memory_space<vmem>>, %arg7: memref<1x64xf32, #tpu.memory_space<vmem>>, %arg8: memref<1x64xf32, #tpu.memory_space<vmem>>, %arg9: memref<1x64xf32, #tpu.memory_space<vmem>>, %arg10: memref<64x128xbf16, #tpu.memory_space<vmem>>, %arg11: memref<1x128xf32, #tpu.memory_space<vmem>>, %arg12: memref<128x64xbf16, #tpu.memory_space<vmem>>, %arg13: memref<1x64xf32, #tpu.memory_space<vmem>>, %arg14: memref<1x17x64xf32, #tpu.memory_space<vmem>>) attributes {dimension_semantics = [#tpu.dimension_semantics<parallel>], iteration_bounds = array<i64: 2>, scalar_prefetch = 0 : i64, scratch_operands = 0 : i64, tpu.core_type = #tpu.core_type<tc>, window_params = [{transform_indices = @transform_0, window_bounds = array<i64: 1, 17, 64>}, {pipeline_mode = #tpu.pipeline_mode<synchronous>, transform_indices = @transform_1, window_bounds = array<i64: 1, 64>}, {pipeline_mode = #tpu.pipeline_mode<synchronous>, transform_indices = @transform_2, window_bounds = array<i64: 1, 64>}, {pipeline_mode = #tpu.pipeline_mode<synchronous>, transform_indices = @transform_3, window_bounds = array<i64: 64, 192>}, {pipeline_mode = #tpu.pipeline_mode<synchronous>, transform_indices = @transform_4, window_bounds = array<i64: 1, 192>}, {pipeline_mode = #tpu.pipeline_mode<synchronous>, transform_indices = @transform_5, window_bounds = array<i64: 64, 64>}, {pipeline_mode = #tpu.pipeline_mode<synchronous>, transform_indices = @transform_6, window_bounds = array<i64: 1, 64>}, {pipeline_mode = #tpu.pipeline_mode<synchronous>, transform_indices = @transform_7, window_bounds = array<i64: 1, 64>}, {pipeline_mode = #tpu.pipeline_mode<synchronous>, transform_indices = @transform_8, window_bounds = array<i64: 1, 64>}, {pipeline_mode = #tpu.pipeline_mode<synchronous>, transform_indices = @transform_9, window_bounds = array<i64: 64, 128>}, {pipeline_mode = #tpu.pipeline_mode<synchronous>, transform_indices = @transform_10, window_bounds = array<i64: 1, 128>}, {pipeline_mode = #tpu.pipeline_mode<synchronous>, transform_indices = @transform_11, window_bounds = array<i64: 128, 64>}, {pipeline_mode = #tpu.pipeline_mode<synchronous>, transform_indices = @transform_12, window_bounds = array<i64: 1, 64>}, {transform_indices = @transform_13, window_bounds = array<i64: 1, 17, 64>}]} {
    %c0 = arith.constant 0 : index
    %c0_0 = arith.constant 0 : index
    %c0_1 = arith.constant 0 : index
    %0 = vector.load %arg1[%c0, %c0_0, %c0_1] : memref<1x17x64xf32, #tpu.memory_space<vmem>>, vector<1x17x64xf32>
    %1 = vector.shape_cast %0 : vector<1x17x64xf32> to vector<17x64xf32>
    %cst = arith.constant dense<0.000000e+00> : vector<17xf32>
    %2 = vector.multi_reduction <add>, %1, %cst [1] : vector<17x64xf32> to vector<17xf32>
    %3 = vector.shape_cast %2 : vector<17xf32> to vector<17x1xf32>
    %cst_2 = arith.constant 6.400000e+01 : f32
    %4 = vector.broadcast %cst_2 : f32 to vector<17x1xf32>
    %5 = arith.divf %3, %4 : vector<17x1xf32>
    %6 = vector.broadcast %5 : vector<17x1xf32> to vector<17x64xf32>
    %7 = arith.subf %1, %6 : vector<17x64xf32>
    %8 = arith.mulf %7, %7 : vector<17x64xf32>
    %cst_3 = arith.constant dense<0.000000e+00> : vector<17xf32>
    %9 = vector.multi_reduction <add>, %8, %cst_3 [1] : vector<17x64xf32> to vector<17xf32>
    %10 = vector.shape_cast %9 : vector<17xf32> to vector<17x1xf32>
    %cst_4 = arith.constant 6.400000e+01 : f32
    %11 = vector.broadcast %cst_4 : f32 to vector<17x1xf32>
    %12 = arith.divf %10, %11 : vector<17x1xf32>
    %13 = vector.broadcast %5 : vector<17x1xf32> to vector<17x64xf32>
    %14 = arith.subf %1, %13 : vector<17x64xf32>
    %cst_5 = arith.constant 9.99999974E-6 : f32
    %15 = vector.broadcast %cst_5 : f32 to vector<17x1xf32>
    %16 = arith.addf %12, %15 : vector<17x1xf32>
    %17 = math.rsqrt %16 : vector<17x1xf32>
    %18 = vector.broadcast %17 : vector<17x1xf32> to vector<17x64xf32>
    %19 = arith.mulf %14, %18 : vector<17x64xf32>
    %c0_6 = arith.constant 0 : index
    %c0_7 = arith.constant 0 : index
    %20 = vector.load %arg2[%c0_6, %c0_7] : memref<1x64xf32, #tpu.memory_space<vmem>>, vector<1x64xf32>
    %21 = vector.broadcast %20 : vector<1x64xf32> to vector<17x64xf32>
    %22 = arith.mulf %19, %21 : vector<17x64xf32>
    %c0_8 = arith.constant 0 : index
    %c0_9 = arith.constant 0 : index
    %23 = vector.load %arg3[%c0_8, %c0_9] : memref<1x64xf32, #tpu.memory_space<vmem>>, vector<1x64xf32>
    %24 = vector.broadcast %23 : vector<1x64xf32> to vector<17x64xf32>
    %25 = arith.addf %22, %24 : vector<17x64xf32>
    %26 = arith.truncf %25 : vector<17x64xf32> to vector<17x64xbf16>
    %c0_10 = arith.constant 0 : index
    %c0_11 = arith.constant 0 : index
    %27 = vector.load %arg4[%c0_10, %c0_11] : memref<64x192xbf16, #tpu.memory_space<vmem>>, vector<64x192xbf16>
    %cst_12 = arith.constant dense<0.000000e+00> : vector<17x192xf32>
    %28 = tpu.matmul %26, %27, %cst_12 {dimension_numbers = #tpu.dot_dimension_numbers<[1], [0], [0], [1], [0, 0, 1, 1], [], []>} : vector<17x64xbf16>, vector<64x192xbf16>, vector<17x192xf32> -> vector<17x192xf32>
    %c0_13 = arith.constant 0 : index
    %c0_14 = arith.constant 0 : index
    %29 = vector.load %arg5[%c0_13, %c0_14] : memref<1x192xf32, #tpu.memory_space<vmem>>, vector<1x192xf32>
    %30 = vector.broadcast %29 : vector<1x192xf32> to vector<17x192xf32>
    %31 = arith.addf %28, %30 : vector<17x192xf32>
    %32 = arith.truncf %31 : vector<17x192xf32> to vector<17x192xbf16>
    %33 = vector.extract_strided_slice %32 {offsets = [0, 0], sizes = [17, 16], strides = [1, 1]} : vector<17x192xbf16> to vector<17x16xbf16>
    %34 = vector.extract_strided_slice %32 {offsets = [0, 64], sizes = [17, 16], strides = [1, 1]} : vector<17x192xbf16> to vector<17x16xbf16>
    %35 = vector.extract_strided_slice %32 {offsets = [0, 128], sizes = [17, 16], strides = [1, 1]} : vector<17x192xbf16> to vector<17x16xbf16>
    %36 = tpu.transpose %34, [1, 0] : vector<17x16xbf16> -> vector<16x17xbf16>
    %cst_15 = arith.constant dense<0.000000e+00> : vector<17x17xf32>
    %37 = tpu.matmul %33, %36, %cst_15 {dimension_numbers = #tpu.dot_dimension_numbers<[1], [0], [0], [1], [0, 0, 1, 1], [], []>} : vector<17x16xbf16>, vector<16x17xbf16>, vector<17x17xf32> -> vector<17x17xf32>
    %cst_16 = arith.constant 2.500000e-01 : f32
    %38 = vector.broadcast %cst_16 : f32 to vector<17x17xf32>
    %39 = arith.mulf %37, %38 : vector<17x17xf32>
    %cst_17 = arith.constant dense<0xFF800000> : vector<17xf32>
    %40 = vector.multi_reduction <maximumf>, %39, %cst_17 [1] : vector<17x17xf32> to vector<17xf32>
    %41 = vector.shape_cast %40 : vector<17xf32> to vector<17x1xf32>
    %42 = vector.broadcast %41 : vector<17x1xf32> to vector<17x17xf32>
    %43 = arith.subf %39, %42 : vector<17x17xf32>
    %44 = math.exp %43 : vector<17x17xf32>
    %cst_18 = arith.constant dense<0.000000e+00> : vector<17xf32>
    %45 = vector.multi_reduction <add>, %44, %cst_18 [1] : vector<17x17xf32> to vector<17xf32>
    %46 = vector.shape_cast %45 : vector<17xf32> to vector<17x1xf32>
    %47 = tpu.reciprocal %46 {approx = true} : vector<17x1xf32> -> vector<17x1xf32>
    %48 = vector.broadcast %47 : vector<17x1xf32> to vector<17x17xf32>
    %49 = arith.mulf %44, %48 : vector<17x17xf32>
    %50 = arith.truncf %49 : vector<17x17xf32> to vector<17x17xbf16>
    %cst_19 = arith.constant dense<0.000000e+00> : vector<17x16xf32>
    %51 = tpu.matmul %50, %35, %cst_19 {dimension_numbers = #tpu.dot_dimension_numbers<[1], [0], [0], [1], [0, 0, 1, 1], [], []>} : vector<17x17xbf16>, vector<17x16xbf16>, vector<17x16xf32> -> vector<17x16xf32>
    %52 = vector.extract_strided_slice %32 {offsets = [0, 16], sizes = [17, 16], strides = [1, 1]} : vector<17x192xbf16> to vector<17x16xbf16>
    %53 = vector.extract_strided_slice %32 {offsets = [0, 80], sizes = [17, 16], strides = [1, 1]} : vector<17x192xbf16> to vector<17x16xbf16>
    %54 = vector.extract_strided_slice %32 {offsets = [0, 144], sizes = [17, 16], strides = [1, 1]} : vector<17x192xbf16> to vector<17x16xbf16>
    %55 = tpu.transpose %53, [1, 0] : vector<17x16xbf16> -> vector<16x17xbf16>
    %cst_20 = arith.constant dense<0.000000e+00> : vector<17x17xf32>
    %56 = tpu.matmul %52, %55, %cst_20 {dimension_numbers = #tpu.dot_dimension_numbers<[1], [0], [0], [1], [0, 0, 1, 1], [], []>} : vector<17x16xbf16>, vector<16x17xbf16>, vector<17x17xf32> -> vector<17x17xf32>
    %cst_21 = arith.constant 2.500000e-01 : f32
    %57 = vector.broadcast %cst_21 : f32 to vector<17x17xf32>
    %58 = arith.mulf %56, %57 : vector<17x17xf32>
    %cst_22 = arith.constant dense<0xFF800000> : vector<17xf32>
    %59 = vector.multi_reduction <maximumf>, %58, %cst_22 [1] : vector<17x17xf32> to vector<17xf32>
    %60 = vector.shape_cast %59 : vector<17xf32> to vector<17x1xf32>
    %61 = vector.broadcast %60 : vector<17x1xf32> to vector<17x17xf32>
    %62 = arith.subf %58, %61 : vector<17x17xf32>
    %63 = math.exp %62 : vector<17x17xf32>
    %cst_23 = arith.constant dense<0.000000e+00> : vector<17xf32>
    %64 = vector.multi_reduction <add>, %63, %cst_23 [1] : vector<17x17xf32> to vector<17xf32>
    %65 = vector.shape_cast %64 : vector<17xf32> to vector<17x1xf32>
    %66 = tpu.reciprocal %65 {approx = true} : vector<17x1xf32> -> vector<17x1xf32>
    %67 = vector.broadcast %66 : vector<17x1xf32> to vector<17x17xf32>
    %68 = arith.mulf %63, %67 : vector<17x17xf32>
    %69 = arith.truncf %68 : vector<17x17xf32> to vector<17x17xbf16>
    %cst_24 = arith.constant dense<0.000000e+00> : vector<17x16xf32>
    %70 = tpu.matmul %69, %54, %cst_24 {dimension_numbers = #tpu.dot_dimension_numbers<[1], [0], [0], [1], [0, 0, 1, 1], [], []>} : vector<17x17xbf16>, vector<17x16xbf16>, vector<17x16xf32> -> vector<17x16xf32>
    %71 = vector.extract_strided_slice %32 {offsets = [0, 32], sizes = [17, 16], strides = [1, 1]} : vector<17x192xbf16> to vector<17x16xbf16>
    %72 = vector.extract_strided_slice %32 {offsets = [0, 96], sizes = [17, 16], strides = [1, 1]} : vector<17x192xbf16> to vector<17x16xbf16>
    %73 = vector.extract_strided_slice %32 {offsets = [0, 160], sizes = [17, 16], strides = [1, 1]} : vector<17x192xbf16> to vector<17x16xbf16>
    %74 = tpu.transpose %72, [1, 0] : vector<17x16xbf16> -> vector<16x17xbf16>
    %cst_25 = arith.constant dense<0.000000e+00> : vector<17x17xf32>
    %75 = tpu.matmul %71, %74, %cst_25 {dimension_numbers = #tpu.dot_dimension_numbers<[1], [0], [0], [1], [0, 0, 1, 1], [], []>} : vector<17x16xbf16>, vector<16x17xbf16>, vector<17x17xf32> -> vector<17x17xf32>
    %cst_26 = arith.constant 2.500000e-01 : f32
    %76 = vector.broadcast %cst_26 : f32 to vector<17x17xf32>
    %77 = arith.mulf %75, %76 : vector<17x17xf32>
    %cst_27 = arith.constant dense<0xFF800000> : vector<17xf32>
    %78 = vector.multi_reduction <maximumf>, %77, %cst_27 [1] : vector<17x17xf32> to vector<17xf32>
    %79 = vector.shape_cast %78 : vector<17xf32> to vector<17x1xf32>
    %80 = vector.broadcast %79 : vector<17x1xf32> to vector<17x17xf32>
    %81 = arith.subf %77, %80 : vector<17x17xf32>
    %82 = math.exp %81 : vector<17x17xf32>
    %cst_28 = arith.constant dense<0.000000e+00> : vector<17xf32>
    %83 = vector.multi_reduction <add>, %82, %cst_28 [1] : vector<17x17xf32> to vector<17xf32>
    %84 = vector.shape_cast %83 : vector<17xf32> to vector<17x1xf32>
    %85 = tpu.reciprocal %84 {approx = true} : vector<17x1xf32> -> vector<17x1xf32>
    %86 = vector.broadcast %85 : vector<17x1xf32> to vector<17x17xf32>
    %87 = arith.mulf %82, %86 : vector<17x17xf32>
    %88 = arith.truncf %87 : vector<17x17xf32> to vector<17x17xbf16>
    %cst_29 = arith.constant dense<0.000000e+00> : vector<17x16xf32>
    %89 = tpu.matmul %88, %73, %cst_29 {dimension_numbers = #tpu.dot_dimension_numbers<[1], [0], [0], [1], [0, 0, 1, 1], [], []>} : vector<17x17xbf16>, vector<17x16xbf16>, vector<17x16xf32> -> vector<17x16xf32>
    %90 = vector.extract_strided_slice %32 {offsets = [0, 48], sizes = [17, 16], strides = [1, 1]} : vector<17x192xbf16> to vector<17x16xbf16>
    %91 = vector.extract_strided_slice %32 {offsets = [0, 112], sizes = [17, 16], strides = [1, 1]} : vector<17x192xbf16> to vector<17x16xbf16>
    %92 = vector.extract_strided_slice %32 {offsets = [0, 176], sizes = [17, 16], strides = [1, 1]} : vector<17x192xbf16> to vector<17x16xbf16>
    %93 = tpu.transpose %91, [1, 0] : vector<17x16xbf16> -> vector<16x17xbf16>
    %cst_30 = arith.constant dense<0.000000e+00> : vector<17x17xf32>
    %94 = tpu.matmul %90, %93, %cst_30 {dimension_numbers = #tpu.dot_dimension_numbers<[1], [0], [0], [1], [0, 0, 1, 1], [], []>} : vector<17x16xbf16>, vector<16x17xbf16>, vector<17x17xf32> -> vector<17x17xf32>
    %cst_31 = arith.constant 2.500000e-01 : f32
    %95 = vector.broadcast %cst_31 : f32 to vector<17x17xf32>
    %96 = arith.mulf %94, %95 : vector<17x17xf32>
    %cst_32 = arith.constant dense<0xFF800000> : vector<17xf32>
    %97 = vector.multi_reduction <maximumf>, %96, %cst_32 [1] : vector<17x17xf32> to vector<17xf32>
    %98 = vector.shape_cast %97 : vector<17xf32> to vector<17x1xf32>
    %99 = vector.broadcast %98 : vector<17x1xf32> to vector<17x17xf32>
    %100 = arith.subf %96, %99 : vector<17x17xf32>
    %101 = math.exp %100 : vector<17x17xf32>
    %cst_33 = arith.constant dense<0.000000e+00> : vector<17xf32>
    %102 = vector.multi_reduction <add>, %101, %cst_33 [1] : vector<17x17xf32> to vector<17xf32>
    %103 = vector.shape_cast %102 : vector<17xf32> to vector<17x1xf32>
    %104 = tpu.reciprocal %103 {approx = true} : vector<17x1xf32> -> vector<17x1xf32>
    %105 = vector.broadcast %104 : vector<17x1xf32> to vector<17x17xf32>
    %106 = arith.mulf %101, %105 : vector<17x17xf32>
    %107 = arith.truncf %106 : vector<17x17xf32> to vector<17x17xbf16>
    %cst_34 = arith.constant dense<0.000000e+00> : vector<17x16xf32>
    %108 = tpu.matmul %107, %92, %cst_34 {dimension_numbers = #tpu.dot_dimension_numbers<[1], [0], [0], [1], [0, 0, 1, 1], [], []>} : vector<17x17xbf16>, vector<17x16xbf16>, vector<17x16xf32> -> vector<17x16xf32>
    %109 = tpu.concatenate %51, %70, %89, %108 in 1 : vector<17x16xf32>, vector<17x16xf32>, vector<17x16xf32>, vector<17x16xf32> -> vector<17x64xf32>
    %110 = arith.truncf %109 : vector<17x64xf32> to vector<17x64xbf16>
    %c0_35 = arith.constant 0 : index
    %c0_36 = arith.constant 0 : index
    %111 = vector.load %arg6[%c0_35, %c0_36] : memref<64x64xbf16, #tpu.memory_space<vmem>>, vector<64x64xbf16>
    %cst_37 = arith.constant dense<0.000000e+00> : vector<17x64xf32>
    %112 = tpu.matmul %110, %111, %cst_37 {dimension_numbers = #tpu.dot_dimension_numbers<[1], [0], [0], [1], [0, 0, 1, 1], [], []>} : vector<17x64xbf16>, vector<64x64xbf16>, vector<17x64xf32> -> vector<17x64xf32>
    %113 = arith.addf %1, %112 : vector<17x64xf32>
    %c0_38 = arith.constant 0 : index
    %c0_39 = arith.constant 0 : index
    %114 = vector.load %arg7[%c0_38, %c0_39] : memref<1x64xf32, #tpu.memory_space<vmem>>, vector<1x64xf32>
    %115 = vector.broadcast %114 : vector<1x64xf32> to vector<17x64xf32>
    %116 = arith.addf %113, %115 : vector<17x64xf32>
    %cst_40 = arith.constant dense<0.000000e+00> : vector<17xf32>
    %117 = vector.multi_reduction <add>, %116, %cst_40 [1] : vector<17x64xf32> to vector<17xf32>
    %118 = vector.shape_cast %117 : vector<17xf32> to vector<17x1xf32>
    %cst_41 = arith.constant 6.400000e+01 : f32
    %119 = vector.broadcast %cst_41 : f32 to vector<17x1xf32>
    %120 = arith.divf %118, %119 : vector<17x1xf32>
    %121 = vector.broadcast %120 : vector<17x1xf32> to vector<17x64xf32>
    %122 = arith.subf %116, %121 : vector<17x64xf32>
    %123 = arith.mulf %122, %122 : vector<17x64xf32>
    %cst_42 = arith.constant dense<0.000000e+00> : vector<17xf32>
    %124 = vector.multi_reduction <add>, %123, %cst_42 [1] : vector<17x64xf32> to vector<17xf32>
    %125 = vector.shape_cast %124 : vector<17xf32> to vector<17x1xf32>
    %cst_43 = arith.constant 6.400000e+01 : f32
    %126 = vector.broadcast %cst_43 : f32 to vector<17x1xf32>
    %127 = arith.divf %125, %126 : vector<17x1xf32>
    %128 = vector.broadcast %120 : vector<17x1xf32> to vector<17x64xf32>
    %129 = arith.subf %116, %128 : vector<17x64xf32>
    %cst_44 = arith.constant 9.99999974E-6 : f32
    %130 = vector.broadcast %cst_44 : f32 to vector<17x1xf32>
    %131 = arith.addf %127, %130 : vector<17x1xf32>
    %132 = math.rsqrt %131 : vector<17x1xf32>
    %133 = vector.broadcast %132 : vector<17x1xf32> to vector<17x64xf32>
    %134 = arith.mulf %129, %133 : vector<17x64xf32>
    %c0_45 = arith.constant 0 : index
    %c0_46 = arith.constant 0 : index
    %135 = vector.load %arg8[%c0_45, %c0_46] : memref<1x64xf32, #tpu.memory_space<vmem>>, vector<1x64xf32>
    %136 = vector.broadcast %135 : vector<1x64xf32> to vector<17x64xf32>
    %137 = arith.mulf %134, %136 : vector<17x64xf32>
    %c0_47 = arith.constant 0 : index
    %c0_48 = arith.constant 0 : index
    %138 = vector.load %arg9[%c0_47, %c0_48] : memref<1x64xf32, #tpu.memory_space<vmem>>, vector<1x64xf32>
    %139 = vector.broadcast %138 : vector<1x64xf32> to vector<17x64xf32>
    %140 = arith.addf %137, %139 : vector<17x64xf32>
    %141 = arith.truncf %140 : vector<17x64xf32> to vector<17x64xbf16>
    %c0_49 = arith.constant 0 : index
    %c0_50 = arith.constant 0 : index
    %142 = vector.load %arg10[%c0_49, %c0_50] : memref<64x128xbf16, #tpu.memory_space<vmem>>, vector<64x128xbf16>
    %cst_51 = arith.constant dense<0.000000e+00> : vector<17x128xf32>
    %143 = tpu.matmul %141, %142, %cst_51 {dimension_numbers = #tpu.dot_dimension_numbers<[1], [0], [0], [1], [0, 0, 1, 1], [], []>} : vector<17x64xbf16>, vector<64x128xbf16>, vector<17x128xf32> -> vector<17x128xf32>
    %c0_52 = arith.constant 0 : index
    %c0_53 = arith.constant 0 : index
    %144 = vector.load %arg11[%c0_52, %c0_53] : memref<1x128xf32, #tpu.memory_space<vmem>>, vector<1x128xf32>
    %145 = vector.broadcast %144 : vector<1x128xf32> to vector<17x128xf32>
    %146 = arith.addf %143, %145 : vector<17x128xf32>
    %cst_54 = arith.constant 5.000000e-01 : f32
    %147 = vector.broadcast %cst_54 : f32 to vector<17x128xf32>
    %148 = arith.mulf %147, %146 : vector<17x128xf32>
    %cst_55 = arith.constant 2.000000e+00 : f32
    %149 = math.sqrt %cst_55 : f32
    %150 = vector.broadcast %149 : f32 to vector<17x128xf32>
    %151 = arith.divf %146, %150 : vector<17x128xf32>
    %152 = math.erf %151 : vector<17x128xf32>
    %cst_56 = arith.constant 1.000000e+00 : f32
    %153 = vector.broadcast %cst_56 : f32 to vector<17x128xf32>
    %154 = arith.addf %153, %152 : vector<17x128xf32>
    %155 = arith.mulf %148, %154 : vector<17x128xf32>
    %156 = arith.truncf %155 : vector<17x128xf32> to vector<17x128xbf16>
    %c0_57 = arith.constant 0 : index
    %c0_58 = arith.constant 0 : index
    %157 = vector.load %arg12[%c0_57, %c0_58] : memref<128x64xbf16, #tpu.memory_space<vmem>>, vector<128x64xbf16>
    %cst_59 = arith.constant dense<0.000000e+00> : vector<17x64xf32>
    %158 = tpu.matmul %156, %157, %cst_59 {dimension_numbers = #tpu.dot_dimension_numbers<[1], [0], [0], [1], [0, 0, 1, 1], [], []>} : vector<17x128xbf16>, vector<128x64xbf16>, vector<17x64xf32> -> vector<17x64xf32>
    %159 = arith.addf %116, %158 : vector<17x64xf32>
    %c0_60 = arith.constant 0 : index
    %c0_61 = arith.constant 0 : index
    %160 = vector.load %arg13[%c0_60, %c0_61] : memref<1x64xf32, #tpu.memory_space<vmem>>, vector<1x64xf32>
    %161 = vector.broadcast %160 : vector<1x64xf32> to vector<17x64xf32>
    %162 = arith.addf %159, %161 : vector<17x64xf32>
    %c0_62 = arith.constant 0 : index
    %c0_63 = arith.constant 0 : index
    %c0_64 = arith.constant 0 : index
    %163 = vector.load %arg14[%c0_62, %c0_63, %c0_64] : memref<1x17x64xf32, #tpu.memory_space<vmem>>, vector<1x17x64xf32>
    %164 = vector.shape_cast %163 : vector<1x17x64xf32> to vector<17x64xf32>
    %165 = vector.shape_cast %162 : vector<17x64xf32> to vector<1x17x64xf32>
    tpu.vector_store %arg14[%c0_62, %c0_63, %c0_64], %165 {strides = array<i32>} : memref<1x17x64xf32, #tpu.memory_space<vmem>>, vector<1x17x64xf32>,
    return
  }
  func.func @transform_0(%arg0: i32) -> (i32, i32, i32) {
    %c0_i32 = arith.constant 0 : i32
    %c0_i32_0 = arith.constant 0 : i32
    %c0_i32_1 = arith.constant 0 : i32
    return %arg0, %c0_i32, %c0_i32_0 : i32, i32, i32
  }
  func.func @transform_1(%arg0: i32) -> (i32, i32) {
    %c0_i32 = arith.constant 0 : i32
    %c0_i32_0 = arith.constant 0 : i32
    %c0_i32_1 = arith.constant 0 : i32
    return %c0_i32, %c0_i32_0 : i32, i32
  }
  func.func @transform_2(%arg0: i32) -> (i32, i32) {
    %c0_i32 = arith.constant 0 : i32
    %c0_i32_0 = arith.constant 0 : i32
    %c0_i32_1 = arith.constant 0 : i32
    return %c0_i32, %c0_i32_0 : i32, i32
  }
  func.func @transform_3(%arg0: i32) -> (i32, i32) {
    %c0_i32 = arith.constant 0 : i32
    %c0_i32_0 = arith.constant 0 : i32
    %c0_i32_1 = arith.constant 0 : i32
    return %c0_i32, %c0_i32_0 : i32, i32
  }
  func.func @transform_4(%arg0: i32) -> (i32, i32) {
    %c0_i32 = arith.constant 0 : i32
    %c0_i32_0 = arith.constant 0 : i32
    %c0_i32_1 = arith.constant 0 : i32
    return %c0_i32, %c0_i32_0 : i32, i32
  }
  func.func @transform_5(%arg0: i32) -> (i32, i32) {
    %c0_i32 = arith.constant 0 : i32
    %c0_i32_0 = arith.constant 0 : i32
    %c0_i32_1 = arith.constant 0 : i32
    return %c0_i32, %c0_i32_0 : i32, i32
  }
  func.func @transform_6(%arg0: i32) -> (i32, i32) {
    %c0_i32 = arith.constant 0 : i32
    %c0_i32_0 = arith.constant 0 : i32
    %c0_i32_1 = arith.constant 0 : i32
    return %c0_i32, %c0_i32_0 : i32, i32
  }
  func.func @transform_7(%arg0: i32) -> (i32, i32) {
    %c0_i32 = arith.constant 0 : i32
    %c0_i32_0 = arith.constant 0 : i32
    %c0_i32_1 = arith.constant 0 : i32
    return %c0_i32, %c0_i32_0 : i32, i32
  }
  func.func @transform_8(%arg0: i32) -> (i32, i32) {
    %c0_i32 = arith.constant 0 : i32
    %c0_i32_0 = arith.constant 0 : i32
    %c0_i32_1 = arith.constant 0 : i32
    return %c0_i32, %c0_i32_0 : i32, i32
  }
  func.func @transform_9(%arg0: i32) -> (i32, i32) {
    %c0_i32 = arith.constant 0 : i32
    %c0_i32_0 = arith.constant 0 : i32
    %c0_i32_1 = arith.constant 0 : i32
    return %c0_i32, %c0_i32_0 : i32, i32
  }
  func.func @transform_10(%arg0: i32) -> (i32, i32) {
    %c0_i32 = arith.constant 0 : i32
    %c0_i32_0 = arith.constant 0 : i32
    %c0_i32_1 = arith.constant 0 : i32
    return %c0_i32, %c0_i32_0 : i32, i32
  }
  func.func @transform_11(%arg0: i32) -> (i32, i32) {
    %c0_i32 = arith.constant 0 : i32
    %c0_i32_0 = arith.constant 0 : i32
    %c0_i32_1 = arith.constant 0 : i32
    return %c0_i32, %c0_i32_0 : i32, i32
  }
  func.func @transform_12(%arg0: i32) -> (i32, i32) {
    %c0_i32 = arith.constant 0 : i32
    %c0_i32_0 = arith.constant 0 : i32
    %c0_i32_1 = arith.constant 0 : i32
    return %c0_i32, %c0_i32_0 : i32, i32
  }
  func.func @transform_13(%arg0: i32) -> (i32, i32, i32) {
    %c0_i32 = arith.constant 0 : i32
    %c0_i32_0 = arith.constant 0 : i32
    %c0_i32_1 = arith.constant 0 : i32
    return %arg0, %c0_i32, %c0_i32_0 : i32, i32, i32
  }
}

module attributes {stable_mosaic.version = 11 : i64} {
  func.func @kernel(%arg0: i32, %arg1: memref<2x64xf32, #tpu.memory_space<vmem>>, %arg2: memref<1x64xf32, #tpu.memory_space<vmem>>, %arg3: memref<1x64xf32, #tpu.memory_space<vmem>>, %arg4: memref<64x32xbf16, #tpu.memory_space<vmem>>, %arg5: memref<1x32xf32, #tpu.memory_space<vmem>>, %arg6: memref<32x16xbf16, #tpu.memory_space<vmem>>, %arg7: memref<1x16xf32, #tpu.memory_space<vmem>>, %arg8: memref<16x10xbf16, #tpu.memory_space<vmem>>, %arg9: memref<1x10xf32, #tpu.memory_space<vmem>>, %arg10: memref<1x1xf32, #tpu.memory_space<vmem>>, %arg11: memref<2x10xf32, #tpu.memory_space<vmem>>) attributes {dimension_semantics = [#tpu.dimension_semantics<arbitrary>], iteration_bounds = array<i64: 1>, scalar_prefetch = 0 : i64, scratch_operands = 0 : i64, tpu.core_type = #tpu.core_type<tc>, window_params = [{pipeline_mode = #tpu.pipeline_mode<synchronous>, transform_indices = @transform_0, window_bounds = array<i64: 2, 64>}, {pipeline_mode = #tpu.pipeline_mode<synchronous>, transform_indices = @transform_1, window_bounds = array<i64: 1, 64>}, {pipeline_mode = #tpu.pipeline_mode<synchronous>, transform_indices = @transform_2, window_bounds = array<i64: 1, 64>}, {pipeline_mode = #tpu.pipeline_mode<synchronous>, transform_indices = @transform_3, window_bounds = array<i64: 64, 32>}, {pipeline_mode = #tpu.pipeline_mode<synchronous>, transform_indices = @transform_4, window_bounds = array<i64: 1, 32>}, {pipeline_mode = #tpu.pipeline_mode<synchronous>, transform_indices = @transform_5, window_bounds = array<i64: 32, 16>}, {pipeline_mode = #tpu.pipeline_mode<synchronous>, transform_indices = @transform_6, window_bounds = array<i64: 1, 16>}, {pipeline_mode = #tpu.pipeline_mode<synchronous>, transform_indices = @transform_7, window_bounds = array<i64: 16, 10>}, {pipeline_mode = #tpu.pipeline_mode<synchronous>, transform_indices = @transform_8, window_bounds = array<i64: 1, 10>}, {pipeline_mode = #tpu.pipeline_mode<synchronous>, transform_indices = @transform_9, window_bounds = array<i64: 1, 1>}, {pipeline_mode = #tpu.pipeline_mode<synchronous>, transform_indices = @transform_10, window_bounds = array<i64: 2, 10>}]} {
    %c0 = arith.constant 0 : index
    %c0_0 = arith.constant 0 : index
    %0 = vector.load %arg1[%c0, %c0_0] : memref<2x64xf32, #tpu.memory_space<vmem>>, vector<2x64xf32>
    %cst = arith.constant dense<0.000000e+00> : vector<2xf32>
    %1 = vector.multi_reduction <add>, %0, %cst [1] : vector<2x64xf32> to vector<2xf32>
    %2 = vector.shape_cast %1 : vector<2xf32> to vector<2x1xf32>
    %cst_1 = arith.constant 6.400000e+01 : f32
    %3 = vector.broadcast %cst_1 : f32 to vector<2x1xf32>
    %4 = arith.divf %2, %3 : vector<2x1xf32>
    %5 = vector.broadcast %4 : vector<2x1xf32> to vector<2x64xf32>
    %6 = arith.subf %0, %5 : vector<2x64xf32>
    %7 = arith.mulf %6, %6 : vector<2x64xf32>
    %cst_2 = arith.constant dense<0.000000e+00> : vector<2xf32>
    %8 = vector.multi_reduction <add>, %7, %cst_2 [1] : vector<2x64xf32> to vector<2xf32>
    %9 = vector.shape_cast %8 : vector<2xf32> to vector<2x1xf32>
    %cst_3 = arith.constant 6.400000e+01 : f32
    %10 = vector.broadcast %cst_3 : f32 to vector<2x1xf32>
    %11 = arith.divf %9, %10 : vector<2x1xf32>
    %12 = vector.broadcast %4 : vector<2x1xf32> to vector<2x64xf32>
    %13 = arith.subf %0, %12 : vector<2x64xf32>
    %cst_4 = arith.constant 9.99999974E-6 : f32
    %14 = vector.broadcast %cst_4 : f32 to vector<2x1xf32>
    %15 = arith.addf %11, %14 : vector<2x1xf32>
    %16 = math.rsqrt %15 : vector<2x1xf32>
    %17 = vector.broadcast %16 : vector<2x1xf32> to vector<2x64xf32>
    %18 = arith.mulf %13, %17 : vector<2x64xf32>
    %c0_5 = arith.constant 0 : index
    %c0_6 = arith.constant 0 : index
    %19 = vector.load %arg2[%c0_5, %c0_6] : memref<1x64xf32, #tpu.memory_space<vmem>>, vector<1x64xf32>
    %20 = vector.broadcast %19 : vector<1x64xf32> to vector<2x64xf32>
    %21 = arith.mulf %18, %20 : vector<2x64xf32>
    %c0_7 = arith.constant 0 : index
    %c0_8 = arith.constant 0 : index
    %22 = vector.load %arg3[%c0_7, %c0_8] : memref<1x64xf32, #tpu.memory_space<vmem>>, vector<1x64xf32>
    %23 = vector.broadcast %22 : vector<1x64xf32> to vector<2x64xf32>
    %24 = arith.addf %21, %23 : vector<2x64xf32>
    %25 = arith.truncf %24 : vector<2x64xf32> to vector<2x64xbf16>
    %c0_9 = arith.constant 0 : index
    %c0_10 = arith.constant 0 : index
    %26 = vector.load %arg4[%c0_9, %c0_10] : memref<64x32xbf16, #tpu.memory_space<vmem>>, vector<64x32xbf16>
    %cst_11 = arith.constant dense<0.000000e+00> : vector<2x32xf32>
    %27 = tpu.matmul %25, %26, %cst_11 {dimension_numbers = #tpu.dot_dimension_numbers<[1], [0], [0], [1], [0, 0, 1, 1], [], []>} : vector<2x64xbf16>, vector<64x32xbf16>, vector<2x32xf32> -> vector<2x32xf32>
    %c0_12 = arith.constant 0 : index
    %c0_13 = arith.constant 0 : index
    %28 = vector.load %arg5[%c0_12, %c0_13] : memref<1x32xf32, #tpu.memory_space<vmem>>, vector<1x32xf32>
    %29 = vector.broadcast %28 : vector<1x32xf32> to vector<2x32xf32>
    %30 = arith.addf %27, %29 : vector<2x32xf32>
    %cst_14 = arith.constant 5.000000e-01 : f32
    %31 = vector.broadcast %cst_14 : f32 to vector<2x32xf32>
    %32 = arith.mulf %31, %30 : vector<2x32xf32>
    %cst_15 = arith.constant 2.000000e+00 : f32
    %33 = math.sqrt %cst_15 : f32
    %34 = vector.broadcast %33 : f32 to vector<2x32xf32>
    %35 = arith.divf %30, %34 : vector<2x32xf32>
    %36 = math.erf %35 : vector<2x32xf32>
    %cst_16 = arith.constant 1.000000e+00 : f32
    %37 = vector.broadcast %cst_16 : f32 to vector<2x32xf32>
    %38 = arith.addf %37, %36 : vector<2x32xf32>
    %39 = arith.mulf %32, %38 : vector<2x32xf32>
    %40 = arith.truncf %39 : vector<2x32xf32> to vector<2x32xbf16>
    %c0_17 = arith.constant 0 : index
    %c0_18 = arith.constant 0 : index
    %41 = vector.load %arg6[%c0_17, %c0_18] : memref<32x16xbf16, #tpu.memory_space<vmem>>, vector<32x16xbf16>
    %cst_19 = arith.constant dense<0.000000e+00> : vector<2x16xf32>
    %42 = tpu.matmul %40, %41, %cst_19 {dimension_numbers = #tpu.dot_dimension_numbers<[1], [0], [0], [1], [0, 0, 1, 1], [], []>} : vector<2x32xbf16>, vector<32x16xbf16>, vector<2x16xf32> -> vector<2x16xf32>
    %c0_20 = arith.constant 0 : index
    %c0_21 = arith.constant 0 : index
    %43 = vector.load %arg7[%c0_20, %c0_21] : memref<1x16xf32, #tpu.memory_space<vmem>>, vector<1x16xf32>
    %44 = vector.broadcast %43 : vector<1x16xf32> to vector<2x16xf32>
    %45 = arith.addf %42, %44 : vector<2x16xf32>
    %cst_22 = arith.constant 5.000000e-01 : f32
    %46 = vector.broadcast %cst_22 : f32 to vector<2x16xf32>
    %47 = arith.mulf %46, %45 : vector<2x16xf32>
    %cst_23 = arith.constant 2.000000e+00 : f32
    %48 = math.sqrt %cst_23 : f32
    %49 = vector.broadcast %48 : f32 to vector<2x16xf32>
    %50 = arith.divf %45, %49 : vector<2x16xf32>
    %51 = math.erf %50 : vector<2x16xf32>
    %cst_24 = arith.constant 1.000000e+00 : f32
    %52 = vector.broadcast %cst_24 : f32 to vector<2x16xf32>
    %53 = arith.addf %52, %51 : vector<2x16xf32>
    %54 = arith.mulf %47, %53 : vector<2x16xf32>
    %55 = arith.truncf %54 : vector<2x16xf32> to vector<2x16xbf16>
    %c0_25 = arith.constant 0 : index
    %c0_26 = arith.constant 0 : index
    %56 = vector.load %arg8[%c0_25, %c0_26] : memref<16x10xbf16, #tpu.memory_space<vmem>>, vector<16x10xbf16>
    %cst_27 = arith.constant dense<0.000000e+00> : vector<2x10xf32>
    %57 = tpu.matmul %55, %56, %cst_27 {dimension_numbers = #tpu.dot_dimension_numbers<[1], [0], [0], [1], [0, 0, 1, 1], [], []>} : vector<2x16xbf16>, vector<16x10xbf16>, vector<2x10xf32> -> vector<2x10xf32>
    %c0_28 = arith.constant 0 : index
    %c0_29 = arith.constant 0 : index
    %58 = vector.load %arg9[%c0_28, %c0_29] : memref<1x10xf32, #tpu.memory_space<vmem>>, vector<1x10xf32>
    %59 = vector.broadcast %58 : vector<1x10xf32> to vector<2x10xf32>
    %60 = arith.addf %57, %59 : vector<2x10xf32>
    %c0_30 = arith.constant 0 : index
    %c0_31 = arith.constant 0 : index
    %61 = vector.load %arg10[%c0_30, %c0_31] : memref<1x1xf32, #tpu.memory_space<vmem>>, vector<1x1xf32>
    %62 = vector.broadcast %61 : vector<1x1xf32> to vector<2x10xf32>
    %63 = arith.divf %60, %62 : vector<2x10xf32>
    %c0_32 = arith.constant 0 : index
    %c0_33 = arith.constant 0 : index
    %64 = vector.load %arg11[%c0_32, %c0_33] : memref<2x10xf32, #tpu.memory_space<vmem>>, vector<2x10xf32>
    tpu.vector_store %arg11[%c0_32, %c0_33], %63 {strides = array<i32>} : memref<2x10xf32, #tpu.memory_space<vmem>>, vector<2x10xf32>,
    return
  }
  func.func @transform_0(%arg0: i32) -> (i32, i32) {
    %c0_i32 = arith.constant 0 : i32
    %c0_i32_0 = arith.constant 0 : i32
    %c0_i32_1 = arith.constant 0 : i32
    return %c0_i32, %c0_i32_0 : i32, i32
  }
  func.func @transform_1(%arg0: i32) -> (i32, i32) {
    %c0_i32 = arith.constant 0 : i32
    %c0_i32_0 = arith.constant 0 : i32
    %c0_i32_1 = arith.constant 0 : i32
    return %c0_i32, %c0_i32_0 : i32, i32
  }
  func.func @transform_2(%arg0: i32) -> (i32, i32) {
    %c0_i32 = arith.constant 0 : i32
    %c0_i32_0 = arith.constant 0 : i32
    %c0_i32_1 = arith.constant 0 : i32
    return %c0_i32, %c0_i32_0 : i32, i32
  }
  func.func @transform_3(%arg0: i32) -> (i32, i32) {
    %c0_i32 = arith.constant 0 : i32
    %c0_i32_0 = arith.constant 0 : i32
    %c0_i32_1 = arith.constant 0 : i32
    return %c0_i32, %c0_i32_0 : i32, i32
  }
  func.func @transform_4(%arg0: i32) -> (i32, i32) {
    %c0_i32 = arith.constant 0 : i32
    %c0_i32_0 = arith.constant 0 : i32
    %c0_i32_1 = arith.constant 0 : i32
    return %c0_i32, %c0_i32_0 : i32, i32
  }
  func.func @transform_5(%arg0: i32) -> (i32, i32) {
    %c0_i32 = arith.constant 0 : i32
    %c0_i32_0 = arith.constant 0 : i32
    %c0_i32_1 = arith.constant 0 : i32
    return %c0_i32, %c0_i32_0 : i32, i32
  }
  func.func @transform_6(%arg0: i32) -> (i32, i32) {
    %c0_i32 = arith.constant 0 : i32
    %c0_i32_0 = arith.constant 0 : i32
    %c0_i32_1 = arith.constant 0 : i32
    return %c0_i32, %c0_i32_0 : i32, i32
  }
  func.func @transform_7(%arg0: i32) -> (i32, i32) {
    %c0_i32 = arith.constant 0 : i32
    %c0_i32_0 = arith.constant 0 : i32
    %c0_i32_1 = arith.constant 0 : i32
    return %c0_i32, %c0_i32_0 : i32, i32
  }
  func.func @transform_8(%arg0: i32) -> (i32, i32) {
    %c0_i32 = arith.constant 0 : i32
    %c0_i32_0 = arith.constant 0 : i32
    %c0_i32_1 = arith.constant 0 : i32
    return %c0_i32, %c0_i32_0 : i32, i32
  }
  func.func @transform_9(%arg0: i32) -> (i32, i32) {
    %c0_i32 = arith.constant 0 : i32
    %c0_i32_0 = arith.constant 0 : i32
    %c0_i32_1 = arith.constant 0 : i32
    return %c0_i32, %c0_i32_0 : i32, i32
  }
  func.func @transform_10(%arg0: i32) -> (i32, i32) {
    %c0_i32 = arith.constant 0 : i32
    %c0_i32_0 = arith.constant 0 : i32
    %c0_i32_1 = arith.constant 0 : i32
    return %c0_i32, %c0_i32_0 : i32, i32
  }
}

</mosaic_0001>

<bundles_post_ra>
// kernel: _lambda_.7
= control target key start
LH: loop header
LB: loop body
LE: loop exit
PB: predicated region body
PF: predicated region fallthrough
CT: control target
= control target key end

     0   :  { %s2683_s12 = smov 0   ;;  %s4522_s0 = inlined_call_operand.vmem [shape: f32[512,9], index: 0, kind: input, shape index: {}]   ;;  %s4523_s1 = inlined_call_operand.vmem [shape: f32[9,64], index: 1, kind: input, shape index: {}]   ;;  %s4524_s2 = inlined_call_operand.vmem [shape: f32[1,64], index: 2, kind: input, shape index: {}]   ;;  %s4525_s3 = inlined_call_operand.vmem [shape: bf16[512,64], index: 3, kind: output, shape index: {}]  }
   0x1 LB: > { %s2428_s13 = sadd.s32 4294967295, %s2652_s12   ;;  %p2432_p0 = scmp.ge.s32.totalorder %s2652_s12, 1  ;;  %s2652_s12 = sphi %s2683_s12, %s13_s12  }
   0x2   : > { %p138_p1 = scmp.lt.s32.totalorder %s2652_s12, 3 }
   0x4   : > { %p139_p2 = pnand %p2432_p0, %p138_p1 }
   0x6   : > { %142 = sbr.rel (%p139_p2) target bundleno = 767 (0x2ff), region = 32 }
   0xb   : > { %s2433_s14 = sshll.u32 %s2428_s13, 5  ;;  %v2654_v0 = vmov 0   ;;  %v2655_v33 = vmov 1   ;;  %v2656_v38 = vmov 2   ;;  %vm2339_vm0 = vcmask 519168  }
   0xc   : > { %2531 = vset.pattern.permute.xlu1 %v2654_v0  ;;  %2530 = vset.pattern.permute.xlu0 %v2654_v0  ;;  %p163_p3 = scmp.lt.s32.totalorder %s2433_s14, 63 }
   0xe   : > { %s4869_s14 = smov (!%p163_p3, %s2433_s14), 63 }
   0xf   : > { %s2434_s15 = sshll.u32 %s4869_s14, 3 }
  0x10   : > { %s2697_s18 = scalar_lea.vmem %s4522_s0, %s2434_s15 }
  0x11   : > { %v2700_v1 = vld [vmem:[%s2697_s18 + $0x10] sm:$0xff]  ;;  %v2703_v2 = vld [vmem:[%s2697_s18] sm:$0xff]  ;;  %v2708_v3 = vld [vmem:[%s2697_s18 + $0x18] sm:$0xff] }
  0x12   : > { %219 = vperm.xlu1 %2531, %v2700_v1   ;;  %209 = vperm.xlu0 %2530, %v2703_v2   ;;  %v2711_v4 = vld [vmem:[%s2697_s18 + $0x8] sm:$0xff]  ;;  %v2719_v6 = vld [vmem:[%s2697_s18 + $0x20] sm:$0xff]  ;;  %v2724_v7 = vld [vmem:[%s2697_s18 + $0x38] sm:$0xff] }
  0x13   : > { %v2716_v5 = vld [vmem:[%s2697_s18 + $0x28] sm:$0xff]  ;;  %v2727_v8 = vld [vmem:[%s2697_s18 + $0x30] sm:$0xff]  ;;  %v2735_v10 = vld [vmem:[%s2697_s18 + $0x40] sm:$0xff] }
  0x14   : > { %v2732_v9 = vld [vmem:[%s2697_s18 + $0x48] sm:$0xff]  ;;  %v2740_v11 = vld [vmem:[%s2697_s18 + $0x58] sm:$0xff]  ;;  %v2743_v12 = vld [vmem:[%s2697_s18 + $0x50] sm:$0xff] }
  0x15   : > { %v2748_v13 = vld [vmem:[%s2697_s18 + $0x68] sm:$0xff]  ;;  %v2751_v14 = vld [vmem:[%s2697_s18 + $0x60] sm:$0xff]  ;;  %v2756_v15 = vld [vmem:[%s2697_s18 + $0x78] sm:$0xff] }
  0x16   : > { %224 = vperm.xlu1 %2531, %v2708_v3   ;;  %214 = vperm.xlu0 %2530, %v2711_v4   ;;  %v2759_v16 = vld [vmem:[%s2697_s18 + $0x70] sm:$0xff]  ;;  %v2764_v17 = vld [vmem:[%s2697_s18 + $0x88] sm:$0xff]  ;;  %v2767_v18 = vld [vmem:[%s2697_s18 + $0x80] sm:$0xff] }
  0x17   : > { %v2772_v19 = vld [vmem:[%s2697_s18 + $0x98] sm:$0xff]  ;;  %v2775_v20 = vld [vmem:[%s2697_s18 + $0x90] sm:$0xff]  ;;  %v2780_v21 = vld [vmem:[%s2697_s18 + $0xa8] sm:$0xff] }
  0x18   : > { %v2783_v22 = vld [vmem:[%s2697_s18 + $0xa0] sm:$0xff]  ;;  %v2788_v23 = vld [vmem:[%s2697_s18 + $0xb8] sm:$0xff]  ;;  %v2791_v24 = vld [vmem:[%s2697_s18 + $0xb0] sm:$0xff] }
  0x19   : > { %v2796_v25 = vld [vmem:[%s2697_s18 + $0xc8] sm:$0xff]  ;;  %v2799_v26 = vld [vmem:[%s2697_s18 + $0xc0] sm:$0xff]  ;;  %v2804_v27 = vld [vmem:[%s2697_s18 + $0xd8] sm:$0xff] }
  0x1a   : > { %234 = vperm.xlu1 %2531, %v2716_v5   ;;  %229 = vperm.xlu0 %2530, %v2719_v6   ;;  %v2807_v28 = vld [vmem:[%s2697_s18 + $0xd0] sm:$0xff]  ;;  %v2812_v29 = vld [vmem:[%s2697_s18 + $0xe8] sm:$0xff]  ;;  %v2815_v30 = vld [vmem:[%s2697_s18 + $0xe0] sm:$0xff] }
  0x1b   : > { %v2820_v31 = vld [vmem:[%s2697_s18 + $0xf8] sm:$0xff]  ;;  %v2823_v32 = vld [vmem:[%s2697_s18 + $0xf0] sm:$0xff] }
  0x1e   : > { %244 = vperm.xlu1 %2531, %v2724_v7   ;;  %239 = vperm.xlu0 %2530, %v2727_v8  }
  0x22   : > { %254 = vperm.xlu1 %2531, %v2732_v9   ;;  %249 = vperm.xlu0 %2530, %v2735_v10  }
  0x26   : > { %264 = vperm.xlu1 %2531, %v2740_v11   ;;  %259 = vperm.xlu0 %2530, %v2743_v12  }
  0x2a   : > { %274 = vperm.xlu1 %2531, %v2748_v13   ;;  %269 = vperm.xlu0 %2530, %v2751_v14  }
  0x2e   : > { %284 = vperm.xlu1 %2531, %v2756_v15   ;;  %279 = vperm.xlu0 %2530, %v2759_v16  }
  0x32   : > { %294 = vperm.xlu1 %2531, %v2764_v17   ;;  %289 = vperm.xlu0 %2530, %v2767_v18  }
  0x36   : > { %304 = vperm.xlu1 %2531, %v2772_v19   ;;  %299 = vperm.xlu0 %2530, %v2775_v20  }
  0x3a   : > { %314 = vperm.xlu1 %2531, %v2780_v21   ;;  %309 = vperm.xlu0 %2530, %v2783_v22  }
  0x3e   : > { %324 = vperm.xlu1 %2531, %v2788_v23   ;;  %319 = vperm.xlu0 %2530, %v2791_v24  }
  0x42   : > { %334 = vperm.xlu1 %2531, %v2796_v25   ;;  %329 = vperm.xlu0 %2530, %v2799_v26  }
  0x46   : > { %344 = vperm.xlu1 %2531, %v2804_v27   ;;  %339 = vperm.xlu0 %2530, %v2807_v28  }
  0x4a   : > { %354 = vperm.xlu1 %2531, %v2812_v29   ;;  %349 = vperm.xlu0 %2530, %v2815_v30  }
  0x4e   : > { %364 = vperm.xlu1 %2531, %v2820_v31   ;;  %359 = vperm.xlu0 %2530, %v2823_v32  }
  0x52   : > { %2533 = vset.pattern.permute.xlu1 %v2655_v33  ;;  %2532 = vset.pattern.permute.xlu0 %v2655_v33 }
  0x53   : > { %441 = vperm.xlu1 %2533, %v2711_v4   ;;  %437 = vperm.xlu0 %2532, %v2703_v2  }
  0x57   : > { %445 = vperm.xlu1 %2533, %v2700_v1   ;;  %449 = vperm.xlu0 %2532, %v2708_v3  }
  0x5b   : > { %453 = vperm.xlu1 %2533, %v2719_v6   ;;  %457 = vperm.xlu0 %2532, %v2716_v5  }
  0x5f   : > { %461 = vperm.xlu1 %2533, %v2727_v8   ;;  %465 = vperm.xlu0 %2532, %v2724_v7  }
  0x63   : > { %469 = vperm.xlu1 %2533, %v2735_v10   ;;  %473 = vperm.xlu0 %2532, %v2732_v9  }
  0x67   : > { %477 = vperm.xlu1 %2533, %v2743_v12   ;;  %481 = vperm.xlu0 %2532, %v2740_v11  }
  0x6b   : > { %485 = vperm.xlu1 %2533, %v2751_v14   ;;  %489 = vperm.xlu0 %2532, %v2748_v13  }
  0x6f   : > { %493 = vperm.xlu1 %2533, %v2759_v16   ;;  %497 = vperm.xlu0 %2532, %v2756_v15  }
  0x73   : > { %501 = vperm.xlu1 %2533, %v2767_v18   ;;  %505 = vperm.xlu0 %2532, %v2764_v17  }
  0x77   : > { %509 = vperm.xlu1 %2533, %v2775_v20   ;;  %513 = vperm.xlu0 %2532, %v2772_v19  }
  0x7b   : > { %517 = vperm.xlu1 %2533, %v2783_v22   ;;  %521 = vperm.xlu0 %2532, %v2780_v21  }
  0x7f   : > { %525 = vperm.xlu1 %2533, %v2791_v24   ;;  %529 = vperm.xlu0 %2532, %v2788_v23  }
  0x83   : > { %533 = vperm.xlu1 %2533, %v2799_v26   ;;  %537 = vperm.xlu0 %2532, %v2796_v25  }
  0x87   : > { %541 = vperm.xlu1 %2533, %v2807_v28   ;;  %545 = vperm.xlu0 %2532, %v2804_v27  }
  0x8b   : > { %549 = vperm.xlu1 %2533, %v2815_v30   ;;  %553 = vperm.xlu0 %2532, %v2812_v29  }
  0x8d   : > { %v2857_v34 = vpop.permute.xlu1 %219  ;;  %v2859_v35 = vpop.permute.xlu0 %209 }
  0x8f   : > { %557 = vperm.xlu1 %2533, %v2823_v32   ;;  %561 = vperm.xlu0 %2532, %v2820_v31  }
  0x91   : > { %v2863_v36 = vpop.permute.xlu1 %224  ;;  %v2865_v37 = vpop.permute.xlu0 %214 }
  0x93   : > { %2534 = vset.pattern.permute.xlu1 %v2656_v38  ;;  %2535 = vset.pattern.permute.xlu0 %v2656_v38 }
  0x94   : > { %634 = vperm.xlu1 %2534, %v2703_v2   ;;  %638 = vperm.xlu0 %2535, %v2711_v4  }
  0x95   : > { %v2869_v39 = vpop.permute.xlu1 %234  ;;  %v2871_v40 = vpop.permute.xlu0 %229 }
  0x98   : > { %642 = vperm.xlu1 %2534, %v2700_v1   ;;  %650 = vperm.xlu0 %2535, %v2719_v6  }
  0x99   : > { %v2875_v41 = vpop.permute.xlu1 %244  ;;  %v2877_v42 = vpop.permute.xlu0 %239 }
  0x9c   : > { %646 = vperm.xlu1 %2534, %v2708_v3   ;;  %658 = vperm.xlu0 %2535, %v2727_v8  }
  0x9d   : > { %v2881_v43 = vpop.permute.xlu1 %254  ;;  %v2883_v44 = vpop.permute.xlu0 %249 }
  0xa0   : > { %654 = vperm.xlu1 %2534, %v2716_v5   ;;  %666 = vperm.xlu0 %2535, %v2735_v10  }
  0xa1   : > { %v2887_v45 = vpop.permute.xlu1 %264  ;;  %v2889_v46 = vpop.permute.xlu0 %259 }
  0xa4   : > { %662 = vperm.xlu1 %2534, %v2724_v7   ;;  %674 = vperm.xlu0 %2535, %v2743_v12  }
  0xa5   : > { %v2893_v47 = vpop.permute.xlu1 %274  ;;  %v2895_v48 = vpop.permute.xlu0 %269 }
  0xa6   : > { %4526 = vst [vmem:[#allocation2_spill] sm:$0xff] %v2895_v48 }
  0xa8   : > { %670 = vperm.xlu1 %2534, %v2732_v9   ;;  %682 = vperm.xlu0 %2535, %v2751_v14  }
  0xa9   : > { %v2899_v49 = vpop.permute.xlu1 %284  ;;  %v2901_v50 = vpop.permute.xlu0 %279 }
  0xaa   : > { %4527 = vst [vmem:[#allocation3_spill] sm:$0xff] %v2899_v49  ;;  %4528 = vst [vmem:[#allocation4_spill] sm:$0xff] %v2901_v50 }
  0xac   : > { %678 = vperm.xlu1 %2534, %v2740_v11   ;;  %690 = vperm.xlu0 %2535, %v2759_v16  }
  0xad   : > { %v2905_v51 = vpop.permute.xlu1 %294  ;;  %v2907_v52 = vpop.permute.xlu0 %289 }
  0xae   : > { %4529 = vst [vmem:[#allocation5_spill] sm:$0xff] %v2907_v52 }
  0xb0   : > { %686 = vperm.xlu1 %2534, %v2748_v13   ;;  %698 = vperm.xlu0 %2535, %v2767_v18  }
  0xb1   : > { %v2911_v53 = vpop.permute.xlu1 %304  ;;  %v2913_v54 = vpop.permute.xlu0 %299 }
  0xb2   : > { %4530 = vst [vmem:[#allocation6_spill] sm:$0xff] %v2913_v54 }
  0xb4   : > { %694 = vperm.xlu1 %2534, %v2756_v15   ;;  %706 = vperm.xlu0 %2535, %v2775_v20  }
  0xb5   : > { %v2917_v55 = vpop.permute.xlu1 %314  ;;  %v2919_v56 = vpop.permute.xlu0 %309 }
  0xb6   : > { %4531 = vst [vmem:[#allocation7_spill] sm:$0xff] %v2919_v56 }
  0xb8   : > { %702 = vperm.xlu1 %2534, %v2764_v17   ;;  %714 = vperm.xlu0 %2535, %v2783_v22  }
  0xb9   : > { %v2923_v57 = vpop.permute.xlu1 %324  ;;  %v2925_v58 = vpop.permute.xlu0 %319 }
  0xba   : > { %4532 = vst [vmem:[#allocation8_spill] sm:$0xff] %v2925_v58  ;;  %v2657_v58 = vmov 3  }
  0xbc   : > { %710 = vperm.xlu1 %2534, %v2772_v19   ;;  %722 = vperm.xlu0 %2535, %v2791_v24  }
  0xbd   : > { %v2929_v59 = vpop.permute.xlu1 %334  ;;  %v2931_v60 = vpop.permute.xlu0 %329 }
  0xbe   : > { %4533 = vst [vmem:[#allocation9_spill] sm:$0xff] %v2931_v60 }
  0xc0   : > { %718 = vperm.xlu1 %2534, %v2780_v21   ;;  %730 = vperm.xlu0 %2535, %v2799_v26  }
  0xc1   : > { %v2935_v61 = vpop.permute.xlu1 %344  ;;  %v2937_v62 = vpop.permute.xlu0 %339 }
  0xc2   : > { %4534 = vst [vmem:[#allocation10_spill] sm:$0xff] %v2937_v62 }
  0xc4   : > { %726 = vperm.xlu1 %2534, %v2788_v23   ;;  %738 = vperm.xlu0 %2535, %v2807_v28  }
  0xc5   : > { %v2941_v63 = vpop.permute.xlu1 %354  ;;  %v2943_v0 = vpop.permute.xlu0 %349 }
  0xc6   : > { %4535 = vst [vmem:[#allocation11_spill] sm:$0xff] %v2943_v0 }
  0xc8   : > { %734 = vperm.xlu1 %2534, %v2796_v25   ;;  %746 = vperm.xlu0 %2535, %v2815_v30  }
  0xc9   : > { %v2947_v33 = vpop.permute.xlu1 %364  ;;  %v2949_v38 = vpop.permute.xlu0 %359 }
  0xca   : > { %4536 = vst [vmem:[#allocation12_spill] sm:$0xff] %v2949_v38 }
  0xcc   : > { %742 = vperm.xlu1 %2534, %v2804_v27   ;;  %754 = vperm.xlu0 %2535, %v2823_v32  }
  0xce   : > { %v2953_v62 = vpop.permute.xlu1 %441  ;;  %v2955_v60 = vpop.permute.xlu0 %437 }
  0xcf   : > { %4537 = vst [vmem:[#allocation13_spill] sm:$0xff] %v2953_v62  ;;  %4538 = vst [vmem:[#allocation14_spill] sm:$0xff] %v2955_v60 }
  0xd0   : > { %750 = vperm.xlu1 %2534, %v2812_v29   ;;  %2536 = vset.pattern.permute.xlu0 %v2657_v58 }
  0xd1   : > { %831 = vperm.xlu0 %2536, %v2703_v2  }
  0xd2   : > { %v2959_v0 = vpop.permute.xlu1 %445  ;;  %v2961_v56 = vpop.permute.xlu0 %449 }
  0xd3   : > { %4539 = vst [vmem:[#allocation15_spill] sm:$0xff] %v2959_v0  ;;  %4540 = vst [vmem:[#allocation16_spill] sm:$0xff] %v2961_v56 }
  0xd4   : > { %758 = vperm.xlu1 %2534, %v2820_v31  }
  0xd5   : > { %843 = vperm.xlu0 %2536, %v2708_v3  }
  0xd6   : > { %v2965_v38 = vpop.permute.xlu1 %453  ;;  %v2967_v54 = vpop.permute.xlu0 %457 }
  0xd7   : > { %4541 = vst [vmem:[#allocation17_spill] sm:$0xff] %v2965_v38  ;;  %4542 = vst [vmem:[#allocation18_spill] sm:$0xff] %v2967_v54 }
  0xd8   : > { %2537 = vset.pattern.permute.xlu1 %v2657_v58 }
  0xd9   : > { %835 = vperm.xlu1 %2537, %v2711_v4   ;;  %851 = vperm.xlu0 %2536, %v2716_v5  }
  0xda   : > { %v2971_v60 = vpop.permute.xlu1 %461  ;;  %v2973_v62 = vpop.permute.xlu0 %465 }
  0xdb   : > { %4543 = vst [vmem:[#allocation19_spill] sm:$0xff] %v2971_v60  ;;  %4544 = vst [vmem:[#allocation20_spill] sm:$0xff] %v2973_v62 }
  0xdd   : > { %839 = vperm.xlu1 %2537, %v2700_v1   ;;  %859 = vperm.xlu0 %2536, %v2724_v7  }
  0xde   : > { %v2977_v56 = vpop.permute.xlu1 %469  ;;  %v2979_v0 = vpop.permute.xlu0 %473 }
  0xdf   : > { %4545 = vst [vmem:[#allocation21_spill] sm:$0xff] %v2977_v56  ;;  %4546 = vst [vmem:[#allocation22_spill] sm:$0xff] %v2979_v0 }
  0xe1   : > { %847 = vperm.xlu1 %2537, %v2719_v6   ;;  %867 = vperm.xlu0 %2536, %v2732_v9  }
  0xe2   : > { %v2983_v58 = vpop.permute.xlu1 %477  ;;  %v2985_v38 = vpop.permute.xlu0 %481 }
  0xe3   : > { %4547 = vst [vmem:[#allocation23_spill] sm:$0xff] %v2983_v58  ;;  %4548 = vst [vmem:[#allocation24_spill] sm:$0xff] %v2985_v38  ;;  %v3004_v58 = vld [vmem:[%s4523_s1] ss:$0 sm:$0xff] }
  0xe4   : > { %v390_v49 = vmul.f32 %v3004_v58, %v2911_v53  ;;  %v394_v53 = vmul.f32 %v3004_v58, %v2923_v57 }
  0xe5   : > { %855 = vperm.xlu1 %2537, %v2727_v8   ;;  %875 = vperm.xlu0 %2536, %v2740_v11  }
  0xe6   : > { %v2989_v60 = vpop.permute.xlu1 %485  ;;  %v2991_v62 = vpop.permute.xlu0 %489 }
  0xe7   : > { %4549 = vst [vmem:[#allocation25_spill] sm:$0xff] %v2989_v60  ;;  %4550 = vst [vmem:[#allocation26_spill] sm:$0xff] %v2991_v62  ;;  %v3009_v60 = vld [vmem:[%s4523_s1 + $0x1] ss:$0 sm:$0xff] }
  0xe9   : > { %863 = vperm.xlu1 %2537, %v2735_v10   ;;  %883 = vperm.xlu0 %2536, %v2748_v13  }
  0xea   : > { %v2995_v56 = vpop.permute.xlu1 %493  ;;  %v2997_v0 = vpop.permute.xlu0 %497 }
  0xeb   : > { %4551 = vst [vmem:[#allocation27_spill] sm:$0xff] %v2995_v56  ;;  %4552 = vst [vmem:[#allocation28_spill] sm:$0xff] %v2997_v0  ;;  %v388_v56 = vmul.f32 %v3004_v58, %v2905_v51 }
  0xed   : > { %871 = vperm.xlu1 %2537, %v2743_v12   ;;  %891 = vperm.xlu0 %2536, %v2756_v15  }
  0xee   : > { %v3011_v62 = vpop.permute.xlu1 %501  ;;  %v506_v38 = vpop.permute.xlu0 %505 }
  0xef   : > { %4553 = vst [vmem:[#allocation29_spill] sm:$0xff] %v3011_v62  ;;  %v585_v0 = vmul.f32 %v3009_v60, %v506_v38 }
  0xf1   : > { %v3016_v54 = vadd.f32 %v585_v0, %v388_v56  ;;  %879 = vperm.xlu1 %2537, %v2751_v14   ;;  %899 = vperm.xlu0 %2536, %v2764_v17   ;;  %v392_v0 = vmul.f32 %v3004_v58, %v2917_v55 }
  0xf2   : > { %v3020_v52 = vpop.permute.xlu1 %509  ;;  %v514_v50 = vpop.permute.xlu0 %513 }
  0xf3   : > { %4554 = vst [vmem:[#allocation30_spill] sm:$0xff] %v3020_v52  ;;  %v587_v62 = vmul.f32 %v3009_v60, %v514_v50 }
  0xf5   : > { %v3025_v48 = vadd.f32 %v587_v62, %v390_v49  ;;  %887 = vperm.xlu1 %2537, %v2759_v16   ;;  %907 = vperm.xlu0 %2536, %v2772_v19  }
  0xf6   : > { %v3029_v51 = vpop.permute.xlu1 %517  ;;  %v522_v56 = vpop.permute.xlu0 %521 }
  0xf7   : > { %4555 = vst [vmem:[#allocation31_spill] sm:$0xff] %v3029_v51  ;;  %v589_v38 = vmul.f32 %v3009_v60, %v522_v56 }
  0xf9   : > { %v3034_v52 = vadd.f32 %v589_v38, %v392_v0  ;;  %895 = vperm.xlu1 %2537, %v2767_v18   ;;  %915 = vperm.xlu0 %2536, %v2780_v21   ;;  %v396_v0 = vmul.f32 %v3004_v58, %v2929_v59 }
  0xfa   : > { %v3038_v49 = vpop.permute.xlu1 %525  ;;  %v530_v50 = vpop.permute.xlu0 %529 }
  0xfb   : > { %4556 = vst [vmem:[#allocation32_spill] sm:$0xff] %v3038_v49  ;;  %v591_v62 = vmul.f32 %v3009_v60, %v530_v50 }
  0xfd   : > { %v3043_v51 = vadd.f32 %v591_v62, %v394_v53  ;;  %903 = vperm.xlu1 %2537, %v2775_v20   ;;  %923 = vperm.xlu0 %2536, %v2788_v23   ;;  %v398_v53 = vmul.f32 %v3004_v58, %v2935_v61 }
  0xfe   : > { %v3047_v55 = vpop.permute.xlu1 %533  ;;  %v538_v56 = vpop.permute.xlu0 %537 }
  0xff   : > { %4557 = vst [vmem:[#allocation33_spill] sm:$0xff] %v3047_v55  ;;  %v593_v38 = vmul.f32 %v3009_v60, %v538_v56 }
 0x101   : > { %v3052_v49 = vadd.f32 %v593_v38, %v396_v0  ;;  %911 = vperm.xlu1 %2537, %v2783_v22   ;;  %931 = vperm.xlu0 %2536, %v2796_v25   ;;  %v400_v0 = vmul.f32 %v3004_v58, %v2941_v63 }
 0x102   : > { %v3056_v57 = vpop.permute.xlu1 %541  ;;  %v546_v50 = vpop.permute.xlu0 %545 }
 0x103   : > { %4558 = vst [vmem:[#allocation34_spill] sm:$0xff] %v3056_v57  ;;  %v595_v62 = vmul.f32 %v3009_v60, %v546_v50 }
 0x105   : > { %v3061_v55 = vadd.f32 %v595_v62, %v398_v53  ;;  %919 = vperm.xlu1 %2537, %v2791_v24   ;;  %939 = vperm.xlu0 %2536, %v2804_v27   ;;  %v402_v53 = vmul.f32 %v3004_v58, %v2947_v33 }
 0x106   : > { %v3065_v59 = vpop.permute.xlu1 %549  ;;  %v554_v56 = vpop.permute.xlu0 %553 }
 0x107   : > { %4559 = vst [vmem:[#allocation35_spill] sm:$0xff] %v3065_v59  ;;  %v597_v38 = vmul.f32 %v3009_v60, %v554_v56 }
 0x109   : > { %v3070_v57 = vadd.f32 %v597_v38, %v400_v0  ;;  %927 = vperm.xlu1 %2537, %v2799_v26   ;;  %947 = vperm.xlu0 %2536, %v2812_v29   ;;  %v2658_v0 = vmov 4  }
 0x10a   : > { %v3074_v61 = vpop.permute.xlu1 %557  ;;  %v562_v50 = vpop.permute.xlu0 %561 }
 0x10b   : > { %4560 = vst [vmem:[#allocation36_spill] sm:$0xff] %v3074_v61  ;;  %v599_v62 = vmul.f32 %v3009_v60, %v562_v50 }
 0x10d   : > { %v3079_v59 = vadd.f32 %v599_v62, %v402_v53  ;;  %935 = vperm.xlu1 %2537, %v2807_v28   ;;  %955 = vperm.xlu0 %2536, %v2820_v31  }
 0x10f   : > { %v3083_v63 = vpop.permute.xlu1 %634  ;;  %v3085_v56 = vpop.permute.xlu0 %638 }
 0x110   : > { %4561 = vst [vmem:[#allocation37_spill] sm:$0xff] %v3083_v63  ;;  %4562 = vst [vmem:[#allocation38_spill] sm:$0xff] %v3085_v56 }
 0x111   : > { %943 = vperm.xlu1 %2537, %v2815_v30   ;;  %2539 = vset.pattern.permute.xlu0 %v2658_v0 }
 0x112   : > { %1032 = vperm.xlu0 %2539, %v2711_v4  }
 0x113   : > { %v3089_v38 = vpop.permute.xlu1 %642  ;;  %v3091_v33 = vpop.permute.xlu0 %650 }
 0x114   : > { %4563 = vst [vmem:[#allocation39_spill] sm:$0xff] %v3089_v38  ;;  %4564 = vst [vmem:[#allocation40_spill] sm:$0xff] %v3091_v33 }
 0x115   : > { %951 = vperm.xlu1 %2537, %v2823_v32  }
 0x116   : > { %1044 = vperm.xlu0 %2539, %v2719_v6  }
 0x117   : > { %v3095_v50 = vpop.permute.xlu1 %646  ;;  %v3097_v53 = vpop.permute.xlu0 %658 }
 0x118   : > { %4565 = vst [vmem:[#allocation41_spill] sm:$0xff] %v3095_v50  ;;  %4566 = vst [vmem:[#allocation42_spill] sm:$0xff] %v3097_v53 }
 0x119   : > { %2538 = vset.pattern.permute.xlu1 %v2658_v0 }
 0x11a   : > { %1028 = vperm.xlu1 %2538, %v2703_v2   ;;  %1052 = vperm.xlu0 %2539, %v2727_v8  }
 0x11b   : > { %v3101_v62 = vpop.permute.xlu1 %654  ;;  %v3103_v56 = vpop.permute.xlu0 %666 }
 0x11c   : > { %4567 = vst [vmem:[#allocation43_spill] sm:$0xff] %v3101_v62  ;;  %4568 = vst [vmem:[#allocation44_spill] sm:$0xff] %v3103_v56 }
 0x11e   : > { %1036 = vperm.xlu1 %2538, %v2700_v1   ;;  %1060 = vperm.xlu0 %2539, %v2735_v10  }
 0x11f   : > { %v3107_v33 = vpop.permute.xlu1 %662  ;;  %v3109_v38 = vpop.permute.xlu0 %674 }
 0x120   : > { %4569 = vst [vmem:[#allocation45_spill] sm:$0xff] %v3107_v33  ;;  %4570 = vst [vmem:[#allocation46_spill] sm:$0xff] %v3109_v38 }
 0x122   : > { %1040 = vperm.xlu1 %2538, %v2708_v3   ;;  %1068 = vperm.xlu0 %2539, %v2743_v12  }
 0x123   : > { %v3113_v0 = vpop.permute.xlu1 %670  ;;  %v3115_v53 = vpop.permute.xlu0 %682 }
 0x124   : > { %4571 = vst [vmem:[#allocation47_spill] sm:$0xff] %v3113_v0  ;;  %4572 = vst [vmem:[#allocation48_spill] sm:$0xff] %v3115_v53 }
 0x126   : > { %1048 = vperm.xlu1 %2538, %v2716_v5   ;;  %1076 = vperm.xlu0 %2539, %v2751_v14  }
 0x127   : > { %v3119_v56 = vpop.permute.xlu1 %678  ;;  %v3121_v63 = vpop.permute.xlu0 %690 }
 0x128   : > { %4573 = vst [vmem:[#allocation49_spill] sm:$0xff] %v3119_v56  ;;  %4574 = vst [vmem:[#allocation50_spill] sm:$0xff] %v3121_v63  ;;  %v3140_v63 = vld [vmem:[%s4523_s1 + $0x2] ss:$0 sm:$0xff] }
 0x12a   : > { %1056 = vperm.xlu1 %2538, %v2724_v7   ;;  %1084 = vperm.xlu0 %2539, %v2759_v16  }
 0x12b   : > { %v3125_v38 = vpop.permute.xlu1 %686  ;;  %v3127_v61 = vpop.permute.xlu0 %698 }
 0x12c   : > { %4575 = vst [vmem:[#allocation51_spill] sm:$0xff] %v3125_v38  ;;  %4576 = vst [vmem:[#allocation52_spill] sm:$0xff] %v3127_v61 }
 0x12e   : > { %1064 = vperm.xlu1 %2538, %v2732_v9   ;;  %1092 = vperm.xlu0 %2539, %v2767_v18  }
 0x12f   : > { %v3131_v53 = vpop.permute.xlu1 %694  ;;  %v3133_v0 = vpop.permute.xlu0 %706 }
 0x130   : > { %4577 = vst [vmem:[#allocation53_spill] sm:$0xff] %v3131_v53  ;;  %4578 = vst [vmem:[#allocation54_spill] sm:$0xff] %v3133_v0 }
 0x132   : > { %1072 = vperm.xlu1 %2538, %v2740_v11   ;;  %1100 = vperm.xlu0 %2539, %v2775_v20  }
 0x133   : > { %v703_v38 = vpop.permute.xlu1 %702  ;;  %v3142_v56 = vpop.permute.xlu0 %714 }
 0x134   : > { %4579 = vst [vmem:[#allocation55_spill] sm:$0xff] %v3142_v56  ;;  %v782_v61 = vmul.f32 %v3140_v63, %v703_v38 }
 0x136   : > { %v3146_v33 = vadd.f32 %v782_v61, %v3016_v54  ;;  %1080 = vperm.xlu1 %2538, %v2748_v13   ;;  %1108 = vperm.xlu0 %2539, %v2783_v22  }
 0x137   : > { %v711_v0 = vpop.permute.xlu1 %710  ;;  %v3150_v53 = vpop.permute.xlu0 %722 }
 0x138   : > { %4580 = vst [vmem:[#allocation56_spill] sm:$0xff] %v3150_v53  ;;  %v784_v62 = vmul.f32 %v3140_v63, %v711_v0 }
 0x13a   : > { %v3154_v50 = vadd.f32 %v784_v62, %v3025_v48  ;;  %1088 = vperm.xlu1 %2538, %v2756_v15   ;;  %1116 = vperm.xlu0 %2539, %v2791_v24  }
 0x13b   : > { %v719_v38 = vpop.permute.xlu1 %718  ;;  %v3158_v56 = vpop.permute.xlu0 %730 }
 0x13c   : > { %4581 = vst [vmem:[#allocation57_spill] sm:$0xff] %v3154_v50  ;;  %4582 = vst [vmem:[#allocation58_spill] sm:$0xff] %v3158_v56  ;;  %v786_v54 = vmul.f32 %v3140_v63, %v719_v38 }
 0x13e   : > { %v3162_v61 = vadd.f32 %v786_v54, %v3034_v52  ;;  %1096 = vperm.xlu1 %2538, %v2764_v17   ;;  %1124 = vperm.xlu0 %2539, %v2799_v26  }
 0x13f   : > { %v727_v0 = vpop.permute.xlu1 %726  ;;  %v3166_v53 = vpop.permute.xlu0 %738 }
 0x140   : > { %4583 = vst [vmem:[#allocation59_spill] sm:$0xff] %v3162_v61  ;;  %4584 = vst [vmem:[#allocation60_spill] sm:$0xff] %v3166_v53  ;;  %v788_v48 = vmul.f32 %v3140_v63, %v727_v0 }
 0x142   : > { %v3170_v62 = vadd.f32 %v788_v48, %v3043_v51  ;;  %1104 = vperm.xlu1 %2538, %v2772_v19   ;;  %1132 = vperm.xlu0 %2539, %v2807_v28  }
 0x143   : > { %v735_v38 = vpop.permute.xlu1 %734  ;;  %v3174_v56 = vpop.permute.xlu0 %746 }
 0x144   : > { %4585 = vst [vmem:[#allocation61_spill] sm:$0xff] %v3170_v62  ;;  %4586 = vst [vmem:[#allocation62_spill] sm:$0xff] %v3174_v56  ;;  %v790_v52 = vmul.f32 %v3140_v63, %v735_v38 }
 0x146   : > { %v3178_v54 = vadd.f32 %v790_v52, %v3052_v49  ;;  %1112 = vperm.xlu1 %2538, %v2780_v21   ;;  %1140 = vperm.xlu0 %2539, %v2815_v30  }
 0x147   : > { %v743_v0 = vpop.permute.xlu1 %742  ;;  %v3182_v53 = vpop.permute.xlu0 %754 }
 0x148   : > { %4587 = vst [vmem:[#allocation63_spill] sm:$0xff] %v3178_v54  ;;  %4588 = vst [vmem:[#allocation64_spill] sm:$0xff] %v3182_v53  ;;  %v792_v51 = vmul.f32 %v3140_v63, %v743_v0  ;;  %v2659_v53 = vmov 5  }
 0x14a   : > { %v3186_v48 = vadd.f32 %v792_v51, %v3061_v55  ;;  %1120 = vperm.xlu1 %2538, %v2788_v23   ;;  %1148 = vperm.xlu0 %2539, %v2823_v32  }
 0x14b   : > { %v751_v38 = vpop.permute.xlu1 %750 }
 0x14c   : > { %v794_v49 = vmul.f32 %v3140_v63, %v751_v38  ;;  %v3191_v52 = vpop.permute.xlu0 %831 }
 0x14d   : > { %4589 = vst [vmem:[#allocation65_spill] sm:$0xff] %v3191_v52 }
 0x14e   : > { %v3194_v56 = vadd.f32 %v794_v49, %v3070_v57  ;;  %1128 = vperm.xlu1 %2538, %v2796_v25   ;;  %2540 = vset.pattern.permute.xlu0 %v2659_v53 }
 0x14f   : > { %v759_v0 = vpop.permute.xlu1 %758  ;;  %1225 = vperm.xlu0 %2540, %v2703_v2  }
 0x150   : > { %v796_v55 = vmul.f32 %v3140_v63, %v759_v0  ;;  %v3199_v51 = vpop.permute.xlu0 %843 }
 0x151   : > { %4590 = vst [vmem:[#allocation66_spill] sm:$0xff] %v3199_v51 }
 0x152   : > { %v3202_v54 = vadd.f32 %v796_v55, %v3079_v59  ;;  %1136 = vperm.xlu1 %2538, %v2804_v27  }
 0x153   : > { %1237 = vperm.xlu0 %2540, %v2708_v3  }
 0x154   : > { %v3206_v57 = vpop.permute.xlu1 %835  ;;  %v3208_v38 = vpop.permute.xlu0 %851 }
 0x155   : > { %4591 = vst [vmem:[#allocation67_spill] sm:$0xff] %v3206_v57  ;;  %4592 = vst [vmem:[#allocation68_spill] sm:$0xff] %v3208_v38 }
 0x156   : > { %1144 = vperm.xlu1 %2538, %v2812_v29  }
 0x157   : > { %1245 = vperm.xlu0 %2540, %v2716_v5  }
 0x158   : > { %v3212_v49 = vpop.permute.xlu1 %839  ;;  %v3214_v0 = vpop.permute.xlu0 %859 }
 0x159   : > { %4593 = vst [vmem:[#allocation69_spill] sm:$0xff] %v3212_v49  ;;  %4594 = vst [vmem:[#allocation70_spill] sm:$0xff] %v3214_v0 }
 0x15a   : > { %1152 = vperm.xlu1 %2538, %v2820_v31  }
 0x15b   : > { %1253 = vperm.xlu0 %2540, %v2724_v7  }
 0x15c   : > { %v3218_v59 = vpop.permute.xlu1 %847  ;;  %v3220_v55 = vpop.permute.xlu0 %867 }
 0x15d   : > { %4595 = vst [vmem:[#allocation71_spill] sm:$0xff] %v3218_v59  ;;  %4596 = vst [vmem:[#allocation72_spill] sm:$0xff] %v3220_v55 }
 0x15e   : > { %2541 = vset.pattern.permute.xlu1 %v2659_v53 }
 0x15f   : > { %1229 = vperm.xlu1 %2541, %v2711_v4   ;;  %1261 = vperm.xlu0 %2540, %v2732_v9  }
 0x160   : > { %v3224_v57 = vpop.permute.xlu1 %855  ;;  %v3226_v52 = vpop.permute.xlu0 %875 }
 0x161   : > { %4597 = vst [vmem:[#allocation73_spill] sm:$0xff] %v3224_v57  ;;  %4598 = vst [vmem:[#allocation74_spill] sm:$0xff] %v3226_v52 }
 0x163   : > { %1233 = vperm.xlu1 %2541, %v2700_v1   ;;  %1269 = vperm.xlu0 %2540, %v2740_v11  }
 0x164   : > { %v3230_v49 = vpop.permute.xlu1 %863  ;;  %v3232_v0 = vpop.permute.xlu0 %883 }
 0x165   : > { %4599 = vst [vmem:[#allocation75_spill] sm:$0xff] %v3230_v49  ;;  %4600 = vst [vmem:[#allocation76_spill] sm:$0xff] %v3232_v0 }
 0x167   : > { %1241 = vperm.xlu1 %2541, %v2719_v6   ;;  %1277 = vperm.xlu0 %2540, %v2748_v13  }
 0x168   : > { %v3236_v53 = vpop.permute.xlu1 %871  ;;  %v3238_v59 = vpop.permute.xlu0 %891 }
 0x169   : > { %4601 = vst [vmem:[#allocation77_spill] sm:$0xff] %v3236_v53  ;;  %4602 = vst [vmem:[#allocation78_spill] sm:$0xff] %v3238_v59 }
 0x16b   : > { %1249 = vperm.xlu1 %2541, %v2727_v8   ;;  %1285 = vperm.xlu0 %2540, %v2756_v15  }
 0x16c   : > { %v3242_v57 = vpop.permute.xlu1 %879  ;;  %v3244_v52 = vpop.permute.xlu0 %899 }
 0x16d   : > { %4603 = vst [vmem:[#allocation79_spill] sm:$0xff] %v3242_v57 }
 0x16f   : > { %1257 = vperm.xlu1 %2541, %v2735_v10   ;;  %1293 = vperm.xlu0 %2540, %v2764_v17  }
 0x170   : > { %v3248_v49 = vpop.permute.xlu1 %887  ;;  %v3250_v0 = vpop.permute.xlu0 %907 }
 0x171   : > { %4604 = vst [vmem:[#allocation80_spill] sm:$0xff] %v3248_v49 }
 0x173   : > { %1265 = vperm.xlu1 %2541, %v2743_v12   ;;  %1301 = vperm.xlu0 %2540, %v2772_v19  }
 0x174   : > { %v3254_v53 = vpop.permute.xlu1 %895  ;;  %v3256_v59 = vpop.permute.xlu0 %915 }
 0x175   : > { %4605 = vst [vmem:[#allocation81_spill] sm:$0xff] %v3254_v53  ;;  %4606 = vst [vmem:[#allocation82_spill] sm:$0xff] %v3256_v59 }
 0x177   : > { %1273 = vperm.xlu1 %2541, %v2751_v14   ;;  %1309 = vperm.xlu0 %2540, %v2780_v21  }
 0x178   : > { %v3260_v57 = vpop.permute.xlu1 %903  ;;  %v3262_v55 = vpop.permute.xlu0 %923 }
 0x179   : > { %4607 = vst [vmem:[#allocation83_spill] sm:$0xff] %v3260_v57  ;;  %4608 = vst [vmem:[#allocation84_spill] sm:$0xff] %v3262_v55 }
 0x17b   : > { %1281 = vperm.xlu1 %2541, %v2759_v16   ;;  %1317 = vperm.xlu0 %2540, %v2788_v23  }
 0x17c   : > { %v3266_v49 = vpop.permute.xlu1 %911  ;;  %v3268_v62 = vpop.permute.xlu0 %931 }
 0x17d   : > { %4609 = vst [vmem:[#allocation85_spill] sm:$0xff] %v3266_v49  ;;  %4610 = vst [vmem:[#allocation86_spill] sm:$0xff] %v3268_v62 }
 0x17f   : > { %1289 = vperm.xlu1 %2541, %v2767_v18   ;;  %1325 = vperm.xlu0 %2540, %v2796_v25  }
 0x180   : > { %v3272_v53 = vpop.permute.xlu1 %919  ;;  %v3274_v38 = vpop.permute.xlu0 %939 }
 0x181   : > { %4611 = vst [vmem:[#allocation87_spill] sm:$0xff] %v3272_v53 }
 0x183   : > { %1297 = vperm.xlu1 %2541, %v2775_v20   ;;  %1333 = vperm.xlu0 %2540, %v2804_v27  }
 0x184   : > { %v3278_v57 = vpop.permute.xlu1 %927  ;;  %v3280_v61 = vpop.permute.xlu0 %947 }
 0x185   : > { %4612 = vst [vmem:[#allocation88_spill] sm:$0xff] %v3278_v57  ;;  %v2660_v57 = vmov 6  }
 0x187   : > { %1305 = vperm.xlu1 %2541, %v2783_v22   ;;  %1341 = vperm.xlu0 %2540, %v2812_v29  }
 0x188   : > { %v3284_v49 = vpop.permute.xlu1 %935  ;;  %v3286_v62 = vpop.permute.xlu0 %955 }
 0x189   : > { %4613 = vst [vmem:[#allocation89_spill] sm:$0xff] %v3284_v49 }
 0x18b   : > { %1313 = vperm.xlu1 %2541, %v2791_v24   ;;  %1349 = vperm.xlu0 %2540, %v2820_v31  }
 0x18c   : > { %v3290_v53 = vpop.permute.xlu1 %943 }
 0x18d   : > { %4614 = vst [vmem:[#allocation90_spill] sm:$0xff] %v3290_v53  ;;  %v3292_v55 = vpop.permute.xlu0 %1032 }
 0x18e   : > { %4615 = vst [vmem:[#allocation91_spill] sm:$0xff] %v3292_v55 }
 0x18f   : > { %1321 = vperm.xlu1 %2541, %v2799_v26   ;;  %2543 = vset.pattern.permute.xlu0 %v2660_v57 }
 0x190   : > { %v3295_v51 = vpop.permute.xlu1 %951  ;;  %1426 = vperm.xlu0 %2543, %v2711_v4  }
 0x191   : > { %4616 = vst [vmem:[#allocation92_spill] sm:$0xff] %v3295_v51  ;;  %v3298_v59 = vpop.permute.xlu0 %1044 }
 0x192   : > { %4617 = vst [vmem:[#allocation93_spill] sm:$0xff] %v3298_v59 }
 0x193   : > { %1329 = vperm.xlu1 %2541, %v2807_v28  }
 0x194   : > { %1438 = vperm.xlu0 %2543, %v2719_v6  }
 0x195   : > { %v3302_v49 = vpop.permute.xlu1 %1028  ;;  %v3304_v50 = vpop.permute.xlu0 %1052 }
 0x196   : > { %4618 = vst [vmem:[#allocation94_spill] sm:$0xff] %v3302_v49  ;;  %4619 = vst [vmem:[#allocation95_spill] sm:$0xff] %v3304_v50 }
 0x197   : > { %1337 = vperm.xlu1 %2541, %v2815_v30  }
 0x198   : > { %1446 = vperm.xlu0 %2543, %v2727_v8  }
 0x199   : > { %v3308_v55 = vpop.permute.xlu1 %1036  ;;  %v3310_v53 = vpop.permute.xlu0 %1060 }
 0x19a   : > { %4620 = vst [vmem:[#allocation96_spill] sm:$0xff] %v3308_v55  ;;  %4621 = vst [vmem:[#allocation97_spill] sm:$0xff] %v3310_v53 }
 0x19b   : > { %1345 = vperm.xlu1 %2541, %v2823_v32  }
 0x19c   : > { %1454 = vperm.xlu0 %2543, %v2735_v10  }
 0x19d   : > { %v3314_v59 = vpop.permute.xlu1 %1040  ;;  %v3316_v51 = vpop.permute.xlu0 %1068 }
 0x19e   : > { %4622 = vst [vmem:[#allocation98_spill] sm:$0xff] %v3316_v51 }
 0x19f   : > { %2542 = vset.pattern.permute.xlu1 %v2660_v57 }
 0x1a0   : > { %1422 = vperm.xlu1 %2542, %v2703_v2   ;;  %1462 = vperm.xlu0 %2543, %v2743_v12  }
 0x1a1   : > { %v3320_v50 = vpop.permute.xlu1 %1048  ;;  %v3322_v49 = vpop.permute.xlu0 %1076 }
 0x1a2   : > { %4623 = vst [vmem:[#allocation99_spill] sm:$0xff] %v3320_v50  ;;  %4624 = vst [vmem:[#allocation100_spill] sm:$0xff] %v3322_v49 }
 0x1a4   : > { %1430 = vperm.xlu1 %2542, %v2700_v1   ;;  %1470 = vperm.xlu0 %2543, %v2751_v14  }
 0x1a5   : > { %v3326_v53 = vpop.permute.xlu1 %1056  ;;  %v3328_v55 = vpop.permute.xlu0 %1084 }
 0x1a6   : > { %4625 = vst [vmem:[#allocation101_spill] sm:$0xff] %v3326_v53  ;;  %4626 = vst [vmem:[#allocation102_spill] sm:$0xff] %v3328_v55 }
 0x1a8   : > { %1434 = vperm.xlu1 %2542, %v2708_v3   ;;  %1478 = vperm.xlu0 %2543, %v2759_v16  }
 0x1a9   : > { %v3332_v57 = vpop.permute.xlu1 %1064  ;;  %v3334_v51 = vpop.permute.xlu0 %1092 }
 0x1aa   : > { %4627 = vst [vmem:[#allocation103_spill] sm:$0xff] %v3332_v57  ;;  %4628 = vst [vmem:[#allocation104_spill] sm:$0xff] %v3334_v51 }
 0x1ac   : > { %1442 = vperm.xlu1 %2542, %v2716_v5   ;;  %1486 = vperm.xlu0 %2543, %v2767_v18  }
 0x1ad   : > { %v3338_v49 = vpop.permute.xlu1 %1072  ;;  %v3340_v50 = vpop.permute.xlu0 %1100 }
 0x1ae   : > { %4629 = vst [vmem:[#allocation105_spill] sm:$0xff] %v3338_v49  ;;  %4630 = vst [vmem:[#allocation106_spill] sm:$0xff] %v3340_v50 }
 0x1b0   : > { %1450 = vperm.xlu1 %2542, %v2724_v7   ;;  %1494 = vperm.xlu0 %2543, %v2775_v20  }
 0x1b1   : > { %v3344_v55 = vpop.permute.xlu1 %1080  ;;  %v3346_v53 = vpop.permute.xlu0 %1108 }
 0x1b2   : > { %4631 = vst [vmem:[#allocation107_spill] sm:$0xff] %v3344_v55  ;;  %4632 = vst [vmem:[#allocation108_spill] sm:$0xff] %v3346_v53 }
 0x1b4   : > { %1458 = vperm.xlu1 %2542, %v2732_v9   ;;  %1502 = vperm.xlu0 %2543, %v2783_v22  }
 0x1b5   : > { %v3350_v51 = vpop.permute.xlu1 %1088  ;;  %v3352_v57 = vpop.permute.xlu0 %1116 }
 0x1b6   : > { %4633 = vst [vmem:[#allocation109_spill] sm:$0xff] %v3350_v51  ;;  %4634 = vst [vmem:[#allocation110_spill] sm:$0xff] %v3352_v57 }
 0x1b8   : > { %1466 = vperm.xlu1 %2542, %v2740_v11   ;;  %1510 = vperm.xlu0 %2543, %v2791_v24  }
 0x1b9   : > { %v3356_v18 = vpop.permute.xlu1 %1096  ;;  %v3358_v50 = vpop.permute.xlu0 %1124 }
 0x1ba   : > { %4635 = vst [vmem:[#allocation111_spill] sm:$0xff] %v3358_v50 }
 0x1bc   : > { %1474 = vperm.xlu1 %2542, %v2748_v13   ;;  %1518 = vperm.xlu0 %2543, %v2799_v26  }
 0x1bd   : > { %v3362_v20 = vpop.permute.xlu1 %1104  ;;  %v3364_v53 = vpop.permute.xlu0 %1132 }
 0x1be   : > { %4636 = vst [vmem:[#allocation112_spill] sm:$0xff] %v3364_v53 }
 0x1c0   : > { %1482 = vperm.xlu1 %2542, %v2756_v15   ;;  %1526 = vperm.xlu0 %2543, %v2807_v28   ;;  %v2661_v28 = vmov 7  }
 0x1c1   : > { %v3368_v22 = vpop.permute.xlu1 %1112  ;;  %v3370_v57 = vpop.permute.xlu0 %1140 }
 0x1c2   : > { %4637 = vst [vmem:[#allocation113_spill] sm:$0xff] %v3370_v57 }
 0x1c4   : > { %1490 = vperm.xlu1 %2542, %v2764_v17   ;;  %1534 = vperm.xlu0 %2543, %v2815_v30  }
 0x1c5   : > { %v3374_v24 = vpop.permute.xlu1 %1120  ;;  %v3376_v50 = vpop.permute.xlu0 %1148 }
 0x1c6   : > { %4638 = vst [vmem:[#allocation114_spill] sm:$0xff] %v3376_v50 }
 0x1c8   : > { %1498 = vperm.xlu1 %2542, %v2772_v19   ;;  %1542 = vperm.xlu0 %2543, %v2823_v32  }
 0x1c9   : > { %v3380_v26 = vpop.permute.xlu1 %1128 }
 0x1ca   : > { %v3382_v53 = vpop.permute.xlu0 %1225 }
 0x1cb   : > { %4639 = vst [vmem:[#allocation115_spill] sm:$0xff] %v3382_v53 }
 0x1cc   : > { %1506 = vperm.xlu1 %2542, %v2780_v21   ;;  %2544 = vset.pattern.permute.xlu0 %v2661_v28 }
 0x1cd   : > { %v1137_v57 = vpop.permute.xlu1 %1136  ;;  %1619 = vperm.xlu0 %2544, %v2703_v2  }
 0x1ce   : > { %v3386_v30 = vpop.permute.xlu0 %1237 }
 0x1d0   : > { %1514 = vperm.xlu1 %2542, %v2788_v23  }
 0x1d1   : > { %v1145_v50 = vpop.permute.xlu1 %1144  ;;  %1631 = vperm.xlu0 %2544, %v2708_v3  }
 0x1d2   : > { %v3390_v51 = vpop.permute.xlu0 %1245 }
 0x1d4   : > { %1522 = vperm.xlu1 %2542, %v2796_v25  }
 0x1d5   : > { %v1153_v32 = vpop.permute.xlu1 %1152  ;;  %1639 = vperm.xlu0 %2544, %v2716_v5  }
 0x1d6   : > { %v3394_v53 = vpop.permute.xlu0 %1253 }
 0x1d7   : > { %4640 = vst [vmem:[#allocation116_spill] sm:$0xff] %v3394_v53 }
 0x1d8   : > { %1530 = vperm.xlu1 %2542, %v2804_v27  }
 0x1d9   : > { %1647 = vperm.xlu0 %2544, %v2724_v7  }
 0x1da   : > { %v3398_v2 = vpop.permute.xlu1 %1229  ;;  %v3400_v55 = vpop.permute.xlu0 %1261 }
 0x1db   : > { %4641 = vst [vmem:[#allocation117_spill] sm:$0xff] %v3398_v2 }
 0x1dc   : > { %1538 = vperm.xlu1 %2542, %v2812_v29  }
 0x1dd   : > { %1655 = vperm.xlu0 %2544, %v2732_v9  }
 0x1de   : > { %v3404_v3 = vpop.permute.xlu1 %1233  ;;  %v3406_v49 = vpop.permute.xlu0 %1269 }
 0x1df   : > { %4642 = vst [vmem:[#allocation118_spill] sm:$0xff] %v3404_v3 }
 0x1e0   : > { %1546 = vperm.xlu1 %2542, %v2820_v31  }
 0x1e1   : > { %1663 = vperm.xlu0 %2544, %v2740_v11  }
 0x1e2   : > { %v3410_v5 = vpop.permute.xlu1 %1241  ;;  %v3412_v53 = vpop.permute.xlu0 %1277 }
 0x1e3   : > { %4643 = vst [vmem:[#allocation119_spill] sm:$0xff] %v3410_v5  ;;  %v4682_v5 = vld [vmem:[#allocation13_spill] sm:$0xff] }
 0x1e4   : > { %2545 = vset.pattern.permute.xlu1 %v2661_v28 }
 0x1e5   : > { %1623 = vperm.xlu1 %2545, %v2711_v4   ;;  %1671 = vperm.xlu0 %2544, %v2748_v13  }
 0x1e6   : > { %v3416_v7 = vpop.permute.xlu1 %1249  ;;  %v3418_v9 = vpop.permute.xlu0 %1285 }
 0x1e7   : > { %4644 = vst [vmem:[#allocation120_spill] sm:$0xff] %v3416_v7  ;;  %v2629_v7 = vld [vmem:[%s2697_s18 + $0x18] sm:$0xff] }
 0x1e9   : > { %1627 = vperm.xlu1 %2545, %v2700_v1   ;;  %1679 = vperm.xlu0 %2544, %v2756_v15  }
 0x1ea   : > { %v3422_v3 = vpop.permute.xlu1 %1257  ;;  %v3424_v11 = vpop.permute.xlu0 %1293 }
 0x1eb   : > { %4645 = vst [vmem:[#allocation121_spill] sm:$0xff] %v3422_v3 }
 0x1ed   : > { %1635 = vperm.xlu1 %2545, %v2719_v6   ;;  %1687 = vperm.xlu0 %2544, %v2764_v17   ;;  %v3447_v17 = vld [vmem:[%s4523_s1 + $0x3] ss:$0 sm:$0xff] }
 0x1ee   : > { %v3428_v28 = vpop.permute.xlu1 %1265  ;;  %v3430_v4 = vpop.permute.xlu0 %1301 }
 0x1ef   : > { %4646 = vst [vmem:[#allocation122_spill] sm:$0xff] %v3428_v28 }
 0x1f1   : > { %1643 = vperm.xlu1 %2545, %v2727_v8   ;;  %1695 = vperm.xlu0 %2544, %v2772_v19   ;;  %v989_v8 = vmul.f32 %v3447_v17, %v3274_v38  ;;  %v991_v38 = vmul.f32 %v3447_v17, %v3280_v61 }
 0x1f2   : > { %v3434_v13 = vpop.permute.xlu1 %1273  ;;  %v3436_v1 = vpop.permute.xlu0 %1309 }
 0x1f3   : > { %4647 = vst [vmem:[#allocation123_spill] sm:$0xff] %v3434_v13  ;;  %v1021_v13 = vadd.f32 %v989_v8, %v3186_v48  ;;  %v1023_v61 = vadd.f32 %v991_v38, %v3194_v56 }
 0x1f5   : > { %1651 = vperm.xlu1 %2545, %v2735_v10   ;;  %1703 = vperm.xlu0 %2544, %v2780_v21   ;;  %v3456_v10 = vld [vmem:[%s4523_s1 + $0x4] ss:$0 sm:$0xff] }
 0x1f6   : > { %v3440_v15 = vpop.permute.xlu1 %1281  ;;  %v3442_v6 = vpop.permute.xlu0 %1317 }
 0x1f7   : > { %4648 = vst [vmem:[#allocation124_spill] sm:$0xff] %v3440_v15  ;;  %v1186_v15 = vmul.f32 %v3456_v10, %v1137_v57  ;;  %v1188_v57 = vmul.f32 %v3456_v10, %v1145_v50  ;;  %v1190_v50 = vmul.f32 %v3456_v10, %v1153_v32 }
 0x1f9   : > { %1659 = vperm.xlu1 %2545, %v2743_v12   ;;  %1711 = vperm.xlu0 %2544, %v2788_v23   ;;  %v3471_v12 = vld [vmem:[%s4523_s1 + $0x5] ss:$0 sm:$0xff]  ;;  %v1218_v28 = vadd.f32 %v1186_v15, %v1021_v13  ;;  %v1220_v13 = vadd.f32 %v1188_v57, %v1023_v61 }
 0x1fa   : > { %v3458_v19 = vpop.permute.xlu1 %1289  ;;  %v3460_v21 = vpop.permute.xlu0 %1325 }
 0x1fb   : > { %4649 = vst [vmem:[#allocation125_spill] sm:$0xff] %v3458_v19 }
 0x1fd   : > { %1667 = vperm.xlu1 %2545, %v2751_v14   ;;  %1719 = vperm.xlu0 %2544, %v2796_v25   ;;  %v993_v14 = vmul.f32 %v3447_v17, %v3286_v62  ;;  %v2612_v62 = vld [vmem:[%s2697_s18 + $0x80] sm:$0xff] }
 0x1fe   : > { %v3473_v23 = vpop.permute.xlu1 %1297  ;;  %v1334_v19 = vpop.permute.xlu0 %1333 }
 0x1ff   : > { %4650 = vst [vmem:[#allocation126_spill] sm:$0xff] %v3473_v23  ;;  %v1383_v48 = vmul.f32 %v3471_v12, %v1334_v19  ;;  %v1025_v56 = vadd.f32 %v993_v14, %v3202_v54  ;;  %v2615_v14 = vld [vmem:[%s2697_s18 + $0x8] sm:$0xff] }
 0x201   : > { %v3480_v25 = vadd.f32 %v1383_v48, %v1218_v28  ;;  %1675 = vperm.xlu1 %2545, %v2759_v16   ;;  %1727 = vperm.xlu0 %2544, %v2804_v27   ;;  %v1222_v28 = vadd.f32 %v1190_v50, %v1025_v56  ;;  %v2662_v48 = vmov 8   ;;  %v3511_v50 = vld [vmem:[%s2697_s18 + $0xb0] sm:$0xff] }
 0x202   : > { %v3484_v8 = vpop.permute.xlu1 %1305  ;;  %v1342_v23 = vpop.permute.xlu0 %1341 }
 0x203   : > { %4651 = vst [vmem:[#allocation127_spill] sm:$0xff] %v3484_v8  ;;  %v1385_v15 = vmul.f32 %v3471_v12, %v1342_v23  ;;  %v2613_v23 = vld [vmem:[%s2697_s18 + $0x90] sm:$0xff] }
 0x204   : > { %v3547_v8 = vld [vmem:[%s2697_s18 + $0xf0] sm:$0xff] }
 0x205   : > { %v3489_v19 = vadd.f32 %v1385_v15, %v1220_v13  ;;  %1683 = vperm.xlu1 %2545, %v2612_v62   ;;  %1735 = vperm.xlu0 %2544, %v2812_v29   ;;  %v2614_v29 = vld [vmem:[%s2697_s18 + $0xa0] sm:$0xff] }
 0x206   : > { %v3493_v16 = vpop.permute.xlu1 %1313  ;;  %v1350_v27 = vpop.permute.xlu0 %1349  ;;  %v2617_v15 = vld [vmem:[%s2697_s18 + $0x20] sm:$0xff] }
 0x207   : > { %4652 = vst [vmem:[#allocation128_spill] sm:$0xff] %v3493_v16  ;;  %v1387_v38 = vmul.f32 %v3471_v12, %v1350_v27  ;;  %v3520_v27 = vld [vmem:[%s2697_s18 + $0xc0] sm:$0xff] }
 0x208   : > { %v3538_v16 = vld [vmem:[%s2697_s18 + $0xe0] sm:$0xff] }
 0x209   : > { %v3496_v32 = vadd.f32 %v1387_v38, %v1222_v28  ;;  %1691 = vperm.xlu1 %2545, %v2613_v23   ;;  %1743 = vperm.xlu0 %2544, %v2820_v31   ;;  %v2619_v38 = vld [vmem:[%s2697_s18 + $0x30] sm:$0xff] }
 0x20a   : > { %v3500_v54 = vpop.permute.xlu1 %1321 }
 0x20b   : > { %4653 = vst [vmem:[#allocation129_spill] sm:$0xff] %v3500_v54  ;;  %v3502_v57 = vpop.permute.xlu0 %1426 }
 0x20c   : > { %4654 = vst [vmem:[#allocation130_spill] sm:$0xff] %v3502_v57  ;;  %v979_v57 = vmul.f32 %v3447_v17, %v3244_v52  ;;  %v4692_v52 = vld [vmem:[#allocation15_spill] sm:$0xff] }
 0x20d   : > { %1699 = vperm.xlu1 %2545, %v2614_v29   ;;  %2547 = vset.pattern.permute.xlu0 %v2662_v48 }
 0x20e   : > { %v3505_v61 = vpop.permute.xlu1 %1329  ;;  %1820 = vperm.xlu0 %2547, %v2615_v14  }
 0x20f   : > { %4655 = vst [vmem:[#allocation131_spill] sm:$0xff] %v3505_v61  ;;  %v3508_v13 = vpop.permute.xlu0 %1438  ;;  %v3529_v61 = vld [vmem:[%s2697_s18 + $0xd0] sm:$0xff] }
 0x210   : > { %4656 = vst [vmem:[#allocation132_spill] sm:$0xff] %v3508_v13  ;;  %v2628_v13 = vld [vmem:[%s2697_s18 + $0x10] sm:$0xff] }
 0x211   : > { %1707 = vperm.xlu1 %2545, %v3511_v50  }
 0x212   : > { %v3514_v31 = vpop.permute.xlu1 %1337  ;;  %1832 = vperm.xlu0 %2547, %v2617_v15   ;;  %v2621_v15 = vld [vmem:[%s2697_s18 + $0x40] sm:$0xff] }
 0x213   : > { %4657 = vst [vmem:[#allocation133_spill] sm:$0xff] %v3514_v31  ;;  %v3517_v56 = vpop.permute.xlu0 %1446 }
 0x214   : > { %4658 = vst [vmem:[#allocation134_spill] sm:$0xff] %v3517_v56  ;;  %v2626_v56 = vld [vmem:[%s2697_s18] sm:$0xff] }
 0x215   : > { %1715 = vperm.xlu1 %2545, %v3520_v27  }
 0x216   : > { %v3523_v28 = vpop.permute.xlu1 %1345  ;;  %1840 = vperm.xlu0 %2547, %v2619_v38   ;;  %v2623_v38 = vld [vmem:[%s2697_s18 + $0x50] sm:$0xff] }
 0x217   : > { %4659 = vst [vmem:[#allocation135_spill] sm:$0xff] %v3523_v28  ;;  %v3526_v14 = vpop.permute.xlu0 %1454 }
 0x218   : > { %4660 = vst [vmem:[#allocation136_spill] sm:$0xff] %v3526_v14 }
 0x219   : > { %1723 = vperm.xlu1 %2545, %v3529_v61  }
 0x21a   : > { %1848 = vperm.xlu0 %2547, %v2621_v15   ;;  %v2625_v15 = vld [vmem:[%s2697_s18 + $0x60] sm:$0xff] }
 0x21b   : > { %v3533_v31 = vpop.permute.xlu1 %1422  ;;  %v3535_v54 = vpop.permute.xlu0 %1462 }
 0x21c   : > { %4661 = vst [vmem:[#allocation137_spill] sm:$0xff] %v3533_v31  ;;  %4662 = vst [vmem:[#allocation138_spill] sm:$0xff] %v3535_v54 }
 0x21d   : > { %1731 = vperm.xlu1 %2545, %v3538_v16  }
 0x21e   : > { %1856 = vperm.xlu0 %2547, %v2623_v38   ;;  %v2627_v38 = vld [vmem:[%s2697_s18 + $0x70] sm:$0xff] }
 0x21f   : > { %v3542_v14 = vpop.permute.xlu1 %1430  ;;  %v3544_v28 = vpop.permute.xlu0 %1470 }
 0x220   : > { %4663 = vst [vmem:[#allocation139_spill] sm:$0xff] %v3542_v14  ;;  %4664 = vst [vmem:[#allocation140_spill] sm:$0xff] %v3544_v28 }
 0x221   : > { %1739 = vperm.xlu1 %2545, %v3547_v8  }
 0x222   : > { %1864 = vperm.xlu0 %2547, %v2625_v15  }
 0x223   : > { %v3551_v54 = vpop.permute.xlu1 %1434  ;;  %v3553_v31 = vpop.permute.xlu0 %1478 }
 0x224   : > { %4665 = vst [vmem:[#allocation141_spill] sm:$0xff] %v3553_v31 }
 0x225   : > { %2546 = vset.pattern.permute.xlu1 %v2662_v48 }
 0x226   : > { %1816 = vperm.xlu1 %2546, %v2626_v56   ;;  %1872 = vperm.xlu0 %2547, %v2627_v38   ;;  %v2630_v56 = vld [vmem:[%s2697_s18 + $0x28] sm:$0xff] }
 0x227   : > { %v3557_v14 = vpop.permute.xlu1 %1442  ;;  %v3559_v28 = vpop.permute.xlu0 %1486 }
 0x228   : > { %4666 = vst [vmem:[#allocation142_spill] sm:$0xff] %v3559_v28 }
 0x22a   : > { %1824 = vperm.xlu1 %2546, %v2628_v13   ;;  %1880 = vperm.xlu0 %2547, %v2612_v62   ;;  %v373_v62 = vmul.f32 %v3004_v58, %v2857_v34  ;;  %v371_v13 = vmul.f32 %v3004_v58, %v2859_v35  ;;  %v3594_v34 = vmul.f32 %v3004_v58, %v2877_v42  ;;  %v4674_v42 = vld [vmem:[#allocation2_spill] sm:$0xff] }
 0x22b   : > { %v3562_v3 = vpop.permute.xlu1 %1450  ;;  %v3564_v15 = vpop.permute.xlu0 %1494  ;;  %v380_v35 = vmul.f32 %v3004_v58, %v2881_v43  ;;  %v3618_v43 = vmul.f32 %v3004_v58, %v4674_v42  ;;  %v569_v42 = vmul.f32 %v3009_v60, %v4682_v5 }
 0x22c   : > { %4667 = vst [vmem:[#allocation143_spill] sm:$0xff] %v3564_v15  ;;  %4671 = vst [vmem:[#allocation147_spill] sm:$0xff] %v3594_v34  ;;  %v4680_v15 = vld [vmem:[#allocation5_spill] sm:$0xff]  ;;  %v4702_v34 = vld [vmem:[#allocation20_spill] sm:$0xff] }
 0x22d   : > { %4675 = vst [vmem:[#allocation2_spill] sm:$0xff] %v3618_v43  ;;  %v4685_v43 = vld [vmem:[#allocation7_spill] sm:$0xff] }
 0x22e   : > { %1828 = vperm.xlu1 %2546, %v2629_v7   ;;  %1888 = vperm.xlu0 %2547, %v2613_v23   ;;  %v374_v7 = vmul.f32 %v3004_v58, %v2863_v36  ;;  %v372_v23 = vmul.f32 %v3004_v58, %v2865_v37  ;;  %v3600_v36 = vmul.f32 %v3004_v58, %v2883_v44  ;;  %v4676_v44 = vld [vmem:[#allocation3_spill] sm:$0xff] }
 0x22f   : > { %v3567_v48 = vpop.permute.xlu1 %1458  ;;  %v3569_v31 = vpop.permute.xlu0 %1502  ;;  %v3604_v37 = vmul.f32 %v3004_v58, %v2887_v45  ;;  %v3622_v45 = vmul.f32 %v3004_v58, %v4676_v44  ;;  %v4683_v44 = vld [vmem:[#allocation6_spill] sm:$0xff] }
 0x230   : > { %4668 = vst [vmem:[#allocation144_spill] sm:$0xff] %v3569_v31  ;;  %4672 = vst [vmem:[#allocation148_spill] sm:$0xff] %v3600_v36  ;;  %v4678_v31 = vld [vmem:[#allocation4_spill] sm:$0xff]  ;;  %v3642_v2 = vmul.f32 %v3004_v58, %v4683_v44  ;;  %v570_v36 = vmul.f32 %v3009_v60, %v4692_v52  ;;  %v1176_v44 = vmul.f32 %v3456_v10, %v3356_v18 }
 0x231   : > { %v981_v52 = vmul.f32 %v3447_v17, %v3250_v0 }
 0x232   : > { %1836 = vperm.xlu1 %2546, %v2630_v56   ;;  %1896 = vperm.xlu0 %2547, %v2614_v29   ;;  %v376_v56 = vmul.f32 %v3004_v58, %v2869_v39  ;;  %v3588_v29 = vmul.f32 %v3004_v58, %v2871_v40  ;;  %v2631_v39 = vld [vmem:[%s2697_s18 + $0x38] sm:$0xff]  ;;  %v3610_v40 = vmul.f32 %v3004_v58, %v2889_v46 }
 0x233   : > { %v3572_v38 = vpop.permute.xlu1 %1466  ;;  %v3574_v28 = vpop.permute.xlu0 %1510  ;;  %v3630_v46 = vmul.f32 %v3004_v58, %v4678_v31  ;;  %4684 = vst [vmem:[#allocation13_spill] sm:$0xff] %v3642_v2  ;;  %v4687_v31 = vld [vmem:[#allocation8_spill] sm:$0xff]  ;;  %v2632_v2 = vld [vmem:[%s2697_s18 + $0x48] sm:$0xff] }
 0x234   : > { %4669 = vst [vmem:[#allocation145_spill] sm:$0xff] %v3574_v28  ;;  %4670 = vst [vmem:[#allocation146_spill] sm:$0xff] %v3588_v29  ;;  %v378_v28 = vmul.f32 %v3004_v58, %v2875_v41  ;;  %v3614_v41 = vmul.f32 %v3004_v58, %v2893_v47  ;;  %v3634_v47 = vmul.f32 %v3004_v58, %v4680_v15  ;;  %v4689_v15 = vld [vmem:[#allocation14_spill] sm:$0xff] }
 0x235   : > { %4673 = vst [vmem:[#allocation149_spill] sm:$0xff] %v3610_v40  ;;  %4679 = vst [vmem:[#allocation4_spill] sm:$0xff] %v3630_v46  ;;  %v3650_v46 = vmul.f32 %v3004_v58, %v4687_v31  ;;  %v4690_v40 = vld [vmem:[#allocation9_spill] sm:$0xff] }
 0x236   : > { %1844 = vperm.xlu1 %2546, %v2631_v39   ;;  %1904 = vperm.xlu0 %2547, %v3511_v50   ;;  %4681 = vst [vmem:[#allocation5_spill] sm:$0xff] %v3634_v47  ;;  %v568_v47 = vmul.f32 %v3009_v60, %v4689_v15  ;;  %v3656_v5 = vmul.f32 %v3004_v58, %v4690_v40  ;;  %v4697_v40 = vld [vmem:[#allocation16_spill] sm:$0xff] }
 0x237   : > { %v3624_v39 = vpop.permute.xlu1 %1474  ;;  %v3626_v50 = vpop.permute.xlu0 %1518  ;;  %4688 = vst [vmem:[#allocation7_spill] sm:$0xff] %v3650_v46  ;;  %v4695_v46 = vld [vmem:[#allocation11_spill] sm:$0xff] }
 0x238   : > { %4677 = vst [vmem:[#allocation3_spill] sm:$0xff] %v3626_v50  ;;  %v3646_v50 = vmul.f32 %v3004_v58, %v4685_v43  ;;  %4691 = vst [vmem:[#allocation8_spill] sm:$0xff] %v3656_v5  ;;  %v4693_v43 = vld [vmem:[#allocation10_spill] sm:$0xff]  ;;  %v3670_v15 = vmul.f32 %v3004_v58, %v4695_v46  ;;  %v571_v5 = vmul.f32 %v3009_v60, %v4697_v40 }
 0x239   : > { %v3666_v31 = vmul.f32 %v3004_v58, %v4693_v43  ;;  %v3684_v43 = vadd.f32 %v569_v42, %v372_v23  ;;  %v1011_v46 = vadd.f32 %v979_v57, %v3146_v33  ;;  %v4701_v40 = vld [vmem:[#allocation18_spill] sm:$0xff]  ;;  %v1178_v33 = vmul.f32 %v3456_v10, %v3362_v20  ;;  %v2633_v57 = vld [vmem:[%s2697_s18 + $0x58] sm:$0xff] }
 0x23a   : > { %4686 = vst [vmem:[#allocation6_spill] sm:$0xff] %v3646_v50  ;;  %1852 = vperm.xlu1 %2546, %v2632_v2   ;;  %1912 = vperm.xlu0 %2547, %v3520_v27   ;;  %4696 = vst [vmem:[#allocation9_spill] sm:$0xff] %v3670_v15  ;;  %v4700_v27 = vld [vmem:[#allocation12_spill] sm:$0xff]  ;;  %v1373_v15 = vmul.f32 %v3471_v12, %v3424_v11  ;;  %v573_v0 = vmul.f32 %v3009_v60, %v4701_v40  ;;  %v4706_v42 = vld [vmem:[#allocation41_spill] sm:$0xff] }
 0x23b   : > { %4694 = vst [vmem:[#allocation14_spill] sm:$0xff] %v3666_v31  ;;  %v3676_v18 = vpop.permute.xlu1 %1482  ;;  %v3678_v2 = vpop.permute.xlu0 %1526  ;;  %v3682_v50 = vmul.f32 %v3004_v58, %v4700_v27  ;;  %v3689_v31 = vadd.f32 %v568_v47, %v371_v13  ;;  %v3697_v58 = vadd.f32 %v570_v36, %v373_v62  ;;  %v1208_v23 = vadd.f32 %v1176_v44, %v1011_v46  ;;  %v4705_v13 = vld [vmem:[#allocation17_spill] sm:$0xff]  ;;  %v3713_v36 = vld [vmem:[%s4523_s1 + $0x6] ss:$0 sm:$0xff] }
 0x23c   : > { %4698 = vst [vmem:[#allocation15_spill] sm:$0xff] %v3676_v18  ;;  %4699 = vst [vmem:[#allocation10_spill] sm:$0xff] %v3678_v2  ;;  %v575_v18 = vmul.f32 %v3009_v60, %v4702_v34  ;;  %v4703_v2 = vld [vmem:[#allocation22_spill] sm:$0xff]  ;;  %v603_v11 = vadd.f32 %v571_v5, %v374_v7  ;;  %v3705_v47 = vmul.f32 %v3009_v60, %v4705_v13  ;;  %v4707_v27 = vld [vmem:[#allocation57_spill] sm:$0xff] }
 0x23d   : > { %v577_v29 = vmul.f32 %v3009_v60, %v4703_v2  ;;  %4704 = vst [vmem:[#allocation11_spill] sm:$0xff] %v3697_v58  ;;  %v768_v34 = vmul.f32 %v3140_v63, %v4706_v42  ;;  %v1013_v62 = vadd.f32 %v981_v52, %v4707_v27  ;;  %v1405_v5 = vadd.f32 %v1373_v15, %v1208_v23  ;;  %v4710_v13 = vld [vmem:[#allocation43_spill] sm:$0xff] }
 0x23e   : > { %1860 = vperm.xlu1 %2546, %v2633_v57   ;;  %1920 = vperm.xlu0 %2547, %v3529_v61   ;;  %v4709_v61 = vld [vmem:[#allocation82_spill] sm:$0xff]  ;;  %v1375_v2 = vmul.f32 %v3471_v12, %v3430_v4  ;;  %v605_v40 = vadd.f32 %v573_v0, %v376_v56  ;;  %v607_v57 = vadd.f32 %v575_v18, %v378_v28  ;;  %v4711_v4 = vld [vmem:[#allocation24_spill] sm:$0xff]  ;;  %v4714_v23 = vld [vmem:[#allocation59_spill] sm:$0xff] }
 0x23f   : > { %v1491_v20 = vpop.permute.xlu1 %1490  ;;  %v3715_v44 = vpop.permute.xlu0 %1534  ;;  %v983_v7 = vmul.f32 %v3447_v17, %v4709_v61  ;;  %v3722_v52 = vadd.f32 %v577_v29, %v380_v35  ;;  %v770_v42 = vmul.f32 %v3140_v63, %v4710_v13  ;;  %v1210_v27 = vadd.f32 %v1178_v33, %v1013_v62  ;;  %v2634_v61 = vld [vmem:[%s2697_s18 + $0x68] sm:$0xff]  ;;  %v4712_v56 = vld [vmem:[#allocation66_spill] sm:$0xff]  ;;  %v4713_v35 = vld [vmem:[#allocation84_spill] sm:$0xff] }
 0x240   : > { %4708 = vst [vmem:[#allocation16_spill] sm:$0xff] %v3715_v44  ;;  %v1570_v46 = vmul.f32 %v3713_v36, %v1491_v20  ;;  %v1180_v44 = vmul.f32 %v3456_v10, %v3368_v22  ;;  %v3734_v15 = vmul.f32 %v3009_v60, %v4711_v4  ;;  %v800_v28 = vadd.f32 %v768_v34, %v603_v11  ;;  %v4715_v11 = vld [vmem:[#allocation45_spill] sm:$0xff]  ;;  %v4718_v4 = vld [vmem:[#allocation86_spill] sm:$0xff] }
 0x241   : > { %v965_v29 = vmul.f32 %v3447_v17, %v4712_v56  ;;  %v985_v18 = vmul.f32 %v3447_v17, %v4713_v35  ;;  %v1015_v33 = vadd.f32 %v983_v7, %v4714_v23  ;;  %v1407_v62 = vadd.f32 %v1375_v2, %v1210_v27  ;;  %v2635_v27 = vld [vmem:[%s2697_s18 + $0x78] sm:$0xff]  ;;  %v4719_v35 = vld [vmem:[#allocation99_spill] sm:$0xff] }
 0x242   : > { %v3728_v58 = vadd.f32 %v1570_v46, %v1405_v5  ;;  %1868 = vperm.xlu1 %2546, %v2634_v61   ;;  %1928 = vperm.xlu0 %2547, %v3538_v16   ;;  %v1377_v16 = vmul.f32 %v3471_v12, %v3436_v1  ;;  %v802_v20 = vadd.f32 %v770_v42, %v605_v40  ;;  %v4716_v5 = vld [vmem:[#allocation68_spill] sm:$0xff]  ;;  %v4717_v40 = vld [vmem:[#allocation61_spill] sm:$0xff] }
 0x243   : > { %v1499_v0 = vpop.permute.xlu1 %1498  ;;  %v3740_v22 = vpop.permute.xlu0 %1542  ;;  %v772_v34 = vmul.f32 %v3140_v63, %v4715_v11  ;;  %v967_v46 = vmul.f32 %v3447_v17, %v4716_v5  ;;  %v1162_v13 = vmul.f32 %v3456_v10, %v3314_v59  ;;  %v1212_v61 = vadd.f32 %v1180_v44, %v1015_v33 }
 0x244   : > { %v1572_v60 = vmul.f32 %v3713_v36, %v1499_v0  ;;  %v1182_v7 = vmul.f32 %v3456_v10, %v3374_v24  ;;  %v997_v1 = vadd.f32 %v965_v29, %v800_v28  ;;  %v1017_v42 = vadd.f32 %v985_v18, %v4717_v40  ;;  %v4720_v18 = vld [vmem:[#allocation47_spill] sm:$0xff] }
 0x245   : > { %v987_v56 = vmul.f32 %v3447_v17, %v4718_v4  ;;  %v1359_v59 = vmul.f32 %v3471_v12, %v3386_v30  ;;  %v1164_v24 = vmul.f32 %v3456_v10, %v4719_v35  ;;  %v1409_v0 = vadd.f32 %v1377_v16, %v1212_v61  ;;  %v4721_v61 = vld [vmem:[#allocation70_spill] sm:$0xff]  ;;  %v4723_v4 = vld [vmem:[#allocation101_spill] sm:$0xff] }
 0x246   : > { %v3754_v2 = vadd.f32 %v1572_v60, %v1407_v62  ;;  %1876 = vperm.xlu1 %2546, %v2635_v27   ;;  %1936 = vperm.xlu0 %2547, %v3547_v8   ;;  %v1379_v23 = vmul.f32 %v3471_v12, %v3442_v6  ;;  %v804_v29 = vadd.f32 %v772_v34, %v607_v57  ;;  %v2636_v6 = vld [vmem:[%s2697_s18 + $0x88] sm:$0xff] }
 0x247   : > { %v1507_v44 = vpop.permute.xlu1 %1506  ;;  %v774_v33 = vmul.f32 %v3140_v63, %v4720_v18  ;;  %v1194_v62 = vadd.f32 %v1162_v13, %v997_v1  ;;  %v1556_v30 = vmul.f32 %v3713_v36, %v3551_v54  ;;  %v999_v60 = vadd.f32 %v967_v46, %v802_v20  ;;  %v4722_v57 = vld [vmem:[#allocation63_spill] sm:$0xff] }
 0x248   : > { %v1574_v8 = vmul.f32 %v3713_v36, %v1507_v44  ;;  %v3768_v28 = vpop.permute.xlu0 %1619  ;;  %v1214_v11 = vadd.f32 %v1182_v7, %v1017_v42  ;;  %v1184_v16 = vmul.f32 %v3456_v10, %v3380_v26  ;;  %v969_v27 = vmul.f32 %v3447_v17, %v4721_v61  ;;  %v3789_v7 = vld [vmem:[%s4523_s1 + $0x7] ss:$0 sm:$0xff] }
 0x249   : > { %v1019_v34 = vadd.f32 %v987_v56, %v4722_v57  ;;  %v1391_v40 = vadd.f32 %v1359_v59, %v1194_v62  ;;  %v1361_v13 = vmul.f32 %v3471_v12, %v3390_v51  ;;  %v1196_v20 = vadd.f32 %v1164_v24, %v999_v60  ;;  %v4725_v60 = vld [vmem:[#allocation116_spill] sm:$0xff] }
 0x24a   : > { %v3776_v5 = vadd.f32 %v1574_v8, %v1409_v0  ;;  %1884 = vperm.xlu1 %2546, %v2636_v6   ;;  %v1411_v46 = vadd.f32 %v1379_v23, %v1214_v11  ;;  %v1381_v26 = vmul.f32 %v3471_v12, %v3460_v21  ;;  %v1166_v56 = vmul.f32 %v3456_v10, %v4723_v4  ;;  %v4724_v21 = vld [vmem:[#allocation72_spill] sm:$0xff]  ;;  %v2637_v8 = vld [vmem:[%s2697_s18 + $0x98] sm:$0xff]  ;;  %v2639_v4 = vld [vmem:[%s2697_s18 + $0xa8] sm:$0xff] }
 0x24b   : > { %v1515_v54 = vpop.permute.xlu1 %1514  ;;  %v1588_v59 = vadd.f32 %v1556_v30, %v1391_v40  ;;  %v1558_v51 = vmul.f32 %v3713_v36, %v3557_v14  ;;  %v806_v35 = vadd.f32 %v774_v33, %v3722_v52  ;;  %v971_v24 = vmul.f32 %v3447_v17, %v4724_v21  ;;  %v4726_v6 = vld [vmem:[#allocation49_spill] sm:$0xff]  ;;  %v4727_v33 = vld [vmem:[#allocation103_spill] sm:$0xff] }
 0x24c   : > { %v1576_v1 = vmul.f32 %v3713_v36, %v1515_v54  ;;  %v1632_v42 = vpop.permute.xlu0 %1631  ;;  %v1216_v0 = vadd.f32 %v1184_v16, %v1019_v34  ;;  %v1001_v18 = vadd.f32 %v969_v27, %v804_v29  ;;  %v1393_v62 = vadd.f32 %v1361_v13, %v1196_v20  ;;  %v3820_v20 = vld [vmem:[%s4523_s1 + $0x1] ss:$0 sm:$0xff]  ;;  %v4730_v21 = vld [vmem:[#allocation51_spill] sm:$0xff] }
 0x24d   : > { %v1753_v44 = vmul.f32 %v3789_v7, %v1632_v42  ;;  %v1363_v30 = vmul.f32 %v3471_v12, %v4725_v60  ;;  %v776_v52 = vmul.f32 %v3140_v63, %v4726_v6  ;;  %v1168_v61 = vmul.f32 %v3456_v10, %v4727_v33  ;;  %v4732_v6 = vld [vmem:[#allocation28_spill] sm:$0xff] }
 0x24e   : > { %v3800_v23 = vadd.f32 %v1576_v1, %v1411_v46  ;;  %1892 = vperm.xlu1 %2546, %v2637_v8   ;;  %v1413_v16 = vadd.f32 %v1381_v26, %v1216_v0  ;;  %v1198_v40 = vadd.f32 %v1166_v56, %v1001_v18  ;;  %v1590_v29 = vadd.f32 %v1558_v51, %v1393_v62  ;;  %v4728_v46 = vld [vmem:[#allocation26_spill] sm:$0xff]  ;;  %v4731_v18 = vld [vmem:[#allocation105_spill] sm:$0xff]  ;;  %v4733_v33 = vld [vmem:[#allocation76_spill] sm:$0xff] }
 0x24f   : > { %v3805_v11 = vadd.f32 %v1753_v44, %v1588_v59  ;;  %v1523_v14 = vpop.permute.xlu1 %1522  ;;  %v1560_v27 = vmul.f32 %v3713_v36, %v3562_v3  ;;  %v611_v54 = vadd.f32 %v3734_v15, %v3604_v37  ;;  %v581_v26 = vmul.f32 %v3820_v20, %v4728_v46  ;;  %v4729_v56 = vld [vmem:[#allocation74_spill] sm:$0xff]  ;;  %v4736_v46 = vld [vmem:[#allocation107_spill] sm:$0xff] }
 0x250   : > { %v1578_v57 = vmul.f32 %v3713_v36, %v1523_v14  ;;  %v1640_v34 = vpop.permute.xlu0 %1639  ;;  %v1003_v1 = vadd.f32 %v971_v24, %v806_v35  ;;  %v973_v3 = vmul.f32 %v3447_v17, %v4729_v56  ;;  %v1395_v59 = vadd.f32 %v1363_v30, %v1198_v40 }
 0x251   : > { %v1755_v13 = vmul.f32 %v3789_v7, %v1640_v34  ;;  %v1365_v37 = vmul.f32 %v3471_v12, %v3400_v55  ;;  %v808_v44 = vadd.f32 %v776_v52, %v611_v54  ;;  %v778_v0 = vmul.f32 %v3140_v63, %v4730_v21  ;;  %v2641_v21 = vld [vmem:[%s2697_s18 + $0xc8] sm:$0xff] }
 0x252   : > { %v3824_v42 = vadd.f32 %v1578_v57, %v1413_v16  ;;  %1900 = vperm.xlu1 %2546, %v2639_v4   ;;  %v1200_v35 = vadd.f32 %v1168_v61, %v1003_v1  ;;  %v1170_v62 = vmul.f32 %v3456_v10, %v4731_v18  ;;  %v1592_v60 = vadd.f32 %v1560_v27, %v1395_v59  ;;  %v2640_v57 = vld [vmem:[%s2697_s18 + $0xb8] sm:$0xff]  ;;  %v4737_v59 = vld [vmem:[#allocation19_spill] sm:$0xff] }
 0x253   : > { %v3831_v15 = vadd.f32 %v1755_v13, %v1590_v29  ;;  %v1531_v51 = vpop.permute.xlu1 %1530  ;;  %v1562_v30 = vmul.f32 %v3713_v36, %v3567_v48  ;;  %v613_v14 = vadd.f32 %v581_v26, %v3614_v41  ;;  %v583_v52 = vmul.f32 %v3820_v20, %v4732_v6  ;;  %v4735_v13 = vld [vmem:[#allocation53_spill] sm:$0xff] }
 0x254   : > { %v1580_v24 = vmul.f32 %v3713_v36, %v1531_v51  ;;  %v1648_v8 = vpop.permute.xlu0 %1647  ;;  %v975_v61 = vmul.f32 %v3447_v17, %v4733_v33  ;;  %v1005_v34 = vadd.f32 %v973_v3, %v808_v44  ;;  %v1397_v40 = vadd.f32 %v1365_v37, %v1200_v35 }
 0x255   : > { %v1757_v55 = vmul.f32 %v3789_v7, %v1648_v8  ;;  %v1367_v48 = vmul.f32 %v3471_v12, %v3406_v49  ;;  %v810_v27 = vadd.f32 %v778_v0, %v613_v14  ;;  %v780_v54 = vmul.f32 %v3140_v63, %v4735_v13  ;;  %v4738_v0 = vld [vmem:[#allocation78_spill] sm:$0xff]  ;;  %v4741_v14 = vld [vmem:[#allocation109_spill] sm:$0xff] }
 0x256   : > { %v3847_v16 = vadd.f32 %v1580_v24, %v3480_v25  ;;  %1908 = vperm.xlu1 %2546, %v2640_v57   ;;  %v1172_v26 = vmul.f32 %v3456_v10, %v4736_v46  ;;  %v1202_v4 = vadd.f32 %v1170_v62, %v1005_v34  ;;  %v1594_v56 = vadd.f32 %v1562_v30, %v1397_v40  ;;  %v4740_v62 = vld [vmem:[#allocation21_spill] sm:$0xff] }
 0x257   : > { %v3852_v29 = vadd.f32 %v1757_v55, %v1592_v60  ;;  %v1539_v41 = vpop.permute.xlu1 %1538  ;;  %v1564_v3 = vmul.f32 %v3713_v36, %v3572_v38  ;;  %v574_v37 = vmul.f32 %v3820_v20, %v4737_v59  ;;  %v615_v51 = vadd.f32 %v583_v52, %v3622_v45  ;;  %v4743_v34 = vld [vmem:[#allocation25_spill] sm:$0xff] }
 0x258   : > { %v1582_v25 = vmul.f32 %v3713_v36, %v1539_v41  ;;  %v1656_v1 = vpop.permute.xlu0 %1655  ;;  %v1007_v44 = vadd.f32 %v975_v61, %v810_v27  ;;  %v977_v35 = vmul.f32 %v3447_v17, %v4738_v0  ;;  %v1399_v24 = vadd.f32 %v1367_v48, %v1202_v4  ;;  %v4742_v61 = vld [vmem:[#allocation23_spill] sm:$0xff]  ;;  %v2642_v13 = vld [vmem:[%s2697_s18 + $0xd8] sm:$0xff] }
 0x259   : > { %4734 = vst [vmem:[#allocation12_spill] sm:$0xff] %v3852_v29  ;;  %v1759_v49 = vmul.f32 %v3789_v7, %v1656_v1  ;;  %v1369_v38 = vmul.f32 %v3471_v12, %v3412_v53  ;;  %v576_v45 = vmul.f32 %v3820_v20, %v4740_v62  ;;  %v812_v60 = vadd.f32 %v780_v54, %v615_v51  ;;  %v4744_v48 = vld [vmem:[#allocation27_spill] sm:$0xff]  ;;  %v4749_v59 = vld [vmem:[#allocation29_spill] sm:$0xff]  ;;  %v4785_v29 = vld [vmem:[#allocation60_spill] sm:$0xff] }
 0x25a   : > { %v3866_v63 = vadd.f32 %v1582_v25, %v3489_v19  ;;  %1916 = vperm.xlu1 %2546, %v2641_v21   ;;  %v1204_v30 = vadd.f32 %v1172_v26, %v1007_v44  ;;  %v1174_v6 = vmul.f32 %v3456_v10, %v4741_v14  ;;  %v1596_v52 = vadd.f32 %v1564_v3, %v1399_v24  ;;  %v4746_v25 = vld [vmem:[#allocation146_spill] sm:$0xff]  ;;  %v4747_v4 = vld [vmem:[#allocation147_spill] sm:$0xff]  ;;  %v4748_v3 = vld [vmem:[#allocation148_spill] sm:$0xff] }
 0x25b   : > { %v3873_v8 = vadd.f32 %v1759_v49, %v1594_v56  ;;  %v1547_v18 = vpop.permute.xlu1 %1546  ;;  %v1566_v33 = vmul.f32 %v3713_v36, %v3624_v39  ;;  %v578_v57 = vmul.f32 %v3820_v20, %v4742_v61  ;;  %v580_v40 = vmul.f32 %v3820_v20, %v4743_v34  ;;  %v4753_v62 = vld [vmem:[#allocation31_spill] sm:$0xff]  ;;  %v4758_v61 = vld [vmem:[#allocation5_spill] sm:$0xff] }
 0x25c   : > { %v1584_v19 = vmul.f32 %v3713_v36, %v1547_v18  ;;  %v1664_v55 = vpop.permute.xlu0 %1663  ;;  %v582_v41 = vmul.f32 %v3820_v20, %v4744_v48  ;;  %v1009_v54 = vadd.f32 %v977_v35, %v812_v60  ;;  %v1401_v46 = vadd.f32 %v1369_v38, %v1204_v30  ;;  %v4750_v35 = vld [vmem:[#allocation15_spill] sm:$0xff]  ;;  %v4751_v38 = vld [vmem:[#allocation149_spill] sm:$0xff]  ;;  %v4754_v60 = vld [vmem:[#allocation32_spill] sm:$0xff] }
 0x25d   : > { %4739 = vst [vmem:[#allocation18_spill] sm:$0xff] %v3873_v8  ;;  %v1761_v53 = vmul.f32 %v3789_v7, %v1664_v55  ;;  %v1371_v39 = vmul.f32 %v3471_v12, %v3418_v9  ;;  %v604_v1 = vadd.f32 %v3705_v47, %v4746_v25  ;;  %v606_v56 = vadd.f32 %v574_v37, %v4747_v4  ;;  %v4752_v47 = vld [vmem:[#allocation30_spill] sm:$0xff]  ;;  %v4759_v34 = vld [vmem:[#allocation33_spill] sm:$0xff] }
 0x25e   : > { %v3890_v27 = vadd.f32 %v1584_v19, %v3496_v32  ;;  %1924 = vperm.xlu1 %2546, %v2642_v13   ;;  %v608_v49 = vadd.f32 %v576_v45, %v4748_v3  ;;  %v584_v32 = vmul.f32 %v3820_v20, %v4749_v59  ;;  %v1206_v21 = vadd.f32 %v1174_v6, %v1009_v54  ;;  %v2643_v19 = vld [vmem:[%s2697_s18 + $0xe8] sm:$0xff]  ;;  %v4755_v55 = vld [vmem:[#allocation2_spill] sm:$0xff]  ;;  %v4756_v6 = vld [vmem:[#allocation4_spill] sm:$0xff] }
 0x25f   : > { %v3895_v26 = vadd.f32 %v1761_v53, %v1596_v52  ;;  %v1598_v0 = vadd.f32 %v1566_v33, %v1401_v46  ;;  %v1568_v9 = vmul.f32 %v3713_v36, %v4750_v35  ;;  %v610_v18 = vadd.f32 %v578_v57, %v4751_v38  ;;  %v4760_v13 = vld [vmem:[#allocation34_spill] sm:$0xff]  ;;  %v4761_v46 = vld [vmem:[#allocation35_spill] sm:$0xff]  ;;  %v4762_v3 = vld [vmem:[#allocation36_spill] sm:$0xff] }
 0x260   : > { %v3903_v51 = vpop.permute.xlu1 %1623  ;;  %v1672_v44 = vpop.permute.xlu0 %1671  ;;  %v586_v37 = vmul.f32 %v3820_v20, %v4752_v47  ;;  %v588_v45 = vmul.f32 %v3820_v20, %v4753_v62  ;;  %v590_v30 = vmul.f32 %v3820_v20, %v4754_v60  ;;  %v612_v14 = vadd.f32 %v580_v40, %v4755_v55  ;;  %v4763_v59 = vld [vmem:[#allocation37_spill] sm:$0xff]  ;;  %v4766_v47 = vld [vmem:[#allocation7_spill] sm:$0xff]  ;;  %v4767_v60 = vld [vmem:[#allocation38_spill] sm:$0xff] }
 0x261   : > { %4745 = vst [vmem:[#allocation20_spill] sm:$0xff] %v3895_v26  ;;  %v1763_v24 = vmul.f32 %v3789_v7, %v1672_v44  ;;  %v614_v52 = vadd.f32 %v582_v41, %v4756_v6  ;;  %v1403_v33 = vadd.f32 %v1371_v39, %v1206_v21  ;;  %v616_v57 = vadd.f32 %v584_v32, %v4758_v61  ;;  %v2644_v39 = vld [vmem:[%s4523_s1 + $0x2] ss:$0 sm:$0xff]  ;;  %v2645_v55 = vld [vmem:[%s2697_s18 + $0xf8] sm:$0xff]  ;;  %v4769_v61 = vld [vmem:[#allocation40_spill] sm:$0xff]  ;;  %s2436_s18 = sshll.u32 %s4869_s14, 2 }
 0x262   : > { %1932 = vperm.xlu1 %2546, %v2643_v19   ;;  %v592_v48 = vmul.f32 %v3820_v20, %v4759_v34  ;;  %v594_v54 = vmul.f32 %v3820_v20, %v4760_v13  ;;  %v596_v25 = vmul.f32 %v3820_v20, %v4761_v46  ;;  %v598_v41 = vmul.f32 %v3820_v20, %v4762_v3  ;;  %v4768_v20 = vld [vmem:[#allocation39_spill] sm:$0xff]  ;;  %v4770_v13 = vld [vmem:[#allocation42_spill] sm:$0xff]  ;;  %s4267_s20 = scalar_lea.vmem %s4525_s3, %s2436_s18 }
 0x263   : > { %v3918_v53 = vadd.f32 %v1763_v24, %v1598_v0  ;;  %v765_v32 = vmul.f32 %v2644_v39, %v4763_v59  ;;  %v1600_v44 = vadd.f32 %v1568_v9, %v1403_v33  ;;  %v4764_v0 = vld [vmem:[#allocation13_spill] sm:$0xff]  ;;  %v4765_v24 = vld [vmem:[#allocation6_spill] sm:$0xff]  ;;  %v622_v62 = vadd.f32 %v590_v30, %v4766_v47  ;;  %v4772_v9 = vld [vmem:[#allocation8_spill] sm:$0xff] }
 0x264   : > { %v3927_v4 = vpop.permute.xlu1 %1627  ;;  %v1680_v40 = vpop.permute.xlu0 %1679  ;;  %v618_v35 = vadd.f32 %v586_v37, %v4764_v0  ;;  %v620_v38 = vadd.f32 %v588_v45, %v4765_v24  ;;  %v766_v19 = vmul.f32 %v2644_v39, %v4767_v60  ;;  %v767_v6 = vmul.f32 %v2644_v39, %v4768_v20  ;;  %v4774_v59 = vld [vmem:[#allocation44_spill] sm:$0xff]  ;;  %v4775_v0 = vld [vmem:[#allocation46_spill] sm:$0xff]  ;;  %v4776_v60 = vld [vmem:[#allocation9_spill] sm:$0xff] }
 0x265   : > { %4757 = vst [vmem:[#allocation22_spill] sm:$0xff] %v3918_v53  ;;  %v1765_v21 = vmul.f32 %v3789_v7, %v1680_v40  ;;  %v769_v34 = vmul.f32 %v2644_v39, %v4769_v61  ;;  %v771_v46 = vmul.f32 %v2644_v39, %v4770_v13  ;;  %v624_v33 = vadd.f32 %v592_v48, %v4772_v9  ;;  %v4773_v40 = vld [vmem:[#allocation14_spill] sm:$0xff]  ;;  %v4777_v48 = vld [vmem:[#allocation48_spill] sm:$0xff] }
 0x266   : > { %1940 = vperm.xlu1 %2546, %v2645_v55   ;;  %v626_v37 = vadd.f32 %v594_v54, %v4773_v40  ;;  %v773_v45 = vmul.f32 %v2644_v39, %v4774_v59  ;;  %v775_v30 = vmul.f32 %v2644_v39, %v4775_v0  ;;  %v628_v55 = vadd.f32 %v596_v25, %v4776_v60  ;;  %v4778_v54 = vld [vmem:[#allocation50_spill] sm:$0xff]  ;;  %v4779_v40 = vld [vmem:[#allocation52_spill] sm:$0xff]  ;;  %v4780_v0 = vld [vmem:[#allocation11_spill] sm:$0xff] }
 0x267   : > { %v3944_v3 = vadd.f32 %v1765_v21, %v1600_v44  ;;  %v630_v20 = vadd.f32 %v598_v41, %v3682_v50  ;;  %v797_v61 = vadd.f32 %v765_v32, %v3689_v31  ;;  %v798_v21 = vadd.f32 %v766_v19, %v3684_v43  ;;  %v4781_v31 = vld [vmem:[#allocation54_spill] sm:$0xff] }
 0x268   : > { %v3950_v24 = vpop.permute.xlu1 %1635  ;;  %v1688_v47 = vpop.permute.xlu0 %1687  ;;  %v777_v13 = vmul.f32 %v2644_v39, %v4777_v48  ;;  %v779_v9 = vmul.f32 %v2644_v39, %v4778_v54  ;;  %v781_v59 = vmul.f32 %v2644_v39, %v4779_v40  ;;  %v801_v53 = vadd.f32 %v769_v34, %v604_v1  ;;  %v4783_v48 = vld [vmem:[#allocation56_spill] sm:$0xff]  ;;  %v4784_v8 = vld [vmem:[#allocation58_spill] sm:$0xff] }
 0x269   : > { %4771 = vst [vmem:[#allocation17_spill] sm:$0xff] %v3944_v3  ;;  %v1767_v44 = vmul.f32 %v3789_v7, %v1688_v47  ;;  %v799_v3 = vadd.f32 %v767_v6, %v4780_v0  ;;  %v803_v26 = vadd.f32 %v771_v46, %v606_v56  ;;  %v805_v50 = vadd.f32 %v773_v45, %v608_v49  ;;  %v4782_v47 = vld [vmem:[#allocation55_spill] sm:$0xff]  ;;  %v4786_v49 = vld [vmem:[#allocation62_spill] sm:$0xff]  ;;  %v4787_v46 = vld [vmem:[#allocation64_spill] sm:$0xff] }
 0x26a   : > { %v807_v41 = vadd.f32 %v775_v30, %v610_v18  ;;  %v783_v32 = vmul.f32 %v2644_v39, %v4781_v31  ;;  %v785_v60 = vmul.f32 %v2644_v39, %v4782_v47  ;;  %v787_v54 = vmul.f32 %v2644_v39, %v4783_v48  ;;  %v4788_v30 = vld [vmem:[#allocation65_spill] sm:$0xff]  ;;  %v4789_v0 = vld [vmem:[#allocation67_spill] sm:$0xff] }
 0x26b   : > { %v3962_v25 = vadd.f32 %v1767_v44, %v3728_v58  ;;  %v789_v40 = vmul.f32 %v2644_v39, %v4784_v8  ;;  %v791_v6 = vmul.f32 %v2644_v39, %v4785_v29  ;;  %v809_v56 = vadd.f32 %v777_v13, %v612_v14  ;;  %v4790_v48 = vld [vmem:[#allocation69_spill] sm:$0xff] }
 0x26c   : > { %v3966_v43 = vpop.permute.xlu1 %1643  ;;  %v1696_v19 = vpop.permute.xlu0 %1695  ;;  %v811_v58 = vadd.f32 %v779_v9, %v614_v52  ;;  %v813_v34 = vadd.f32 %v781_v59, %v616_v57  ;;  %v793_v18 = vmul.f32 %v2644_v39, %v4786_v49  ;;  %v795_v45 = vmul.f32 %v2644_v39, %v4787_v46  ;;  %v4791_v52 = vld [vmem:[#allocation71_spill] sm:$0xff] }
 0x26d   : > { %v1769_v1 = vmul.f32 %v3789_v7, %v1696_v19  ;;  %v962_v44 = vmul.f32 %v3447_v17, %v4788_v30  ;;  %v963_v31 = vmul.f32 %v3447_v17, %v4789_v0  ;;  %v815_v8 = vadd.f32 %v783_v32, %v618_v35  ;;  %v4792_v30 = vld [vmem:[#allocation73_spill] sm:$0xff]  ;;  %v4793_v35 = vld [vmem:[#allocation75_spill] sm:$0xff] }
 0x26e   : > { %v817_v29 = vadd.f32 %v785_v60, %v620_v38  ;;  %v964_v14 = vmul.f32 %v3447_v17, %v4790_v48  ;;  %v966_v57 = vmul.f32 %v3447_v17, %v4791_v52  ;;  %v819_v9 = vadd.f32 %v787_v54, %v622_v62  ;;  %v4794_v32 = vld [vmem:[#allocation77_spill] sm:$0xff]  ;;  %v4797_v54 = vld [vmem:[#allocation80_spill] sm:$0xff] }
 0x26f   : > { %v3979_v47 = vadd.f32 %v1769_v1, %v3754_v2  ;;  %v821_v59 = vadd.f32 %v789_v40, %v624_v33  ;;  %v823_v19 = vadd.f32 %v791_v6, %v626_v37  ;;  %v825_v46 = vadd.f32 %v793_v18, %v628_v55  ;;  %v4796_v37 = vld [vmem:[#allocation79_spill] sm:$0xff] }
 0x270   : > { %v3985_v13 = vpop.permute.xlu1 %1651  ;;  %v1704_v39 = vpop.permute.xlu0 %1703  ;;  %v968_v2 = vmul.f32 %v3447_v17, %v4792_v30  ;;  %v970_v38 = vmul.f32 %v3447_v17, %v4793_v35  ;;  %v972_v60 = vmul.f32 %v3447_v17, %v4794_v32  ;;  %v827_v1 = vadd.f32 %v795_v45, %v630_v20  ;;  %v4799_v20 = vld [vmem:[#allocation83_spill] sm:$0xff]  ;;  %v4803_v35 = vld [vmem:[#allocation89_spill] sm:$0xff] }
 0x271   : > { %v1771_v49 = vmul.f32 %v3789_v7, %v1704_v39  ;;  %v994_v0 = vadd.f32 %v962_v44, %v797_v61  ;;  %v995_v48 = vadd.f32 %v963_v31, %v798_v21  ;;  %v996_v62 = vadd.f32 %v964_v14, %v799_v3  ;;  %v4798_v39 = vld [vmem:[#allocation81_spill] sm:$0xff]  ;;  %v4801_v31 = vld [vmem:[#allocation87_spill] sm:$0xff] }
 0x272   : > { %v998_v33 = vadd.f32 %v966_v57, %v801_v53  ;;  %v974_v55 = vmul.f32 %v3447_v17, %v4796_v37  ;;  %v976_v40 = vmul.f32 %v3447_v17, %v4797_v54  ;;  %v978_v30 = vmul.f32 %v3447_v17, %v4798_v39  ;;  %v4800_v21 = vld [vmem:[#allocation85_spill] sm:$0xff]  ;;  %v4802_v57 = vld [vmem:[#allocation88_spill] sm:$0xff]  ;;  %v4804_v37 = vld [vmem:[#allocation90_spill] sm:$0xff] }
 0x273   : > { %v3995_v52 = vadd.f32 %v1771_v49, %v3776_v5  ;;  %v980_v61 = vmul.f32 %v3447_v17, %v4799_v20  ;;  %v982_v5 = vmul.f32 %v3447_v17, %v4800_v21  ;;  %v1000_v3 = vadd.f32 %v968_v2, %v803_v26  ;;  %v4805_v26 = vld [vmem:[#allocation91_spill] sm:$0xff] }
 0x274   : > { %v4001_v6 = vpop.permute.xlu1 %1659  ;;  %v1712_v18 = vpop.permute.xlu0 %1711  ;;  %v1002_v45 = vadd.f32 %v970_v38, %v805_v50  ;;  %v1004_v44 = vadd.f32 %v972_v60, %v807_v41  ;;  %v984_v14 = vmul.f32 %v3447_v17, %v4801_v31  ;;  %v986_v49 = vmul.f32 %v3447_v17, %v4802_v57  ;;  %v4806_v41 = vld [vmem:[#allocation92_spill] sm:$0xff] }
 0x275   : > { %4795 = vst [vmem:[#allocation41_spill] sm:$0xff] %v3995_v52  ;;  %v1773_v53 = vmul.f32 %v3789_v7, %v1712_v18  ;;  %v988_v32 = vmul.f32 %v3447_v17, %v4803_v35  ;;  %v990_v54 = vmul.f32 %v3447_v17, %v4804_v37  ;;  %v1006_v20 = vadd.f32 %v974_v55, %v809_v56  ;;  %v4807_v52 = vld [vmem:[#allocation93_spill] sm:$0xff]  ;;  %v4808_v56 = vld [vmem:[#allocation94_spill] sm:$0xff]  ;;  %v4809_v55 = vld [vmem:[#allocation95_spill] sm:$0xff] }
 0x276   : > { %v1008_v18 = vadd.f32 %v976_v40, %v811_v58  ;;  %v1160_v50 = vmul.f32 %v3456_v10, %v4805_v26  ;;  %v992_v2 = vmul.f32 %v3447_v17, %v4806_v41  ;;  %v1010_v21 = vadd.f32 %v978_v30, %v813_v34  ;;  %v4812_v30 = vld [vmem:[#allocation97_spill] sm:$0xff] }
 0x277   : > { %v4019_v39 = vadd.f32 %v1773_v53, %v3800_v23  ;;  %v1012_v31 = vadd.f32 %v980_v61, %v815_v8  ;;  %v1014_v57 = vadd.f32 %v982_v5, %v817_v29  ;;  %v1016_v37 = vadd.f32 %v984_v14, %v819_v9  ;;  %v4811_v29 = vld [vmem:[#allocation96_spill] sm:$0xff]  ;;  %v4813_v14 = vld [vmem:[#allocation98_spill] sm:$0xff] }
 0x278   : > { %v4025_v38 = vpop.permute.xlu1 %1667  ;;  %v1720_v60 = vpop.permute.xlu0 %1719  ;;  %v1163_v23 = vmul.f32 %v3456_v10, %v4807_v52  ;;  %v1159_v58 = vmul.f32 %v3456_v10, %v4808_v56  ;;  %v1165_v40 = vmul.f32 %v3456_v10, %v4809_v55  ;;  %v1018_v53 = vadd.f32 %v986_v49, %v821_v59  ;;  %v4814_v59 = vld [vmem:[#allocation100_spill] sm:$0xff] }
 0x279   : > { %v1775_v35 = vmul.f32 %v3789_v7, %v1720_v60  ;;  %v1020_v17 = vadd.f32 %v988_v32, %v823_v19  ;;  %v1022_v26 = vadd.f32 %v990_v54, %v825_v46  ;;  %v1192_v34 = vadd.f32 %v1160_v50, %v995_v48  ;;  %v4815_v46 = vld [vmem:[#allocation102_spill] sm:$0xff]  ;;  %v4816_v54 = vld [vmem:[#allocation104_spill] sm:$0xff] }
 0x27a   : > { %v1024_v8 = vadd.f32 %v992_v2, %v827_v1  ;;  %v1161_v9 = vmul.f32 %v3456_v10, %v4811_v29  ;;  %v1167_v52 = vmul.f32 %v3456_v10, %v4812_v30  ;;  %v1169_v60 = vmul.f32 %v3456_v10, %v4813_v14  ;;  %v4817_v2 = vld [vmem:[#allocation106_spill] sm:$0xff]  ;;  %v4818_v56 = vld [vmem:[#allocation108_spill] sm:$0xff] }
 0x27b   : > { %v4035_v41 = vadd.f32 %v1775_v35, %v3824_v42  ;;  %v1171_v19 = vmul.f32 %v3456_v10, %v4814_v59  ;;  %v1173_v42 = vmul.f32 %v3456_v10, %v4815_v46  ;;  %v1195_v48 = vadd.f32 %v1163_v23, %v998_v33  ;;  %v4819_v29 = vld [vmem:[#allocation110_spill] sm:$0xff]  ;;  %v4820_v33 = vld [vmem:[#allocation111_spill] sm:$0xff] }
 0x27c   : > { %v4041_v61 = vpop.permute.xlu1 %1675  ;;  %v1728_v5 = vpop.permute.xlu0 %1727  ;;  %v1191_v49 = vadd.f32 %v1159_v58, %v994_v0  ;;  %v1197_v32 = vadd.f32 %v1165_v40, %v1000_v3  ;;  %v1175_v50 = vmul.f32 %v3456_v10, %v4816_v54  ;;  %v1177_v35 = vmul.f32 %v3456_v10, %v4817_v2  ;;  %v4821_v3 = vld [vmem:[#allocation112_spill] sm:$0xff] }
 0x27d   : > { %4810 = vst [vmem:[#allocation57_spill] sm:$0xff] %v4035_v41  ;;  %v1777_v1 = vmul.f32 %v3789_v7, %v1728_v5  ;;  %v1179_v55 = vmul.f32 %v3456_v10, %v4818_v56  ;;  %v1181_v30 = vmul.f32 %v3456_v10, %v4819_v29  ;;  %v1193_v59 = vadd.f32 %v1161_v9, %v996_v62  ;;  %v4822_v41 = vld [vmem:[#allocation113_spill] sm:$0xff]  ;;  %v4823_v62 = vld [vmem:[#allocation114_spill] sm:$0xff] }
 0x27e   : > { %v1199_v5 = vadd.f32 %v1167_v52, %v1002_v45  ;;  %v1183_v0 = vmul.f32 %v3456_v10, %v4820_v33  ;;  %v1185_v23 = vmul.f32 %v3456_v10, %v4821_v3  ;;  %v1201_v46 = vadd.f32 %v1169_v60, %v1004_v44  ;;  %v4824_v9 = vld [vmem:[#allocation117_spill] sm:$0xff]  ;;  %v4827_v60 = vld [vmem:[#allocation130_spill] sm:$0xff] }
 0x27f   : > { %v4059_v14 = vadd.f32 %v1777_v1, %v3847_v16  ;;  %v1203_v54 = vadd.f32 %v1171_v19, %v1006_v20  ;;  %v1205_v2 = vadd.f32 %v1173_v42, %v1008_v18  ;;  %v1207_v29 = vadd.f32 %v1175_v50, %v1010_v21  ;;  %v4826_v21 = vld [vmem:[#allocation115_spill] sm:$0xff]  ;;  %v4830_v50 = vld [vmem:[#allocation120_spill] sm:$0xff] }
 0x280   : > { %v4065_v58 = vpop.permute.xlu1 %1683  ;;  %v1736_v40 = vpop.permute.xlu0 %1735  ;;  %v1187_v16 = vmul.f32 %v3456_v10, %v4822_v41  ;;  %v1189_v45 = vmul.f32 %v3456_v10, %v4823_v62  ;;  %v1357_v52 = vmul.f32 %v3471_v12, %v4824_v9  ;;  %v1209_v1 = vadd.f32 %v1177_v35, %v1012_v31  ;;  %v4829_v42 = vld [vmem:[#allocation119_spill] sm:$0xff] }
 0x281   : > { %v1779_v56 = vmul.f32 %v3789_v7, %v1736_v40  ;;  %v4074_v33 = vadd.f32 %v1179_v55, %v1014_v57  ;;  %v4076_v3 = vadd.f32 %v1181_v30, %v1016_v37  ;;  %v4081_v20 = vadd.f32 %v1183_v0, %v1018_v53  ;;  %v4828_v57 = vld [vmem:[#allocation118_spill] sm:$0xff]  ;;  %v4833_v9 = vld [vmem:[#allocation123_spill] sm:$0xff] }
 0x282   : > { %v4083_v18 = vadd.f32 %v1185_v23, %v1020_v17  ;;  %v1356_v41 = vmul.f32 %v3471_v12, %v4826_v21  ;;  %v1554_v10 = vmul.f32 %v3713_v36, %v4827_v60  ;;  %v1358_v37 = vmul.f32 %v3471_v12, %v4828_v57  ;;  %v4831_v23 = vld [vmem:[#allocation121_spill] sm:$0xff] }
 0x283   : > { %v4079_v44 = vadd.f32 %v1779_v56, %v3866_v63  ;;  %v1360_v63 = vmul.f32 %v3471_v12, %v4829_v42  ;;  %v1362_v53 = vmul.f32 %v3471_v12, %v4830_v50  ;;  %v1219_v35 = vadd.f32 %v1187_v16, %v1022_v26  ;;  %v4832_v56 = vld [vmem:[#allocation122_spill] sm:$0xff]  ;;  %v4112_v26 = vld [vmem:[%s4523_s1 + $0x8] ss:$0 sm:$0xff] }
 0x284   : > { %v4089_v19 = vpop.permute.xlu1 %1691  ;;  %v1744_v31 = vpop.permute.xlu0 %1743  ;;  %v1221_v55 = vadd.f32 %v1189_v45, %v1024_v8  ;;  %v1389_v30 = vadd.f32 %v1357_v52, %v1192_v34  ;;  %v1751_v0 = vmul.f32 %v3789_v7, %v3903_v51  ;;  %v1364_v40 = vmul.f32 %v3471_v12, %v4831_v23  ;;  %v4835_v34 = vld [vmem:[#allocation124_spill] sm:$0xff]  ;;  %v4836_v8 = vld [vmem:[#allocation125_spill] sm:$0xff] }
 0x285   : > { %4825 = vst [vmem:[#allocation82_spill] sm:$0xff] %v4079_v44  ;;  %v1781_v17 = vmul.f32 %v3789_v7, %v1744_v31  ;;  %v1366_v62 = vmul.f32 %v3471_v12, %v4832_v56  ;;  %v1368_v21 = vmul.f32 %v3471_v12, %v4833_v9  ;;  %v1370_v51 = vmul.f32 %v3471_v12, %v4835_v34  ;;  %v4837_v52 = vld [vmem:[#allocation132_spill] sm:$0xff]  ;;  %v4838_v56 = vld [vmem:[#allocation126_spill] sm:$0xff] }
 0x286   : > { %v1372_v16 = vmul.f32 %v3471_v12, %v4836_v8  ;;  %v1586_v45 = vadd.f32 %v1554_v10, %v1389_v30  ;;  %v1557_v31 = vmul.f32 %v3713_v36, %v4837_v52  ;;  %v1388_v42 = vadd.f32 %v1356_v41, %v1191_v49  ;;  %v4839_v44 = vld [vmem:[#allocation134_spill] sm:$0xff] }
 0x287   : > { %v4107_v60 = vadd.f32 %v1781_v17, %v3890_v27  ;;  %v4122_v27 = vadd.f32 %v1358_v37, %v1193_v59  ;;  %v1392_v50 = vadd.f32 %v1360_v63, %v1195_v48  ;;  %v1394_v17 = vadd.f32 %v1362_v53, %v1197_v32  ;;  %v4136_v48 = vld [vmem:[%s4524_s2] ss:$0 sm:$0xff]  ;;  %v4840_v63 = vld [vmem:[#allocation127_spill] sm:$0xff]  ;;  %v4842_v53 = vld [vmem:[#allocation129_spill] sm:$0xff] }
 0x288   : > { %v4120_v57 = vpop.permute.xlu1 %1699  ;;  %v1374_v9 = vmul.f32 %v3471_v12, %v4838_v56  ;;  %v1754_v34 = vmul.f32 %v3789_v7, %v3950_v24  ;;  %v1396_v30 = vadd.f32 %v1364_v40, %v1199_v5  ;;  %v1398_v8 = vadd.f32 %v1366_v62, %v1201_v46  ;;  %v4841_v46 = vld [vmem:[#allocation128_spill] sm:$0xff] }
 0x289   : > { %4834 = vst [vmem:[#allocation43_spill] sm:$0xff] %v4107_v60  ;;  %v1821_v23 = vpop.permute.xlu0 %1820  ;;  %v1783_v60 = vadd.f32 %v1751_v0, %v1586_v45  ;;  %v4129_v52 = vadd.f32 %v1368_v21, %v1203_v54  ;;  %v1559_v49 = vmul.f32 %v3713_v36, %v4839_v44  ;;  %v1402_v32 = vadd.f32 %v1370_v51, %v1205_v2  ;;  %v4846_v56 = vld [vmem:[#allocation136_spill] sm:$0xff] }
 0x28a   : > { %v1948_v10 = vmul.f32 %v4112_v26, %v1821_v23  ;;  %v4138_v59 = vadd.f32 %v1372_v16, %v1207_v29  ;;  %v1589_v41 = vadd.f32 %v1557_v31, %v1392_v50  ;;  %v1376_v5 = vmul.f32 %v3471_v12, %v4840_v63  ;;  %v4844_v16 = vld [vmem:[#allocation133_spill] sm:$0xff]  ;;  %v4845_v50 = vld [vmem:[#allocation135_spill] sm:$0xff] }
 0x28b   : > { %v1378_v54 = vmul.f32 %v3471_v12, %v4841_v46  ;;  %v1380_v44 = vmul.f32 %v3471_v12, %v4842_v53  ;;  %v1756_v0 = vmul.f32 %v3789_v7, %v3966_v43  ;;  %v1406_v2 = vadd.f32 %v1374_v9, %v1209_v1  ;;  %v4847_v1 = vld [vmem:[#allocation137_spill] sm:$0xff] }
 0x28c   : > { %v1980_v37 = vadd.f32 %v1948_v10, %v1783_v60  ;;  %v4140_v24 = vpop.permute.xlu1 %1707  ;;  %v1786_v29 = vadd.f32 %v1754_v34, %v1589_v41  ;;  %v4843_v60 = vld [vmem:[#allocation131_spill] sm:$0xff]  ;;  %v1384_v45 = vmul.f32 %v3471_v12, %v4844_v16  ;;  %v1591_v31 = vadd.f32 %v1559_v49, %v1394_v17 }
 0x28d   : > { %v1833_v40 = vpop.permute.xlu0 %1832  ;;  %v1382_v51 = vmul.f32 %v3471_v12, %v4843_v60  ;;  %v1386_v23 = vmul.f32 %v3471_v12, %v4845_v50  ;;  %v1561_v43 = vmul.f32 %v3713_v36, %v4846_v56  ;;  %v1553_v9 = vmul.f32 %v3713_v36, %v4847_v1  ;;  %v4849_v60 = vld [vmem:[#allocation139_spill] sm:$0xff]  ;;  %v4852_v56 = vld [vmem:[#allocation142_spill] sm:$0xff] }
 0x28e   : > { %v4151_v62 = vadd.f32 %v4136_v48, %v1980_v37  ;;  %v1951_v21 = vmul.f32 %v4112_v26, %v1833_v40  ;;  %v1408_v37 = vadd.f32 %v1376_v5, %v4074_v33  ;;  %v1410_v63 = vadd.f32 %v1378_v54, %v4076_v3  ;;  %v4848_v3 = vld [vmem:[#allocation138_spill] sm:$0xff]  ;;  %v4853_v1 = vld [vmem:[#allocation143_spill] sm:$0xff] }
 0x28f   : > { %v1412_v17 = vadd.f32 %v1380_v44, %v4081_v20  ;;  %v1788_v49 = vadd.f32 %v1756_v0, %v1591_v31  ;;  %v1758_v12 = vmul.f32 %v3789_v7, %v3985_v13  ;;  %v4179_v33 = vadd.f32 %v1386_v23, %v1221_v55  ;;  %v4850_v31 = vld [vmem:[#allocation140_spill] sm:$0xff] }
 0x290   : > { %v2084_v34 = vmul.f32 0.70710677, %v4151_v62  ;;  %v1983_v10 = vadd.f32 %v1951_v21, %v1786_v29  ;;  %v4165_v41 = vpop.permute.xlu1 %1715  ;;  %v1414_v29 = vadd.f32 %v1382_v51, %v4083_v18  ;;  %v4177_v21 = vadd.f32 %v1384_v45, %v1219_v35  ;;  %v4851_v35 = vld [vmem:[#allocation141_spill] sm:$0xff] }
 0x291   : > { %v1841_v46 = vpop.permute.xlu0 %1840  ;;  %v1563_v20 = vmul.f32 %v3713_v36, %v4848_v3  ;;  %v1593_v5 = vadd.f32 %v1561_v43, %v1396_v30  ;;  %v1585_v54 = vadd.f32 %v1553_v9, %v1388_v42  ;;  %v1555_v16 = vmul.f32 %v3713_v36, %v4849_v60 }
 0x292   : > { %2548 = verf.f32 %v2084_v34  ;;  %v4173_v53 = vadd.f32 %v4136_v48, %v1983_v10  ;;  %v1953_v40 = vmul.f32 %v4112_v26, %v1841_v46  ;;  %v1565_v18 = vmul.f32 %v3713_v36, %v4850_v31  ;;  %v4854_v34 = vld [vmem:[#allocation144_spill] sm:$0xff]  ;;  %v4856_v46 = vld [vmem:[#allocation3_spill] sm:$0xff] }
 0x293   : > { %v1567_v55 = vmul.f32 %v3713_v36, %v4851_v35  ;;  %v1760_v51 = vmul.f32 %v3789_v7, %v4001_v6  ;;  %v1790_v30 = vadd.f32 %v1758_v12, %v1593_v5  ;;  %v1595_v23 = vadd.f32 %v1563_v20, %v1398_v8 }
 0x294   : > { %v2087_v44 = vmul.f32 0.70710677, %v4173_v53  ;;  %v1985_v13 = vadd.f32 %v1953_v40, %v1788_v49  ;;  %v4184_v0 = vpop.permute.xlu1 %1723  ;;  %v1569_v43 = vmul.f32 %v3713_v36, %v4852_v56  ;;  %v1571_v9 = vmul.f32 %v3713_v36, %v4853_v1  ;;  %v4855_v49 = vld [vmem:[#allocation145_spill] sm:$0xff] }
 0x295   : > { %v1849_v45 = vpop.permute.xlu0 %1848  ;;  %v1573_v10 = vmul.f32 %v3713_v36, %v4854_v34  ;;  %v1575_v6 = vmul.f32 %v3713_v36, %v4855_v49  ;;  %v1577_v12 = vmul.f32 %v3713_v36, %v4856_v46  ;;  %v1587_v8 = vadd.f32 %v1555_v16, %v4122_v27  ;;  %v4857_v27 = vld [vmem:[#allocation10_spill] sm:$0xff] }
 0x296   : > { %2550 = verf.f32 %v2087_v44  ;;  %v4195_v42 = vadd.f32 %v4136_v48, %v1985_v13  ;;  %v1955_v50 = vmul.f32 %v4112_v26, %v1849_v45  ;;  %v1597_v20 = vadd.f32 %v1565_v18, %v4129_v52 }
 0x297   : > { %v1599_v44 = vadd.f32 %v1567_v55, %v1402_v32  ;;  %v1792_v13 = vadd.f32 %v1760_v51, %v1595_v23  ;;  %v1762_v31 = vmul.f32 %v3789_v7, %v4025_v38  ;;  %v4220_v56 = vadd.f32 %v1573_v10, %v1408_v37  ;;  %v4858_v51 = vld [vmem:[#allocation16_spill] sm:$0xff] }
 0x298   : > { %v2089_v40 = vmul.f32 0.70710677, %v4195_v42  ;;  %v1987_v3 = vadd.f32 %v1955_v50, %v1790_v30  ;;  %v4209_v5 = vpop.permute.xlu1 %1731  ;;  %v1601_v30 = vadd.f32 %v1569_v43, %v4138_v59  ;;  %v1603_v50 = vadd.f32 %v1571_v9, %v1406_v2 }
 0x299   : > { %v1857_v60 = vpop.permute.xlu0 %1856  ;;  %v1579_v52 = vmul.f32 %v3713_v36, %v4857_v27  ;;  %v4224_v32 = vadd.f32 %v1575_v6, %v1410_v63  ;;  %v4226_v16 = vadd.f32 %v1577_v12, %v1412_v17  ;;  %v1581_v59 = vmul.f32 %v3713_v36, %v4858_v51 }
 0x29a   : > { %2552 = verf.f32 %v2089_v40  ;;  %v4216_v35 = vadd.f32 %v4136_v48, %v1987_v3  ;;  %v1957_v45 = vmul.f32 %v4112_v26, %v1857_v60  ;;  %v1583_v2 = vmul.f32 %v3713_v36, %v3740_v22 }
 0x29b   : > { %v1750_v37 = vmul.f32 %v3789_v7, %v3768_v28  ;;  %v1752_v63 = vmul.f32 %v3789_v7, %v3927_v4  ;;  %v1794_v23 = vadd.f32 %v1762_v31, %v1597_v20  ;;  %v4243_v34 = vadd.f32 %v1579_v52, %v1414_v29 }
 0x29c   : > { %v2091_v38 = vmul.f32 0.70710677, %v4216_v35  ;;  %v1989_v18 = vadd.f32 %v1957_v45, %v1792_v13  ;;  %v4229_v55 = vpop.permute.xlu1 %1739  ;;  %v1764_v36 = vmul.f32 %v3789_v7, %v4041_v61  ;;  %v1766_v22 = vmul.f32 %v3789_v7, %v4065_v58 }
 0x29d   : > { %v1865_v17 = vpop.permute.xlu0 %1864  ;;  %v1768_v28 = vmul.f32 %v3789_v7, %v4089_v19  ;;  %v2051_v4 = vmul.f32 0.5, %v4151_v62  ;;  %v4255_v46 = vadd.f32 %v1581_v59, %v4177_v21  ;;  %v4258_v29 = vadd.f32 %v1583_v2, %v4179_v33 }
 0x29e   : > { %2554 = verf.f32 %v2091_v38  ;;  %v4240_v43 = vadd.f32 %v4136_v48, %v1989_v18  ;;  %v1959_v1 = vmul.f32 %v4112_v26, %v1865_v17  ;;  %v1782_v61 = vadd.f32 %v1750_v37, %v1585_v54 }
 0x29f   : > { %v2549_v9 = vpop.eup %2548  ;;  %v1784_v12 = vadd.f32 %v1752_v63, %v1587_v8  ;;  %v1796_v13 = vadd.f32 %v1764_v36, %v1599_v44  ;;  %v1798_v60 = vadd.f32 %v1766_v22, %v1601_v30  ;;  %v1800_v31 = vadd.f32 %v1768_v28, %v1603_v50 }
 0x2a0   : > { %v2148_v10 = vadd.f32 1.0, %v2549_v9  ;;  %v2093_v49 = vmul.f32 0.70710677, %v4240_v43  ;;  %v1991_v6 = vadd.f32 %v1959_v1, %v1794_v23  ;;  %v2054_v54 = vmul.f32 0.5, %v4173_v53 }
 0x2a1   : > { %v1817_v40 = vpop.permute.xlu1 %1816  ;;  %v1873_v58 = vpop.permute.xlu0 %1872  ;;  %v1770_v27 = vmul.f32 %v3789_v7, %v4120_v57  ;;  %v1772_v44 = vmul.f32 %v3789_v7, %v4140_v24  ;;  %v1774_v57 = vmul.f32 %v3789_v7, %v4165_v41  ;;  %v2056_v2 = vmul.f32 0.5, %v4195_v42 }
 0x2a2   : > { %v2180_v3 = vmul.f32 %v2148_v10, %v2051_v4  ;;  %2556 = verf.f32 %v2093_v49  ;;  %v4261_v19 = vadd.f32 %v4136_v48, %v1991_v6  ;;  %v1947_v62 = vmul.f32 %v4112_v26, %v1817_v40 }
 0x2a3   : > { %v2551_v20 = vpop.eup %2550  ;;  %v1961_v21 = vmul.f32 %v4112_v26, %v1873_v58  ;;  %v1802_v9 = vadd.f32 %v1770_v27, %v4220_v56  ;;  %v1776_v36 = vmul.f32 %v3789_v7, %v4184_v0  ;;  %v1804_v0 = vadd.f32 %v1772_v44, %v4224_v32 }
 0x2a4   : > { %v2482_v33 = vpack.c.bf16 %v2180_v3, %v2180_v3  ;;  %v2151_v8 = vadd.f32 1.0, %v2551_v20  ;;  %v2095_v45 = vmul.f32 0.70710677, %v4261_v19  ;;  %v1979_v30 = vadd.f32 %v1947_v62, %v1782_v61 }
 0x2a5   : > { %v1993_v50 = vadd.f32 %v1961_v21, %v1796_v13  ;;  %v1825_v52 = vpop.permute.xlu1 %1824  ;;  %v1881_v38 = vpop.permute.xlu0 %1880  ;;  %v4305_v61 = vadd.f32 %v1774_v57, %v4226_v16  ;;  %v2058_v58 = vmul.f32 0.5, %v4216_v35  ;;  %v4310_v62 = vadd.f32 %v1776_v36, %v4243_v34 }
 0x2a6   : > { %2341 = vst.msk [vmem:[%s4267_s20 + $0x4] sm:$0xf] %vm2339_vm0, %v2482_v33  ;;  %v2183_v18 = vmul.f32 %v2151_v8, %v2054_v54  ;;  %2558 = verf.f32 %v2095_v45  ;;  %v1949_v51 = vmul.f32 %v4112_v26, %v1825_v52  ;;  %v1963_v53 = vmul.f32 %v4112_v26, %v1881_v38 }
 0x2a7   : > { %v2553_v59 = vpop.eup %2552  ;;  %v4284_v24 = vadd.f32 %v4136_v48, %v1979_v30  ;;  %v4287_v37 = vadd.f32 %v4136_v48, %v1993_v50  ;;  %v1778_v34 = vmul.f32 %v3789_v7, %v4209_v5  ;;  %v2060_v45 = vmul.f32 0.5, %v4240_v43 }
 0x2a8   : > { %v2485_v63 = vpack.c.bf16 %v2183_v18, %v2183_v18  ;;  %v2153_v17 = vadd.f32 1.0, %v2553_v59  ;;  %v1981_v23 = vadd.f32 %v1949_v51, %v1784_v12  ;;  %v1995_v1 = vadd.f32 %v1963_v53, %v1798_v60 }
 0x2a9   : > { %v2083_v22 = vmul.f32 0.70710677, %v4284_v24  ;;  %v2097_v41 = vmul.f32 0.70710677, %v4287_v37  ;;  %v1829_v42 = vpop.permute.xlu1 %1828  ;;  %v1889_v28 = vpop.permute.xlu0 %1888  ;;  %v1780_v30 = vmul.f32 %v3789_v7, %v4229_v55  ;;  %v2062_v51 = vmul.f32 0.5, %v4261_v19 }
 0x2aa   : > { %2344 = vst.msk [vmem:[%s4267_s20 + $0x10] sm:$0xf] %vm2339_vm0, %v2485_v63  ;;  %v2185_v4 = vmul.f32 %v2153_v17, %v2056_v2  ;;  %v4297_v10 = vadd.f32 %v4136_v48, %v1981_v23  ;;  %v4300_v49 = vadd.f32 %v4136_v48, %v1995_v1  ;;  %v1950_v56 = vmul.f32 %v4112_v26, %v1829_v42  ;;  %v4859_v17 = vld [vmem:[#allocation12_spill] sm:$0xff] }
 0x2ab   : > { %v2555_v6 = vpop.eup %2554  ;;  %2560 = verf.f32 %v2083_v22  ;;  %v1965_v12 = vmul.f32 %v4112_v26, %v1889_v28  ;;  %v4346_v23 = vadd.f32 %v1778_v34, %v4255_v46  ;;  %v4349_v1 = vadd.f32 %v1780_v30, %v4258_v29 }
 0x2ac   : > { %v2487_v40 = vpack.c.bf16 %v2185_v4, %v2185_v4  ;;  %v2155_v3 = vadd.f32 1.0, %v2555_v6  ;;  %2562 = verf.f32 %v2097_v41  ;;  %v2085_v20 = vmul.f32 0.70710677, %v4297_v10 }
 0x2ad   : > { %v2099_v13 = vmul.f32 0.70710677, %v4300_v49  ;;  %v1982_v32 = vadd.f32 %v1950_v56, %v3805_v11  ;;  %v1837_v60 = vpop.permute.xlu1 %1836  ;;  %v1897_v16 = vpop.permute.xlu0 %1896  ;;  %v1997_v33 = vadd.f32 %v1965_v12, %v1800_v31  ;;  %v2050_v46 = vmul.f32 0.5, %v4284_v24 }
 0x2ae   : > { %2346 = vst.msk [vmem:[%s4267_s20 + $0x18] sm:$0xf] %vm2339_vm0, %v2487_v40  ;;  %v2187_v21 = vmul.f32 %v2155_v3, %v2058_v58  ;;  %v1952_v54 = vmul.f32 %v4112_v26, %v1837_v60  ;;  %v1967_v35 = vmul.f32 %v4112_v26, %v1897_v16  ;;  %2564 = verf.f32 %v2085_v20 }
 0x2af   : > { %v2557_v8 = vpop.eup %2556  ;;  %v4323_v11 = vadd.f32 %v4136_v48, %v1982_v32  ;;  %2566 = verf.f32 %v2099_v13  ;;  %v4326_v31 = vadd.f32 %v4136_v48, %v1997_v33  ;;  %v2064_v29 = vmul.f32 0.5, %v4287_v37  ;;  %v4860_v32 = vld [vmem:[#allocation18_spill] sm:$0xff] }
 0x2b0   : > { %v2489_v27 = vpack.c.bf16 %v2187_v21, %v2187_v21  ;;  %v2157_v44 = vadd.f32 1.0, %v2557_v8  ;;  %v1984_v52 = vadd.f32 %v1952_v54, %v3831_v15  ;;  %v1999_v5 = vadd.f32 %v1967_v35, %v1802_v9 }
 0x2b1   : > { %v2086_v50 = vmul.f32 0.70710677, %v4323_v11  ;;  %v1845_v38 = vpop.permute.xlu1 %1844  ;;  %v1905_v43 = vpop.permute.xlu0 %1904  ;;  %v2101_v53 = vmul.f32 0.70710677, %v4326_v31  ;;  %v2052_v58 = vmul.f32 0.5, %v4297_v10  ;;  %v2066_v35 = vmul.f32 0.5, %v4300_v49 }
 0x2b2   : > { %2348 = vst.msk [vmem:[%s4267_s20 + $0x20] sm:$0xf] %vm2339_vm0, %v2489_v27  ;;  %v2189_v18 = vmul.f32 %v2157_v44, %v2060_v45  ;;  %v1954_v59 = vmul.f32 %v4112_v26, %v1845_v38  ;;  %v4338_v7 = vadd.f32 %v4136_v48, %v1984_v52  ;;  %v4341_v15 = vadd.f32 %v4136_v48, %v1999_v5  ;;  %v4861_v44 = vld [vmem:[#allocation20_spill] sm:$0xff] }
 0x2b3   : > { %v2559_v57 = vpop.eup %2558  ;;  %2568 = verf.f32 %v2086_v50  ;;  %v1969_v55 = vmul.f32 %v4112_v26, %v1905_v43  ;;  %v2053_v49 = vmul.f32 0.5, %v4323_v11 }
 0x2b4   : > { %v2491_v2 = vpack.c.bf16 %v2189_v18, %v2189_v18  ;;  %v2159_v63 = vadd.f32 1.0, %v2559_v57  ;;  %2570 = verf.f32 %v2101_v53  ;;  %v1986_v19 = vadd.f32 %v1954_v59, %v4859_v17 }
 0x2b5   : > { %v2088_v9 = vmul.f32 0.70710677, %v4338_v7  ;;  %v2103_v36 = vmul.f32 0.70710677, %v4341_v15  ;;  %v1853_v22 = vpop.permute.xlu1 %1852  ;;  %v1913_v41 = vpop.permute.xlu0 %1912  ;;  %v2001_v4 = vadd.f32 %v1969_v55, %v1804_v0  ;;  %v2068_v59 = vmul.f32 0.5, %v4326_v31 }
 0x2b6   : > { %2350 = vst.msk [vmem:[%s4267_s20 + $0x28] sm:$0xf] %vm2339_vm0, %v2491_v2  ;;  %v2191_v42 = vmul.f32 %v2159_v63, %v2062_v51  ;;  %v4356_v28 = vadd.f32 %v4136_v48, %v1986_v19  ;;  %v1956_v56 = vmul.f32 %v4112_v26, %v1853_v22  ;;  %v1971_v6 = vmul.f32 %v4112_v26, %v1913_v41 }
 0x2b7   : > { %2572 = verf.f32 %v2088_v9  ;;  %v4365_v0 = vadd.f32 %v4136_v48, %v2001_v4  ;;  %v2055_v41 = vmul.f32 0.5, %v4338_v7 }
 0x2b8   : > { %v2561_v12 = vpop.eup %2560  ;;  %v2493_v40 = vpack.c.bf16 %v2191_v42, %v2191_v42  ;;  %2574 = verf.f32 %v2103_v36  ;;  %v2090_v3 = vmul.f32 0.70710677, %v4356_v28  ;;  %v1988_v24 = vadd.f32 %v1956_v56, %v4860_v32 }
 0x2b9   : > { %v2563_v20 = vpop.eup %2562  ;;  %v2147_v13 = vadd.f32 1.0, %v2561_v12  ;;  %v2003_v60 = vadd.f32 %v1971_v6, %v4305_v61  ;;  %v1861_v37 = vpop.permute.xlu1 %1860  ;;  %v2105_v8 = vmul.f32 0.70710677, %v4365_v0 }
 0x2ba   : > { %v1921_v16 = vpop.permute.xlu0 %1920  ;;  %2352 = vst.msk [vmem:[%s4267_s20 + $0x30] sm:$0xf] %vm2339_vm0, %v2493_v40  ;;  %v2161_v21 = vadd.f32 1.0, %v2563_v20  ;;  %2576 = verf.f32 %v2090_v3  ;;  %v1958_v10 = vmul.f32 %v4112_v26, %v1861_v37  ;;  %v4376_v34 = vadd.f32 %v4136_v48, %v1988_v24 }
 0x2bb   : > { %v1973_v33 = vmul.f32 %v4112_v26, %v1921_v16  ;;  %v2179_v54 = vmul.f32 %v2147_v13, %v2050_v46  ;;  %v2565_v45 = vpop.eup %2564  ;;  %v4379_v27 = vadd.f32 %v4136_v48, %v2003_v60  ;;  %2578 = verf.f32 %v2105_v8 }
 0x2bc   : > { %v2193_v61 = vmul.f32 %v2161_v21, %v2064_v29  ;;  %v1990_v30 = vadd.f32 %v1958_v10, %v4861_v44  ;;  %v2567_v52 = vpop.eup %2566  ;;  %v2149_v38 = vadd.f32 1.0, %v2565_v45  ;;  %v2092_v57 = vmul.f32 0.70710677, %v4376_v34 }
 0x2bd   : > { %v2005_v50 = vadd.f32 %v1973_v33, %v4310_v62  ;;  %v2481_v5 = vpack.c.bf16 %v2179_v54, %v2179_v54  ;;  %v1869_v43 = vpop.permute.xlu1 %1868  ;;  %v2163_v53 = vadd.f32 1.0, %v2567_v52  ;;  %v2107_v62 = vmul.f32 0.70710677, %v4379_v27  ;;  %v4863_v54 = vld [vmem:[#allocation17_spill] sm:$0xff] }
 0x2be   : > { %v1929_v18 = vpop.permute.xlu0 %1928  ;;  %v2495_v51 = vpack.c.bf16 %v2193_v61, %v2193_v61  ;;  %v2181_v55 = vmul.f32 %v2149_v38, %v2052_v58  ;;  %v4390_v2 = vadd.f32 %v4136_v48, %v1990_v30  ;;  %2580 = verf.f32 %v2092_v57  ;;  %v4862_v58 = vld [vmem:[#allocation22_spill] sm:$0xff] }
 0x2bf   : > { %2340 = vst.msk [vmem:[%s4267_s20] sm:$0xf] %vm2339_vm0, %v2481_v5  ;;  %v4393_v63 = vadd.f32 %v4136_v48, %v2005_v50  ;;  %v2195_v17 = vmul.f32 %v2163_v53, %v2066_v35  ;;  %v1960_v31 = vmul.f32 %v4112_v26, %v1869_v43  ;;  %v1975_v19 = vmul.f32 %v4112_v26, %v1929_v18 }
 0x2c0   : > { %v2569_v11 = vpop.eup %2568  ;;  %2354 = vst.msk [vmem:[%s4267_s20 + $0x38] sm:$0xf] %vm2339_vm0, %v2495_v51  ;;  %v2483_v36 = vpack.c.bf16 %v2181_v55, %v2181_v55  ;;  %2582 = verf.f32 %v2107_v62  ;;  %v2070_v29 = vmul.f32 0.5, %v4341_v15  ;;  %v2094_v6 = vmul.f32 0.70710677, %v4390_v2 }
 0x2c1   : > { %v2571_v9 = vpop.eup %2570  ;;  %v2150_v22 = vadd.f32 1.0, %v2569_v11  ;;  %v1877_v42 = vpop.permute.xlu1 %1876  ;;  %v2497_v56 = vpack.c.bf16 %v2195_v17, %v2195_v17  ;;  %v2109_v40 = vmul.f32 0.70710677, %v4393_v63  ;;  %v1992_v3 = vadd.f32 %v1960_v31, %v4862_v58 }
 0x2c2   : > { %v1937_v4 = vpop.permute.xlu0 %1936  ;;  %v2165_v46 = vadd.f32 1.0, %v2571_v9  ;;  %2342 = vst.msk [vmem:[%s4267_s20 + $0x8] sm:$0xf] %vm2339_vm0, %v2483_v36  ;;  %v2007_v20 = vadd.f32 %v1975_v19, %v4346_v23  ;;  %2584 = verf.f32 %v2094_v6  ;;  %v1962_v32 = vmul.f32 %v4112_v26, %v1877_v42 }
 0x2c3   : > { %v2182_v12 = vmul.f32 %v2150_v22, %v2053_v49  ;;  %2356 = vst.msk [vmem:[%s4267_s20 + $0x40] sm:$0xf] %vm2339_vm0, %v2497_v56  ;;  %v1977_v15 = vmul.f32 %v4112_v26, %v1937_v4  ;;  %2586 = verf.f32 %v2109_v40  ;;  %v4412_v16 = vadd.f32 %v4136_v48, %v1992_v3  ;;  %v4864_v3 = vld [vmem:[#allocation41_spill] sm:$0xff] }
 0x2c4   : > { %v2573_v13 = vpop.eup %2572  ;;  %v2197_v7 = vmul.f32 %v2165_v46, %v2068_v59  ;;  %v4415_v33 = vadd.f32 %v4136_v48, %v2007_v20  ;;  %v1994_v35 = vadd.f32 %v1962_v32, %v4863_v54  ;;  %v2057_v50 = vmul.f32 0.5, %v4356_v28 }
 0x2c5   : > { %v2575_v24 = vpop.eup %2574  ;;  %v2484_v60 = vpack.c.bf16 %v2182_v12, %v2182_v12  ;;  %v2152_v37 = vadd.f32 1.0, %v2573_v13  ;;  %v1885_v21 = vpop.permute.xlu1 %1884  ;;  %v2096_v61 = vmul.f32 0.70710677, %v4412_v16  ;;  %v2009_v44 = vadd.f32 %v1977_v15, %v4349_v1 }
 0x2c6   : > { %v2499_v23 = vpack.c.bf16 %v2197_v7, %v2197_v7  ;;  %v2167_v10 = vadd.f32 1.0, %v2575_v24  ;;  %v2111_v5 = vmul.f32 0.70710677, %v4415_v33  ;;  %v4427_v49 = vadd.f32 %v4136_v48, %v1994_v35 }
 0x2c7   : > { %v2577_v8 = vpop.eup %2576  ;;  %2343 = vst.msk [vmem:[%s4267_s20 + $0xc] sm:$0xf] %vm2339_vm0, %v2484_v60  ;;  %v2184_v45 = vmul.f32 %v2152_v37, %v2055_v41  ;;  %2588 = verf.f32 %v2096_v61  ;;  %v4430_v43 = vadd.f32 %v4136_v48, %v2009_v44  ;;  %v1964_v59 = vmul.f32 %v4112_v26, %v1885_v21 }
 0x2c8   : > { %2358 = vst.msk [vmem:[%s4267_s20 + $0x48] sm:$0xf] %vm2339_vm0, %v2499_v23  ;;  %v2199_v30 = vmul.f32 %v2167_v10, %v2070_v29  ;;  %v2154_v52 = vadd.f32 1.0, %v2577_v8  ;;  %v2579_v1 = vpop.eup %2578  ;;  %2590 = verf.f32 %v2111_v5  ;;  %v2072_v28 = vmul.f32 0.5, %v4365_v0 }
 0x2c9   : > { %v2486_v38 = vpack.c.bf16 %v2184_v45, %v2184_v45  ;;  %v1893_v18 = vpop.permute.xlu1 %1892  ;;  %v2169_v57 = vadd.f32 1.0, %v2579_v1  ;;  %v2098_v55 = vmul.f32 0.70710677, %v4427_v49  ;;  %v2113_v11 = vmul.f32 0.70710677, %v4430_v43  ;;  %v4865_v1 = vld [vmem:[#allocation57_spill] sm:$0xff] }
 0x2ca   : > { %v2501_v51 = vpack.c.bf16 %v2199_v30, %v2199_v30  ;;  %v2186_v53 = vmul.f32 %v2154_v52, %v2057_v50  ;;  %v1996_v17 = vadd.f32 %v1964_v59, %v3962_v25  ;;  %v1966_v31 = vmul.f32 %v4112_v26, %v1893_v18 }
 0x2cb   : > { %2345 = vst.msk [vmem:[%s4267_s20 + $0x14] sm:$0xf] %vm2339_vm0, %v2486_v38  ;;  %v2581_v19 = vpop.eup %2580  ;;  %v2201_v9 = vmul.f32 %v2169_v57, %v2072_v28  ;;  %v2059_v36 = vmul.f32 0.5, %v4376_v34  ;;  %2592 = verf.f32 %v2098_v55  ;;  %v2074_v56 = vmul.f32 0.5, %v4379_v27 }
 0x2cc   : > { %2360 = vst.msk [vmem:[%s4267_s20 + $0x50] sm:$0xf] %vm2339_vm0, %v2501_v51  ;;  %v2488_v62 = vpack.c.bf16 %v2186_v53, %v2186_v53  ;;  %v2156_v41 = vadd.f32 1.0, %v2581_v19  ;;  %2594 = verf.f32 %v2113_v11  ;;  %v4446_v42 = vadd.f32 %v4136_v48, %v1996_v17 }
 0x2cd   : > { %v1901_v22 = vpop.permute.xlu1 %1900  ;;  %v2583_v0 = vpop.eup %2582  ;;  %v1998_v4 = vadd.f32 %v1966_v31, %v3979_v47  ;;  %v2503_v25 = vpack.c.bf16 %v2201_v9, %v2201_v9  ;;  %v2061_v47 = vmul.f32 0.5, %v4390_v2  ;;  %v2076_v15 = vmul.f32 0.5, %v4393_v63 }
 0x2ce   : > { %2347 = vst.msk [vmem:[%s4267_s20 + $0x1c] sm:$0xf] %vm2339_vm0, %v2488_v62  ;;  %v2171_v46 = vadd.f32 1.0, %v2583_v0  ;;  %v1968_v29 = vmul.f32 %v4112_v26, %v1901_v22  ;;  %v2188_v34 = vmul.f32 %v2156_v41, %v2059_v36  ;;  %v2100_v6 = vmul.f32 0.70710677, %v4446_v42 }
 0x2cf   : > { %v4453_v12 = vadd.f32 %v4136_v48, %v1998_v4  ;;  %v2585_v40 = vpop.eup %2584  ;;  %2362 = vst.msk [vmem:[%s4267_s20 + $0x58] sm:$0xf] %vm2339_vm0, %v2503_v25  ;;  %v2063_v50 = vmul.f32 0.5, %v4412_v16  ;;  %v2078_v5 = vmul.f32 0.5, %v4415_v33  ;;  %v2065_v33 = vmul.f32 0.5, %v4427_v49 }
 0x2d0   : > { %v2203_v58 = vmul.f32 %v2171_v46, %v2074_v56  ;;  %v2000_v20 = vadd.f32 %v1968_v29, %v4864_v3  ;;  %v2587_v13 = vpop.eup %2586  ;;  %v2490_v7 = vpack.c.bf16 %v2188_v34, %v2188_v34  ;;  %v2158_v32 = vadd.f32 1.0, %v2585_v40 }
 0x2d1   : > { %v1909_v27 = vpop.permute.xlu1 %1908  ;;  %2596 = verf.f32 %v2100_v6  ;;  %v2173_v60 = vadd.f32 1.0, %v2587_v13  ;;  %v2102_v37 = vmul.f32 0.70710677, %v4453_v12  ;;  %v2080_v19 = vmul.f32 0.5, %v4430_v43  ;;  %v4866_v6 = vld [vmem:[#allocation82_spill] sm:$0xff] }
 0x2d2   : > { %v2505_v24 = vpack.c.bf16 %v2203_v58, %v2203_v58  ;;  %v4462_v21 = vadd.f32 %v4136_v48, %v2000_v20  ;;  %2349 = vst.msk [vmem:[%s4267_s20 + $0x24] sm:$0xf] %vm2339_vm0, %v2490_v7  ;;  %v2190_v23 = vmul.f32 %v2158_v32, %v2061_v47  ;;  %v1970_v2 = vmul.f32 %v4112_v26, %v1909_v27 }
 0x2d3   : > { %v2205_v10 = vmul.f32 %v2173_v60, %v2076_v15  ;;  %2598 = verf.f32 %v2102_v37  ;;  %v2067_v29 = vmul.f32 0.5, %v4446_v42  ;;  %v2069_v13 = vmul.f32 0.5, %v4453_v12 }
 0x2d4   : > { %2364 = vst.msk [vmem:[%s4267_s20 + $0x60] sm:$0xf] %vm2339_vm0, %v2505_v24  ;;  %v2104_v63 = vmul.f32 0.70710677, %v4462_v21  ;;  %v2589_v35 = vpop.eup %2588  ;;  %v2492_v8 = vpack.c.bf16 %v2190_v23, %v2190_v23  ;;  %v2002_v45 = vadd.f32 %v1970_v2, %v4019_v39  ;;  %v4867_v24 = vld [vmem:[#allocation43_spill] sm:$0xff]  ;;  %v2071_v23 = vmul.f32 0.5, %v4462_v21 }
 0x2d5   : > { %v1917_v54 = vpop.permute.xlu1 %1916  ;;  %v2591_v44 = vpop.eup %2590  ;;  %v2507_v30 = vpack.c.bf16 %v2205_v10, %v2205_v10  ;;  %v2160_v52 = vadd.f32 1.0, %v2589_v35 }
 0x2d6   : > { %v1972_v61 = vmul.f32 %v4112_v26, %v1917_v54  ;;  %2600 = verf.f32 %v2104_v63  ;;  %2351 = vst.msk [vmem:[%s4267_s20 + $0x2c] sm:$0xf] %vm2339_vm0, %v2492_v8  ;;  %v2175_v38 = vadd.f32 1.0, %v2591_v44  ;;  %v2041_v18 = vadd.f32 %v4136_v48, %v2002_v45 }
 0x2d7   : > { %2366 = vst.msk [vmem:[%s4267_s20 + $0x68] sm:$0xf] %vm2339_vm0, %v2507_v30  ;;  %v2192_v39 = vmul.f32 %v2160_v52, %v2063_v50 }
 0x2d8   : > { %v2004_v51 = vadd.f32 %v1972_v61, %v4865_v1  ;;  %v2593_v59 = vpop.eup %2592  ;;  %v2207_v28 = vmul.f32 %v2175_v38, %v2078_v5  ;;  %v2106_v57 = vmul.f32 0.70710677, %v2041_v18  ;;  %v2073_v8 = vmul.f32 0.5, %v2041_v18 }
 0x2d9   : > { %v1925_v53 = vpop.permute.xlu1 %1924  ;;  %v2595_v55 = vpop.eup %2594  ;;  %v2494_v62 = vpack.c.bf16 %v2192_v39, %v2192_v39  ;;  %v2162_v11 = vadd.f32 1.0, %v2593_v59 }
 0x2da   : > { %v2043_v16 = vadd.f32 %v4136_v48, %v2004_v51  ;;  %v1974_v17 = vmul.f32 %v4112_v26, %v1925_v53  ;;  %v2509_v31 = vpack.c.bf16 %v2207_v28, %v2207_v28  ;;  %v2177_v9 = vadd.f32 1.0, %v2595_v55 }
 0x2db   : > { %2602 = verf.f32 %v2106_v57  ;;  %2353 = vst.msk [vmem:[%s4267_s20 + $0x34] sm:$0xf] %vm2339_vm0, %v2494_v62  ;;  %v2194_v36 = vmul.f32 %v2162_v11, %v2065_v33 }
 0x2dc   : > { %v2108_v22 = vmul.f32 0.70710677, %v2043_v16  ;;  %v2006_v0 = vadd.f32 %v1974_v17, %v4059_v14  ;;  %2368 = vst.msk [vmem:[%s4267_s20 + $0x70] sm:$0xf] %vm2339_vm0, %v2509_v31  ;;  %v2209_v49 = vmul.f32 %v2177_v9, %v2080_v19  ;;  %v2075_v44 = vmul.f32 0.5, %v2043_v16 }
 0x2dd   : > { %v1933_v41 = vpop.permute.xlu1 %1932  ;;  %v2496_v56 = vpack.c.bf16 %v2194_v36, %v2194_v36 }
 0x2de   : > { %v1976_v4 = vmul.f32 %v4112_v26, %v1933_v41  ;;  %v2597_v25 = vpop.eup %2596  ;;  %2604 = verf.f32 %v2108_v22  ;;  %v2045_v43 = vadd.f32 %v4136_v48, %v2006_v0  ;;  %v2511_v46 = vpack.c.bf16 %v2209_v49, %v2209_v49 }
 0x2df   : > { %v2164_v34 = vadd.f32 1.0, %v2597_v25  ;;  %2355 = vst.msk [vmem:[%s4267_s20 + $0x3c] sm:$0xf] %vm2339_vm0, %v2496_v56 }
 0x2e0   : > { %v2008_v40 = vadd.f32 %v1976_v4, %v4866_v6  ;;  %v2110_v14 = vmul.f32 0.70710677, %v2045_v43  ;;  %v2599_v47 = vpop.eup %2598  ;;  %2370 = vst.msk [vmem:[%s4267_s20 + $0x78] sm:$0xf] %vm2339_vm0, %v2511_v46  ;;  %v2077_v38 = vmul.f32 0.5, %v2045_v43 }
 0x2e1   : > { %v1941_v58 = vpop.permute.xlu1 %1940  ;;  %v2196_v3 = vmul.f32 %v2164_v34, %v2067_v29  ;;  %v2166_v7 = vadd.f32 1.0, %v2599_v47 }
 0x2e2   : > { %v2047_v20 = vadd.f32 %v4136_v48, %v2008_v40  ;;  %v1978_v27 = vmul.f32 %v4112_v26, %v1941_v58  ;;  %2606 = verf.f32 %v2110_v14 }
 0x2e3   : > { %v2601_v42 = vpop.eup %2600  ;;  %v2498_v32 = vpack.c.bf16 %v2196_v3, %v2196_v3  ;;  %v2198_v37 = vmul.f32 %v2166_v7, %v2069_v13 }
 0x2e4   : > { %v2112_v15 = vmul.f32 0.70710677, %v2047_v20  ;;  %v2010_v60 = vadd.f32 %v1978_v27, %v4867_v24  ;;  %v2168_v2 = vadd.f32 1.0, %v2601_v42  ;;  %v2079_v39 = vmul.f32 0.5, %v2047_v20 }
 0x2e5   : > { %2357 = vst.msk [vmem:[%s4267_s20 + $0x44] sm:$0xf] %vm2339_vm0, %v2498_v32  ;;  %v2500_v10 = vpack.c.bf16 %v2198_v37, %v2198_v37 }
 0x2e6   : > { %2608 = verf.f32 %v2112_v15  ;;  %v2049_v26 = vadd.f32 %v4136_v48, %v2010_v60  ;;  %v2200_v12 = vmul.f32 %v2168_v2, %v2071_v23 }
 0x2e7   : > { %2359 = vst.msk [vmem:[%s4267_s20 + $0x4c] sm:$0xf] %vm2339_vm0, %v2500_v10 }
 0x2e8   : > { %v2114_v63 = vmul.f32 0.70710677, %v2049_v26  ;;  %v2603_v54 = vpop.eup %2602  ;;  %v2502_v35 = vpack.c.bf16 %v2200_v12, %v2200_v12  ;;  %v2081_v55 = vmul.f32 0.5, %v2049_v26 }
 0x2e9   : > { %v2170_v45 = vadd.f32 1.0, %v2603_v54 }
 0x2ea   : > { %2610 = verf.f32 %v2114_v63  ;;  %2361 = vst.msk [vmem:[%s4267_s20 + $0x54] sm:$0xf] %vm2339_vm0, %v2502_v35 }
 0x2eb   : > { %v2605_v21 = vpop.eup %2604  ;;  %v2202_v61 = vmul.f32 %v2170_v45, %v2073_v8 }
 0x2ec   : > { %v2172_v30 = vadd.f32 1.0, %v2605_v21 }
 0x2ed   : > { %v2504_v48 = vpack.c.bf16 %v2202_v61, %v2202_v61 }
 0x2ee   : > { %v2204_v50 = vmul.f32 %v2172_v30, %v2075_v44 }
 0x2ef   : > { %v2607_v52 = vpop.eup %2606  ;;  %2363 = vst.msk [vmem:[%s4267_s20 + $0x5c] sm:$0xf] %vm2339_vm0, %v2504_v48 }
 0x2f0   : > { %v2506_v5 = vpack.c.bf16 %v2204_v50, %v2204_v50  ;;  %v2174_v1 = vadd.f32 1.0, %v2607_v52 }
 0x2f2   : > { %2365 = vst.msk [vmem:[%s4267_s20 + $0x64] sm:$0xf] %vm2339_vm0, %v2506_v5  ;;  %v2206_v51 = vmul.f32 %v2174_v1, %v2077_v38 }
 0x2f3   : > { %v2609_v18 = vpop.eup %2608 }
 0x2f4   : > { %v2176_v53 = vadd.f32 1.0, %v2609_v18  ;;  %v2508_v59 = vpack.c.bf16 %v2206_v51, %v2206_v51 }
 0x2f6   : > { %v2208_v28 = vmul.f32 %v2176_v53, %v2079_v39  ;;  %2367 = vst.msk [vmem:[%s4267_s20 + $0x6c] sm:$0xf] %vm2339_vm0, %v2508_v59 }
 0x2f7   : > { %v2611_v57 = vpop.eup %2610 }
 0x2f8   : > { %v2510_v16 = vpack.c.bf16 %v2208_v28, %v2208_v28  ;;  %v2178_v62 = vadd.f32 1.0, %v2611_v57 }
 0x2fa   : > { %2369 = vst.msk [vmem:[%s4267_s20 + $0x74] sm:$0xf] %vm2339_vm0, %v2510_v16  ;;  %v2210_v33 = vmul.f32 %v2178_v62, %v2081_v55 }
 0x2fc   : > { %v2512_v11 = vpack.c.bf16 %v2210_v33, %v2210_v33 }
 0x2fe   : > { %2371 = vst.msk [vmem:[%s4267_s20 + $0x7c] sm:$0xf] %vm2339_vm0, %v2512_v11 }
 0x2ff PF: > { %s13_s12 = sadd.s32 1, %s2652_s12  }
 0x300   : > { %p10_p4 = scmp.ge.s32.totalorder %s13_s12, 4  }
 0x302   :  { %12 = sbr.rel (!%p10_p4) target bundleno = 1 (0x1), region = 62 }

// kernel: _lambda_.8
= control target key start
LH: loop header
LB: loop body
LE: loop exit
PB: predicated region body
PF: predicated region fallthrough
CT: control target
= control target key end

     0   :  { %s3111_s12 = smov 0   ;;  %s3113_s13 = smov 0   ;;  %s3717_s0 = inlined_call_operand.vmem [shape: bf16[512,576], index: 0, kind: input, shape index: {}]   ;;  %s3718_s1 = inlined_call_operand.vmem [shape: bf16[576,128], index: 1, kind: input, shape index: {}]   ;;  %s3719_s2 = inlined_call_operand.vmem [shape: f32[1,128], index: 2, kind: input, shape index: {}]   ;;  %s3720_s3 = inlined_call_operand.vmem [shape: bf16[512,128], index: 3, kind: output, shape index: {}]  }
   0x1   :  { %s3115_s14 = smov 0  }
   0x2 LB: > { %s32_s15 = sadd.s32 1, %s3085_s13  ;;  %p2231_p0 = scmp.ge.s32.totalorder %s3089_s14, 1  ;;  %s3089_s14 = sphi %s3115_s14, %s13_s14   ;;  %s3085_s13 = sphi %s3113_s13, %s3758_s13   ;;  %s3081_s12 = sphi %s3111_s12, %s3757_s12  }
   0x3   : > { %p34_p1 = scmp.ge.s32.totalorder %s32_s15, 2  ;;  %p191_p2 = scmp.lt.s32.totalorder %s3089_s14, 3 }
   0x5   : > { %s3760_s15 = smov (%p34_p1, %s32_s15), 0  ;;  %p192_p3 = pnand %p2231_p0, %p191_p2 }
   0x7   : > { %195 = sbr.rel (%p192_p3) target bundleno = 427 (0x1ab), region = 32 }
   0xc   : > { %v2855_v0 = vld [vmem:[%s3718_s1 + $0x78] sm:$0xff]   ;;  %s2232_s18 = sshll.u32 %s3081_s12, 5  ;;  %v2857_v2 = vld [vmem:[%s3718_s1 + $0x70] sm:$0xff]   ;;  %v2859_v4 = vld [vmem:[%s3718_s1 + $0x68] sm:$0xff]   ;;  %vm1120_vm0 = vcmask 523264  }
   0xd   : > { %v2856_v1 = vld [vmem:[%s3718_s1 + $0x38] sm:$0xff]   ;;  %2530 = vmatprep.subr.bf16.mxu0 %v2855_v0  ;;  %2814 = vmatprep.subr.bf16.mxu1 %v2855_v0  ;;  %p236_p4 = scmp.lt.s32.totalorder %s2232_s18, 63  ;;  %v2858_v3 = vld [vmem:[%s3718_s1 + $0x30] sm:$0xff]   ;;  %v2860_v5 = vld [vmem:[%s3718_s1 + $0x28] sm:$0xff]  }
   0xe   : > { %2531 = vmatpush3.bf16.msra.mxu0 %v2856_v1  ;;  %2822 = vmatpush3.bf16.msra.mxu1 %v2856_v1  ;;  %v2861_v6 = vld [vmem:[%s3718_s1 + $0x60] sm:$0xff]   ;;  %v2863_v8 = vld [vmem:[%s3718_s1 + $0x58] sm:$0xff]   ;;  %v2865_v10 = vld [vmem:[%s3718_s1 + $0x50] sm:$0xff]  }
   0xf   : > { %2532 = vmatprep.subr.bf16.mxu0 %v2857_v2  ;;  %2815 = vmatprep.subr.bf16.mxu1 %v2857_v2  ;;  %s3762_s18 = smov (!%p236_p4, %s2232_s18), 63  ;;  %v2862_v7 = vld [vmem:[%s3718_s1 + $0x20] sm:$0xff]   ;;  %v2864_v9 = vld [vmem:[%s3718_s1 + $0x18] sm:$0xff]   ;;  %v2866_v13 = vld [vmem:[%s3718_s1 + $0x10] sm:$0xff]  }
  0x10   : > { %s2830_s4 = smul.u32 20, %s3762_s18  ;;  %v2867_v14 = vld [vmem:[%s3718_s1 + $0x48] sm:$0xff]   ;;  %v2869_v16 = vld [vmem:[%s3718_s1 + $0x40] sm:$0xff]   ;;  %v2877_v18 = vld [vmem:[%s3718_s1 + $0xf8] sm:$0xff]   ;;  %s2235_s27 = sshll.u32 %s3762_s18, 2 }
  0x11   : > { %v2868_v15 = vld [vmem:[%s3718_s1 + $0x8] sm:$0xff]   ;;  %v2870_v17 = vld [vmem:[%s3718_s1] sm:$0xff]   ;;  %v2880_v19 = vld [vmem:[%s3718_s1 + $0x118] sm:$0xff]   ;;  %s3570_s29 = scalar_lea.vmem %s3720_s3, %s2235_s27 }
  0x12   : > { %2533 = vmatpush3.bf16.msra.mxu0 %v2858_v3  ;;  %2823 = vmatpush3.bf16.msra.mxu1 %v2858_v3  ;;  %s3162_s11 = scalar_lea.vmem %s3717_s0, %s2830_s4  ;;  %v2878_v22 = vld [vmem:[%s3718_s1 + $0xb8] sm:$0xff]   ;;  %v2879_v23 = vld [vmem:[%s3718_s1 + $0xf0] sm:$0xff]   ;;  %v2888_v28 = vld [vmem:[%s3718_s1 + $0xe8] sm:$0xff]  }
  0x13   : > { %2534 = vmatprep.subr.bf16.mxu0 %v2859_v4  ;;  %2816 = vmatprep.subr.bf16.mxu1 %v2859_v4  ;;  %v2873_v11 = vld [vmem:[%s3162_s11 + $0x4] ss:$20 sps:$4 sm:$0xff]   ;;  %v2871_v20 = vld [vmem:[%s3162_s11] ss:$20 sps:$4 sm:$0xff]   ;;  %v2886_v27 = vld [vmem:[%s3162_s11 + $0x28] ss:$20 sps:$4 sm:$0xff]  }
  0x14   : > { %v2876_v12 = vld [vmem:[%s3162_s11 + $0x1e4] ss:$20 sps:$4 sm:$0xff]   ;;  %1201 = vmatprep.mubr.bf16.mxu0 %v2873_v11  ;;  %v2874_v21 = vld [vmem:[%s3162_s11 + $0x1e0] ss:$20 sps:$4 sm:$0xff]   ;;  %v2887_v29 = vld [vmem:[%s3162_s11 + $0x208] ss:$20 sps:$4 sm:$0xff]  }
  0x15   : > { %1297 = vmatprep.mubr.bf16.mxu1 %v2876_v12  ;;  %v2882_v24 = vld [vmem:[%s3162_s11 + $0x2c] ss:$20 sps:$4 sm:$0xff]   ;;  %v2881_v26 = vld [vmem:[%s3718_s1 + $0xb0] sm:$0xff]   ;;  %v2898_v37 = vld [vmem:[%s3718_s1 + $0xd8] sm:$0xff]  }
  0x16   : > { %2535 = vmatpush3.bf16.msra.mxu0 %v2860_v5  ;;  %2824 = vmatpush3.bf16.msra.mxu1 %v2860_v5  ;;  %v2884_v25 = vld [vmem:[%s3162_s11 + $0x20c] ss:$20 sps:$4 sm:$0xff]   ;;  %v2892_v32 = vld [vmem:[%s3162_s11 + $0x54] ss:$20 sps:$4 sm:$0xff]   ;;  %v2896_v36 = vld [vmem:[%s3162_s11 + $0x50] ss:$20 sps:$4 sm:$0xff]  }
  0x17   : > { %2536 = vmatprep.subr.bf16.mxu0 %v2861_v6  ;;  %2817 = vmatprep.subr.bf16.mxu1 %v2861_v6  ;;  %v2889_v30 = vld [vmem:[%s3718_s1 + $0xa8] sm:$0xff]   ;;  %v2890_v31 = vld [vmem:[%s3718_s1 + $0xe0] sm:$0xff]   ;;  %v2911_v35 = vld [vmem:[%s3718_s1 + $0x110] sm:$0xff]  }
  0x18   : > { %v2894_v33 = vld [vmem:[%s3162_s11 + $0x234] ss:$20 sps:$4 sm:$0xff]   ;;  %v2891_v34 = vld [vmem:[%s3718_s1 + $0xa0] sm:$0xff]   ;;  %v2899_v39 = vld [vmem:[%s3718_s1 + $0x98] sm:$0xff]  }
  0x19   : > { %v2897_v38 = vld [vmem:[%s3162_s11 + $0x230] ss:$20 sps:$4 sm:$0xff]   ;;  %v2906_v44 = vld [vmem:[%s3162_s11 + $0x78] ss:$20 sps:$4 sm:$0xff]   ;;  %v2915_v53 = vld [vmem:[%s3162_s11 + $0x8] ss:$20 sps:$4 sm:$0xff]  }
  0x1a   : > { %2537 = vmatpush3.bf16.msra.mxu0 %v2862_v7  ;;  %2825 = vmatpush3.bf16.msra.mxu1 %v2862_v7  ;;  %v2900_v40 = vld [vmem:[%s3718_s1 + $0xd0] sm:$0xff]   ;;  %v2907_v45 = vld [vmem:[%s3162_s11 + $0x258] ss:$20 sps:$4 sm:$0xff]   ;;  %v2910_v49 = vld [vmem:[%s3718_s1 + $0xc0] sm:$0xff]  }
  0x1b   : > { %2538 = vmatprep.subr.bf16.mxu0 %v2863_v8  ;;  %2818 = vmatprep.subr.bf16.mxu1 %v2863_v8  ;;  %v2902_v41 = vld [vmem:[%s3162_s11 + $0x7c] ss:$20 sps:$4 sm:$0xff]   ;;  %v2908_v46 = vld [vmem:[%s3718_s1 + $0xc8] sm:$0xff]   ;;  %v2913_v50 = vld [vmem:[%s3162_s11 + $0xa4] ss:$20 sps:$4 sm:$0xff]  }
  0x1c   : > { %v2904_v42 = vld [vmem:[%s3162_s11 + $0x25c] ss:$20 sps:$4 sm:$0xff]   ;;  %v2931_v47 = vld [vmem:[%s3718_s1 + $0x108] sm:$0xff]   ;;  %v2912_v52 = vld [vmem:[%s3718_s1 + $0x80] sm:$0xff]  }
  0x1d   : > { %v2901_v43 = vld [vmem:[%s3718_s1 + $0x90] sm:$0xff]   ;;  %v2909_v48 = vld [vmem:[%s3718_s1 + $0x88] sm:$0xff]   ;;  %v2950_v56 = vld [vmem:[%s3718_s1 + $0x100] sm:$0xff]  }
  0x1e   : > { %2539 = vmatpush3.bf16.msra.mxu0 %v2864_v9  ;;  %2826 = vmatpush3.bf16.msra.mxu1 %v2864_v9  ;;  %v2917_v51 = vld [vmem:[%s3162_s11 + $0xc] ss:$20 sps:$4 sm:$0xff]   ;;  %v2921_v57 = vld [vmem:[%s3162_s11 + $0x34] ss:$20 sps:$4 sm:$0xff]   ;;  %v2924_v59 = vld [vmem:[%s3162_s11 + $0x30] ss:$20 sps:$4 sm:$0xff]  }
  0x1f   : > { %2540 = vmatprep.subr.bf16.mxu0 %v2865_v10  ;;  %2819 = vmatprep.subr.bf16.mxu1 %v2865_v10  ;;  %v2918_v54 = vld [vmem:[%s3162_s11 + $0xa0] ss:$20 sps:$4 sm:$0xff]   ;;  %v2923_v58 = vld [vmem:[%s3162_s11 + $0xc8] ss:$20 sps:$4 sm:$0xff]   ;;  %v2929_v62 = vld [vmem:[%s3162_s11 + $0xf0] ss:$20 sps:$4 sm:$0xff]  }
  0x20   : > { %v2919_v55 = vld [vmem:[%s3162_s11 + $0xcc] ss:$20 sps:$4 sm:$0xff]   ;;  %v2925_v60 = vld [vmem:[%s3162_s11 + $0xf4] ss:$20 sps:$4 sm:$0xff]   ;;  %v2927_v61 = vld [vmem:[%s3162_s11 + $0x5c] ss:$20 sps:$4 sm:$0xff]  }
  0x21   : > { %v2930_v63 = vld [vmem:[%s3162_s11 + $0x58] ss:$20 sps:$4 sm:$0xff]   ;;  %v2932_v0 = vld [vmem:[%s3162_s11 + $0x11c] ss:$20 sps:$4 sm:$0xff]   ;;  %v2937_v3 = vld [vmem:[%s3162_s11 + $0x80] ss:$20 sps:$4 sm:$0xff]  }
  0x22   : > { %2541 = vmatpush3.bf16.msra.mxu0 %v2866_v13  ;;  %2827 = vmatpush3.bf16.msra.mxu1 %v2866_v13  ;;  %v2934_v1 = vld [vmem:[%s3162_s11 + $0x84] ss:$20 sps:$4 sm:$0xff]   ;;  %v2940_v5 = vld [vmem:[%s3162_s11 + $0xac] ss:$20 sps:$4 sm:$0xff]   ;;  %v2943_v7 = vld [vmem:[%s3162_s11 + $0xa8] ss:$20 sps:$4 sm:$0xff]  }
  0x23   : > { %2542 = vmatprep.subr.bf16.mxu0 %v2867_v14  ;;  %2820 = vmatprep.subr.bf16.mxu1 %v2867_v14  ;;  %v2936_v2 = vld [vmem:[%s3162_s11 + $0x118] ss:$20 sps:$4 sm:$0xff]   ;;  %v2942_v6 = vld [vmem:[%s3162_s11 + $0x140] ss:$20 sps:$4 sm:$0xff]   ;;  %v2948_v10 = vld [vmem:[%s3162_s11 + $0x168] ss:$20 sps:$4 sm:$0xff]  }
  0x24   : > { %v2938_v4 = vld [vmem:[%s3162_s11 + $0x144] ss:$20 sps:$4 sm:$0xff]   ;;  %v2944_v8 = vld [vmem:[%s3162_s11 + $0x16c] ss:$20 sps:$4 sm:$0xff]   ;;  %v2946_v9 = vld [vmem:[%s3162_s11 + $0xd4] ss:$20 sps:$4 sm:$0xff]  }
  0x25   : > { %v2949_v11 = vld [vmem:[%s3162_s11 + $0xd0] ss:$20 sps:$4 sm:$0xff]   ;;  %v2951_v12 = vld [vmem:[%s3162_s11 + $0x194] ss:$20 sps:$4 sm:$0xff]  }
  0x26   : > { %2543 = vmatpush3.bf16.msra.mxu0 %v2868_v15  ;;  %2828 = vmatpush3.bf16.msra.mxu1 %v2868_v15  ;;  %v2953_v13 = vld [vmem:[%s3162_s11 + $0xfc] ss:$20 sps:$4 sm:$0xff]   ;;  %v2956_v15 = vld [vmem:[%s3162_s11 + $0xf8] ss:$20 sps:$4 sm:$0xff]  }
  0x27   : > { %2544 = vmatprep.subr.bf16.mxu0 %v2869_v16  ;;  %2821 = vmatprep.subr.bf16.mxu1 %v2869_v16  ;;  %v2955_v14 = vld [vmem:[%s3162_s11 + $0x190] ss:$20 sps:$4 sm:$0xff]  }
  0x28   : > { %v2957_v16 = vld [vmem:[%s3162_s11 + $0x1bc] ss:$20 sps:$4 sm:$0xff]  }
  0x2a   : > { %2545 = vmatpush3.bf16.msra.mxu0 %v2870_v17  ;;  %2829 = vmatpush3.bf16.msra.mxu1 %v2870_v17  ;;  %v2959_v17 = vld [vmem:[%s3162_s11 + $0x124] ss:$20 sps:$4 sm:$0xff]  }
  0x2b   : > { %2642 = vmatprep.subr.bf16.mxu1 %v2877_v18  ;;  %2774 = vmatprep.subr.bf16.mxu0 %v2880_v19  ;;  %v2961_v18 = vld [vmem:[%s3162_s11 + $0x1b8] ss:$20 sps:$4 sm:$0xff]  }
  0x2d   : > { %1202 = vmatmul.mubr.bf16.vlgmr.msra.gmra.mxu0 %v2871_v20  ;;  %1298 = vmatmul.mubr.bf16.vlgmr.msra.gmra.mxu1 %v2874_v21  ;;  %v2963_v20 = vld [vmem:[%s3162_s11 + $0x14c] ss:$20 sps:$4 sm:$0xff]   ;;  %v2965_v21 = vld [vmem:[%s3162_s11 + $0x10] ss:$20 sps:$4 sm:$0xff]  }
  0x2e   : > { %2643 = vmatpush3.bf16.msra.mxu1 %v2878_v22  ;;  %2775 = vmatpush3.bf16.msra.mxu0 %v2880_v19  ;;  %v2962_v19 = vld [vmem:[%s3162_s11 + $0x120] ss:$20 sps:$4 sm:$0xff]   ;;  %v2966_v22 = vld [vmem:[%s3162_s11 + $0x148] ss:$20 sps:$4 sm:$0xff]  }
  0x2f   : > { %2644 = vmatprep.subr.bf16.mxu1 %v2879_v23  ;;  %1209 = vmatprep.mubr.bf16.mxu0 %v2882_v24  ;;  %v2967_v23 = vld [vmem:[%s3162_s11 + $0x38] ss:$20 sps:$4 sm:$0xff]   ;;  %v2968_v24 = vld [vmem:[%s3162_s11 + $0x174] ss:$20 sps:$4 sm:$0xff]  }
  0x30   : > { %1305 = vmatprep.mubr.bf16.mxu1 %v2884_v25  ;;  %2776 = vmatprep.subr.bf16.mxu0 %v2911_v35  ;;  %v2970_v25 = vld [vmem:[%s3162_s11 + $0x60] ss:$20 sps:$4 sm:$0xff]  }
  0x32   : > { %2645 = vmatpush3.bf16.msra.mxu1 %v2881_v26  ;;  %2777 = vmatpush3.bf16.msra.mxu0 %v2911_v35  ;;  %v2971_v26 = vld [vmem:[%s3162_s11 + $0x170] ss:$20 sps:$4 sm:$0xff]   ;;  %v2982_v35 = vld [vmem:[%s3162_s11 + $0x128] ss:$20 sps:$4 sm:$0xff]  }
  0x33   : > { %2646 = vmatprep.subr.bf16.mxu1 %v2888_v28  ;;  %2778 = vmatprep.subr.bf16.mxu0 %v2931_v47  ;;  %v2973_v28 = vld [vmem:[%s3162_s11 + $0x19c] ss:$20 sps:$4 sm:$0xff]  }
  0x35   : > { %1210 = vmatmul.mubr.bf16.gmra.mxu0 %v2886_v27  ;;  %1306 = vmatmul.mubr.bf16.gmra.mxu1 %v2887_v29  ;;  %v2972_v27 = vld [vmem:[%s3162_s11 + $0x88] ss:$20 sps:$4 sm:$0xff]   ;;  %v2975_v29 = vld [vmem:[%s3162_s11 + $0xb0] ss:$20 sps:$4 sm:$0xff]  }
  0x36   : > { %2647 = vmatpush3.bf16.msra.mxu1 %v2889_v30  ;;  %1217 = vmatprep.mubr.bf16.mxu0 %v2892_v32  ;;  %v2976_v30 = vld [vmem:[%s3162_s11 + $0x198] ss:$20 sps:$4 sm:$0xff]  }
  0x37   : > { %2648 = vmatprep.subr.bf16.mxu1 %v2890_v31  ;;  %1313 = vmatprep.mubr.bf16.mxu1 %v2894_v33  ;;  %v2977_v31 = vld [vmem:[%s3162_s11 + $0xd8] ss:$20 sps:$4 sm:$0xff]   ;;  %v2980_v33 = vld [vmem:[%s3162_s11 + $0x100] ss:$20 sps:$4 sm:$0xff]  }
  0x38   : > { %2779 = vmatpush3.bf16.msra.mxu0 %v2931_v47  ;;  %v2978_v32 = vld [vmem:[%s3162_s11 + $0x1c4] ss:$20 sps:$4 sm:$0xff]  }
  0x39   : > { %2780 = vmatprep.subr.bf16.mxu0 %v2950_v56  ;;  %v2997_v47 = vld [vmem:[%s3162_s11 + $0x218] ss:$20 sps:$4 sm:$0xff]  }
  0x3a   : > { %2649 = vmatpush3.bf16.msra.mxu1 %v2891_v34  ;;  %v2981_v34 = vld [vmem:[%s3162_s11 + $0x1c0] ss:$20 sps:$4 sm:$0xff]  }
  0x3b   : > { %2650 = vmatprep.subr.bf16.mxu1 %v2898_v37  ;;  %v2985_v37 = vld [vmem:[%s3162_s11 + $0x150] ss:$20 sps:$4 sm:$0xff]  }
  0x3c   : > { %2781 = vmatpush3.bf16.msra.mxu0 %v2950_v56 }
  0x3d   : > { %1218 = vmatmul.mubr.bf16.gmra.mxu0 %v2896_v36  ;;  %1314 = vmatmul.mubr.bf16.gmra.mxu1 %v2897_v38  ;;  %v2983_v36 = vld [vmem:[%s3162_s11 + $0x1ec] ss:$20 sps:$4 sm:$0xff]   ;;  %v2986_v38 = vld [vmem:[%s3162_s11 + $0x1e8] ss:$20 sps:$4 sm:$0xff]  }
  0x3e   : > { %2651 = vmatpush3.bf16.msra.mxu1 %v2899_v39  ;;  %1225 = vmatprep.mubr.bf16.mxu0 %v2902_v41  ;;  %v2987_v39 = vld [vmem:[%s3162_s11 + $0x178] ss:$20 sps:$4 sm:$0xff]   ;;  %v2990_v41 = vld [vmem:[%s3162_s11 + $0x1a0] ss:$20 sps:$4 sm:$0xff]  }
  0x3f   : > { %2652 = vmatprep.subr.bf16.mxu1 %v2900_v40  ;;  %1321 = vmatprep.mubr.bf16.mxu1 %v2904_v42  ;;  %v2988_v40 = vld [vmem:[%s3162_s11 + $0x214] ss:$20 sps:$4 sm:$0xff]   ;;  %v2991_v42 = vld [vmem:[%s3162_s11 + $0x210] ss:$20 sps:$4 sm:$0xff]  }
  0x42   : > { %2653 = vmatpush3.bf16.msra.mxu1 %v2901_v43  ;;  %v2992_v43 = vld [vmem:[%s3162_s11 + $0x1c8] ss:$20 sps:$4 sm:$0xff]  }
  0x43   : > { %2654 = vmatprep.subr.bf16.mxu1 %v2908_v46  ;;  %v2996_v46 = vld [vmem:[%s3162_s11 + $0x238] ss:$20 sps:$4 sm:$0xff]  }
  0x45   : > { %1226 = vmatmul.mubr.bf16.gmra.mxu0 %v2906_v44  ;;  %1322 = vmatmul.mubr.bf16.gmra.mxu1 %v2907_v45  ;;  %v2993_v44 = vld [vmem:[%s3162_s11 + $0x23c] ss:$20 sps:$4 sm:$0xff]  }
  0x46   : > { %2655 = vmatpush3.bf16.msra.mxu1 %v2909_v48  ;;  %1233 = vmatprep.mubr.bf16.mxu0 %v2913_v50  ;;  %v2995_v45 = vld [vmem:[%s3162_s11 + $0x1f0] ss:$20 sps:$4 sm:$0xff]   ;;  %v3001_v50 = vld [vmem:[%s3162_s11 + $0x260] ss:$20 sps:$4 sm:$0xff]  }
  0x47   : > { %2656 = vmatprep.subr.bf16.mxu1 %v2910_v49  ;;  %1362 = vmatprep.mubr.bf16.mxu1 %v2917_v51  ;;  %v2998_v48 = vld [vmem:[%s3162_s11 + $0x264] ss:$20 sps:$4 sm:$0xff]   ;;  %v3000_v49 = vld [vmem:[%s3162_s11 + $0x240] ss:$20 sps:$4 sm:$0xff]   ;;  %v3002_v51 = vld [vmem:[%s3162_s11 + $0x268] ss:$20 sps:$4 sm:$0xff]  }
  0x4a   : > { %2657 = vmatpush3.bf16.msra.mxu1 %v2912_v52 }
  0x4d   : > { %1234 = vmatmul.mubr.bf16.gmra.mxu0 %v2918_v54  ;;  %1363 = vmatmul.mubr.bf16.vlgmr.msra.gmra.mxu1 %v2915_v53 }
  0x4e   : > { %1241 = vmatprep.mubr.bf16.mxu0 %v2919_v55  ;;  %1370 = vmatprep.mubr.bf16.mxu1 %v2921_v57 }
  0x55   : > { %1242 = vmatmul.mubr.bf16.gmra.mxu0 %v2923_v58  ;;  %1371 = vmatmul.mubr.bf16.gmra.mxu1 %v2924_v59 }
  0x56   : > { %1249 = vmatprep.mubr.bf16.mxu0 %v2925_v60  ;;  %1378 = vmatprep.mubr.bf16.mxu1 %v2927_v61 }
  0x5d   : > { %1250 = vmatmul.mubr.bf16.gmra.mxu0 %v2929_v62  ;;  %1379 = vmatmul.mubr.bf16.gmra.mxu1 %v2930_v63 }
  0x5e   : > { %1257 = vmatprep.mubr.bf16.mxu0 %v2932_v0  ;;  %1386 = vmatprep.mubr.bf16.mxu1 %v2934_v1 }
  0x65   : > { %1258 = vmatmul.mubr.bf16.gmra.mxu0 %v2936_v2  ;;  %1387 = vmatmul.mubr.bf16.gmra.mxu1 %v2937_v3 }
  0x66   : > { %1265 = vmatprep.mubr.bf16.mxu0 %v2938_v4  ;;  %1394 = vmatprep.mubr.bf16.mxu1 %v2940_v5 }
  0x6d   : > { %1266 = vmatmul.mubr.bf16.gmra.mxu0 %v2942_v6  ;;  %1395 = vmatmul.mubr.bf16.gmra.mxu1 %v2943_v7 }
  0x6e   : > { %1273 = vmatprep.mubr.bf16.mxu0 %v2944_v8  ;;  %1402 = vmatprep.mubr.bf16.mxu1 %v2946_v9 }
  0x75   : > { %1274 = vmatmul.mubr.bf16.gmra.mxu0 %v2948_v10  ;;  %1403 = vmatmul.mubr.bf16.gmra.mxu1 %v2949_v11 }
  0x76   : > { %1281 = vmatprep.mubr.bf16.mxu0 %v2951_v12  ;;  %1410 = vmatprep.mubr.bf16.mxu1 %v2953_v13 }
  0x7d   : > { %1282 = vmatmul.mubr.bf16.gmra.mxu0 %v2955_v14  ;;  %1411 = vmatmul.mubr.bf16.gmra.mxu1 %v2956_v15 }
  0x7e   : > { %1289 = vmatprep.mubr.bf16.mxu0 %v2957_v16  ;;  %1418 = vmatprep.mubr.bf16.mxu1 %v2959_v17 }
  0x85   : > { %1290 = vmatmul.mubr.bf16.gmra.mxu0 %v2961_v18  ;;  %1419 = vmatmul.mubr.bf16.gmra.mxu1 %v2962_v19 }
  0x86   : > { %1426 = vmatprep.mubr.bf16.mxu1 %v2963_v20  ;;  %2782 = vmatprep.mubr.msk.bf16.mxu0 %vm1120_vm0, %v2965_v21 }
  0x8d   : > { %1427 = vmatmul.mubr.bf16.gmra.mxu1 %v2966_v22  ;;  %2783 = vmatmul.mubr.msk.bf16.vlgmr.msra.gmra.mxu0 %vm1120_vm0, %v2967_v23 }
  0x8e   : > { %1434 = vmatprep.mubr.bf16.mxu1 %v2968_v24  ;;  %2786 = vmatprep.mubr.msk.bf16.mxu0 %vm1120_vm0, %v2970_v25 }
  0x95   : > { %1435 = vmatmul.mubr.bf16.gmra.mxu1 %v2971_v26  ;;  %2787 = vmatmul.mubr.msk.bf16.gmra.mxu0 %vm1120_vm0, %v2972_v27 }
  0x96   : > { %1442 = vmatprep.mubr.bf16.mxu1 %v2973_v28  ;;  %2790 = vmatprep.mubr.msk.bf16.mxu0 %vm1120_vm0, %v2975_v29 }
  0x9d   : > { %1443 = vmatmul.mubr.bf16.gmra.mxu1 %v2976_v30  ;;  %2791 = vmatmul.mubr.msk.bf16.gmra.mxu0 %vm1120_vm0, %v2977_v31 }
  0x9e   : > { %1450 = vmatprep.mubr.bf16.mxu1 %v2978_v32  ;;  %2794 = vmatprep.mubr.msk.bf16.mxu0 %vm1120_vm0, %v2980_v33 }
  0xa5   : > { %1451 = vmatmul.mubr.bf16.gmra.mxu1 %v2981_v34  ;;  %2795 = vmatmul.mubr.msk.bf16.gmra.mxu0 %vm1120_vm0, %v2982_v35 }
  0xa6   : > { %1458 = vmatprep.mubr.bf16.mxu1 %v2983_v36  ;;  %2798 = vmatprep.mubr.msk.bf16.mxu0 %vm1120_vm0, %v2985_v37 }
  0xad   : > { %1459 = vmatmul.mubr.bf16.gmra.mxu1 %v2986_v38  ;;  %2799 = vmatmul.mubr.msk.bf16.gmra.mxu0 %vm1120_vm0, %v2987_v39 }
  0xae   : > { %1466 = vmatprep.mubr.bf16.mxu1 %v2988_v40  ;;  %2802 = vmatprep.mubr.msk.bf16.mxu0 %vm1120_vm0, %v2990_v41 }
  0xb5   : > { %1467 = vmatmul.mubr.bf16.gmra.mxu1 %v2991_v42  ;;  %2803 = vmatmul.mubr.msk.bf16.gmra.mxu0 %vm1120_vm0, %v2992_v43 }
  0xb6   : > { %1474 = vmatprep.mubr.bf16.mxu1 %v2993_v44  ;;  %2806 = vmatprep.mubr.msk.bf16.mxu0 %vm1120_vm0, %v2995_v45 }
  0xbd   : > { %1475 = vmatmul.mubr.bf16.gmra.mxu1 %v2996_v46  ;;  %2807 = vmatmul.mubr.msk.bf16.gmra.mxu0 %vm1120_vm0, %v2997_v47 }
  0xbe   : > { %1482 = vmatprep.mubr.bf16.mxu1 %v2998_v48  ;;  %2810 = vmatprep.mubr.msk.bf16.mxu0 %vm1120_vm0, %v3000_v49 }
  0xc5   : > { %1483 = vmatmul.mubr.bf16.gmra.mxu1 %v3001_v50  ;;  %2811 = vmatmul.mubr.msk.bf16.gmra.mxu0 %vm1120_vm0, %v3002_v51 }
  0xed   : > { %v2546_v52 = vpop.f32.mrf.mxu0  ;;  %v2618_v53 = vpop.f32.mrf.mxu1 }
  0xef   : > { %v2547_v54 = vpop.f32.mrf.mxu0  ;;  %v2619_v55 = vpop.f32.mrf.mxu1 }
  0xf0   : > { %v2548_v56 = vadd.f32 %v2547_v54, %v2546_v52  ;;  %v3341_v57 = vadd.f32 %v2619_v55, %v2618_v53 }
  0xf1   : > { %v2549_v58 = vpop.f32.mrf.mxu0  ;;  %v2621_v59 = vpop.f32.mrf.mxu1 }
  0xf2   : > { %3721 = vst [vmem:[#allocation3_spill] sm:$0xff] %v3341_v57 }
  0xf3   : > { %v2550_v60 = vpop.f32.mrf.mxu0  ;;  %v2622_v61 = vpop.f32.mrf.mxu1 }
  0xf4   : > { %v3343_v62 = vadd.f32 %v2550_v60, %v2549_v58  ;;  %v3345_v63 = vadd.f32 %v2622_v61, %v2621_v59 }
  0xf5   : > { %v2552_v0 = vpop.f32.mrf.mxu0  ;;  %v2624_v1 = vpop.f32.mrf.mxu1 }
  0xf6   : > { %3722 = vst [vmem:[#allocation4_spill] sm:$0xff] %v3345_v63 }
  0xf7   : > { %v2553_v2 = vpop.f32.mrf.mxu0  ;;  %v2625_v3 = vpop.f32.mrf.mxu1 }
  0xf8   : > { %v3347_v4 = vadd.f32 %v2553_v2, %v2552_v0  ;;  %v3349_v5 = vadd.f32 %v2625_v3, %v2624_v1 }
  0xf9   : > { %v2555_v6 = vpop.f32.mrf.mxu0  ;;  %v2627_v7 = vpop.f32.mrf.mxu1 }
  0xfa   : > { %3723 = vst [vmem:[#allocation5_spill] sm:$0xff] %v3349_v5 }
  0xfb   : > { %v2556_v8 = vpop.f32.mrf.mxu0  ;;  %v2628_v9 = vpop.f32.mrf.mxu1 }
  0xfc   : > { %v3351_v10 = vadd.f32 %v2556_v8, %v2555_v6  ;;  %v3353_v11 = vadd.f32 %v2628_v9, %v2627_v7 }
  0xfd   : > { %v2558_v12 = vpop.f32.mrf.mxu0  ;;  %v2630_v13 = vpop.f32.mrf.mxu1 }
  0xfe   : > { %3724 = vst [vmem:[#allocation6_spill] sm:$0xff] %v3353_v11 }
  0xff   : > { %v2559_v14 = vpop.f32.mrf.mxu0  ;;  %v2631_v15 = vpop.f32.mrf.mxu1 }
 0x100   : > { %v3355_v16 = vadd.f32 %v2559_v14, %v2558_v12  ;;  %v3357_v17 = vadd.f32 %v2631_v15, %v2630_v13 }
 0x101   : > { %v2561_v18 = vpop.f32.mrf.mxu0  ;;  %v2633_v19 = vpop.f32.mrf.mxu1 }
 0x102   : > { %3725 = vst [vmem:[#allocation7_spill] sm:$0xff] %v3357_v17 }
 0x103   : > { %v2562_v20 = vpop.f32.mrf.mxu0  ;;  %v2634_v21 = vpop.f32.mrf.mxu1 }
 0x104   : > { %v3359_v22 = vadd.f32 %v2562_v20, %v2561_v18  ;;  %v3361_v23 = vadd.f32 %v2634_v21, %v2633_v19 }
 0x105   : > { %v2564_v24 = vpop.f32.mrf.mxu0  ;;  %v2636_v25 = vpop.f32.mrf.mxu1 }
 0x106   : > { %3726 = vst [vmem:[#allocation8_spill] sm:$0xff] %v3361_v23 }
 0x107   : > { %v2565_v26 = vpop.f32.mrf.mxu0  ;;  %v2637_v27 = vpop.f32.mrf.mxu1 }
 0x108   : > { %v3363_v28 = vadd.f32 %v2565_v26, %v2564_v24  ;;  %v3365_v29 = vadd.f32 %v2637_v27, %v2636_v25 }
 0x109   : > { %v2567_v30 = vpop.f32.mrf.mxu0  ;;  %v2639_v31 = vpop.f32.mrf.mxu1 }
 0x10a   : > { %3727 = vst [vmem:[#allocation9_spill] sm:$0xff] %v3365_v29 }
 0x10b   : > { %v2568_v32 = vpop.f32.mrf.mxu0  ;;  %v2640_v33 = vpop.f32.mrf.mxu1 }
 0x10c   : > { %v3367_v34 = vadd.f32 %v2568_v32, %v2567_v30  ;;  %v3369_v35 = vadd.f32 %v2640_v33, %v2639_v31 }
 0x10d   : > { %v2570_v36 = vpop.f32.mrf.mxu0  ;;  %v2658_v37 = vpop.f32.mrf.mxu1 }
 0x10e   : > { %3728 = vst [vmem:[#allocation10_spill] sm:$0xff] %v3369_v35 }
 0x10f   : > { %v2571_v38 = vpop.f32.mrf.mxu0  ;;  %v2659_v39 = vpop.f32.mrf.mxu1 }
 0x110   : > { %v3371_v40 = vadd.f32 %v2571_v38, %v2570_v36  ;;  %v2660_v41 = vadd.f32 %v2659_v39, %v2658_v37 }
 0x111   : > { %v2573_v42 = vpop.f32.mrf.mxu0  ;;  %v3373_v43 = vpop.f32.mrf.mxu1 }
 0x112   : > { %v3375_v44 = vadd.f32 %v2660_v41, %v2548_v56 }
 0x113   : > { %v2574_v45 = vpop.f32.mrf.mxu0  ;;  %v3377_v46 = vpop.f32.mrf.mxu1 }
 0x114   : > { %v3379_v47 = vadd.f32 %v2574_v45, %v2573_v42 }
 0x115   : > { %v2576_v48 = vpop.f32.mrf.mxu0  ;;  %v2664_v49 = vpop.f32.mrf.mxu1 }
 0x117   : > { %v2577_v50 = vpop.f32.mrf.mxu0  ;;  %v2665_v51 = vpop.f32.mrf.mxu1 }
 0x118   : > { %v3381_v52 = vadd.f32 %v2577_v50, %v2576_v48  ;;  %v2666_v17 = vadd.f32 %v2665_v51, %v2664_v49  ;;  %v3445_v49 = vld [vmem:[%s3719_s2] ss:$0 sm:$0xff] }
 0x119   : > { %v2579_v53 = vpop.f32.mrf.mxu0  ;;  %v2667_v54 = vpop.f32.mrf.mxu1 }
 0x11b   : > { %v2580_v55 = vpop.f32.mrf.mxu0  ;;  %v2668_v58 = vpop.f32.mrf.mxu1 }
 0x11c   : > { %v3383_v59 = vadd.f32 %v2580_v55, %v2579_v53 }
 0x11d   : > { %v2582_v60 = vpop.f32.mrf.mxu0  ;;  %v2670_v56 = vpop.f32.mrf.mxu1 }
 0x11f   : > { %v2583_v61 = vpop.f32.mrf.mxu0  ;;  %v2671_v0 = vpop.f32.mrf.mxu1 }
 0x120   : > { %v3385_v1 = vadd.f32 %v2583_v61, %v2582_v60 }
 0x121   : > { %v2585_v2 = vpop.f32.mrf.mxu0  ;;  %v2673_v3 = vpop.f32.mrf.mxu1 }
 0x122   : > { %3729 = vst [vmem:[#allocation11_spill] sm:$0xff] %v3385_v1 }
 0x123   : > { %v2586_v6 = vpop.f32.mrf.mxu0  ;;  %v2674_v7 = vpop.f32.mrf.mxu1 }
 0x124   : > { %v3387_v8 = vadd.f32 %v2586_v6, %v2585_v2  ;;  %v2675_v51 = vadd.f32 %v2674_v7, %v2673_v3 }
 0x125   : > { %v3389_v9 = vpop.f32.mrf.mxu0  ;;  %v2676_v12 = vpop.f32.mrf.mxu1 }
 0x126   : > { %3730 = vst [vmem:[#allocation12_spill] sm:$0xff] %v3387_v8  ;;  %v1373_v8 = vadd.f32 %v2666_v17, %v3347_v4 }
 0x127   : > { %v3391_v13 = vpop.f32.mrf.mxu0  ;;  %v2677_v14 = vpop.f32.mrf.mxu1 }
 0x129   : > { %v3393_v15 = vpop.f32.mrf.mxu0  ;;  %v2679_v18 = vpop.f32.mrf.mxu1 }
 0x12b   : > { %v2592_v19 = vpop.f32.mrf.mxu0  ;;  %v2680_v20 = vpop.f32.mrf.mxu1 }
 0x12d   : > { %v2594_v21 = vpop.f32.mrf.mxu0  ;;  %v2682_v24 = vpop.f32.mrf.mxu1 }
 0x12f   : > { %v2595_v25 = vpop.f32.mrf.mxu0  ;;  %v2683_v26 = vpop.f32.mrf.mxu1 }
 0x130   : > { %v3395_v27 = vadd.f32 %v2595_v25, %v2594_v21 }
 0x131   : > { %v3397_v30 = vpop.f32.mrf.mxu0  ;;  %v2685_v31 = vpop.f32.mrf.mxu1 }
 0x132   : > { %3731 = vst [vmem:[#allocation13_spill] sm:$0xff] %v3395_v27  ;;  %v2669_v27 = vadd.f32 %v2668_v58, %v2667_v54  ;;  %v2684_v58 = vadd.f32 %v2683_v26, %v2682_v24 }
 0x133   : > { %v3399_v32 = vpop.f32.mrf.mxu0  ;;  %v2686_v33 = vpop.f32.mrf.mxu1 }
 0x135   : > { %v3401_v36 = vpop.f32.mrf.mxu0  ;;  %v2688_v37 = vpop.f32.mrf.mxu1 }
 0x137   : > { %v3403_v38 = vpop.f32.mrf.mxu0  ;;  %v2689_v39 = vpop.f32.mrf.mxu1 }
 0x139   : > { %v3405_v41 = vpop.f32.mrf.mxu0  ;;  %v2691_v42 = vpop.f32.mrf.mxu1 }
 0x13b   : > { %v3407_v45 = vpop.f32.mrf.mxu0  ;;  %v2692_v48 = vpop.f32.mrf.mxu1 }
 0x13c   : > { %v2693_v26 = vadd.f32 %v2692_v48, %v2691_v42  ;;  %v3492_v42 = vadd.f32 %v3407_v45, %v3405_v41 }
 0x13d   : > { %v3409_v50 = vpop.f32.mrf.mxu0  ;;  %v2694_v53 = vpop.f32.mrf.mxu1 }
 0x13f   : > { %v3411_v55 = vpop.f32.mrf.mxu0  ;;  %v2695_v60 = vpop.f32.mrf.mxu1 }
 0x141   : > { %v3413_v61 = vpop.f32.mrf.mxu0  ;;  %v3415_v2 = vpop.f32.mrf.mxu1 }
 0x142   : > { %3732 = vst [vmem:[#allocation14_spill] sm:$0xff] %v3413_v61 }
 0x143   : > { %v3417_v6 = vpop.f32.mrf.mxu0  ;;  %v3419_v21 = vpop.f32.mrf.mxu1 }
 0x144   : > { %3733 = vst [vmem:[#allocation15_spill] sm:$0xff] %v3417_v6  ;;  %v2672_v6 = vadd.f32 %v2671_v0, %v2670_v56 }
 0x145   : > { %v3421_v25 = vpop.f32.mrf.mxu0  ;;  %v3423_v35 = vpop.f32.mrf.mxu1 }
 0x146   : > { %3734 = vst [vmem:[#allocation16_spill] sm:$0xff] %v3421_v25  ;;  %v2663_v25 = vadd.f32 %v3377_v46, %v3373_v43  ;;  %v1376_v43 = vadd.f32 %v2669_v27, %v3351_v10  ;;  %v2681_v46 = vadd.f32 %v2680_v20, %v2679_v18  ;;  %v2590_v10 = vadd.f32 %v3391_v13, %v3389_v9 }
 0x147   : > { %v3425_v23 = vpop.f32.mrf.mxu0  ;;  %v3427_v29 = vpop.f32.mrf.mxu1  ;;  %v1397_v13 = vadd.f32 %v2684_v58, %v3371_v40 }
 0x148   : > { %3735 = vst [vmem:[#allocation17_spill] sm:$0xff] %v3425_v23  ;;  %v1392_v9 = vadd.f32 %v2681_v46, %v3367_v34 }
 0x149   : > { %v3429_v63 = vpop.f32.mrf.mxu0  ;;  %v3431_v11 = vpop.f32.mrf.mxu1 }
 0x14a   : > { %3736 = vst [vmem:[#allocation18_spill] sm:$0xff] %v3429_v63 }
 0x14b   : > { %v3433_v57 = vpop.f32.mrf.mxu0  ;;  %v3435_v5 = vpop.f32.mrf.mxu1 }
 0x14c   : > { %3737 = vst [vmem:[#allocation19_spill] sm:$0xff] %v3433_v57  ;;  %v2678_v57 = vadd.f32 %v2677_v14, %v2676_v12  ;;  %v2687_v12 = vadd.f32 %v2686_v33, %v2685_v31  ;;  %v2696_v31 = vadd.f32 %v2695_v60, %v2694_v53  ;;  %v1408_v60 = vadd.f32 %v2693_v26, %v3383_v59  ;;  %v3740_v59 = vld [vmem:[#allocation14_spill] sm:$0xff] }
 0x14d   : > { %v3440_v61 = vpop.f32.mrf.mxu1  ;;  %v2784_v23 = vpop.f32.mrf.mxu0  ;;  %v2705_v41 = vadd.f32 %v3435_v5, %v3431_v11  ;;  %v3742_v46 = vld [vmem:[#allocation16_spill] sm:$0xff] }
 0x14e   : > { %3738 = vst [vmem:[#allocation20_spill] sm:$0xff] %v3440_v61  ;;  %v1534_v63 = vadd.f32 %v2784_v23, %v1373_v8  ;;  %v1368_v61 = vadd.f32 %v2663_v25, %v3343_v62  ;;  %v1381_v23 = vadd.f32 %v2672_v6, %v3355_v16  ;;  %v1384_v8 = vadd.f32 %v2675_v51, %v3359_v22 }
 0x14f   : > { %v3447_v1 = vpop.f32.mrf.mxu1  ;;  %v1525_v54 = vpop.f32.mrf.mxu0  ;;  %v1389_v62 = vadd.f32 %v2678_v57, %v3363_v28  ;;  %v2690_v16 = vadd.f32 %v2689_v39, %v2688_v37  ;;  %v3486_v34 = vadd.f32 %v2687_v12, %v3379_v47  ;;  %v2702_v47 = vadd.f32 %v3427_v29, %v3423_v35 }
 0x150   : > { %v3450_v4 = vadd.f32 %v3445_v49, %v1534_v63  ;;  %v1526_v17 = vadd.f32 %v1525_v54, %v3375_v44  ;;  %v3466_v44 = vadd.f32 %v2592_v19, %v3393_v15  ;;  %v3477_v15 = vadd.f32 %v3399_v32, %v3397_v30 }
 0x151   : > { %v3454_v56 = vpop.f32.mrf.mxu1  ;;  %v2785_v0 = vpop.f32.mrf.mxu0  ;;  %v3482_v19 = vadd.f32 %v3403_v38, %v3401_v36  ;;  %v1405_v32 = vadd.f32 %v2690_v16, %v3381_v52  ;;  %v2699_v36 = vadd.f32 %v3419_v21, %v3415_v2  ;;  %v3502_v52 = vadd.f32 %v3411_v55, %v3409_v50  ;;  %v3739_v21 = vld [vmem:[#allocation11_spill] sm:$0xff]  ;;  %v3743_v50 = vld [vmem:[#allocation17_spill] sm:$0xff] }
 0x152   : > { %v1825_v3 = vmul.f32 0.70710677, %v3450_v4  ;;  %v3460_v7 = vadd.f32 %v3445_v49, %v1526_v17  ;;  %v1537_v63 = vadd.f32 %v2785_v0, %v1376_v43  ;;  %v3507_v54 = vadd.f32 %v2696_v31, %v3739_v21  ;;  %v3741_v17 = vld [vmem:[#allocation15_spill] sm:$0xff] }
 0x153   : > { %v2710_v14 = vpop.f32.mrf.mxu1  ;;  %v1528_v18 = vpop.f32.mrf.mxu0  ;;  %v3511_v29 = vadd.f32 %v3741_v17, %v3740_v59  ;;  %v3516_v55 = vadd.f32 %v3743_v50, %v3742_v46  ;;  %v1421_v16 = vadd.f32 %v2702_v47, %v2590_v10  ;;  %v3747_v26 = vld [vmem:[#allocation19_spill] sm:$0xff] }
 0x154   : > { %3003 = verf.f32 %v1825_v3  ;;  %v1823_v20 = vmul.f32 0.70710677, %v3460_v7  ;;  %v3471_v24 = vadd.f32 %v3445_v49, %v1537_v63  ;;  %v1529_v22 = vadd.f32 %v1528_v18, %v1368_v61  ;;  %v3745_v3 = vld [vmem:[#allocation12_spill] sm:$0xff] }
 0x155   : > { %v2712_v27 = vpop.f32.mrf.mxu1  ;;  %v2788_v6 = vpop.f32.mrf.mxu0  ;;  %v3744_v58 = vld [vmem:[#allocation20_spill] sm:$0xff]  ;;  %v3521_v63 = vadd.f32 %v2699_v36, %v3745_v3  ;;  %v2711_v12 = vadd.f32 %v2710_v14, %v3454_v56  ;;  %v1790_v31 = vmul.f32 0.5, %v3460_v7  ;;  %v3748_v36 = vld [vmem:[#allocation13_spill] sm:$0xff] }
 0x156   : > { %3005 = verf.f32 %v1823_v20  ;;  %v1826_v57 = vmul.f32 0.70710677, %v3471_v24  ;;  %v1550_v28 = vadd.f32 %v2788_v6, %v1389_v62  ;;  %v1759_v33 = vadd.f32 %v3445_v49, %v1529_v22  ;;  %v3746_v20 = vld [vmem:[#allocation18_spill] sm:$0xff] }
 0x157   : > { %v2713_v37 = vpop.f32.mrf.mxu1  ;;  %v1541_v39 = vpop.f32.mrf.mxu0  ;;  %v2708_v5 = vadd.f32 %v3447_v1, %v3744_v58  ;;  %v3526_v22 = vadd.f32 %v3747_v26, %v3746_v20 }
 0x158   : > { %3007 = verf.f32 %v1826_v57  ;;  %v1764_v40 = vadd.f32 %v3445_v49, %v1550_v28  ;;  %v1542_v30 = vadd.f32 %v1541_v39, %v1381_v23  ;;  %v1824_v38 = vmul.f32 0.70710677, %v1759_v33 }
 0x159   : > { %v2715_v48 = vpop.f32.mrf.mxu1  ;;  %v2789_v53 = vpop.f32.mrf.mxu0  ;;  %v2714_v57 = vadd.f32 %v2713_v37, %v2712_v27  ;;  %v1792_v28 = vmul.f32 0.5, %v3450_v4 }
 0x15a   : > { %v1829_v61 = vmul.f32 0.70710677, %v1764_v40  ;;  %v1762_v25 = vadd.f32 %v3445_v49, %v1542_v30  ;;  %v1553_v51 = vadd.f32 %v2789_v53, %v1392_v9  ;;  %3009 = verf.f32 %v1824_v38 }
 0x15b   : > { %v2716_v45 = vpop.f32.mrf.mxu1  ;;  %v1544_v2 = vpop.f32.mrf.mxu0  ;;  %v3532_v9 = vadd.f32 %v2705_v41, %v3466_v44  ;;  %v3543_v38 = vadd.f32 %v2708_v5, %v3748_v36  ;;  %v1793_v44 = vmul.f32 0.5, %v3471_v24  ;;  %v1791_v53 = vmul.f32 0.5, %v1759_v33 }
 0x15c   : > { %3011 = verf.f32 %v1829_v61  ;;  %v1827_v35 = vmul.f32 0.70710677, %v1762_v25  ;;  %v1765_v43 = vadd.f32 %v3445_v49, %v1553_v51  ;;  %v1545_v11 = vadd.f32 %v1544_v2, %v1384_v8 }
 0x15d   : > { %v2718_v0 = vpop.f32.mrf.mxu1  ;;  %v2792_v23 = vpop.f32.mrf.mxu0  ;;  %v3551_v7 = vmul.f32 0.5, %v1764_v40  ;;  %v3553_v2 = vmul.f32 0.5, %v1762_v25  ;;  %v2717_v24 = vadd.f32 %v2716_v45, %v2715_v48  ;;  %v1437_v21 = vadd.f32 %v2714_v57, %v3482_v19 }
 0x15e   : > { %v1830_v18 = vmul.f32 0.70710677, %v1765_v43  ;;  %v1566_v62 = vadd.f32 %v2792_v23, %v1405_v32  ;;  %3013 = verf.f32 %v1827_v35  ;;  %v3529_v6 = vadd.f32 %v3445_v49, %v1545_v11 }
 0x15f   : > { %v2719_v1 = vpop.f32.mrf.mxu1  ;;  %v1557_v8 = vpop.f32.mrf.mxu0  ;;  %v1797_v50 = vmul.f32 0.5, %v1765_v43  ;;  %v1440_v20 = vadd.f32 %v2717_v24, %v3492_v42 }
 0x160   : > { %3015 = verf.f32 %v1830_v18  ;;  %v3535_v56 = vadd.f32 %v3445_v49, %v1566_v62  ;;  %v1558_v14 = vadd.f32 %v1557_v8, %v1397_v13  ;;  %v1828_v39 = vmul.f32 0.70710677, %v3529_v6 }
 0x161   : > { %v3004_v10 = vpop.eup %3003  ;;  %v3540_v30 = vpop.f32.mrf.mxu1  ;;  %v3549_v13 = vadd.f32 %v2711_v12, %v3477_v15  ;;  %v2720_v25 = vadd.f32 %v2719_v1, %v2718_v0  ;;  %v1795_v8 = vmul.f32 0.5, %v3529_v6 }
 0x162   : > { %v2793_v32 = vpop.f32.mrf.mxu0  ;;  %v1833_v27 = vmul.f32 0.70710677, %v3535_v56  ;;  %v1766_v37 = vadd.f32 %v3445_v49, %v1558_v14  ;;  %3017 = verf.f32 %v1828_v39  ;;  %v1889_v41 = vadd.f32 1.0, %v3004_v10 }
 0x163   : > { %v3006_v4 = vpop.eup %3005  ;;  %v1569_v47 = vadd.f32 %v2793_v32, %v1408_v60  ;;  %v2722_v61 = vpop.f32.mrf.mxu1  ;;  %v3581_v42 = vmul.f32 0.5, %v3535_v56  ;;  %v3586_v6 = vadd.f32 %v2720_v25, %v3502_v52 }
 0x164   : > { %v1560_v51 = vpop.f32.mrf.mxu0  ;;  %3019 = verf.f32 %v1833_v27  ;;  %v1831_v17 = vmul.f32 0.70710677, %v1766_v37  ;;  %v1887_v46 = vadd.f32 1.0, %v3006_v4  ;;  %v1921_v23 = vmul.f32 %v1889_v41, %v1792_v28 }
 0x165   : > { %v3008_v59 = vpop.eup %3007  ;;  %v3557_v15 = vadd.f32 %v3445_v49, %v1569_v47  ;;  %v1561_v33 = vadd.f32 %v1560_v51, %v3486_v34  ;;  %v2724_v40 = vpop.f32.mrf.mxu1  ;;  %v3591_v41 = vadd.f32 %v2722_v61, %v3540_v30 }
 0x166   : > { %v2796_v35 = vpop.f32.mrf.mxu0  ;;  %v1890_v60 = vadd.f32 1.0, %v3008_v59  ;;  %3021 = verf.f32 %v1831_v17  ;;  %v1919_v26 = vmul.f32 %v1887_v46, %v1790_v31  ;;  %v3583_v31 = vmul.f32 0.5, %v1766_v37 }
 0x167   : > { %v1582_v58 = vadd.f32 %v2796_v35, %v1421_v16  ;;  %v1834_v48 = vmul.f32 0.70710677, %v3557_v15  ;;  %v3563_v19 = vadd.f32 %v3445_v49, %v1561_v33  ;;  %v2725_v45 = vpop.f32.mrf.mxu1  ;;  %v3010_v11 = vpop.eup %3009 }
 0x168   : > { %v1573_v5 = vpop.f32.mrf.mxu0  ;;  %v1922_v3 = vmul.f32 %v1890_v60, %v1793_v44  ;;  %v1888_v43 = vadd.f32 1.0, %v3010_v11  ;;  %v2726_v52 = vadd.f32 %v2725_v45, %v2724_v40 }
 0x169   : > { %v1772_v34 = vadd.f32 %v3445_v49, %v1582_v58  ;;  %v1574_v12 = vadd.f32 %v1573_v5, %v3507_v54  ;;  %v3012_v18 = vpop.eup %3011  ;;  %3023 = verf.f32 %v1834_v48  ;;  %v1832_v0 = vmul.f32 0.70710677, %v3563_v19  ;;  %v2727_v62 = vpop.f32.mrf.mxu1 }
 0x16a   : > { %v2797_v16 = vpop.f32.mrf.mxu0  ;;  %v2443_v1 = vpack.c.bf16 %v1922_v3, %v1921_v23  ;;  %v1920_v57 = vmul.f32 %v1888_v43, %v1791_v53  ;;  %v1893_v36 = vadd.f32 1.0, %v3012_v18 }
 0x16b   : > { %v1837_v54 = vmul.f32 0.70710677, %v1772_v34  ;;  %3025 = verf.f32 %v1832_v0  ;;  %v3576_v14 = vadd.f32 %v3445_v49, %v1574_v12  ;;  %v1585_v10 = vadd.f32 %v2797_v16, %v3532_v9  ;;  %v2728_v28 = vpop.f32.mrf.mxu1  ;;  %v3014_v32 = vpop.eup %3013 }
 0x16c   : > { %v1576_v39 = vpop.f32.mrf.mxu0  ;;  %2515 = vst [vmem:[%s3570_s29 + $0x8] sm:$0xff] %v2443_v1   ;;  %v2438_v27 = vpack.c.bf16 %v1920_v57, %v1919_v26  ;;  %v1891_v24 = vadd.f32 1.0, %v3014_v32  ;;  %v1925_v46 = vmul.f32 %v1893_v36, %v3551_v7  ;;  %v1799_v7 = vmul.f32 0.5, %v3563_v19 }
 0x16d   : > { %v3016_v44 = vpop.eup %3015  ;;  %3027 = verf.f32 %v1837_v54  ;;  %v1835_v4 = vmul.f32 0.70710677, %v3576_v14  ;;  %v1773_v9 = vadd.f32 %v3445_v49, %v1585_v10  ;;  %v2730_v53 = vpop.f32.mrf.mxu1  ;;  %v1577_v56 = vadd.f32 %v1576_v39, %v3521_v63 }
 0x16e   : > { %v2800_v47 = vpop.f32.mrf.mxu0  ;;  %v1894_v51 = vadd.f32 1.0, %v3016_v44  ;;  %2439 = vst [vmem:[%s3570_s29] sm:$0xff] %v2438_v27   ;;  %v1801_v63 = vmul.f32 0.5, %v3557_v15  ;;  %v1923_v11 = vmul.f32 %v1891_v24, %v3553_v2  ;;  %v2729_v43 = vadd.f32 %v2728_v28, %v2727_v62 }
 0x16f   : > { %v1598_v37 = vadd.f32 %v2800_v47, %v1437_v21  ;;  %3029 = verf.f32 %v1835_v4  ;;  %v1838_v59 = vmul.f32 0.70710677, %v1773_v9  ;;  %v2731_v17 = vpop.f32.mrf.mxu1  ;;  %v3018_v35 = vpop.eup %3017  ;;  %v1771_v58 = vadd.f32 %v3445_v49, %v1577_v56 }
 0x170   : > { %v1589_v33 = vpop.f32.mrf.mxu0  ;;  %v1926_v60 = vmul.f32 %v1894_v51, %v1797_v50  ;;  %v1892_v30 = vadd.f32 1.0, %v3018_v35  ;;  %v3605_v50 = vmul.f32 0.5, %v1772_v34  ;;  %v1453_v19 = vadd.f32 %v2726_v52, %v3516_v55 }
 0x171   : > { %v3598_v25 = vadd.f32 %v3445_v49, %v1598_v37  ;;  %3031 = verf.f32 %v1838_v59  ;;  %v1590_v61 = vadd.f32 %v1589_v33, %v3543_v38  ;;  %v3602_v21 = vpop.f32.mrf.mxu1  ;;  %v3020_v48 = vpop.eup %3019  ;;  %v1836_v5 = vmul.f32 0.70710677, %v1771_v58 }
 0x172   : > { %v2801_v40 = vpop.f32.mrf.mxu0  ;;  %v2453_v45 = vpack.c.bf16 %v1926_v60, %v1925_v46  ;;  %v1924_v23 = vmul.f32 %v1892_v30, %v1795_v8  ;;  %v1897_v16 = vadd.f32 1.0, %v3020_v48  ;;  %v1805_v55 = vmul.f32 0.5, %v1773_v9 }
 0x173   : > { %v1841_v3 = vmul.f32 0.70710677, %v3598_v25  ;;  %v3610_v15 = vadd.f32 %v3445_v49, %v1590_v61  ;;  %v2734_v12 = vpop.f32.mrf.mxu1  ;;  %v3022_v18 = vpop.eup %3021  ;;  %3033 = verf.f32 %v1836_v5  ;;  %v1601_v0 = vadd.f32 %v2801_v40, %v1440_v20 }
 0x174   : > { %v1592_v38 = vpop.f32.mrf.mxu0  ;;  %2517 = vst [vmem:[%s3570_s29 + $0x18] sm:$0xff] %v2453_v45   ;;  %v2448_v34 = vpack.c.bf16 %v1924_v23, %v1923_v11  ;;  %v1895_v26 = vadd.f32 1.0, %v3022_v18  ;;  %v3621_v20 = vmul.f32 0.5, %v3576_v14  ;;  %v2732_v28 = vadd.f32 %v2731_v17, %v2730_v53 }
 0x175   : > { %3035 = verf.f32 %v1841_v3  ;;  %v2736_v2 = vpop.f32.mrf.mxu1  ;;  %v1839_v54 = vmul.f32 0.70710677, %v3610_v15  ;;  %v3616_v57 = vadd.f32 %v3445_v49, %v1601_v0  ;;  %v1593_v10 = vadd.f32 %v1592_v38, %v3549_v13  ;;  %v3749_v38 = vld [vmem:[#allocation5_spill] sm:$0xff] }
 0x176   : > { %v2804_v1 = vpop.f32.mrf.mxu0  ;;  %v3024_v8 = vpop.eup %3023  ;;  %2516 = vst [vmem:[%s3570_s29 + $0x10] sm:$0xff] %v2448_v34   ;;  %v1456_v47 = vadd.f32 %v2729_v43, %v3526_v22  ;;  %v1929_v13 = vmul.f32 %v1897_v16, %v3581_v42  ;;  %v1927_v24 = vmul.f32 %v1895_v26, %v3583_v31  ;;  %v1803_v52 = vmul.f32 0.5, %v1771_v58  ;;  %v3751_v34 = vld [vmem:[#allocation6_spill] sm:$0xff] }
 0x177   : > { %v1614_v39 = vadd.f32 %v2804_v1, %v1453_v19  ;;  %v1898_v62 = vadd.f32 1.0, %v3024_v8  ;;  %v2737_v32 = vpop.f32.mrf.mxu1  ;;  %3037 = verf.f32 %v1839_v54  ;;  %v1842_v27 = vmul.f32 0.70710677, %v3616_v57 }
 0x178   : > { %v1605_v36 = vpop.f32.mrf.mxu0  ;;  %v3026_v44 = vpop.eup %3025  ;;  %v3625_v4 = vadd.f32 %v3445_v49, %v1593_v10  ;;  %v2738_v42 = vadd.f32 %v2737_v32, %v2736_v2  ;;  %v1448_v31 = vadd.f32 %v3591_v41, %v3511_v29  ;;  %v3640_v40 = vmul.f32 0.5, %v3598_v25 }
 0x179   : > { %v1930_v51 = vmul.f32 %v1898_v62, %v1801_v63  ;;  %v1896_v56 = vadd.f32 1.0, %v3026_v44  ;;  %v3630_v14 = vadd.f32 %v3445_v49, %v1614_v39  ;;  %v2739_v9 = vpop.f32.mrf.mxu1  ;;  %3039 = verf.f32 %v1842_v27 }
 0x17a   : > { %v2805_v53 = vpop.f32.mrf.mxu0  ;;  %v3028_v37 = vpop.eup %3027  ;;  %v1840_v59 = vmul.f32 0.70710677, %v3625_v4  ;;  %v1606_v30 = vadd.f32 %v1605_v36, %v3586_v6  ;;  %v2735_v11 = vadd.f32 %v2734_v12, %v3602_v21  ;;  %v1469_v25 = vadd.f32 %v2738_v42, %v3749_v38  ;;  %v3750_v21 = vld [vmem:[#allocation3_spill] sm:$0xff] }
 0x17b   : > { %v2463_v17 = vpack.c.bf16 %v1930_v51, %v1929_v13  ;;  %v1928_v33 = vmul.f32 %v1896_v56, %v1799_v7  ;;  %v1845_v22 = vmul.f32 0.70710677, %v3630_v14  ;;  %v2740_v35 = vpop.f32.mrf.mxu1  ;;  %v1617_v63 = vadd.f32 %v2805_v53, %v1456_v47  ;;  %v3752_v13 = vld [vmem:[#allocation4_spill] sm:$0xff] }
 0x17c   : > { %v1608_v46 = vpop.f32.mrf.mxu0  ;;  %v3030_v60 = vpop.eup %3029  ;;  %3041 = verf.f32 %v1840_v59  ;;  %v1901_v61 = vadd.f32 1.0, %v3028_v37  ;;  %v2741_v48 = vadd.f32 %v2740_v35, %v2739_v9  ;;  %v3644_v23 = vadd.f32 %v3445_v49, %v1606_v30 }
 0x17d   : > { %2519 = vst [vmem:[%s3570_s29 + $0x28] sm:$0xff] %v2463_v17   ;;  %v2458_v58 = vpack.c.bf16 %v1928_v33, %v1927_v24  ;;  %v2742_v45 = vpop.f32.mrf.mxu1  ;;  %v3647_v6 = vadd.f32 %v3445_v49, %v1617_v63  ;;  %v1609_v3 = vadd.f32 %v1608_v46, %v1448_v31  ;;  %v1899_v29 = vadd.f32 1.0, %v3030_v60 }
 0x17e   : > { %v2808_v7 = vpop.f32.mrf.mxu0  ;;  %v3032_v5 = vpop.eup %3031  ;;  %3043 = verf.f32 %v1845_v22  ;;  %v1843_v0 = vmul.f32 0.70710677, %v3644_v23  ;;  %v1461_v12 = vadd.f32 %v2732_v28, %v3750_v21  ;;  %v1472_v16 = vadd.f32 %v2741_v48, %v3751_v34 }
 0x17f   : > { %2518 = vst [vmem:[%s3570_s29 + $0x20] sm:$0xff] %v2458_v58   ;;  %v1902_v41 = vadd.f32 1.0, %v3032_v5  ;;  %v2743_v18 = vpop.f32.mrf.mxu1  ;;  %v1846_v19 = vmul.f32 0.70710677, %v3647_v6  ;;  %v1933_v2 = vmul.f32 %v1901_v61, %v3605_v50  ;;  %v3657_v8 = vadd.f32 %v3445_v49, %v1609_v3 }
 0x180   : > { %v1621_v43 = vpop.f32.mrf.mxu0  ;;  %v3034_v26 = vpop.eup %3033  ;;  %v1630_v54 = vadd.f32 %v2808_v7, %v1469_v25  ;;  %3045 = verf.f32 %v1843_v0  ;;  %v1931_v28 = vmul.f32 %v1899_v29, %v3621_v20  ;;  %v1464_v50 = vadd.f32 %v2735_v11, %v3752_v13  ;;  %v3754_v0 = vld [vmem:[#allocation9_spill] sm:$0xff] }
 0x181   : > { %v1934_v1 = vmul.f32 %v1902_v41, %v1805_v55  ;;  %v2745_v10 = vpop.f32.mrf.mxu1  ;;  %v1900_v32 = vadd.f32 1.0, %v3034_v26  ;;  %v1622_v36 = vadd.f32 %v1621_v43, %v1461_v12  ;;  %3047 = verf.f32 %v1846_v19  ;;  %v3755_v12 = vld [vmem:[#allocation8_spill] sm:$0xff] }
 0x182   : > { %v2809_v39 = vpop.f32.mrf.mxu0  ;;  %v3036_v62 = vpop.eup %3035  ;;  %v1844_v56 = vmul.f32 0.70710677, %v3657_v8  ;;  %v3663_v9 = vadd.f32 %v3445_v49, %v1630_v54  ;;  %v1806_v20 = vmul.f32 0.5, %v3610_v15  ;;  %v2744_v35 = vadd.f32 %v2743_v18, %v2742_v45  ;;  %v3753_v18 = vld [vmem:[#allocation7_spill] sm:$0xff] }
 0x183   : > { %v1633_v44 = vadd.f32 %v2809_v39, %v1472_v16  ;;  %v2473_v27 = vpack.c.bf16 %v1934_v1, %v1933_v2  ;;  %v2746_v47 = vpop.f32.mrf.mxu1  ;;  %v1932_v51 = vmul.f32 %v1900_v32, %v1803_v52  ;;  %v3666_v53 = vadd.f32 %v3445_v49, %v1622_v36  ;;  %v3756_v36 = vld [vmem:[#allocation10_spill] sm:$0xff] }
 0x184   : > { %v1624_v55 = vpop.f32.mrf.mxu0  ;;  %v3038_v37 = vpop.eup %3037  ;;  %v1905_v24 = vadd.f32 1.0, %v3036_v62  ;;  %3049 = verf.f32 %v1844_v56  ;;  %v1809_v60 = vmul.f32 0.5, %v3616_v57  ;;  %v1849_v30 = vmul.f32 0.70710677, %v3663_v9 }
 0x185   : > { %2521 = vst [vmem:[%s3570_s29 + $0x38] sm:$0xff] %v2473_v27   ;;  %v3671_v59 = vadd.f32 %v3445_v49, %v1633_v44  ;;  %v1625_v17 = vadd.f32 %v1624_v55, %v1464_v50  ;;  %v2748_v33 = vpop.f32.mrf.mxu1  ;;  %v2468_v22 = vpack.c.bf16 %v1932_v51, %v1931_v28  ;;  %v1903_v42 = vadd.f32 1.0, %v3038_v37 }
 0x186   : > { %v2812_v52 = vpop.f32.mrf.mxu0  ;;  %v3040_v46 = vpop.eup %3039  ;;  %v1847_v63 = vmul.f32 0.70710677, %v3666_v53  ;;  %v2747_v31 = vadd.f32 %v2746_v47, %v2745_v10  ;;  %v1807_v48 = vmul.f32 0.5, %v3625_v4  ;;  %v1937_v11 = vmul.f32 %v1905_v24, %v3640_v40 }
 0x187   : > { %v2749_v15 = vpop.f32.mrf.mxu1  ;;  %2520 = vst [vmem:[%s3570_s29 + $0x30] sm:$0xff] %v2468_v22   ;;  %v1906_v61 = vadd.f32 1.0, %v3040_v46  ;;  %v1850_v7 = vmul.f32 0.70710677, %v3671_v59  ;;  %v3680_v5 = vadd.f32 %v3445_v49, %v1625_v17  ;;  %v1935_v57 = vmul.f32 %v1903_v42, %v1806_v20 }
 0x188   : > { %v1637_v58 = vpop.f32.mrf.mxu0  ;;  %3051 = verf.f32 %v1849_v30  ;;  %v2750_v3 = vadd.f32 %v2749_v15, %v2748_v33  ;;  %v1477_v43 = vadd.f32 %v2744_v35, %v3753_v18  ;;  %v1480_v34 = vadd.f32 %v2747_v31, %v3755_v12 }
 0x189   : > { %v3042_v45 = vpop.eup %3041  ;;  %v2751_v29 = vpop.f32.mrf.mxu1  ;;  %v1938_v38 = vmul.f32 %v1906_v61, %v1809_v60  ;;  %3053 = verf.f32 %v1847_v63  ;;  %v1848_v4 = vmul.f32 0.70710677, %v3680_v5  ;;  %v1812_v56 = vmul.f32 0.5, %v3630_v14 }
 0x18a   : > { %v2813_v41 = vpop.f32.mrf.mxu0  ;;  %v1904_v25 = vadd.f32 1.0, %v3042_v45  ;;  %3055 = verf.f32 %v1850_v7  ;;  %v1485_v19 = vadd.f32 %v2750_v3, %v3754_v0  ;;  %v1638_v1 = vadd.f32 %v1637_v58, %v1477_v43 }
 0x18b   : > { %v2752_v21 = vpop.f32.mrf.mxu1  ;;  %v3044_v16 = vpop.eup %3043  ;;  %v2483_v26 = vpack.c.bf16 %v1938_v38, %v1937_v11  ;;  %3057 = verf.f32 %v1848_v4  ;;  %v1813_v37 = vmul.f32 0.5, %v3647_v6  ;;  %v1810_v35 = vmul.f32 0.5, %v3644_v23 }
 0x18c   : > { %v1640_v40 = vpop.f32.mrf.mxu0  ;;  %v1936_v2 = vmul.f32 %v1904_v25, %v1807_v48  ;;  %v2753_v54 = vadd.f32 %v2752_v21, %v2751_v29  ;;  %v1646_v10 = vadd.f32 %v2812_v52, %v1485_v19  ;;  %v1786_v32 = vadd.f32 %v3445_v49, %v1638_v1 }
 0x18d   : > { %v1641_v39 = vadd.f32 %v1640_v40, %v1480_v34  ;;  %2523 = vst [vmem:[%s3570_s29 + $0x48] sm:$0xff] %v2483_v26   ;;  %v3046_v28 = vpop.eup %3045  ;;  %v1909_v27 = vadd.f32 1.0, %v3044_v16  ;;  %v1811_v60 = vmul.f32 0.5, %v3657_v8  ;;  %v1816_v23 = vmul.f32 0.5, %v3663_v9 }
 0x18e   : > { %v2478_v62 = vpack.c.bf16 %v1936_v2, %v1935_v57  ;;  %v1488_v44 = vadd.f32 %v2753_v54, %v3756_v36  ;;  %v1788_v47 = vadd.f32 %v3445_v49, %v1646_v10  ;;  %v3048_v50 = vpop.eup %3047  ;;  %v1851_v55 = vmul.f32 0.70710677, %v1786_v32 }
 0x18f   : > { %v1787_v13 = vadd.f32 %v3445_v49, %v1641_v39  ;;  %v1910_v24 = vadd.f32 1.0, %v3048_v50  ;;  %v1907_v17 = vadd.f32 1.0, %v3046_v28  ;;  %v1941_v42 = vmul.f32 %v1909_v27, %v1812_v56 }
 0x190   : > { %2522 = vst [vmem:[%s3570_s29 + $0x40] sm:$0xff] %v2478_v62   ;;  %v1649_v51 = vadd.f32 %v2813_v41, %v1488_v44  ;;  %v1853_v20 = vmul.f32 0.70710677, %v1788_v47  ;;  %3059 = verf.f32 %v1851_v55  ;;  %v1817_v8 = vmul.f32 0.5, %v3671_v59 }
 0x191   : > { %v1852_v52 = vmul.f32 0.70710677, %v1787_v13  ;;  %v3050_v22 = vpop.eup %3049  ;;  %v1942_v46 = vmul.f32 %v1910_v24, %v1813_v37  ;;  %v1939_v31 = vmul.f32 %v1907_v17, %v1810_v35  ;;  %v1814_v57 = vmul.f32 0.5, %v3666_v53 }
 0x192   : > { %v1789_v33 = vadd.f32 %v3445_v49, %v1649_v51  ;;  %3061 = verf.f32 %v1853_v20  ;;  %v1908_v30 = vadd.f32 1.0, %v3050_v22  ;;  %v1815_v41 = vmul.f32 0.5, %v3680_v5 }
 0x193   : > { %3063 = verf.f32 %v1852_v52  ;;  %v2493_v6 = vpack.c.bf16 %v1942_v46, %v1941_v42  ;;  %v1818_v12 = vmul.f32 0.5, %v1786_v32  ;;  %v1819_v53 = vmul.f32 0.5, %v1787_v13 }
 0x194   : > { %v1854_v14 = vmul.f32 0.70710677, %v1789_v33  ;;  %v1940_v15 = vmul.f32 %v1908_v30, %v1811_v60  ;;  %v1820_v16 = vmul.f32 0.5, %v1788_v47  ;;  %v1821_v26 = vmul.f32 0.5, %v1789_v33 }
 0x195   : > { %v3052_v63 = vpop.eup %3051  ;;  %2525 = vst [vmem:[%s3570_s29 + $0x58] sm:$0xff] %v2493_v6  }
 0x196   : > { %3065 = verf.f32 %v1854_v14  ;;  %v3054_v49 = vpop.eup %3053  ;;  %v1913_v58 = vadd.f32 1.0, %v3052_v63  ;;  %v2488_v48 = vpack.c.bf16 %v1940_v15, %v1939_v31 }
 0x197   : > { %v3056_v61 = vpop.eup %3055  ;;  %v1911_v7 = vadd.f32 1.0, %v3054_v49 }
 0x198   : > { %v1914_v45 = vadd.f32 1.0, %v3056_v61  ;;  %v3058_v11 = vpop.eup %3057  ;;  %2524 = vst [vmem:[%s3570_s29 + $0x50] sm:$0xff] %v2488_v48   ;;  %v1945_v3 = vmul.f32 %v1913_v58, %v1816_v23 }
 0x199   : > { %v1912_v38 = vadd.f32 1.0, %v3058_v11  ;;  %v1943_v25 = vmul.f32 %v1911_v7, %v1814_v57 }
 0x19a   : > { %v1946_v29 = vmul.f32 %v1914_v45, %v1817_v8 }
 0x19b   : > { %v1944_v43 = vmul.f32 %v1912_v38, %v1815_v41 }
 0x19c   : > { %v2503_v18 = vpack.c.bf16 %v1946_v29, %v1945_v3 }
 0x19d   : > { %v3060_v4 = vpop.eup %3059  ;;  %v2498_v9 = vpack.c.bf16 %v1944_v43, %v1943_v25 }
 0x19e   : > { %2527 = vst [vmem:[%s3570_s29 + $0x68] sm:$0xff] %v2503_v18   ;;  %v1915_v19 = vadd.f32 1.0, %v3060_v4 }
 0x19f   : > { %v3062_v0 = vpop.eup %3061  ;;  %2526 = vst [vmem:[%s3570_s29 + $0x60] sm:$0xff] %v2498_v9  }
 0x1a0   : > { %v3064_v59 = vpop.eup %3063  ;;  %v1917_v21 = vadd.f32 1.0, %v3062_v0  ;;  %v1947_v5 = vmul.f32 %v1915_v19, %v1818_v12 }
 0x1a1   : > { %v1916_v34 = vadd.f32 1.0, %v3064_v59 }
 0x1a2   : > { %v1949_v54 = vmul.f32 %v1917_v21, %v1820_v16 }
 0x1a3   : > { %v3066_v40 = vpop.eup %3065  ;;  %v1948_v1 = vmul.f32 %v1916_v34, %v1819_v53 }
 0x1a4   : > { %v1918_v2 = vadd.f32 1.0, %v3066_v40 }
 0x1a5   : > { %v2508_v39 = vpack.c.bf16 %v1948_v1, %v1947_v5 }
 0x1a6   : > { %v1950_v10 = vmul.f32 %v1918_v2, %v1821_v26 }
 0x1a7   : > { %2528 = vst [vmem:[%s3570_s29 + $0x70] sm:$0xff] %v2508_v39  }
 0x1a8   : > { %v2513_v62 = vpack.c.bf16 %v1950_v10, %v1949_v54 }
 0x1aa   : > { %2529 = vst [vmem:[%s3570_s29 + $0x78] sm:$0xff] %v2513_v62  }
 0x1ab PF: > { %s13_s14 = sadd.s32 1, %s3089_s14   ;;  %s3757_s12 = smov %s3085_s13 }
 0x1ac   : > { %p10_p5 = scmp.ge.s32.totalorder %s13_s14, 4   ;;  %s3758_s13 = smov %s3760_s15 }
 0x1ae   :  { %12 = sbr.rel (!%p10_p5) target bundleno = 2 (0x2), region = 76 }

// kernel: _lambda_.9
= control target key start
LH: loop header
LB: loop body
LE: loop exit
PB: predicated region body
PF: predicated region fallthrough
CT: control target
= control target key end

     0   :  { %s1641_s12 = smov 0   ;;  %s1643_s13 = smov 0   ;;  %s1833_s0 = inlined_call_operand.vmem [shape: bf16[32,2048], index: 0, kind: input, shape index: {}]   ;;  %s1834_s1 = inlined_call_operand.vmem [shape: bf16[2048,64], index: 1, kind: input, shape index: {}]   ;;  %s1835_s2 = inlined_call_operand.vmem [shape: f32[1,64], index: 2, kind: input, shape index: {}]   ;;  %s1836_s3 = inlined_call_operand.vmem [shape: f32[32,64], index: 3, kind: output, shape index: {}]  }
   0x1   :  { %s1645_s14 = smov 0   ;;  %s1647_s15 = smov 0  }
   0x2   :  { %s1649_s16 = smov 0  }
   0x3 LB: > { %s25_s17 = sadd.s32 1, %s1614_s15  ;;  %p48_p1 = scmp.ne.s32.totalorder %s1606_s13, %s1602_s12  ;;  %s1618_s16 = sphi %s1649_s16, %s13_s16   ;;  %s1614_s15 = sphi %s1647_s15, %s1840_s15   ;;  %s1610_s14 = sphi %s1645_s14, %s1839_s14   ;;  %s1606_s13 = sphi %s1643_s13, %s1838_s13   ;;  %s1602_s12 = sphi %s1641_s12, %s1837_s12  }
   0x4   : > { %p26_p0 = scmp.ge.s32.totalorder %s25_s17, 2  ;;  %p49_p2 = scmp.eq.s32.totalorder %s1618_s16, 0 }
   0x5   : > { %s41_s19 = sadd.s32 1, %s1606_s13  ;;  %p1267_p5 = scmp.ge.s32.totalorder %s1618_s16, 2 }
   0x6   : > { %s1842_s17 = smov (%p26_p0, %s25_s17), 0  ;;  %p50_p3 = por %p49_p2, %p48_p1 }
   0x7   : > { %s37_s18 = ssub.s32 %s1614_s15, %s1842_s17  ;;  %162 = sbr.rel (%p1267_p5) target bundleno = 24 (0x18), region = 20 }
   0x8   : > { %p39_p4 = scmp.eq.s32.totalorder %s37_s18, 0 }
   0xa   : > { %s1676_s20 = scalar_select %p39_p4, %s1606_s13, %s41_s19  }
   0xc   : > { %165 = sbr.rel (!%p50_p3) target bundleno = 24 (0x18), region = 24  ;;  %s167_s21 = sand.u32 (%p50_p3), 1, %s1606_s13  }
   0xd   : > { %s1362_s22 = sshll.u32 (%p50_p3), %s1614_s15, 5  ;;  %s1268_s23 = sshll.u32 (%p50_p3), %s167_s21, 7 }
   0xe   : > { %s1684_s26 = scalar_lea.vmem (%p50_p3), %s1833_s0, %s1362_s22  ;;  %s169_s27 = scalar_lea.vmem (%p50_p3), [#allocation3], %s1268_s23 }
   0xf   : > { %v188_v0 = vld [vmem:[%s1684_s26] sm:$0xff] (%p50_p3)  ;;  %v190_v1 = vld [vmem:[%s1684_s26 + $0x8] sm:$0xff] (%p50_p3)  ;;  %v192_v2 = vld [vmem:[%s1684_s26 + $0x10] sm:$0xff] (%p50_p3) }
  0x10   : > { %189 = vst [vmem:[%s169_s27] sm:$0xff] (%p50_p3), %v188_v0  ;;  %191 = vst [vmem:[%s169_s27 + $0x8] sm:$0xff] (%p50_p3), %v190_v1  ;;  %v194_v3 = vld [vmem:[%s1684_s26 + $0x18] sm:$0xff] (%p50_p3)  ;;  %v196_v4 = vld [vmem:[%s1684_s26 + $0x40] sm:$0xff] (%p50_p3) }
  0x11   : > { %193 = vst [vmem:[%s169_s27 + $0x10] sm:$0xff] %v192_v2  ;;  %v198_v5 = vld [vmem:[%s1684_s26 + $0x48] sm:$0xff]  ;;  %195 = vst [vmem:[%s169_s27 + $0x18] sm:$0xff] %v194_v3  ;;  %v200_v6 = vld [vmem:[%s1684_s26 + $0x50] sm:$0xff] }
  0x12   : > { %197 = vst [vmem:[%s169_s27 + $0x20] sm:$0xff] %v196_v4  ;;  %199 = vst [vmem:[%s169_s27 + $0x28] sm:$0xff] %v198_v5  ;;  %v202_v7 = vld [vmem:[%s1684_s26 + $0x58] sm:$0xff]  ;;  %v204_v8 = vld [vmem:[%s1684_s26 + $0x80] sm:$0xff] }
  0x13   : > { %201 = vst [vmem:[%s169_s27 + $0x30] sm:$0xff] %v200_v6  ;;  %203 = vst [vmem:[%s169_s27 + $0x38] sm:$0xff] %v202_v7  ;;  %v206_v9 = vld [vmem:[%s1684_s26 + $0x88] sm:$0xff]  ;;  %v208_v10 = vld [vmem:[%s1684_s26 + $0x90] sm:$0xff] }
  0x14   : > { %205 = vst [vmem:[%s169_s27 + $0x40] sm:$0xff] %v204_v8  ;;  %v210_v11 = vld [vmem:[%s1684_s26 + $0x98] sm:$0xff]  ;;  %207 = vst [vmem:[%s169_s27 + $0x48] sm:$0xff] %v206_v9  ;;  %v212_v12 = vld [vmem:[%s1684_s26 + $0xc0] sm:$0xff] }
  0x15   : > { %209 = vst [vmem:[%s169_s27 + $0x50] sm:$0xff] %v208_v10  ;;  %211 = vst [vmem:[%s169_s27 + $0x58] sm:$0xff] %v210_v11  ;;  %v214_v13 = vld [vmem:[%s1684_s26 + $0xc8] sm:$0xff]  ;;  %v216_v14 = vld [vmem:[%s1684_s26 + $0xd0] sm:$0xff] }
  0x16   : > { %213 = vst [vmem:[%s169_s27 + $0x60] sm:$0xff] %v212_v12  ;;  %215 = vst [vmem:[%s169_s27 + $0x68] sm:$0xff] %v214_v13  ;;  %v218_v15 = vld [vmem:[%s1684_s26 + $0xd8] sm:$0xff] }
  0x17   : > { %217 = vst [vmem:[%s169_s27 + $0x70] sm:$0xff] %v216_v14  ;;  %219 = vst [vmem:[%s169_s27 + $0x78] sm:$0xff] %v218_v15 }
  0x18 PF: > { %p1271_p6 = scmp.ge.s32.totalorder %s1618_s16, 1  ;;  %p236_p7 = scmp.lt.s32.totalorder %s1618_s16, 3 }
  0x1a   : > { %p237_p8 = pnand %p1271_p6, %p236_p7 }
  0x1b   : > { %s243_s28 = sand.u32 (!%p237_p8), 1, %s1602_s12   ;;  %s1273_s29 = sshll.u32 (!%p237_p8), %s1610_s14, 7 }
  0x1c   : > { %240 = sbr.rel (%p237_p8) target bundleno = 333 (0x14d), region = 51  ;;  %s1272_s30 = sshll.u32 (!%p237_p8), %s243_s28, 7 }
  0x1d   : > { %p283_p9 = scmp.lt.s32.totalorder (!%p237_p8), %s1273_s29, 255  ;;  %s1711_s8 = scalar_lea.vmem (!%p237_p8), [#allocation3], %s1272_s30 }
  0x1e   : > { %p1275_p10 = scmp.ne.s32.totalorder (!%p237_p8), %s1610_s14, 0 }
  0x21   : > { %s1844_s29 = smov (!%p283_p9, %s1273_s29), 255  ;;  %307 = sbr.rel (%p1275_p10) target bundleno = 41 (0x29), region = 59 }
  0x22   : > { %s1274_s4 = sshll.u32 %s1844_s29, 2 }
  0x23   : > { %s1709_s7 = scalar_lea.vmem %s1834_s1, %s1274_s4 }
  0x26   : > { %vm308_vm0 = vcmask 523264   ;;  %v1620_v16 = vmov 0.0  }
  0x27   : > { %309 = vst.msk [vmem:[#allocation2] sm:$0xff] %vm308_vm0, %v1620_v16  ;;  %310 = vst.msk [vmem:[#allocation2 + $0x8] sm:$0xff] %vm308_vm0, %v1620_v16 }
  0x28   : > { %311 = vst.msk [vmem:[#allocation2 + $0x10] sm:$0xff] %vm308_vm0, %v1620_v16  ;;  %312 = vst.msk [vmem:[#allocation2 + $0x18] sm:$0xff] %vm308_vm0, %v1620_v16 }
  0x29 PF: > { %v1516_v17 = vld [vmem:[%s1709_s7 + $0x78] sm:$0xff]   ;;  %v1520_v21 = vld [vmem:[%s1709_s7 + $0x70] sm:$0xff]   ;;  %v1524_v25 = vld [vmem:[%s1709_s7 + $0x68] sm:$0xff]   ;;  %vm1125_vm1 = vcmask 523264   ;;  %p1356_p11 = scmp.ne.s32.totalorder %s1610_s14, 1 }
  0x2a   : > { %v1517_v18 = vld [vmem:[%s1709_s7 + $0xf8] sm:$0xff]   ;;  %1363 = vmatprep.subr.bf16.mxu0 %v1516_v17  ;;  %v1521_v22 = vld [vmem:[%s1709_s7 + $0xf0] sm:$0xff]   ;;  %v1525_v26 = vld [vmem:[%s1709_s7 + $0xe8] sm:$0xff]  }
  0x2b   : > { %v1518_v19 = vld [vmem:[%s1709_s7 + $0x38] sm:$0xff]   ;;  %1391 = vmatprep.subr.bf16.mxu1 %v1517_v18  ;;  %v1522_v23 = vld [vmem:[%s1709_s7 + $0x30] sm:$0xff]   ;;  %v1526_v27 = vld [vmem:[%s1709_s7 + $0x28] sm:$0xff]  }
  0x2c   : > { %v1519_v20 = vld [vmem:[%s1709_s7 + $0xb8] sm:$0xff]   ;;  %1364 = vmatpush3.bf16.msra.mxu0 %v1518_v19  ;;  %v1523_v24 = vld [vmem:[%s1709_s7 + $0xb0] sm:$0xff]   ;;  %v1527_v28 = vld [vmem:[%s1709_s7 + $0xa8] sm:$0xff]  }
  0x2d   : > { %1392 = vmatpush3.bf16.msra.mxu1 %v1519_v20  ;;  %1365 = vmatprep.subr.bf16.mxu0 %v1520_v21  ;;  %v1528_v29 = vld [vmem:[%s1709_s7 + $0x60] sm:$0xff]   ;;  %v1532_v33 = vld [vmem:[%s1709_s7 + $0x58] sm:$0xff]   ;;  %v1536_v37 = vld [vmem:[%s1709_s7 + $0x50] sm:$0xff]  }
  0x2e   : > { %1393 = vmatprep.subr.bf16.mxu1 %v1521_v22  ;;  %v1529_v30 = vld [vmem:[%s1709_s7 + $0xe0] sm:$0xff]   ;;  %v1533_v34 = vld [vmem:[%s1709_s7 + $0xd8] sm:$0xff]   ;;  %v1537_v38 = vld [vmem:[%s1709_s7 + $0xd0] sm:$0xff]  }
  0x2f   : > { %v1530_v31 = vld [vmem:[%s1709_s7 + $0x20] sm:$0xff]   ;;  %v1534_v35 = vld [vmem:[%s1709_s7 + $0x18] sm:$0xff]   ;;  %v1538_v39 = vld [vmem:[%s1709_s7 + $0x10] sm:$0xff]  }
  0x30   : > { %1366 = vmatpush3.bf16.msra.mxu0 %v1522_v23  ;;  %v1531_v32 = vld [vmem:[%s1709_s7 + $0xa0] sm:$0xff]   ;;  %v1535_v36 = vld [vmem:[%s1709_s7 + $0x98] sm:$0xff]   ;;  %v1539_v40 = vld [vmem:[%s1709_s7 + $0x90] sm:$0xff]  }
  0x31   : > { %1394 = vmatpush3.bf16.msra.mxu1 %v1523_v24  ;;  %1367 = vmatprep.subr.bf16.mxu0 %v1524_v25  ;;  %v1540_v41 = vld [vmem:[%s1709_s7 + $0x48] sm:$0xff]   ;;  %v1544_v45 = vld [vmem:[%s1709_s7 + $0x40] sm:$0xff]   ;;  %v1548_v57 = vld [vmem:[%s1709_s7 + $0x178] sm:$0xff]  }
  0x32   : > { %1395 = vmatprep.subr.bf16.mxu1 %v1525_v26  ;;  %v1541_v42 = vld [vmem:[%s1709_s7 + $0xc8] sm:$0xff]   ;;  %v1545_v46 = vld [vmem:[%s1709_s7 + $0xc0] sm:$0xff]   ;;  %v1549_v58 = vld [vmem:[%s1709_s7 + $0x1f8] sm:$0xff]  }
  0x33   : > { %v1542_v43 = vld [vmem:[%s1709_s7 + $0x8] sm:$0xff]   ;;  %v1546_v47 = vld [vmem:[%s1709_s7] sm:$0xff]   ;;  %v1550_v59 = vld [vmem:[%s1709_s7 + $0x138] sm:$0xff]  }
  0x34   : > { %1368 = vmatpush3.bf16.msra.mxu0 %v1526_v27  ;;  %v1543_v44 = vld [vmem:[%s1709_s7 + $0x88] sm:$0xff]   ;;  %v1547_v48 = vld [vmem:[%s1709_s7 + $0x80] sm:$0xff]   ;;  %v1551_v60 = vld [vmem:[%s1709_s7 + $0x1b8] sm:$0xff]  }
  0x35   : > { %1396 = vmatpush3.bf16.msra.mxu1 %v1527_v28  ;;  %1369 = vmatprep.subr.bf16.mxu0 %v1528_v29  ;;  %v317_v49 = vld [vmem:[%s1711_s8] sm:$0xff]  ;;  %v318_v51 = vld [vmem:[%s1711_s8 + $0x8] sm:$0xff]  ;;  %v1552_v61 = vld [vmem:[%s1709_s7 + $0x170] sm:$0xff]  }
  0x36   : > { %1397 = vmatprep.subr.bf16.mxu1 %v1529_v30  ;;  %v321_v50 = vld [vmem:[%s1711_s8 + $0x20] sm:$0xff]  ;;  %v322_v54 = vld [vmem:[%s1711_s8 + $0x28] sm:$0xff]  ;;  %v1553_v62 = vld [vmem:[%s1709_s7 + $0x1f0] sm:$0xff]  }
  0x37   : > { %v1276_v52 = vcombine.low %v317_v49, %v321_v50  ;;  %v1277_v53 = vcombine.high %v317_v49, %v321_v50  ;;  %v1278_v55 = vcombine.low %v318_v51, %v322_v54  ;;  %v1279_v56 = vcombine.high %v318_v51, %v322_v54  ;;  %v1554_v63 = vld [vmem:[%s1709_s7 + $0x130] sm:$0xff]   ;;  %v1556_v1 = vld [vmem:[%s1709_s7 + $0x168] sm:$0xff]   ;;  %v1560_v5 = vld [vmem:[%s1709_s7 + $0x160] sm:$0xff]  }
  0x38   : > { %1370 = vmatpush3.bf16.msra.mxu0 %v1530_v31  ;;  %v1555_v0 = vld [vmem:[%s1709_s7 + $0x1b0] sm:$0xff]   ;;  %v1557_v2 = vld [vmem:[%s1709_s7 + $0x1e8] sm:$0xff]   ;;  %v1561_v6 = vld [vmem:[%s1709_s7 + $0x1e0] sm:$0xff]  }
  0x39   : > { %1398 = vmatpush3.bf16.msra.mxu1 %v1531_v32  ;;  %1371 = vmatprep.subr.bf16.mxu0 %v1532_v33  ;;  %v1558_v3 = vld [vmem:[%s1709_s7 + $0x128] sm:$0xff]   ;;  %v1562_v7 = vld [vmem:[%s1709_s7 + $0x120] sm:$0xff]   ;;  %v1564_v9 = vld [vmem:[%s1709_s7 + $0x158] sm:$0xff]  }
  0x3a   : > { %1399 = vmatprep.subr.bf16.mxu1 %v1533_v34  ;;  %957 = vmatprep.mubr.bf16.mxu0 %v1277_v53  ;;  %v1559_v4 = vld [vmem:[%s1709_s7 + $0x1a8] sm:$0xff]   ;;  %v1563_v8 = vld [vmem:[%s1709_s7 + $0x1a0] sm:$0xff]   ;;  %v1565_v10 = vld [vmem:[%s1709_s7 + $0x1d8] sm:$0xff]  }
  0x3b   : > { %1006 = vmatprep.mubr.bf16.mxu1 %v1279_v56  ;;  %v325_v11 = vld [vmem:[%s1711_s8 + $0x40] sm:$0xff]  ;;  %v326_v14 = vld [vmem:[%s1711_s8 + $0x48] sm:$0xff]  ;;  %v1566_v18 = vld [vmem:[%s1709_s7 + $0x118] sm:$0xff]  }
  0x3c   : > { %1372 = vmatpush3.bf16.msra.mxu0 %v1534_v35  ;;  %v329_v12 = vld [vmem:[%s1711_s8 + $0x60] sm:$0xff]  ;;  %v330_v15 = vld [vmem:[%s1711_s8 + $0x68] sm:$0xff]  ;;  %v1567_v20 = vld [vmem:[%s1709_s7 + $0x198] sm:$0xff]  }
  0x3d   : > { %1400 = vmatpush3.bf16.msra.mxu1 %v1535_v36  ;;  %1373 = vmatprep.subr.bf16.mxu0 %v1536_v37  ;;  %v1285_v13 = vcombine.high %v325_v11, %v329_v12  ;;  %v1284_v16 = vcombine.low %v325_v11, %v329_v12  ;;  %v1287_v17 = vcombine.high %v326_v14, %v330_v15  ;;  %v1568_v21 = vld [vmem:[%s1709_s7 + $0x150] sm:$0xff]   ;;  %v1572_v25 = vld [vmem:[%s1709_s7 + $0x148] sm:$0xff]   ;;  %v1576_v29 = vld [vmem:[%s1709_s7 + $0x140] sm:$0xff]  }
  0x3e   : > { %1401 = vmatprep.subr.bf16.mxu1 %v1537_v38  ;;  %v1286_v19 = vcombine.low %v326_v14, %v330_v15  ;;  %v1569_v22 = vld [vmem:[%s1709_s7 + $0x1d0] sm:$0xff]   ;;  %v1573_v26 = vld [vmem:[%s1709_s7 + $0x1c8] sm:$0xff]   ;;  %v1577_v30 = vld [vmem:[%s1709_s7 + $0x1c0] sm:$0xff]  }
  0x3f   : > { %v1570_v23 = vld [vmem:[%s1709_s7 + $0x110] sm:$0xff]   ;;  %v1574_v27 = vld [vmem:[%s1709_s7 + $0x108] sm:$0xff]   ;;  %v1578_v31 = vld [vmem:[%s1709_s7 + $0x100] sm:$0xff]  }
  0x40   : > { %1374 = vmatpush3.bf16.msra.mxu0 %v1538_v39  ;;  %v1571_v24 = vld [vmem:[%s1709_s7 + $0x190] sm:$0xff]   ;;  %v1575_v28 = vld [vmem:[%s1709_s7 + $0x188] sm:$0xff]   ;;  %v1579_v32 = vld [vmem:[%s1709_s7 + $0x180] sm:$0xff]  }
  0x41   : > { %1402 = vmatpush3.bf16.msra.mxu1 %v1539_v40  ;;  %1375 = vmatprep.subr.bf16.mxu0 %v1540_v41  ;;  %v319_v33 = vld [vmem:[%s1711_s8 + $0x10] sm:$0xff]  ;;  %v320_v35 = vld [vmem:[%s1711_s8 + $0x18] sm:$0xff] }
  0x42   : > { %1403 = vmatprep.subr.bf16.mxu1 %v1541_v42  ;;  %v323_v34 = vld [vmem:[%s1711_s8 + $0x30] sm:$0xff]  ;;  %v324_v36 = vld [vmem:[%s1711_s8 + $0x38] sm:$0xff] }
  0x43   : > { %v1280_v37 = vcombine.low %v319_v33, %v323_v34  ;;  %v1281_v38 = vcombine.high %v319_v33, %v323_v34  ;;  %v1282_v39 = vcombine.low %v320_v35, %v324_v36  ;;  %v1283_v40 = vcombine.high %v320_v35, %v324_v36  ;;  %v327_v41 = vld [vmem:[%s1711_s8 + $0x50] sm:$0xff] }
  0x44   : > { %1376 = vmatpush3.bf16.msra.mxu0 %v1542_v43  ;;  %v331_v42 = vld [vmem:[%s1711_s8 + $0x70] sm:$0xff]  ;;  %v328_v43 = vld [vmem:[%s1711_s8 + $0x58] sm:$0xff] }
  0x45   : > { %1404 = vmatpush3.bf16.msra.mxu1 %v1543_v44  ;;  %1377 = vmatprep.subr.bf16.mxu0 %v1544_v45  ;;  %v1289_v44 = vcombine.high %v327_v41, %v331_v42  ;;  %v332_v45 = vld [vmem:[%s1711_s8 + $0x78] sm:$0xff] }
  0x46   : > { %1405 = vmatprep.subr.bf16.mxu1 %v1545_v46  ;;  %v1291_v46 = vcombine.high %v328_v43, %v332_v45 }
  0x48   : > { %1378 = vmatpush3.bf16.msra.mxu0 %v1546_v47  ;;  %v1288_v47 = vcombine.low %v327_v41, %v331_v42  ;;  %v315_v41 = vld [vmem:[#allocation2 + $0x10] sm:$0xff] }
  0x49   : > { %1406 = vmatpush3.bf16.msra.mxu1 %v1547_v48  ;;  %1419 = vmatprep.subr.bf16.mxu0 %v1548_v57  ;;  %v1290_v48 = vcombine.low %v328_v43, %v332_v45 }
  0x4a   : > { %1447 = vmatprep.subr.bf16.mxu1 %v1549_v58 }
  0x4b   : > { %958 = vmatmul.mubr.bf16.vlgmr.msra.gmra.mxu0 %v1276_v52 }
  0x4c   : > { %1007 = vmatmul.mubr.bf16.vlgmr.msra.gmra.mxu1 %v1278_v55  ;;  %1420 = vmatpush3.bf16.msra.mxu0 %v1550_v59 }
  0x4d   : > { %1448 = vmatpush3.bf16.msra.mxu1 %v1551_v60  ;;  %1421 = vmatprep.subr.bf16.mxu0 %v1552_v61 }
  0x4e   : > { %1449 = vmatprep.subr.bf16.mxu1 %v1553_v62  ;;  %965 = vmatprep.mubr.bf16.mxu0 %v1285_v13 }
  0x4f   : > { %1014 = vmatprep.mubr.bf16.mxu1 %v1287_v17  ;;  %v313_v17 = vld [vmem:[#allocation2] sm:$0xff] }
  0x50   : > { %1422 = vmatpush3.bf16.msra.mxu0 %v1554_v63 }
  0x51   : > { %1450 = vmatpush3.bf16.msra.mxu1 %v1555_v0  ;;  %1423 = vmatprep.subr.bf16.mxu0 %v1556_v1 }
  0x52   : > { %1451 = vmatprep.subr.bf16.mxu1 %v1557_v2 }
  0x53   : > { %966 = vmatmul.mubr.bf16.gmra.mxu0 %v1284_v16 }
  0x54   : > { %1424 = vmatpush3.bf16.msra.mxu0 %v1558_v3  ;;  %1015 = vmatmul.mubr.bf16.gmra.mxu1 %v1286_v19 }
  0x55   : > { %1452 = vmatpush3.bf16.msra.mxu1 %v1559_v4  ;;  %1425 = vmatprep.subr.bf16.mxu0 %v1560_v5 }
  0x56   : > { %1453 = vmatprep.subr.bf16.mxu1 %v1561_v6  ;;  %1055 = vmatprep.mubr.bf16.mxu0 %v1281_v38 }
  0x57   : > { %1104 = vmatprep.mubr.bf16.mxu1 %v1283_v40 }
  0x58   : > { %1426 = vmatpush3.bf16.msra.mxu0 %v1562_v7 }
  0x59   : > { %1454 = vmatpush3.bf16.msra.mxu1 %v1563_v8  ;;  %1427 = vmatprep.subr.bf16.mxu0 %v1564_v9 }
  0x5a   : > { %1455 = vmatprep.subr.bf16.mxu1 %v1565_v10 }
  0x5c   : > { %1428 = vmatpush3.bf16.msra.mxu0 %v1566_v18 }
  0x5d   : > { %1456 = vmatpush3.bf16.msra.mxu1 %v1567_v20  ;;  %1429 = vmatprep.subr.bf16.mxu0 %v1568_v21 }
  0x5e   : > { %1457 = vmatprep.subr.bf16.mxu1 %v1569_v22 }
  0x60   : > { %1430 = vmatpush3.bf16.msra.mxu0 %v1570_v23 }
  0x61   : > { %1458 = vmatpush3.bf16.msra.mxu1 %v1571_v24  ;;  %1431 = vmatprep.subr.bf16.mxu0 %v1572_v25 }
  0x62   : > { %1459 = vmatprep.subr.bf16.mxu1 %v1573_v26 }
  0x64   : > { %1432 = vmatpush3.bf16.msra.mxu0 %v1574_v27 }
  0x65   : > { %1460 = vmatpush3.bf16.msra.mxu1 %v1575_v28  ;;  %1433 = vmatprep.subr.bf16.mxu0 %v1576_v29  ;;  %v314_v29 = vld [vmem:[#allocation2 + $0x8] sm:$0xff] }
  0x66   : > { %1461 = vmatprep.subr.bf16.mxu1 %v1577_v30 }
  0x68   : > { %1434 = vmatpush3.bf16.msra.mxu0 %v1578_v31 }
  0x69   : > { %1462 = vmatpush3.bf16.msra.mxu1 %v1579_v32 }
  0x6b   : > { %1056 = vmatmul.mubr.bf16.vlgmr.msra.gmra.mxu0 %v1280_v37 }
  0x6c   : > { %1105 = vmatmul.mubr.bf16.vlgmr.msra.gmra.mxu1 %v1282_v39  ;;  %1063 = vmatprep.mubr.bf16.mxu0 %v1289_v44 }
  0x6d   : > { %1112 = vmatprep.mubr.bf16.mxu1 %v1291_v46 }
  0x73   : > { %1064 = vmatmul.mubr.bf16.gmra.mxu0 %v1288_v47 }
  0x74   : > { %1113 = vmatmul.mubr.bf16.gmra.mxu1 %v1290_v48 }
 0x10b   : > { %v1379_v49 = vpop.f32.mrf.mxu0 }
 0x10c   : > { %v1407_v50 = vpop.f32.mrf.mxu1 }
 0x10d   : > { %v1380_v51 = vpop.f32.mrf.mxu0 }
 0x10e   : > { %v1408_v52 = vpop.f32.mrf.mxu1  ;;  %v1381_v1 = vadd.f32 %v1380_v51, %v1379_v49 }
 0x10f   : > { %v1382_v53 = vpop.f32.mrf.mxu0  ;;  %v1409_v2 = vadd.f32 %v1408_v52, %v1407_v50  ;;  %v316_v50 = vld [vmem:[#allocation2 + $0x18] sm:$0xff] }
 0x110   : > { %v1410_v54 = vpop.f32.mrf.mxu1 }
 0x111   : > { %v1383_v55 = vpop.f32.mrf.mxu0  ;;  %v1009_v7 = vadd.f32 %v1409_v2, %v1381_v1 }
 0x112   : > { %v1411_v56 = vpop.f32.mrf.mxu1  ;;  %v1384_v8 = vadd.f32 %v1383_v55, %v1382_v53 }
 0x113   : > { %v1385_v57 = vpop.f32.mrf.mxu0  ;;  %v1412_v9 = vadd.f32 %v1411_v56, %v1410_v54 }
 0x114   : > { %v1413_v58 = vpop.f32.mrf.mxu1 }
 0x115   : > { %v1386_v59 = vpop.f32.mrf.mxu0  ;;  %v1012_v20 = vadd.f32 %v1412_v9, %v1384_v8 }
 0x116   : > { %v1414_v60 = vpop.f32.mrf.mxu1  ;;  %v1387_v15 = vadd.f32 %v1386_v59, %v1385_v57 }
 0x117   : > { %v1388_v61 = vpop.f32.mrf.mxu0  ;;  %v1415_v16 = vadd.f32 %v1414_v60, %v1413_v58 }
 0x118   : > { %v1416_v62 = vpop.f32.mrf.mxu1 }
 0x119   : > { %v1389_v63 = vpop.f32.mrf.mxu0  ;;  %v1017_v28 = vadd.f32 %v1415_v16, %v1387_v15 }
 0x11a   : > { %v1417_v0 = vpop.f32.mrf.mxu1  ;;  %v1390_v32 = vadd.f32 %v1389_v63, %v1388_v61 }
 0x11b   : > { %v1418_v33 = vadd.f32 %v1417_v0, %v1416_v62 }
 0x11d   : > { %v1020_v44 = vadd.f32 %v1418_v33, %v1390_v32 }
 0x12b   : > { %v1435_v3 = vpop.f32.mrf.mxu0 }
 0x12c   : > { %v1463_v4 = vpop.f32.mrf.mxu1 }
 0x12d   : > { %v1436_v5 = vpop.f32.mrf.mxu0 }
 0x12e   : > { %v1464_v6 = vpop.f32.mrf.mxu1  ;;  %v1437_v10 = vadd.f32 %v1436_v5, %v1435_v3 }
 0x12f   : > { %v1438_v11 = vpop.f32.mrf.mxu0  ;;  %v1465_v14 = vadd.f32 %v1464_v6, %v1463_v4 }
 0x130   : > { %v1466_v12 = vpop.f32.mrf.mxu1  ;;  %v1058_v13 = vadd.f32 %v1437_v10, %v1009_v7 }
 0x131   : > { %v1439_v18 = vpop.f32.mrf.mxu0 }
 0x132   : > { %v1467_v19 = vpop.f32.mrf.mxu1  ;;  %v1107_v21 = vadd.f32 %v1465_v14, %v1058_v13  ;;  %v1440_v22 = vadd.f32 %v1439_v18, %v1438_v11 }
 0x133   : > { %v1441_v23 = vpop.f32.mrf.mxu0  ;;  %v1468_v27 = vadd.f32 %v1467_v19, %v1466_v12 }
 0x134   : > { %v1469_v24 = vpop.f32.mrf.mxu1  ;;  %v1121_v25 = vadd.f32 %v1107_v21, %v313_v17  ;;  %v1061_v26 = vadd.f32 %v1440_v22, %v1012_v20 }
 0x135   : > { %v1442_v30 = vpop.f32.mrf.mxu0 }
 0x136   : > { %v1470_v31 = vpop.f32.mrf.mxu1  ;;  %1126 = vst.msk [vmem:[#allocation2] sm:$0xff] %vm1125_vm1, %v1121_v25  ;;  %v1110_v34 = vadd.f32 %v1468_v27, %v1061_v26  ;;  %v1443_v35 = vadd.f32 %v1442_v30, %v1441_v23 }
 0x137   : > { %v1444_v36 = vpop.f32.mrf.mxu0  ;;  %v1471_v40 = vadd.f32 %v1470_v31, %v1469_v24 }
 0x138   : > { %v1472_v37 = vpop.f32.mrf.mxu1  ;;  %v1122_v38 = vadd.f32 %v1110_v34, %v314_v29  ;;  %v1066_v39 = vadd.f32 %v1443_v35, %v1017_v28 }
 0x139   : > { %v1445_v42 = vpop.f32.mrf.mxu0 }
 0x13a   : > { %v1473_v43 = vpop.f32.mrf.mxu1  ;;  %1127 = vst.msk [vmem:[#allocation2 + $0x8] sm:$0xff] %vm1125_vm1, %v1122_v38  ;;  %v1115_v45 = vadd.f32 %v1471_v40, %v1066_v39  ;;  %v1446_v46 = vadd.f32 %v1445_v42, %v1444_v36 }
 0x13b   : > { %v1474_v49 = vadd.f32 %v1473_v43, %v1472_v37 }
 0x13c   : > { %v1123_v47 = vadd.f32 %v1115_v45, %v315_v41  ;;  %v1069_v48 = vadd.f32 %v1446_v46, %v1020_v44 }
 0x13e   : > { %1128 = vst.msk [vmem:[#allocation2 + $0x10] sm:$0xff] %vm1125_vm1, %v1123_v47  ;;  %v1118_v51 = vadd.f32 %v1474_v49, %v1069_v48  ;;  %1133 = sbr.rel (%p1356_p11) target bundleno = 333 (0x14d), region = 63 }
 0x140   : > { %v1124_v52 = vadd.f32 %v1118_v51, %v316_v50 }
 0x142   : > { %1129 = vst.msk [vmem:[#allocation2 + $0x18] sm:$0xff] %vm1125_vm1, %v1124_v52 }
 0x143   : > { %v1134_v53 = vld [vmem:[#allocation2] sm:$0xff]  ;;  %v1135_v55 = vld [vmem:[#allocation2 + $0x8] sm:$0xff] }
 0x144   : > { %v1357_v54 = vld [vmem:[%s1835_s2] ss:$0 sm:$0xff] }
 0x145   : > { %v1145_v56 = vadd.f32 %v1357_v54, %v1134_v53  ;;  %v1146_v57 = vadd.f32 %v1357_v54, %v1135_v55  ;;  %v1136_v58 = vld [vmem:[#allocation2 + $0x10] sm:$0xff] }
 0x146   : > { %v1147_v60 = vadd.f32 %v1357_v54, %v1136_v58 }
 0x147   : > { %1149 = vst.msk [vmem:[%s1836_s3] sm:$0xff] %vm1125_vm1, %v1145_v56  ;;  %1150 = vst.msk [vmem:[%s1836_s3 + $0x8] sm:$0xff] %vm1125_vm1, %v1146_v57 }
 0x148   : > { %1151 = vst.msk [vmem:[%s1836_s3 + $0x10] sm:$0xff] %vm1125_vm1, %v1147_v60 }
 0x149   : > { %v1137_v59 = vld [vmem:[#allocation2 + $0x18] sm:$0xff] }
 0x14a   : > { %v1148_v61 = vadd.f32 %v1357_v54, %v1137_v59 }
 0x14c   : > { %1152 = vst.msk [vmem:[%s1836_s3 + $0x18] sm:$0xff] %vm1125_vm1, %v1148_v61 }
 0x14d PF: > { %s13_s16 = sadd.s32 1, %s1618_s16   ;;  %s1837_s12 = smov %s1606_s13 }
 0x14e   : > { %p10_p12 = scmp.ge.s32.totalorder %s13_s16, 4   ;;  %s1838_s13 = smov %s1676_s20 }
 0x14f   : > { %s1839_s14 = smov %s1614_s15  ;;  %s1840_s15 = smov %s1842_s17 }
 0x150   :  { %12 = sbr.rel (!%p10_p12) target bundleno = 3 (0x3), region = 104 }

// kernel: _lambda_.10
= control target key start
LH: loop header
LB: loop body
LE: loop exit
PB: predicated region body
PF: predicated region fallthrough
CT: control target
= control target key end

     0   :  { %s386_s15 = smov 0   ;;  %s434_s0 = inlined_call_operand.vmem [shape: f32[2,17,64], index: 0, kind: input, shape index: {}]   ;;  %s435_s1 = inlined_call_operand.vmem [shape: f32[1,17,64], index: 1, kind: input, shape index: {}]   ;;  %s436_s2 = inlined_call_operand.vmem [shape: f32[1,64], index: 2, kind: input, shape index: {}]   ;;  %s437_s3 = inlined_call_operand.vmem [shape: f32[1,64], index: 3, kind: input, shape index: {}]   ;;  %s438_s4 = inlined_call_operand.vmem [shape: f32[2,17,64], index: 4, kind: output, shape index: {}]  }
   0x1 LB: > { %s327_s16 = sadd.s32 4294967295, %s359_s15   ;;  %p331_p0 = scmp.ge.s32.totalorder %s359_s15, 1  ;;  %s359_s15 = sphi %s386_s15, %s14_s15  }
   0x2   : > { %p162_p1 = scmp.lt.s32.totalorder %s359_s15, 3 }
   0x4   : > { %p163_p2 = pnand %p331_p0, %p162_p1 }
   0x5   : > { %p188_p3 = scmp.lt.s32.totalorder (!%p163_p2), %s327_s16, 1 }
   0x6   : > { %166 = sbr.rel (%p163_p2) target bundleno = 332 (0x14c), region = 36 }
   0xb   : > { %s440_s16 = smov (!%p188_p3, %s327_s16), 1  ;;  %v201_v0 = vld [vmem:[%s435_s1] sm:$0xff]  ;;  %v203_v1 = vld [vmem:[%s435_s1 + $0x10] sm:$0x1]  ;;  %v202_v2 = vld [vmem:[%s435_s1 + $0x8] sm:$0xff]  ;;  %vm207_vm0 = vcmask 523264  }
   0xc   : > { %s338_s17 = smul.u32 24, %s440_s16  ;;  %vm214_vm1 = vcmask 516096   ;;  %v334_v37 = vld [vmem:[%s436_s2] ss:$0 sm:$0xff] }
   0xd   : > { %v335_v39 = vld [vmem:[%s437_s3] ss:$0 sm:$0xff] }
   0xe   : > { %s192_s26 = scalar_lea.vmem %s434_s0, %s338_s17  ;;  %s197_s7 = scalar_lea.vmem %s438_s4, %s338_s17 }
   0xf   : > { %v198_v3 = vld [vmem:[%s192_s26] sm:$0xff]  ;;  %v200_v4 = vld [vmem:[%s192_s26 + $0x10] sm:$0x1]  ;;  %v199_v5 = vld [vmem:[%s192_s26 + $0x8] sm:$0xff] }
  0x10   : > { %v204_v6 = vadd.f32 %v201_v0, %v198_v3  ;;  %v206_v7 = vadd.f32 %v203_v1, %v200_v4  ;;  %v205_v8 = vadd.f32 %v202_v2, %v199_v5 }
  0x12   : > { %v208_v9 = vsel %vm207_vm0, %v204_v6, 0.0  ;;  %v215_v10 = vsel %vm214_vm1, %v206_v7, 0.0  ;;  %v211_v11 = vsel %vm207_vm0, %v205_v8, 0.0 }
  0x13   : > { %209 = vadd.xlane.f32.xlu0 %v208_v9  ;;  %216 = vadd.xlane.f32.xlu1 %v215_v10 }
  0x17   : > { %212 = vadd.xlane.f32.xlu0 %v211_v11 }
  0x9c   : > { %v210_v12 = vpop.xlane.xlu0 %209  ;;  %v217_v13 = vpop.xlane.xlu1 %216 }
  0x9d   : > { %v219_v14 = vmul.f32 0.015625, %v210_v12  ;;  %v221_v15 = vmul.f32 0.015625, %v217_v13 }
  0x9f   : > { %v222_v16 = vsub.f32 %v204_v6, %v219_v14  ;;  %v224_v17 = vsub.f32 %v206_v7, %v221_v15 }
  0xa0   : > { %v213_v18 = vpop.xlane.xlu0 %212 }
  0xa1   : > { %v220_v19 = vmul.f32 0.015625, %v213_v18  ;;  %v225_v20 = vmul.f32 %v222_v16, %v222_v16  ;;  %v227_v21 = vmul.f32 %v224_v17, %v224_v17 }
  0xa3   : > { %v223_v22 = vsub.f32 %v205_v8, %v220_v19  ;;  %v228_v23 = vsel %vm207_vm0, %v225_v20, 0.0  ;;  %v234_v24 = vsel %vm214_vm1, %v227_v21, 0.0 }
  0xa4   : > { %229 = vadd.xlane.f32.xlu1 %v228_v23 }
  0xa5   : > { %v226_v25 = vmul.f32 %v223_v22, %v223_v22 }
  0xa7   : > { %v231_v26 = vsel %vm207_vm0, %v226_v25, 0.0 }
  0xa8   : > { %235 = vadd.xlane.f32.xlu1 %v234_v24  ;;  %232 = vadd.xlane.f32.xlu0 %v231_v26 }
 0x12d   : > { %v230_v27 = vpop.xlane.xlu1 %229 }
 0x12e   : > { %v237_v28 = vmul.f32 0.015625, %v230_v27 }
 0x130   : > { %v240_v29 = vadd.f32 1e-05, %v237_v28 }
 0x131   : > { %v236_v30 = vpop.xlane.xlu1 %235  ;;  %v233_v31 = vpop.xlane.xlu0 %232 }
 0x132   : > { %347 = vrsqrt.f32 %v240_v29  ;;  %v239_v32 = vmul.f32 0.015625, %v236_v30  ;;  %v238_v33 = vmul.f32 0.015625, %v233_v31 }
 0x134   : > { %v242_v34 = vadd.f32 1e-05, %v239_v32  ;;  %v241_v35 = vadd.f32 1e-05, %v238_v33 }
 0x136   : > { %349 = vrsqrt.f32 %v242_v34 }
 0x137   : > { %351 = vrsqrt.f32 %v241_v35 }
 0x13f   : > { %v348_v36 = vpop.eup %347 }
 0x140   : > { %v246_v38 = vmul.f32 %v348_v36, %v222_v16 }
 0x142   : > { %v256_v40 = vmul.f32 %v334_v37, %v246_v38 }
 0x143   : > { %v350_v41 = vpop.eup %349 }
 0x144   : > { %v352_v42 = vpop.eup %351  ;;  %v266_v43 = vadd.f32 %v335_v39, %v256_v40  ;;  %v248_v44 = vmul.f32 %v350_v41, %v224_v17 }
 0x145   : > { %v247_v45 = vmul.f32 %v352_v42, %v223_v22 }
 0x146   : > { %269 = vst.msk [vmem:[%s197_s7] sm:$0xff] %vm207_vm0, %v266_v43  ;;  %v258_v46 = vmul.f32 %v334_v37, %v248_v44 }
 0x147   : > { %v257_v47 = vmul.f32 %v334_v37, %v247_v45 }
 0x148   : > { %v268_v48 = vadd.f32 %v335_v39, %v258_v46 }
 0x149   : > { %v267_v49 = vadd.f32 %v335_v39, %v257_v47 }
 0x14a   : > { %271 = vst.msk [vmem:[%s197_s7 + $0x10] sm:$0x1] %vm214_vm1, %v268_v48 }
 0x14b   : > { %270 = vst.msk [vmem:[%s197_s7 + $0x8] sm:$0xff] %vm207_vm0, %v267_v49 }
 0x14c PF: > { %s14_s15 = sadd.s32 1, %s359_s15  }
 0x14d   : > { %p11_p4 = scmp.ge.s32.totalorder %s14_s15, 4  }
 0x14f   :  { %13 = sbr.rel (!%p11_p4) target bundleno = 1 (0x1), region = 66 }

// kernel: _lambda_.13
= control target key start
LH: loop header
LB: loop body
LE: loop exit
PB: predicated region body
PF: predicated region fallthrough
CT: control target
= control target key end

     0   :  { %s524_s0 = inlined_call_operand.vmem [shape: f32[2,64], index: 0, kind: input, shape index: {}]   ;;  %s525_s1 = inlined_call_operand.vmem [shape: f32[1,64], index: 1, kind: input, shape index: {}]   ;;  %s526_s2 = inlined_call_operand.vmem [shape: f32[1,64], index: 2, kind: input, shape index: {}]   ;;  %s527_s3 = inlined_call_operand.vmem [shape: bf16[64,32], index: 3, kind: input, shape index: {}]   ;;  %s528_s4 = inlined_call_operand.vmem [shape: f32[1,32], index: 4, kind: input, shape index: {}]   ;;  %s529_s5 = inlined_call_operand.vmem [shape: bf16[32,16], index: 5, kind: input, shape index: {}]   ;;  %s530_s6 = inlined_call_operand.vmem [shape: f32[1,16], index: 6, kind: input, shape index: {}]   ;;  %s531_s7 = inlined_call_operand.vmem [shape: bf16[16,10], index: 7, kind: input, shape index: {}]   ;;  %s532_s8 = inlined_call_operand.vmem [shape: f32[1,10], index: 8, kind: input, shape index: {}]   ;;  %s533_s9 = inlined_call_operand.<no memory space> [shape: f32[1,1], index: 9, kind: input, shape index: {}]   ;;  %s534_s10 = inlined_call_operand.hbm [shape: f32[2,10], index: 10, kind: output, shape index: {}]  }
   0x1   :  { %v15_v0 = vstv %s533_s9 }
   0x2   :  { %16 = vst [vmem:[#allocation2] sm:$0x1] %v15_v0 }
   0x3   :  { %v39_v1 = vld [vmem:[%s524_s0] sm:$0x3]  ;;  %vm40_vm0 = vcmask 517120  }
   0x4   :  { %v41_v2 = vsel %vm40_vm0, %v39_v1, 0.0 }
   0x5   :  { %42 = vadd.xlane.f32.xlu0 %v41_v2 }
   0x6   :  { %17 = vsyncpa [#allocation4], 0  ;;  %v380_v8 = vld [vmem:[%s527_s3 + $0x18] sm:$0xff]   ;;  %v417_v9 = vmov 0.0   ;;  %vm418_vm1 = vmmov 0   ;;  %v381_v10 = vld [vmem:[%s527_s3 + $0x10] sm:$0xff]  }
   0x7   :  { %348 = vmatprep.subr.bf16.mxu0 %v417_v9  ;;  %356 = vmatprep.mubr.msk.bf16.mxu0 %vm418_vm1, %v417_v9  ;;  %v382_v11 = vld [vmem:[%s527_s3 + $0x8] sm:$0xff]   ;;  %v383_v12 = vld [vmem:[%s527_s3] sm:$0xff]   ;;  %vm111_vm2 = vcmask 523264   ;;  %vm185_vm3 = vcmask 261120   ;;  %v419_v39 = vmov 0   ;;  %vm250_vm4 = vcmask 130048  }
   0x8   :  { %349 = vmatpush3.bf16.msra.mxu0 %v380_v8  ;;  %360 = vmatprep.subr.bf16.mxu1 %v417_v9  ;;  %v322_v17 = vld [vmem:[%s525_s1] ss:$0 sm:$0xff]  ;;  %v384_v23 = vld [vmem:[%s529_s5 + $0x8] sm:$0xff]   ;;  %vm306_vm5 = vcmask 74752  }
   0x9   :  { %350 = vmatprep.subr.bf16.mxu0 %v417_v9  ;;  %364 = vmatprep.mubr.msk.bf16.mxu1 %vm418_vm1, %v417_v9  ;;  %v323_v19 = vld [vmem:[%s526_s2] ss:$0 sm:$0xff] }
   0xa   :  { %361 = vmatpush3.bf16.msra.mxu1 %v384_v23  ;;  %v385_v24 = vld [vmem:[%s529_s5] sm:$0xff]   ;;  %378 = vset.pattern.permute.xlu1 %v419_v39 }
   0xb   :  { %362 = vmatprep.subr.bf16.mxu1 %v417_v9  ;;  %v324_v25 = vld [vmem:[%s528_s4] ss:$0 sm:$0xff]  ;;  %379 = vset.pattern.permute.xlu0 %v419_v39 }
   0xc   :  { %351 = vmatpush3.bf16.msra.mxu0 %v381_v10  ;;  %v386_v37 = vld [vmem:[%s531_s7] sm:$0xff]  }
   0xd   :  { %352 = vmatprep.subr.bf16.mxu0 %v417_v9  ;;  %v337_v38 = vld [vmem:[#allocation2] ss:$0 sm:$0xff] }
   0xe   :  { %363 = vmatpush3.bf16.msra.mxu1 %v385_v24  ;;  %301 = vperm.xlu1 %378, %v337_v38   ;;  %v330_v40 = vld [vmem:[%s530_s6] ss:$0 sm:$0xff]  ;;  %s420_s6 = smov [#allocation3]  }
   0xf   :  { %368 = vmatprep.subr.bf16.mxu1 %v417_v9  ;;  %v334_v53 = vld [vmem:[%s532_s8] ss:$0 sm:$0xff]  ;;  %s314_s13 = sshll.u32 %s420_s6, 4  ;;  %s315_s13 = int_to_ptr.vmem [resolvable:$true] %s314_s13 }
  0x10   :  { %353 = vmatpush3.bf16.msra.mxu0 %v382_v11  ;;  %s395_s14 = scalar_lea.vmem %s315_s13, 32  ;;  %p400_p1 = scmp.lt.s32.totalorder %s315_s13, %s315_s13 }
  0x11   :  { %354 = vmatprep.subr.bf16.mxu0 %v417_v9  ;;  %p396_p0 = scmp.ne.s32.totalorder %s315_s13, %s395_s14  ;;  %p401_p2 = scmp.lt.s32.totalorder %s395_s14, %s395_s14 }
  0x13   :  { %p402_p3 = por %p401_p2, %p400_p1 }
  0x14   :  { %355 = vmatpush3.bf16.msra.mxu0 %v383_v12 }
  0x15   :  { %p403_p4 = pnand %p402_p3, %p396_p0 }
  0x89   :  { %v302_v52 = vpop.permute.xlu1 %301 }
  0x8e   :  { %v43_v3 = vpop.xlane.xlu0 %42 }
  0x8f   :  { %v45_v4 = vmul.f32 0.015625, %v43_v3 }
  0x91   :  { %v46_v5 = vsub.f32 %v39_v1, %v45_v4 }
  0x93   :  { %v47_v6 = vmul.f32 %v46_v5, %v46_v5 }
  0x95   :  { %v48_v7 = vsel %vm40_vm0, %v47_v6, 0.0 }
  0x96   :  { %49 = vadd.xlane.f32.xlu0 %v48_v7 }
 0x11f   :  { %v50_v13 = vpop.xlane.xlu0 %49 }
 0x120   :  { %v51_v14 = vmul.f32 0.015625, %v50_v13 }
 0x122   :  { %v52_v15 = vadd.f32 1e-05, %v51_v14 }
 0x124   :  { %387 = vrsqrt.f32 %v52_v15 }
 0x131   :  { %v388_v16 = vpop.eup %387 }
 0x132   :  { %v54_v18 = vmul.f32 %v388_v16, %v46_v5 }
 0x134   :  { %v62_v20 = vmul.f32 %v322_v17, %v54_v18 }
 0x136   :  { %v70_v21 = vadd.f32 %v323_v19, %v62_v20 }
 0x138   :  { %v71_v22 = vpack.c.bf16 %v70_v21, %v70_v21 }
 0x13a   :  { %357 = vmatmul.mubr.msk.bf16.vlgmr.msra.gmra.mxu0 %vm111_vm2, %v71_v22 }
 0x1fa   :  { %v149_v26 = vpop.f32.mrf.mxu0 }
 0x1fb   :  { %v150_v27 = vadd.f32 %v324_v25, %v149_v26 }
 0x1fc   :  { %v358_v28 = vpop.f32.mrf.mxu0 }
 0x1fd   :  { %v157_v29 = vmul.f32 0.70710677, %v150_v27  ;;  %v155_v33 = vmul.f32 0.5, %v150_v27 }
 0x1fe   :  { %v152_v30 = vpop.f32.mrf.mxu0 }
 0x1ff   :  { %389 = verf.f32 %v157_v29 }
 0x200   :  { %v359_v31 = vpop.f32.mrf.mxu0 }
 0x20c   :  { %v390_v32 = vpop.eup %389 }
 0x20d   :  { %v159_v34 = vadd.f32 1.0, %v390_v32 }
 0x20f   :  { %v160_v35 = vmul.f32 %v159_v34, %v155_v33 }
 0x211   :  { %v161_v36 = vpack.c.bf16 %v160_v35, %v160_v35 }
 0x213   :  { %365 = vmatmul.mubr.msk.bf16.vlgmr.msra.gmra.mxu1 %vm185_vm3, %v161_v36 }
 0x214   :  { %370 = vmatprep.mubr.msk.bf16.mxu1 %vm418_vm1, %v417_v9  ;;  %369 = vmatpush3.bf16.msra.mxu1 %v386_v37 }
 0x2d3   :  { %v223_v41 = vpop.f32.mrf.mxu1 }
 0x2d4   :  { %v224_v42 = vadd.f32 %v330_v40, %v223_v41 }
 0x2d5   :  { %v366_v43 = vpop.f32.mrf.mxu1 }
 0x2d6   :  { %v230_v44 = vmul.f32 0.70710677, %v224_v42  ;;  %v229_v48 = vmul.f32 0.5, %v224_v42 }
 0x2d7   :  { %v226_v45 = vpop.f32.mrf.mxu1 }
 0x2d8   :  { %391 = verf.f32 %v230_v44 }
 0x2d9   :  { %v367_v46 = vpop.f32.mrf.mxu1  ;;  %393 = vrcp.f32 %v302_v52 }
 0x2e5   :  { %v392_v47 = vpop.eup %391 }
 0x2e6   :  { %v232_v49 = vadd.f32 1.0, %v392_v47  ;;  %v394_v54 = vpop.eup %393 }
 0x2e8   :  { %v233_v50 = vmul.f32 %v232_v49, %v229_v48 }
 0x2ea   :  { %v234_v51 = vpack.c.bf16 %v233_v50, %v233_v50 }
 0x2ec   :  { %371 = vmatmul.mubr.msk.bf16.vlgmr.msra.gmra.mxu1 %vm250_vm4, %v234_v51 }
 0x3ac   :  { %v288_v55 = vpop.f32.mrf.mxu1 }
 0x3ad   :  { %v289_v56 = vadd.f32 %v334_v53, %v288_v55 }
 0x3ae   :  { %v372_v57 = vpop.f32.mrf.mxu1 }
 0x3af   :  { %v305_v58 = vmul.f32 %v394_v54, %v289_v56 }
 0x3b0   :  { %v291_v59 = vpop.f32.mrf.mxu1 }
 0x3b1   :  { %307 = vst.msk [vmem:[#allocation3] sm:$0x3] %vm306_vm5, %v305_v58 }
 0x3b2   :  { %v373_v60 = vpop.f32.mrf.mxu1 }
 0x3b3   :  { %406 = shalt.err (!%p403_p4)
}
 0x3b4   :  { %317 = dma.vmem_to_hbm [thread:$0]  %s315_s13, 32, %s534_s10, [#allocation4]  }
 0x3b5   :  { %415 = dma.done.wait [#allocation4], 32  }
 0x3b6   :  { %416 = vsyncadd [#allocation4], 4294967264 }
 0x3b7   :  { %321 = vsyncpa [#allocation4], 1 }

// kernel: _lambda_.11
= control target key start
LH: loop header
LB: loop body
LE: loop exit
PB: predicated region body
PF: predicated region fallthrough
CT: control target
= control target key end

     0   :  { %s2250_s25 = smov 0   ;;  %s2587_s0 = inlined_call_operand.vmem [shape: f32[2,17,64], index: 0, kind: input, shape index: {}]   ;;  %s2588_s1 = inlined_call_operand.vmem [shape: f32[1,64], index: 1, kind: input, shape index: {}]   ;;  %s2589_s2 = inlined_call_operand.vmem [shape: f32[1,64], index: 2, kind: input, shape index: {}]   ;;  %s2590_s3 = inlined_call_operand.vmem [shape: bf16[64,192], index: 3, kind: input, shape index: {}]   ;;  %s2591_s4 = inlined_call_operand.vmem [shape: f32[1,192], index: 4, kind: input, shape index: {}]   ;;  %s2592_s5 = inlined_call_operand.vmem [shape: bf16[64,64], index: 5, kind: input, shape index: {}]   ;;  %s2593_s6 = inlined_call_operand.vmem [shape: f32[1,64], index: 6, kind: input, shape index: {}]   ;;  %s2594_s7 = inlined_call_operand.vmem [shape: f32[1,64], index: 7, kind: input, shape index: {}]   ;;  %s2595_s8 = inlined_call_operand.vmem [shape: f32[1,64], index: 8, kind: input, shape index: {}]   ;;  %s2596_s9 = inlined_call_operand.vmem [shape: bf16[64,128], index: 9, kind: input, shape index: {}]   ;;  %s2597_s10 = inlined_call_operand.vmem [shape: f32[1,128], index: 10, kind: input, shape index: {}]   ;;  %s2598_s11 = inlined_call_operand.vmem [shape: bf16[128,64], index: 11, kind: input, shape index: {}]   ;;  %s2599_s12 = inlined_call_operand.vmem [shape: f32[1,64], index: 12, kind: input, shape index: {}]   ;;  %s2600_s13 = inlined_call_operand.vmem [shape: f32[2,17,64], index: 13, kind: output, shape index: {}]  }
   0x1 LB: > { %s1806_s26 = sadd.s32 4294967295, %s2170_s25   ;;  %p1810_p0 = scmp.ge.s32.totalorder %s2170_s25, 1  ;;  %s2170_s25 = sphi %s2250_s25, %s23_s25  }
   0x2   : > { %p387_p1 = scmp.lt.s32.totalorder %s2170_s25, 3 }
   0x4   : > { %p388_p2 = pnand %p1810_p0, %p387_p1 }
   0x5   : > { %p431_p3 = scmp.lt.s32.totalorder (!%p388_p2), %s1806_s26, 1  ;;  %s2173_s22 = smov (!%p388_p2), 48  }
   0x6   : > { %391 = sbr.rel (%p388_p2) target bundleno = 3049 (0xbe9), region = 72  ;;  %s2174_s23 = smov (!%p388_p2), 64  }
   0x7   : > { %s2175_s24 = smov (!%p388_p2), 112   ;;  %s2176_s28 = smov (!%p388_p2), 96  }
   0x8   : > { %s2177_s29 = smov (!%p388_p2), 32   ;;  %s2179_s14 = smov (!%p388_p2), 80  }
   0xb   : > { %s2602_s26 = smov (!%p431_p3, %s1806_s26), 1  ;;  %vm445_vm0 = vcmask 523264   ;;  %vm452_vm1 = vcmask 516096   ;;  %v2070_v21 = vld [vmem:[%s2590_s3 + $0x34] ss:$8 sps:$4 sm:$0xff]   ;;  %v2172_v25 = vmov 0   ;;  %v519_v55 = vlaneseq }
   0xc   : > { %s2038_s27 = smul.u32 24, %s2602_s26  ;;  %v2072_v22 = vld [vmem:[%s2590_s3 + $0x30] ss:$8 sps:$4 sm:$0xff]   ;;  %v2073_v23 = vld [vmem:[%s2590_s3 + $0x24] ss:$8 sps:$4 sm:$0xff]   ;;  %583 = vmatprep.subr.bf16.mxu1 %v2070_v21  ;;  %607 = vmatprep.mubr.bf16.mxu1 %v2172_v25  ;;  %vm636_vm2 = vcmask 130048  }
   0xd   : > { %584 = vmatpush1.bf16.msra.mxu1 %v2072_v22  ;;  %v2075_v24 = vld [vmem:[%s2590_s3 + $0x20] ss:$8 sps:$4 sm:$0xff]   ;;  %v2076_v26 = vld [vmem:[%s2590_s3 + $0x14] ss:$8 sps:$4 sm:$0xff]   ;;  %v2078_v27 = vld [vmem:[%s2590_s3 + $0x10] ss:$8 sps:$4 sm:$0xff]  }
   0xe   : > { %s435_s30 = scalar_lea.vmem %s2587_s0, %s2038_s27  ;;  %585 = vmatprep.subr.bf16.mxu1 %v2073_v23  ;;  %v2079_v28 = vld [vmem:[%s2590_s3 + $0x4] ss:$8 sps:$4 sm:$0xff]   ;;  %v2081_v29 = vld [vmem:[%s2590_s3] ss:$8 sps:$4 sm:$0xff]   ;;  %v520_v56 = vshrl.u32 %v519_v55, 7  ;;  %vm743_vm3 = vcmask 1040384   ;;  %s440_s17 = scalar_lea.vmem %s2600_s13, %s2038_s27 }
   0xf   : > { %v2266_v0 = vld [vmem:[%s435_s30] sm:$0xff]  ;;  %v2268_v1 = vld [vmem:[%s435_s30 + $0x10] sm:$0x1]  ;;  %v2270_v2 = vld [vmem:[%s435_s30 + $0x8] sm:$0xff]  ;;  %vm700_vm4 = vcmask 138240   ;;  %vm707_vm5 = vcmask 131072  }
  0x10   : > { %v446_v3 = vsel %vm445_vm0, %v2266_v0, 0.0  ;;  %v453_v4 = vsel %vm452_vm1, %v2268_v1, 0.0  ;;  %v449_v5 = vsel %vm445_vm0, %v2270_v2, 0.0  ;;  %v1813_v41 = vld [vmem:[%s2588_s1] ss:$0 sm:$0xff]  ;;  %v521_v57 = vsub.s32 0, %v520_v56 }
  0x11   : > { %447 = vadd.xlane.f32.xlu0 %v446_v3  ;;  %454 = vadd.xlane.f32.xlu1 %v453_v4  ;;  %v1814_v46 = vld [vmem:[%s2589_s2] ss:$0 sm:$0xff]  ;;  %v525_v59 = vsub.s32 1, %v520_v56  ;;  %s2178_s30 = smov 16   ;;  %vm1342_vm6 = vcmask 261120   ;;  %vm1346_vm7 = vcmask 392192  }
  0x12   : > { %586 = vmatpush1.bf16.msra.mxu1 %v2075_v24  ;;  %v517_v58 = vld [vmem:[%s2591_s4] sm:$0x3] }
  0x13   : > { %587 = vmatprep.subr.bf16.mxu1 %v2076_v26  ;;  %v522_v61 = vrot.slane %v517_v58, %v521_v57  ;;  %v526_v63 = vrot.slane %v517_v58, %v525_v59  ;;  %v2356_v26 = vsel %vm743_vm3, 65535, %v2172_v25 }
  0x15   : > { %450 = vadd.xlane.f32.xlu0 %v449_v5 }
  0x16   : > { %588 = vmatpush1.bf16.msra.mxu1 %v2078_v27 }
  0x17   : > { %589 = vmatprep.subr.bf16.mxu1 %v2079_v28 }
  0x1a   : > { %590 = vmatpush1.bf16.msra.mxu1 %v2081_v29 }
  0x9a   : > { %v448_v6 = vpop.xlane.xlu0 %447  ;;  %v455_v7 = vpop.xlane.xlu1 %454 }
  0x9b   : > { %v457_v8 = vmul.f32 0.015625, %v448_v6  ;;  %v459_v9 = vmul.f32 0.015625, %v455_v7 }
  0x9d   : > { %v460_v10 = vsub.f32 %v2266_v0, %v457_v8  ;;  %v462_v11 = vsub.f32 %v2268_v1, %v459_v9 }
  0x9e   : > { %v451_v12 = vpop.xlane.xlu0 %450 }
  0x9f   : > { %v458_v13 = vmul.f32 0.015625, %v451_v12  ;;  %v463_v14 = vmul.f32 %v460_v10, %v460_v10  ;;  %v465_v15 = vmul.f32 %v462_v11, %v462_v11 }
  0xa1   : > { %v461_v16 = vsub.f32 %v2270_v2, %v458_v13  ;;  %v466_v17 = vsel %vm445_vm0, %v463_v14, 0.0  ;;  %v472_v18 = vsel %vm452_vm1, %v465_v15, 0.0 }
  0xa2   : > { %467 = vadd.xlane.f32.xlu1 %v466_v17 }
  0xa3   : > { %v464_v19 = vmul.f32 %v461_v16, %v461_v16 }
  0xa5   : > { %v469_v20 = vsel %vm445_vm0, %v464_v19, 0.0 }
  0xa6   : > { %473 = vadd.xlane.f32.xlu1 %v472_v18  ;;  %470 = vadd.xlane.f32.xlu0 %v469_v20 }
 0x12b   : > { %v468_v30 = vpop.xlane.xlu1 %467 }
 0x12c   : > { %v475_v31 = vmul.f32 0.015625, %v468_v30 }
 0x12e   : > { %v478_v32 = vadd.f32 1e-05, %v475_v31 }
 0x12f   : > { %v474_v33 = vpop.xlane.xlu1 %473  ;;  %v471_v34 = vpop.xlane.xlu0 %470 }
 0x130   : > { %2098 = vrsqrt.f32 %v478_v32  ;;  %v477_v35 = vmul.f32 0.015625, %v474_v33  ;;  %v476_v36 = vmul.f32 0.015625, %v471_v34 }
 0x132   : > { %v480_v37 = vadd.f32 1e-05, %v477_v35  ;;  %v479_v38 = vadd.f32 1e-05, %v476_v36 }
 0x134   : > { %2100 = vrsqrt.f32 %v480_v37 }
 0x135   : > { %2102 = vrsqrt.f32 %v479_v38 }
 0x13d   : > { %v2099_v39 = vpop.eup %2098 }
 0x13e   : > { %v484_v40 = vmul.f32 %v2099_v39, %v460_v10 }
 0x140   : > { %v494_v45 = vmul.f32 %v1813_v41, %v484_v40 }
 0x141   : > { %v2101_v42 = vpop.eup %2100 }
 0x142   : > { %v2103_v43 = vpop.eup %2102  ;;  %v486_v48 = vmul.f32 %v2101_v42, %v462_v11  ;;  %v504_v49 = vadd.f32 %v1814_v46, %v494_v45 }
 0x143   : > { %v485_v44 = vmul.f32 %v2103_v43, %v461_v16 }
 0x144   : > { %v496_v52 = vmul.f32 %v1813_v41, %v486_v48 }
 0x145   : > { %v495_v47 = vmul.f32 %v1813_v41, %v485_v44 }
 0x146   : > { %v506_v53 = vadd.f32 %v1814_v46, %v496_v52 }
 0x147   : > { %v505_v50 = vadd.f32 %v1814_v46, %v495_v47 }
 0x148   : > { %v508_v54 = vpack.c.bf16 %v506_v53, %v506_v53 }
 0x149   : > { %v507_v51 = vpack.c.bf16 %v505_v50, %v504_v49 }
 0x14b   : > { %1823 = vmatmul.mubr.msk.bf16.vlgmr.msra.gmra.mxu1 %vm445_vm0, %v507_v51 }
 0x14c   : > { %617 = vmatprep.mubr.bf16.mxu1 %v2172_v25 }
 0x153   : > { %1824 = vmatmul.mubr.msk.bf16.gmra.mxu1 %vm445_vm0, %v508_v54 }
 0x20b   : > { %v609_v60 = vpop.f32.mrf.mxu1 }
 0x20c   : > { %v610_v4 = vadd.f32 %v609_v60, %v522_v61 }
 0x20d   : > { %v611_v62 = vpop.f32.mrf.mxu1 }
 0x20e   : > { %v612_v7 = vadd.f32 %v611_v62, %v526_v63 }
 0x20f   : > { %v613_v3 = vpop.f32.mrf.mxu1 }
 0x210   : > { %v614_v5 = vadd.f32 %v613_v3, %v522_v61 }
 0x211   : > { %v615_v6 = vpop.f32.mrf.mxu1 }
 0x212   : > { %v2321_v8 = vpack.c.bf16 %v614_v5, %v610_v4  ;;  %v616_v9 = vadd.f32 %v615_v6, %v526_v63 }
 0x213   : > { %v619_v10 = vpop.f32.mrf.mxu1 }
 0x214   : > { %v2323_v11 = vpack.c.bf16 %v616_v9, %v612_v7  ;;  %v620_v12 = vadd.f32 %v619_v10, %v522_v61  ;;  %1926 = vmatprep.mubr.msk.bf16.mxu1 %vm636_vm2, %v2321_v8 }
 0x215   : > { %v621_v13 = vpop.f32.mrf.mxu1 }
 0x216   : > { %v2327_v14 = vpack.c.bf16 %v620_v12, %v620_v12  ;;  %v622_v19 = vadd.f32 %v621_v13, %v526_v63 }
 0x217   : > { %v623_v15 = vpop.f32.mrf.mxu1 }
 0x218   : > { %803 = vrot.lane.b32.xlu1 %v2327_v14, %s2173_s22  ;;  %634 = vrot.lane.b32.xlu0 %v2327_v14, %s2174_s23  ;;  %v2351_v24 = vpack.c.bf16 %v622_v19, %v622_v19 }
 0x219   : > { %v624_v16 = vpop.f32.mrf.mxu1 }
 0x21a   : > { %v747_v30 = vand.u32 %v2356_v26, %v2351_v24 }
 0x21c   : > { %797 = vrot.lane.b32.xlu0 %v2321_v8, %s2175_s24  ;;  %632 = vrot.lane.b32.xlu1 %v2321_v8, %s2174_s23 }
 0x220   : > { %799 = vrot.lane.b32.xlu0 %v2327_v14, %s2175_s24  ;;  %801 = vrot.lane.b32.xlu1 %v2321_v8, %s2173_s22 }
 0x224   : > { %967 = vrot.lane.b32.xlu0 %v2321_v8, %s2176_s28  ;;  %973 = vrot.lane.b32.xlu1 %v2327_v14, %s2177_s29 }
 0x228   : > { %971 = vrot.lane.b32.xlu1 %v2321_v8, %s2177_s29 }
 0x22c   : > { %969 = vrot.lane.b32.xlu1 %v2327_v14, %s2176_s28 }
 0x28a   : > { %v804_v17 = vpop.permute.xlu1 %803  ;;  %v635_v18 = vpop.permute.xlu0 %634 }
 0x28b   : > { %v647_v20 = vsel %vm636_vm2, %v635_v18, 0  ;;  %2030 = vmatprep.subr.msk.bf16.mxu1 %vm636_vm2, %v635_v18  ;;  %2032 = vmatprep.subr.msk.bf16.mxu0 %vm636_vm2, %v804_v17  ;;  %v815_v21 = vsel %vm636_vm2, %v804_v17, 0 }
 0x28c   : > { %1923 = vmatpush3.bf16.xpose.msra.mxu1 %v647_v20  ;;  %1939 = vmatpush3.bf16.xpose.msra.mxu0 %v815_v21 }
 0x28e   : > { %v798_v22 = vpop.permute.xlu0 %797  ;;  %v633_v23 = vpop.permute.xlu1 %632 }
 0x28f   : > { %2031 = vmatprep.subr.msk.bf16.mxu1 %vm636_vm2, %v633_v23  ;;  %1942 = vmatprep.mubr.msk.bf16.mxu0 %vm636_vm2, %v798_v22  ;;  %v644_v28 = vsel %vm636_vm2, %v633_v23, 0 }
 0x292   : > { %v802_v27 = vpop.permute.xlu1 %801  ;;  %v800_v31 = vpop.permute.xlu0 %799 }
 0x293   : > { %2033 = vmatprep.subr.msk.bf16.mxu0 %vm636_vm2, %v802_v27  ;;  %v812_v29 = vsel %vm636_vm2, %v802_v27, 0 }
 0x294   : > { %1925 = vmatpush3.bf16.xpose.msra.mxu1 %v644_v28  ;;  %1941 = vmatpush3.bf16.xpose.msra.mxu0 %v812_v29 }
 0x295   : > { %1930 = vmatprep.subr.bf16.mxu1 %v747_v30 }
 0x296   : > { %v974_v32 = vpop.permute.xlu1 %973  ;;  %v968_v33 = vpop.permute.xlu0 %967 }
 0x297   : > { %2034 = vmatprep.subr.msk.bf16.mxu0 %vm636_vm2, %v974_v32  ;;  %v985_v25 = vsel %vm636_vm2, %v974_v32, 0 }
 0x29a   : > { %v972_v34 = vpop.permute.xlu1 %971 }
 0x29b   : > { %1927 = vmatmul.mubr.msk.bf16.vlgmr.msra.gmra.mxu1 %vm636_vm2, %v2327_v14  ;;  %1943 = vmatmul.mubr.msk.bf16.vlgmr.msra.gmra.mxu0 %vm636_vm2, %v800_v31  ;;  %v982_v35 = vsel %vm636_vm2, %v972_v34, 0 }
 0x29c   : > { %1931 = vmatpush3.bf16.msra.mxu1 %v747_v30  ;;  %1955 = vmatpush3.bf16.xpose.msra.mxu0 %v985_v25 }
 0x29d   : > { %1958 = vmatprep.mubr.msk.bf16.mxu0 %vm636_vm2, %v968_v33  ;;  %1932 = vmatprep.subr.bf16.mxu1 %v2323_v11 }
 0x29e   : > { %2035 = vmatprep.subr.msk.bf16.mxu0 %vm636_vm2, %v972_v34  ;;  %v970_v36 = vpop.permute.xlu1 %969 }
 0x2a0   : > { %1933 = vmatpush3.bf16.msra.mxu1 %v2323_v11 }
 0x2a4   : > { %1957 = vmatpush3.bf16.xpose.msra.mxu0 %v982_v35 }
 0x2ab   : > { %1959 = vmatmul.mubr.msk.bf16.vlgmr.msra.gmra.mxu0 %vm636_vm2, %v970_v36 }
 0x35b   : > { %v1928_v37 = vpop.f32.mrf.mxu1  ;;  %v1944_v38 = vpop.f32.mrf.mxu0 }
 0x35c   : > { %v699_v44 = vmul.f32 0.25, %v1928_v37  ;;  %v867_v48 = vmul.f32 0.25, %v1944_v38 }
 0x35d   : > { %v683_v39 = vpop.f32.mrf.mxu1  ;;  %v851_v40 = vpop.f32.mrf.mxu0 }
 0x35e   : > { %v697_v41 = vmul.f32 0.25, %v683_v39  ;;  %v865_v49 = vmul.f32 0.25, %v851_v40  ;;  %v708_v50 = vsel %vm707_vm5, %v699_v44, -inf  ;;  %v874_v55 = vsel %vm707_vm5, %v867_v48, -inf }
 0x35f   : > { %v1929_v42 = vpop.f32.mrf.mxu1  ;;  %v1945_v43 = vpop.f32.mrf.mxu0 }
 0x360   : > { %v701_v45 = vsel %vm700_vm4, %v697_v41, -inf  ;;  %v868_v54 = vsel %vm700_vm4, %v865_v49, -inf }
 0x361   : > { %702 = vmax.xlane.f32.xlu0 %v701_v45  ;;  %v686_v46 = vpop.f32.mrf.mxu1  ;;  %v854_v52 = vpop.f32.mrf.mxu0 }
 0x362   : > { %v698_v47 = vmul.f32 0.25, %v686_v46  ;;  %v2377_v53 = vmul.f32 0.25, %v854_v52 }
 0x364   : > { %v704_v51 = vsel %vm700_vm4, %v698_v47, -inf  ;;  %v871_v57 = vsel %vm700_vm4, %v2377_v53, -inf }
 0x365   : > { %709 = vmax.xlane.f32.xlu0 %v708_v50  ;;  %705 = vmax.xlane.f32.xlu1 %v704_v51 }
 0x369   : > { %869 = vmax.xlane.f32.xlu0 %v868_v54  ;;  %875 = vmax.xlane.f32.xlu1 %v874_v55 }
 0x36b   : > { %v1960_v56 = vpop.f32.mrf.mxu0 }
 0x36c   : > { %v1037_v61 = vmul.f32 0.25, %v1960_v56 }
 0x36d   : > { %v1021_v58 = vpop.f32.mrf.mxu0  ;;  %872 = vmax.xlane.f32.xlu0 %v871_v57 }
 0x36e   : > { %v1035_v59 = vmul.f32 0.25, %v1021_v58  ;;  %v1044_v4 = vsel %vm707_vm5, %v1037_v61, -inf }
 0x36f   : > { %v1961_v60 = vpop.f32.mrf.mxu0 }
 0x370   : > { %v1038_v62 = vsel %vm700_vm4, %v1035_v59, -inf }
 0x371   : > { %v1024_v63 = vpop.f32.mrf.mxu0  ;;  %1039 = vmax.xlane.f32.xlu0 %v1038_v62 }
 0x372   : > { %v1036_v3 = vmul.f32 0.25, %v1024_v63 }
 0x374   : > { %v1041_v5 = vsel %vm700_vm4, %v1036_v3, -inf }
 0x375   : > { %1045 = vmax.xlane.f32.xlu0 %v1044_v4  ;;  %1042 = vmax.xlane.f32.xlu1 %v1041_v5 }
 0x3ea   : > { %v703_v6 = vpop.xlane.xlu0 %702 }
 0x3eb   : > { %v711_v7 = vsub.f32 %v697_v41, %v703_v6 }
 0x3ed   : > { %v714_v13 = vmul.f32 1.442695, %v711_v7 }
 0x3ee   : > { %v710_v9 = vpop.xlane.xlu0 %709  ;;  %v706_v10 = vpop.xlane.xlu1 %705 }
 0x3ef   : > { %v713_v12 = vsub.f32 %v699_v44, %v710_v9  ;;  %v712_v21 = vsub.f32 %v698_v47, %v706_v10 }
 0x3f1   : > { %v718_v15 = vmul.f32 1.442695, %v713_v12  ;;  %v716_v23 = vmul.f32 1.442695, %v712_v21 }
 0x3f2   : > { %v870_v16 = vpop.xlane.xlu0 %869  ;;  %v876_v17 = vpop.xlane.xlu1 %875 }
 0x3f3   : > { %2104 = vpow2.f32 %v718_v15  ;;  %v877_v18 = vsub.f32 %v865_v49, %v870_v16  ;;  %v879_v19 = vsub.f32 %v867_v48, %v876_v17 }
 0x3f4   : > { %2106 = vpow2.f32 %v714_v13 }
 0x3f5   : > { %v884_v20 = vmul.f32 1.442695, %v879_v19  ;;  %v880_v22 = vmul.f32 1.442695, %v877_v18 }
 0x3f6   : > { %v873_v36 = vpop.xlane.xlu0 %872 }
 0x3f7   : > { %2108 = vpow2.f32 %v884_v20  ;;  %v878_v38 = vsub.f32 %v2377_v53, %v873_v36 }
 0x3f8   : > { %2110 = vpow2.f32 %v880_v22 }
 0x3f9   : > { %2112 = vpow2.f32 %v716_v23  ;;  %v882_v41 = vmul.f32 1.442695, %v878_v38 }
 0x3fa   : > { %v1040_v37 = vpop.xlane.xlu0 %1039 }
 0x3fb   : > { %2114 = vpow2.f32 %v882_v41  ;;  %v1047_v44 = vsub.f32 %v1035_v59, %v1040_v37 }
 0x3fd   : > { %v1050_v47 = vmul.f32 1.442695, %v1047_v44 }
 0x3fe   : > { %v1046_v39 = vpop.xlane.xlu0 %1045  ;;  %v1043_v40 = vpop.xlane.xlu1 %1042 }
 0x3ff   : > { %v1049_v42 = vsub.f32 %v1037_v61, %v1046_v39  ;;  %v1048_v43 = vsub.f32 %v1036_v3, %v1043_v40 }
 0x400   : > { %v2386_v27 = vpop.eup %2104 }
 0x401   : > { %v726_v28 = vsel %vm707_vm5, %v2386_v27, 0.0  ;;  %v2390_v29 = vpop.eup %2106  ;;  %v1054_v45 = vmul.f32 1.442695, %v1049_v42  ;;  %v1052_v46 = vmul.f32 1.442695, %v1048_v43 }
 0x402   : > { %727 = vadd.xlane.f32.xlu1 %v726_v28  ;;  %v720_v31 = vsel %vm700_vm4, %v2390_v29, 0.0 }
 0x403   : > { %2116 = vpow2.f32 %v1054_v45 }
 0x404   : > { %v2392_v30 = vpop.eup %2108  ;;  %2118 = vpow2.f32 %v1052_v46 }
 0x405   : > { %v892_v32 = vsel %vm707_vm5, %v2392_v30, 0.0  ;;  %v2398_v25 = vpop.eup %2110  ;;  %2120 = vpow2.f32 %v1050_v47 }
 0x406   : > { %721 = vadd.xlane.f32.xlu1 %v720_v31  ;;  %893 = vadd.xlane.f32.xlu0 %v892_v32  ;;  %v886_v33 = vsel %vm700_vm4, %v2398_v25, 0.0  ;;  %v2113_v34 = vpop.eup %2112 }
 0x407   : > { %v723_v35 = vsel %vm700_vm4, %v2113_v34, 0.0 }
 0x408   : > { %v2115_v48 = vpop.eup %2114 }
 0x409   : > { %v889_v49 = vsel %vm700_vm4, %v2115_v48, 0.0 }
 0x40a   : > { %887 = vadd.xlane.f32.xlu0 %v886_v33 }
 0x40e   : > { %724 = vadd.xlane.f32.xlu0 %v723_v35 }
 0x410   : > { %v2411_v50 = vpop.eup %2116 }
 0x411   : > { %v2413_v51 = vpop.eup %2118  ;;  %v1062_v52 = vsel %vm707_vm5, %v2411_v50, 0.0 }
 0x412   : > { %v2417_v53 = vpop.eup %2120  ;;  %v1059_v54 = vsel %vm700_vm4, %v2413_v51, 0.0 }
 0x413   : > { %v1056_v55 = vsel %vm700_vm4, %v2417_v53, 0.0 }
 0x417   : > { %905 = vrot.lane.b32.xlu1 %v2323_v11, %s2175_s24 }
 0x41b   : > { %1075 = vrot.lane.b32.xlu1 %v2351_v24, %s2176_s28 }
 0x424   : > { %907 = vrot.lane.b32.xlu0 %v2351_v24, %s2175_s24 }
 0x43f   : > { %890 = vadd.xlane.f32.xlu1 %v889_v49 }
 0x443   : > { %1063 = vadd.xlane.f32.xlu1 %v1062_v52  ;;  %1060 = vadd.xlane.f32.xlu0 %v1059_v54 }
 0x447   : > { %1057 = vadd.xlane.f32.xlu1 %v1056_v55 }
 0x458   : > { %1073 = vrot.lane.b32.xlu1 %v2323_v11, %s2176_s28 }
 0x459   : > { %1141 = vrot.lane.b32.xlu0 %v2327_v14, %s2178_s30 }
 0x45c   : > { %1139 = vrot.lane.b32.xlu1 %v2321_v8, %s2178_s30 }
 0x45d   : > { %1135 = vrot.lane.b32.xlu0 %v2321_v8, %s2179_s14 }
 0x460   : > { %1137 = vrot.lane.b32.xlu1 %v2327_v14, %s2179_s14 }
 0x48b   : > { %v728_v56 = vpop.xlane.xlu1 %727 }
 0x48c   : > { %2122 = vrcp.f32 %v728_v56 }
 0x48f   : > { %v894_v57 = vpop.xlane.xlu0 %893  ;;  %v722_v58 = vpop.xlane.xlu1 %721 }
 0x490   : > { %2124 = vrcp.f32 %v722_v58 }
 0x493   : > { %v888_v59 = vpop.xlane.xlu0 %887  ;;  %v906_v5 = vpop.permute.xlu1 %905 }
 0x497   : > { %v725_v60 = vpop.xlane.xlu0 %724  ;;  %v1076_v10 = vpop.permute.xlu1 %1075 }
 0x498   : > { %2126 = vrcp.f32 %v725_v60  ;;  %v1085_v12 = vand.u32 %v1076_v10, %v2356_v26 }
 0x499   : > { %v2123_v63 = vpop.eup %2122  ;;  %2128 = vrcp.f32 %v894_v57 }
 0x49a   : > { %v734_v8 = vmul.f32 %v2123_v63, %v2386_v27  ;;  %2130 = vrcp.f32 %v888_v59 }
 0x49b   : > { %v908_v61 = vpop.permute.xlu0 %907 }
 0x49c   : > { %v917_v62 = vand.u32 %v908_v61, %v2356_v26  ;;  %v736_v9 = vpack.c.bf16 %v734_v8, %v734_v8 }
 0x49d   : > { %v2125_v3 = vpop.eup %2124 }
 0x49e   : > { %1946 = vmatprep.subr.bf16.mxu1 %v917_v62  ;;  %v732_v14 = vmul.f32 %v2125_v3, %v2390_v29 }
 0x4a5   : > { %v2127_v4 = vpop.eup %2126 }
 0x4a6   : > { %v733_v6 = vmul.f32 %v2127_v4, %v2113_v34  ;;  %v2129_v18 = vpop.eup %2128 }
 0x4a7   : > { %v2131_v19 = vpop.eup %2130  ;;  %v900_v21 = vmul.f32 %v2129_v18, %v2392_v30 }
 0x4a8   : > { %v735_v7 = vpack.c.bf16 %v733_v6, %v732_v14  ;;  %v898_v22 = vmul.f32 %v2131_v19, %v2398_v25 }
 0x4a9   : > { %v902_v28 = vpack.c.bf16 %v900_v21, %v900_v21 }
 0x4aa   : > { %1934 = vmatprep.mubr.msk.bf16.mxu1 %vm700_vm4, %v735_v7 }
 0x4ab   : > { %1935 = vmatmul.mubr.msk.bf16.vlgmr.msra.gmra.mxu1 %vm700_vm4, %v736_v9 }
 0x4ac   : > { %1947 = vmatpush3.bf16.msra.mxu1 %v917_v62 }
 0x4ad   : > { %1948 = vmatprep.subr.bf16.mxu1 %v906_v5 }
 0x4b0   : > { %1949 = vmatpush3.bf16.msra.mxu1 %v906_v5 }
 0x4b1   : > { %1962 = vmatprep.subr.bf16.mxu1 %v1085_v12 }
 0x4c8   : > { %v891_v13 = vpop.xlane.xlu1 %890 }
 0x4c9   : > { %2132 = vrcp.f32 %v891_v13 }
 0x4cc   : > { %v1064_v15 = vpop.xlane.xlu1 %1063  ;;  %v1061_v16 = vpop.xlane.xlu0 %1060 }
 0x4cd   : > { %2134 = vrcp.f32 %v1064_v15 }
 0x4ce   : > { %2136 = vrcp.f32 %v1061_v16 }
 0x4d0   : > { %v1058_v17 = vpop.xlane.xlu1 %1057  ;;  %v1142_v34 = vpop.permute.xlu0 %1141 }
 0x4d1   : > { %2138 = vrcp.f32 %v1058_v17  ;;  %v1153_v38 = vsel %vm636_vm2, %v1142_v34, 0 }
 0x4d4   : > { %v1074_v32 = vpop.permute.xlu1 %1073  ;;  %v1136_v39 = vpop.permute.xlu0 %1135 }
 0x4d6   : > { %v2133_v20 = vpop.eup %2132 }
 0x4d7   : > { %v899_v23 = vmul.f32 %v2133_v20, %v2115_v48 }
 0x4d8   : > { %v1140_v40 = vpop.permute.xlu1 %1139 }
 0x4d9   : > { %v901_v27 = vpack.c.bf16 %v899_v23, %v898_v22  ;;  %v1150_v41 = vsel %vm636_vm2, %v1140_v40, 0 }
 0x4da   : > { %v2135_v29 = vpop.eup %2134 }
 0x4db   : > { %1950 = vmatprep.mubr.msk.bf16.mxu1 %vm700_vm4, %v901_v27  ;;  %v2137_v31 = vpop.eup %2136  ;;  %v1070_v35 = vmul.f32 %v2135_v29, %v2411_v50 }
 0x4dc   : > { %1951 = vmatmul.mubr.msk.bf16.vlgmr.msra.gmra.mxu1 %vm700_vm4, %v902_v28  ;;  %v1069_v25 = vmul.f32 %v2137_v31, %v2413_v51  ;;  %v1138_v42 = vpop.permute.xlu1 %1137 }
 0x4dd   : > { %1963 = vmatpush3.bf16.msra.mxu1 %v1085_v12  ;;  %v1072_v37 = vpack.c.bf16 %v1070_v35, %v1070_v35 }
 0x4de   : > { %v2139_v33 = vpop.eup %2138  ;;  %1964 = vmatprep.subr.bf16.mxu1 %v1074_v32 }
 0x4df   : > { %v1068_v30 = vmul.f32 %v2139_v33, %v2417_v53 }
 0x4e1   : > { %1965 = vmatpush3.bf16.msra.mxu1 %v1074_v32  ;;  %v1071_v36 = vpack.c.bf16 %v1069_v25, %v1068_v30 }
 0x4e2   : > { %2036 = vmatprep.subr.msk.bf16.mxu1 %vm636_vm2, %v1142_v34 }
 0x4e3   : > { %1966 = vmatprep.mubr.msk.bf16.mxu1 %vm700_vm4, %v1071_v36  ;;  %v2083_v36 = vld [vmem:[%s2592_s5 + $0x10] sm:$0xff]  }
 0x4e4   : > { %1967 = vmatmul.mubr.msk.bf16.vlgmr.msra.gmra.mxu1 %vm700_vm4, %v1072_v37  ;;  %v2084_v37 = vld [vmem:[%s2592_s5 + $0x8] sm:$0xff]  }
 0x4e5   : > { %1971 = vmatpush3.bf16.xpose.msra.mxu1 %v1153_v38  ;;  %1974 = vmatprep.mubr.msk.bf16.mxu1 %vm636_vm2, %v1136_v39  ;;  %v2085_v38 = vld [vmem:[%s2592_s5] sm:$0xff]  }
 0x4e6   : > { %2037 = vmatprep.subr.msk.bf16.mxu1 %vm636_vm2, %v1140_v40 }
 0x4ed   : > { %1973 = vmatpush3.bf16.xpose.msra.mxu1 %v1150_v41 }
 0x4f4   : > { %1975 = vmatmul.mubr.msk.bf16.vlgmr.msra.gmra.mxu1 %vm636_vm2, %v1138_v42 }
 0x56b   : > { %v2454_v43 = vpop.f32.mrf.mxu1 }
 0x56d   : > { %v2456_v44 = vpop.f32.mrf.mxu1 }
 0x56f   : > { %v1937_v45 = vpop.f32.mrf.mxu1 }
 0x571   : > { %v2458_v46 = vpop.f32.mrf.mxu1 }
 0x59c   : > { %v1952_v47 = vpop.f32.mrf.mxu1 }
 0x59e   : > { %v953_v48 = vpop.f32.mrf.mxu1 }
 0x5a0   : > { %v1953_v49 = vpop.f32.mrf.mxu1 }
 0x5a2   : > { %v956_v50 = vpop.f32.mrf.mxu1 }
 0x5a3   : > { %v2055_v51 = vpack.i.bf16 %v956_v50, %v953_v48 }
 0x5a4   : > { %v1968_v52 = vpop.f32.mrf.mxu1 }
 0x5a6   : > { %v1121_v53 = vpop.f32.mrf.mxu1 }
 0x5a8   : > { %v1969_v54 = vpop.f32.mrf.mxu1 }
 0x5aa   : > { %v1124_v55 = vpop.f32.mrf.mxu1 }
 0x5ab   : > { %v2060_v56 = vpack.i.bf16 %v1124_v55, %v1121_v53 }
 0x5b4   : > { %v1976_v57 = vpop.f32.mrf.mxu1 }
 0x5b5   : > { %v1205_v61 = vmul.f32 0.25, %v1976_v57 }
 0x5b6   : > { %v1189_v58 = vpop.f32.mrf.mxu1 }
 0x5b7   : > { %v1203_v59 = vmul.f32 0.25, %v1189_v58  ;;  %v1212_v4 = vsel %vm707_vm5, %v1205_v61, -inf }
 0x5b8   : > { %v1977_v60 = vpop.f32.mrf.mxu1 }
 0x5b9   : > { %v1206_v62 = vsel %vm700_vm4, %v1203_v59, -inf }
 0x5ba   : > { %1207 = vmax.xlane.f32.xlu0 %v1206_v62  ;;  %v1192_v63 = vpop.f32.mrf.mxu1 }
 0x5bb   : > { %v1204_v3 = vmul.f32 0.25, %v1192_v63 }
 0x5bd   : > { %v1209_v8 = vsel %vm700_vm4, %v1204_v3, -inf }
 0x5be   : > { %1213 = vmax.xlane.f32.xlu0 %v1212_v4  ;;  %1210 = vmax.xlane.f32.xlu1 %v1209_v8 }
 0x643   : > { %v1208_v5 = vpop.xlane.xlu0 %1207 }
 0x644   : > { %v1215_v14 = vsub.f32 %v1203_v59, %v1208_v5 }
 0x646   : > { %v1218_v6 = vmul.f32 1.442695, %v1215_v14 }
 0x647   : > { %v1214_v7 = vpop.xlane.xlu0 %1213  ;;  %v1211_v9 = vpop.xlane.xlu1 %1210 }
 0x648   : > { %2140 = vpow2.f32 %v1218_v6  ;;  %v1217_v10 = vsub.f32 %v1205_v61, %v1214_v7  ;;  %v1216_v12 = vsub.f32 %v1204_v3, %v1211_v9  ;;  %v1847_v9 = vld [vmem:[%s2593_s6] ss:$0 sm:$0xff] }
 0x64a   : > { %v1222_v13 = vmul.f32 1.442695, %v1217_v10  ;;  %v1220_v15 = vmul.f32 1.442695, %v1216_v12 }
 0x64c   : > { %2142 = vpow2.f32 %v1222_v13 }
 0x64d   : > { %2144 = vpow2.f32 %v1220_v15 }
 0x655   : > { %v2141_v16 = vpop.eup %2140 }
 0x656   : > { %v1224_v17 = vsel %vm700_vm4, %v2141_v16, 0.0 }
 0x657   : > { %1225 = vadd.xlane.f32.xlu0 %v1224_v17 }
 0x659   : > { %v2143_v18 = vpop.eup %2142 }
 0x65a   : > { %v2145_v19 = vpop.eup %2144  ;;  %v1230_v20 = vsel %vm707_vm5, %v2143_v18, 0.0 }
 0x65b   : > { %1231 = vadd.xlane.f32.xlu1 %v1230_v20  ;;  %v1227_v21 = vsel %vm700_vm4, %v2145_v19, 0.0 }
 0x65c   : > { %1228 = vadd.xlane.f32.xlu0 %v1227_v21 }
 0x66c   : > { %1241 = vrot.lane.b32.xlu1 %v2323_v11, %s2179_s14 }
 0x670   : > { %2056 = vrot.lane.b32.xlu1 %v2055_v51, %s2178_s30 }
 0x672   : > { %1243 = vrot.lane.b32.xlu0 %v2351_v24, %s2179_s14 }
 0x674   : > { %1310 = vrot.lane.b32.xlu1 %v1952_v47, %s2178_s30 }
 0x676   : > { %2061 = vrot.lane.b32.xlu0 %v2060_v56, %s2177_s29 }
 0x678   : > { %1322 = vrot.lane.b32.xlu1 %v1968_v52, %s2177_s29 }
 0x6e0   : > { %v1226_v22 = vpop.xlane.xlu0 %1225 }
 0x6e1   : > { %2146 = vrcp.f32 %v1226_v22 }
 0x6e4   : > { %v1232_v23 = vpop.xlane.xlu1 %1231 }
 0x6e5   : > { %v1229_v27 = vpop.xlane.xlu0 %1228  ;;  %2148 = vrcp.f32 %v1232_v23 }
 0x6e6   : > { %2150 = vrcp.f32 %v1229_v27 }
 0x6e8   : > { %v1242_v29 = vpop.permute.xlu1 %1241 }
 0x6e9   : > { %v1244_v28 = vpop.permute.xlu0 %1243 }
 0x6ea   : > { %v1253_v11 = vand.u32 %v1244_v28, %v2356_v26  ;;  %v2082_v26 = vld [vmem:[%s2592_s5 + $0x18] sm:$0xff]  }
 0x6ec   : > { %1978 = vmatprep.subr.bf16.mxu0 %v1253_v11  ;;  %v2057_v47 = vpop.permute.xlu1 %2056 }
 0x6ed   : > { %1979 = vmatpush3.bf16.msra.mxu0 %v1253_v11  ;;  %v2062_v49 = vpop.permute.xlu0 %2061  ;;  %v2059_v50 = vunpack.i.h.bf16 %v2057_v47  ;;  %v2058_v51 = vunpack.i.l.bf16 %v2057_v47 }
 0x6ee   : > { %1980 = vmatprep.subr.bf16.mxu0 %v1242_v29  ;;  %v2147_v24 = vpop.eup %2146  ;;  %v2064_v53 = vunpack.i.h.bf16 %v2062_v49  ;;  %v2063_v54 = vunpack.i.l.bf16 %v2062_v49 }
 0x6ef   : > { %v1236_v34 = vmul.f32 %v2147_v24, %v2141_v16  ;;  %v1340_v55 = vsel %vm636_vm2, %v2458_v46, %v2059_v50  ;;  %v1339_v56 = vsel %vm636_vm2, %v2456_v44, %v2058_v51  ;;  %v1848_v50 = vld [vmem:[%s2594_s7] ss:$0 sm:$0xff] }
 0x6f0   : > { %v1311_v48 = vpop.permute.xlu1 %1310  ;;  %v1343_v63 = vsel %vm1342_vm6, %v1339_v56, %v2063_v54  ;;  %v1344_v3 = vsel %vm1342_vm6, %v1340_v55, %v2064_v53  ;;  %v1849_v56 = vld [vmem:[%s2595_s8] ss:$0 sm:$0xff] }
 0x6f1   : > { %1981 = vmatpush3.bf16.msra.mxu0 %v1242_v29  ;;  %v1341_v58 = vsel %vm636_vm2, %v2454_v43, %v1311_v48 }
 0x6f2   : > { %v2149_v31 = vpop.eup %2148  ;;  %1986 = vmatprep.subr.bf16.mxu0 %v2082_v26 }
 0x6f3   : > { %v2151_v32 = vpop.eup %2150  ;;  %v1238_v33 = vmul.f32 %v2149_v31, %v2143_v18 }
 0x6f4   : > { %v1237_v35 = vmul.f32 %v2151_v32, %v2145_v19  ;;  %v1323_v52 = vpop.permute.xlu1 %1322 }
 0x6f5   : > { %v1240_v30 = vpack.c.bf16 %v1238_v33, %v1238_v33  ;;  %v1345_v60 = vsel %vm1342_vm6, %v1341_v58, %v1323_v52 }
 0x6f6   : > { %v1239_v25 = vpack.c.bf16 %v1237_v35, %v1236_v34  ;;  %v2086_v35 = vld [vmem:[%s2596_s9 + $0x18] sm:$0xff]  }
 0x6f7   : > { %1998 = vmatprep.subr.bf16.mxu1 %v2086_v35 }
 0x6f8   : > { %1982 = vmatprep.mubr.msk.bf16.mxu0 %vm700_vm4, %v1239_v25  ;;  %1999 = vmatpush3.bf16.msra.mxu1 %v2086_v35  ;;  %v2088_v25 = vld [vmem:[%s2596_s9 + $0x8] sm:$0xff]  }
 0x6f9   : > { %1983 = vmatmul.mubr.msk.bf16.vlgmr.msra.gmra.mxu0 %vm700_vm4, %v1240_v30  ;;  %v2087_v30 = vld [vmem:[%s2596_s9 + $0x10] sm:$0xff]  }
 0x6fa   : > { %1987 = vmatpush3.bf16.msra.mxu0 %v2082_v26  ;;  %2000 = vmatprep.subr.bf16.mxu1 %v2087_v30  ;;  %v2089_v26 = vld [vmem:[%s2596_s9] sm:$0xff]  }
 0x6fb   : > { %1988 = vmatprep.subr.bf16.mxu0 %v2083_v36 }
 0x6fc   : > { %2001 = vmatpush3.bf16.msra.mxu1 %v2087_v30 }
 0x6fd   : > { %2002 = vmatprep.subr.bf16.mxu1 %v2088_v25 }
 0x6fe   : > { %1989 = vmatpush3.bf16.msra.mxu0 %v2083_v36 }
 0x6ff   : > { %1990 = vmatprep.subr.bf16.mxu0 %v2084_v37 }
 0x700   : > { %2003 = vmatpush3.bf16.msra.mxu1 %v2088_v25  ;;  %v1865_v25 = vld [vmem:[%s2599_s12] ss:$0 sm:$0xff] }
 0x701   : > { %2004 = vmatprep.subr.bf16.mxu1 %v2089_v26 }
 0x702   : > { %1991 = vmatpush3.bf16.msra.mxu0 %v2084_v37 }
 0x703   : > { %1992 = vmatprep.subr.bf16.mxu0 %v2085_v38 }
 0x704   : > { %2005 = vmatpush3.bf16.msra.mxu1 %v2089_v26 }
 0x706   : > { %1993 = vmatpush3.bf16.msra.mxu0 %v2085_v38 }
 0x7b9   : > { %v1984_v39 = vpop.f32.mrf.mxu0 }
 0x7ba   : > { %1334 = vrot.lane.b32.xlu1 %v1984_v39, %s2173_s22 }
 0x7bb   : > { %v1289_v40 = vpop.f32.mrf.mxu0 }
 0x7bd   : > { %v1985_v41 = vpop.f32.mrf.mxu0 }
 0x7bf   : > { %v1292_v42 = vpop.f32.mrf.mxu0 }
 0x7c0   : > { %v2065_v45 = vpack.i.bf16 %v1292_v42, %v1289_v40 }
 0x7c2   : > { %2066 = vrot.lane.b32.xlu0 %v2065_v45, %s2173_s22 }
 0x82c   : > { %v1335_v57 = vpop.permute.xlu1 %1334 }
 0x82d   : > { %v1349_v4 = vsel %vm1346_vm7, %v1345_v60, %v1335_v57 }
 0x82e   : > { %v1351_v46 = vpack.c.bf16 %v1349_v4, %v1349_v4  ;;  %v2091_v4 = vld [vmem:[%s2598_s11 + $0x30] sm:$0xff]  }
 0x834   : > { %v2067_v59 = vpop.permute.xlu0 %2066 }
 0x835   : > { %v2069_v61 = vunpack.i.h.bf16 %v2067_v59  ;;  %v2068_v62 = vunpack.i.l.bf16 %v2067_v59 }
 0x837   : > { %v1347_v8 = vsel %vm1346_vm7, %v1343_v63, %v2068_v62  ;;  %v1348_v5 = vsel %vm1346_vm7, %v1344_v3, %v2069_v61  ;;  %v2090_v3 = vld [vmem:[%s2598_s11 + $0x38] sm:$0xff]  }
 0x838   : > { %v1350_v14 = vpack.c.bf16 %v1348_v5, %v1347_v8  ;;  %2010 = vmatprep.subr.bf16.mxu0 %v2090_v3  ;;  %v2092_v8 = vld [vmem:[%s2598_s11 + $0x28] sm:$0xff]   ;;  %v2093_v5 = vld [vmem:[%s2598_s11 + $0x20] sm:$0xff]  }
 0x83a   : > { %1994 = vmatprep.mubr.msk.bf16.mxu0 %vm445_vm0, %v1350_v14  ;;  %v2094_v14 = vld [vmem:[%s2598_s11 + $0x18] sm:$0xff]  }
 0x83b   : > { %1995 = vmatmul.mubr.msk.bf16.vlgmr.msra.gmra.mxu0 %vm445_vm0, %v1351_v46  ;;  %v2095_v46 = vld [vmem:[%s2598_s11 + $0x10] sm:$0xff]  }
 0x83c   : > { %2011 = vmatpush3.bf16.msra.mxu0 %v2090_v3 }
 0x83d   : > { %2012 = vmatprep.subr.bf16.mxu0 %v2091_v4 }
 0x840   : > { %2013 = vmatpush3.bf16.msra.mxu0 %v2091_v4 }
 0x841   : > { %2014 = vmatprep.subr.bf16.mxu0 %v2092_v8 }
 0x844   : > { %2015 = vmatpush3.bf16.msra.mxu0 %v2092_v8 }
 0x845   : > { %2016 = vmatprep.subr.bf16.mxu0 %v2093_v5 }
 0x848   : > { %2017 = vmatpush3.bf16.msra.mxu0 %v2093_v5 }
 0x849   : > { %2018 = vmatprep.subr.bf16.mxu0 %v2094_v14 }
 0x84c   : > { %2019 = vmatpush3.bf16.msra.mxu0 %v2094_v14 }
 0x84d   : > { %2020 = vmatprep.subr.bf16.mxu0 %v2095_v46 }
 0x850   : > { %2021 = vmatpush3.bf16.msra.mxu0 %v2095_v46 }
 0x8fb   : > { %v1996_v44 = vpop.f32.mrf.mxu0 }
 0x8fc   : > { %v1440_v7 = vadd.f32 %v1996_v44, %v2268_v1  ;;  %v2096_v44 = vld [vmem:[%s2598_s11 + $0x8] sm:$0xff]  }
 0x8fd   : > { %v1424_v6 = vpop.f32.mrf.mxu0  ;;  %2022 = vmatprep.subr.bf16.mxu0 %v2096_v44 }
 0x8fe   : > { %v1438_v43 = vadd.f32 %v1424_v6, %v2266_v0  ;;  %v2506_v15 = vadd.f32 %v1847_v9, %v1440_v7  ;;  %2023 = vmatpush3.bf16.msra.mxu0 %v2096_v44  ;;  %v2097_v6 = vld [vmem:[%s2598_s11] sm:$0xff]  }
 0x8ff   : > { %v1997_v10 = vpop.f32.mrf.mxu0  ;;  %2024 = vmatprep.subr.bf16.mxu0 %v2097_v6  ;;  %v1850_v7 = vld [vmem:[%s2597_s10] ss:$0 sm:$0xff] }
 0x900   : > { %v2504_v12 = vadd.f32 %v1847_v9, %v1438_v43  ;;  %v1457_v0 = vsel %vm452_vm1, %v2506_v15, 0.0 }
 0x901   : > { %v1427_v13 = vpop.f32.mrf.mxu0 }
 0x902   : > { %v1439_v16 = vadd.f32 %v1427_v13, %v2270_v2  ;;  %v1451_v17 = vsel %vm445_vm0, %v2504_v12, 0.0  ;;  %2025 = vmatpush3.bf16.msra.mxu0 %v2097_v6 }
 0x903   : > { %1452 = vadd.xlane.f32.xlu0 %v1451_v17 }
 0x904   : > { %v2511_v18 = vadd.f32 %v1847_v9, %v1439_v16 }
 0x906   : > { %v1454_v1 = vsel %vm445_vm0, %v2511_v18, 0.0 }
 0x907   : > { %1458 = vadd.xlane.f32.xlu0 %v1457_v0  ;;  %1455 = vadd.xlane.f32.xlu1 %v1454_v1 }
 0x98c   : > { %v1453_v19 = vpop.xlane.xlu0 %1452 }
 0x98d   : > { %v1460_v20 = vmul.f32 0.015625, %v1453_v19 }
 0x98f   : > { %v1463_v21 = vsub.f32 %v2504_v12, %v1460_v20 }
 0x990   : > { %v1459_v22 = vpop.xlane.xlu0 %1458  ;;  %v1456_v2 = vpop.xlane.xlu1 %1455 }
 0x991   : > { %v1462_v23 = vmul.f32 0.015625, %v1459_v22  ;;  %v1461_v27 = vmul.f32 0.015625, %v1456_v2  ;;  %v1466_v28 = vmul.f32 %v1463_v21, %v1463_v21 }
 0x993   : > { %v1465_v11 = vsub.f32 %v2506_v15, %v1462_v23  ;;  %v1464_v29 = vsub.f32 %v2511_v18, %v1461_v27  ;;  %v1469_v24 = vsel %vm445_vm0, %v1466_v28, 0.0 }
 0x994   : > { %1470 = vadd.xlane.f32.xlu0 %v1469_v24 }
 0x995   : > { %v1468_v31 = vmul.f32 %v1465_v11, %v1465_v11  ;;  %v1467_v32 = vmul.f32 %v1464_v29, %v1464_v29 }
 0x997   : > { %v1475_v33 = vsel %vm452_vm1, %v1468_v31, 0.0  ;;  %v1472_v34 = vsel %vm445_vm0, %v1467_v32, 0.0 }
 0x998   : > { %1476 = vadd.xlane.f32.xlu1 %v1475_v33  ;;  %1473 = vadd.xlane.f32.xlu0 %v1472_v34 }
 0xa1d   : > { %v1471_v36 = vpop.xlane.xlu0 %1470 }
 0xa1e   : > { %v1478_v37 = vmul.f32 0.015625, %v1471_v36 }
 0xa20   : > { %v1481_v38 = vadd.f32 1e-05, %v1478_v37 }
 0xa21   : > { %v1474_v39 = vpop.xlane.xlu0 %1473  ;;  %v1477_v40 = vpop.xlane.xlu1 %1476 }
 0xa22   : > { %2152 = vrsqrt.f32 %v1481_v38  ;;  %v1479_v41 = vmul.f32 0.015625, %v1474_v39  ;;  %v1480_v42 = vmul.f32 0.015625, %v1477_v40 }
 0xa24   : > { %v1482_v45 = vadd.f32 1e-05, %v1479_v41  ;;  %v1483_v47 = vadd.f32 1e-05, %v1480_v42 }
 0xa26   : > { %2154 = vrsqrt.f32 %v1482_v45 }
 0xa27   : > { %2156 = vrsqrt.f32 %v1483_v47 }
 0xa2f   : > { %v2153_v48 = vpop.eup %2152 }
 0xa30   : > { %v1487_v49 = vmul.f32 %v2153_v48, %v1463_v21 }
 0xa32   : > { %v1497_v54 = vmul.f32 %v1848_v50, %v1487_v49 }
 0xa33   : > { %v2155_v51 = vpop.eup %2154 }
 0xa34   : > { %v2157_v52 = vpop.eup %2156  ;;  %v1488_v53 = vmul.f32 %v2155_v51, %v1464_v29  ;;  %v1507_v59 = vadd.f32 %v1849_v56, %v1497_v54 }
 0xa35   : > { %v1489_v55 = vmul.f32 %v2157_v52, %v1465_v11 }
 0xa36   : > { %v1498_v57 = vmul.f32 %v1848_v50, %v1488_v53 }
 0xa37   : > { %v1499_v58 = vmul.f32 %v1848_v50, %v1489_v55 }
 0xa38   : > { %v1508_v60 = vadd.f32 %v1849_v56, %v1498_v57 }
 0xa39   : > { %v1509_v61 = vadd.f32 %v1849_v56, %v1499_v58 }
 0xa3a   : > { %v1510_v62 = vpack.c.bf16 %v1508_v60, %v1507_v59 }
 0xa3b   : > { %v1511_v63 = vpack.c.bf16 %v1509_v61, %v1509_v61 }
 0xa3c   : > { %2006 = vmatprep.mubr.msk.bf16.mxu1 %vm445_vm0, %v1510_v62 }
 0xa3d   : > { %2007 = vmatmul.mubr.msk.bf16.vlgmr.msra.gmra.mxu1 %vm445_vm0, %v1511_v63 }
 0xafd   : > { %v2008_v43 = vpop.f32.mrf.mxu1 }
 0xafe   : > { %v1600_v9 = vadd.f32 %v2008_v43, %v1850_v7 }
 0xaff   : > { %v1591_v10 = vpop.f32.mrf.mxu1 }
 0xb00   : > { %v1611_v13 = vmul.f32 0.70710677, %v1600_v9  ;;  %v1592_v16 = vadd.f32 %v1850_v7, %v1591_v10  ;;  %v1607_v28 = vmul.f32 0.5, %v1600_v9 }
 0xb01   : > { %v2009_v17 = vpop.f32.mrf.mxu1 }
 0xb02   : > { %v1609_v0 = vmul.f32 0.70710677, %v1592_v16  ;;  %2158 = verf.f32 %v1611_v13  ;;  %v1605_v11 = vmul.f32 0.5, %v1592_v16 }
 0xb03   : > { %v1594_v1 = vpop.f32.mrf.mxu1 }
 0xb04   : > { %2160 = verf.f32 %v1609_v0  ;;  %v1595_v19 = vadd.f32 %v1850_v7, %v1594_v1 }
 0xb06   : > { %v1610_v20 = vmul.f32 0.70710677, %v1595_v19  ;;  %v1606_v29 = vmul.f32 0.5, %v1595_v19 }
 0xb08   : > { %2162 = verf.f32 %v1610_v20 }
 0xb0f   : > { %v2159_v21 = vpop.eup %2158 }
 0xb10   : > { %v1617_v2 = vadd.f32 1.0, %v2159_v21 }
 0xb11   : > { %v2161_v22 = vpop.eup %2160 }
 0xb12   : > { %v1615_v23 = vadd.f32 1.0, %v2161_v22  ;;  %v1620_v31 = vmul.f32 %v1617_v2, %v1607_v28 }
 0xb14   : > { %v1618_v32 = vmul.f32 %v1615_v23, %v1605_v11  ;;  %v1622_v35 = vpack.c.bf16 %v1620_v31, %v1620_v31 }
 0xb15   : > { %v2163_v27 = vpop.eup %2162 }
 0xb16   : > { %v1616_v24 = vadd.f32 1.0, %v2163_v27 }
 0xb18   : > { %v1619_v33 = vmul.f32 %v1616_v24, %v1606_v29 }
 0xb1a   : > { %v1621_v34 = vpack.c.bf16 %v1619_v33, %v1618_v32 }
 0xb1c   : > { %2026 = vmatprep.mubr.bf16.mxu0 %v1621_v34 }
 0xb1d   : > { %2027 = vmatmul.mubr.bf16.vlgmr.msra.gmra.mxu0 %v1622_v35 }
 0xbdd   : > { %v2028_v30 = vpop.f32.mrf.mxu0 }
 0xbde   : > { %v1737_v26 = vadd.f32 %v2028_v30, %v2506_v15 }
 0xbdf   : > { %v1721_v36 = vpop.f32.mrf.mxu0 }
 0xbe0   : > { %v1747_v37 = vadd.f32 %v1865_v25, %v1737_v26  ;;  %v1735_v38 = vadd.f32 %v1721_v36, %v2504_v12 }
 0xbe1   : > { %v2029_v39 = vpop.f32.mrf.mxu0 }
 0xbe2   : > { %1750 = vst.msk [vmem:[%s440_s17 + $0x10] sm:$0x1] %vm452_vm1, %v1747_v37  ;;  %v1745_v40 = vadd.f32 %v1865_v25, %v1735_v38 }
 0xbe3   : > { %v1724_v41 = vpop.f32.mrf.mxu0 }
 0xbe4   : > { %1748 = vst.msk [vmem:[%s440_s17] sm:$0xff] %vm445_vm0, %v1745_v40  ;;  %v1736_v42 = vadd.f32 %v1724_v41, %v2511_v18 }
 0xbe6   : > { %v1746_v45 = vadd.f32 %v1865_v25, %v1736_v42 }
 0xbe8   : > { %1749 = vst.msk [vmem:[%s440_s17 + $0x8] sm:$0xff] %vm445_vm0, %v1746_v45 }
 0xbe9 PF: > { %s23_s25 = sadd.s32 1, %s2170_s25  }
 0xbea   : > { %p20_p4 = scmp.ge.s32.totalorder %s23_s25, 4  }
 0xbec   :  { %22 = sbr.rel (!%p20_p4) target bundleno = 1 (0x1), region = 102 }

</bundles_post_ra>
